<compile_context>
chip_gen: v7x
topology: tpu7x:2x2x1
jax: 0.10.0
libtpu: 0.0.40
codegen_flags: <defaults>
</compile_context>

<pallas_src>
import functools

import jax
import jax.numpy as jnp
from jax import lax
from jax.experimental import pallas as pl
from jax.experimental.pallas import tpu as pltpu

# Module constant is 256; scaled down for the small self-test (semantics identical).
EMBEDDING_DIM = 64
NUM_LAYERS = 3
HIDDEN = EMBEDDING_DIM * 2      # == nn.GRU hidden_size in the module

TQ_TARGET = 8                   # timesteps per grid step (raise to 16-32 at full scale)
SUBLANE = 8                     # f32 sublane tile -> batch padded to a multiple of this
LANE = 128                      # lane tile -> speaker dim padded to a multiple of this


def _fused_gru_cell(x, h_prev, w_cat, b_cat, H):
    """GRU cell with the ih/hh matmuls fused into one (2H, 4H) contraction.

    w_cat columns: [0:2H] -> gi_rz + gh_rz, [2H:3H] -> gi_n, [3H:4H] -> gh_n.
    b_cat is already broadcast to (B, 4H) (r/z biases pre-summed in the wrapper).
    """
    xh = jnp.concatenate([x.astype(jnp.bfloat16), h_prev.astype(jnp.bfloat16)],
                         axis=-1)                                    # (B, 2H) bf16
    g = jnp.dot(xh, w_cat, preferred_element_type=jnp.float32) + b_cat   # (B, 4H) f32
    r = jax.nn.sigmoid(g[:, 0:H])
    z = jax.nn.sigmoid(g[:, H:2 * H])
    n = jnp.tanh(g[:, 2 * H:3 * H] + r * g[:, 3 * H:4 * H])
    return (1.0 - z) * n + z * h_prev


def _whosaid_kernel(gi0_ref, h0_ref, w_hh0_ref, b_hh0n_ref,
                    wcat1_ref, bcat1_ref, wcat2_ref, bcat2_ref,
                    w_out_ref, b_out_ref,
                    logp_ref, h_out_ref,
                    h_scratch, y_scratch,
                    *, TQ, B, H, T_real, padded):
    blk = pl.program_id(0)
    nblk = pl.num_programs(0)

    # Load the initial hidden state into the persistent VMEM scratch at block 0.
    @pl.when(blk == 0)
    def _():
        h_scratch[...] = h0_ref[...]

    # Resident weights: load once per grid step; biases pre-broadcast (hoisted out of
    # the unrolled time loop -- JAX does not CSE broadcast_in_dim).
    w_hh0 = w_hh0_ref[...]                                            # (H, 3H)  bf16
    b_hh0n = jnp.broadcast_to(b_hh0n_ref[...], (B, H))                # (B, H)   f32
    wcat1 = wcat1_ref[...]                                            # (2H, 4H) bf16
    bcat1 = jnp.broadcast_to(bcat1_ref[...], (B, 4 * H))
    wcat2 = wcat2_ref[...]
    bcat2 = jnp.broadcast_to(bcat2_ref[...], (B, 4 * H))

    def step(i, carry):
        h0, h1, h2 = carry
        gi0 = gi0_ref[pl.ds(i * B, B), :]                             # (B, 3H) f32
        # ---- layer 0 (input-to-hidden matmul was hoisted out of the kernel) ----
        gh0 = jnp.dot(h0.astype(jnp.bfloat16), w_hh0,
                      preferred_element_type=jnp.float32)             # (B, 3H)
        r = jax.nn.sigmoid(gi0[:, 0:H] + gh0[:, 0:H])
        z = jax.nn.sigmoid(gi0[:, H:2 * H] + gh0[:, H:2 * H])
        n = jnp.tanh(gi0[:, 2 * H:3 * H] + r * (gh0[:, 2 * H:3 * H] + b_hh0n))
        h0n = (1.0 - z) * n + z * h0
        # ---- layers 1 & 2 (fused ih/hh matmul) ----
        # TODO(synk): nn.GRU applies dropout(0.5) between layers only in training mode;
        # inference (eval) semantics are implemented here.
        h1n = _fused_gru_cell(h0n, h1, wcat1, bcat1, H)
        h2n = _fused_gru_cell(h1n, h2, wcat2, bcat2, H)
        if padded:
            # Freeze the recurrence on zero-padded tail timesteps so the emitted
            # final hidden state corresponds to step T_real - 1.
            keep = (blk * TQ + i < T_real).astype(jnp.float32)
            h0n = keep * h0n + (1.0 - keep) * h0
            h1n = keep * h1n + (1.0 - keep) * h1
            h2n = keep * h2n + (1.0 - keep) * h2
        y_scratch[pl.ds(i * B, B), :] = h2n
        return (h0n, h1n, h2n)

    h_init = (h_scratch[0], h_scratch[1], h_scratch[2])
    h0f, h1f, h2f = lax.fori_loop(0, TQ, step, h_init, unroll=True)
    h_scratch[0] = h0f
    h_scratch[1] = h1f
    h_scratch[2] = h2f

    # Output linear + log_softmax for the whole time block: one lane-dense
    # (TQ*B, H) x (H, S_pad) matmul + a single (TQ*B, 128)-aligned store.
    logits = jnp.dot(y_scratch[...].astype(jnp.bfloat16), w_out_ref[...],
                     preferred_element_type=jnp.float32) + b_out_ref[...]
    m = jnp.max(logits, axis=-1, keepdims=True)
    shifted = logits - m
    lse = jnp.log(jnp.sum(jnp.exp(shifted), axis=-1, keepdims=True))
    logp_ref[...] = shifted - lse

    # Emit the final hidden state once, at the last block.
    @pl.when(blk == nblk - 1)
    def _():
        h_out_ref[...] = h_scratch[...]


@jax.jit
def whosaid_forward(token_ids, hidden, params):
    """token_ids: (T, B) int32, hidden: (3, B, H) f32 -> (log_probs (T,B,S), hidden (3,B,H))."""
    E, H = EMBEDDING_DIM, HIDDEN
    T, B = token_ids.shape
    S = params["w_out"].shape[1]

    TQ = min(TQ_TARGET, T)
    T_pad = pl.cdiv(T, TQ) * TQ
    B_pad = ((B + SUBLANE - 1) // SUBLANE) * SUBLANE
    S_pad = ((S + LANE - 1) // LANE) * LANE
    padded = T_pad != T

    # -------- plain-JAX glue: embedding gather + hoisted layer-0 ih matmul --------
    x = jnp.take(params["embedding"], token_ids, axis=0).astype(jnp.float32)   # (T, B, E)
    # Layer-0 gi has no time dependence -> one big (T*B, E) x (E, 3H) matmul here.
    # Fold b_ih0 and the r/z part of b_hh0 in; the n-gate hh bias must stay separate.
    b0 = params["b_ih0"] + jnp.concatenate(
        [params["b_hh0"][:, :2 * H], jnp.zeros((1, H), jnp.float32)], axis=1)
    gi0 = x.reshape(T * B, E) @ params["w_ih0"] + b0                            # (T*B, 3H)
    gi0 = gi0.reshape(T, B, 3 * H)
    gi0 = jnp.pad(gi0, ((0, T_pad - T), (0, B_pad - B), (0, 0)))
    gi0 = gi0.reshape(T_pad * B_pad, 3 * H)

    h0 = jnp.pad(hidden.astype(jnp.float32), ((0, 0), (0, B_pad - B), (0, 0)))  # (3, B_pad, H)

    # -------- fused / padded weights (bf16 for the MXU, biases stay f32) --------
    def fuse(l):
        w_ih, w_hh = params[f"w_ih{l}"], params[f"w_hh{l}"]
        b_ih, b_hh = params[f"b_ih{l}"], params[f"b_hh{l}"]
        zeros = jnp.zeros((H, H), jnp.float32)
        top = jnp.concatenate([w_ih[:, :2 * H], w_ih[:, 2 * H:], zeros], axis=1)   # (H, 4H)
        bot = jnp.concatenate([w_hh[:, :2 * H], zeros, w_hh[:, 2 * H:]], axis=1)   # (H, 4H)
        w_cat = jnp.concatenate([top, bot], axis=0).astype(jnp.bfloat16)           # (2H, 4H)
        b_cat = jnp.concatenate(
            [b_ih[:, :2 * H] + b_hh[:, :2 * H], b_ih[:, 2 * H:], b_hh[:, 2 * H:]], axis=1)
        return w_cat, b_cat

    w_hh0 = params["w_hh0"].astype(jnp.bfloat16)                                 # (H, 3H)
    b_hh0n = params["b_hh0"][:, 2 * H:]                                          # (1, H)
    wcat1, bcat1 = fuse(1)
    wcat2, bcat2 = fuse(2)
    w_out = jnp.pad(params["w_out"], ((0, 0), (0, S_pad - S))).astype(jnp.bfloat16)
    # Padded speaker columns get a large negative bias so they vanish from the softmax sum.
    b_out = jnp.pad(params["b_out"], ((0, 0), (0, S_pad - S)), constant_values=-1e9)

    weight_args = [w_hh0, b_hh0n, wcat1, bcat1, wcat2, bcat2, w_out, b_out]

    def resident(arr):
        z = (0,) * arr.ndim
        return pl.BlockSpec(arr.shape, lambda t, z=z: z)   # whole array, constant index

    in_specs = [pl.BlockSpec((TQ * B_pad, 3 * H), lambda t: (t, 0)),   # per-block gi0 slab
                resident(h0)]
    in_specs += [resident(w) for w in weight_args]                      # weights stay resident

    out_specs = [pl.BlockSpec((TQ * B_pad, S_pad), lambda t: (t, 0)),   # lane-dense log-probs
                 pl.BlockSpec((NUM_LAYERS, B_pad, H), lambda t: (0, 0, 0))]

    kernel = functools.partial(_whosaid_kernel, TQ=TQ, B=B_pad, H=H,
                               T_real=T, padded=padded)

    logp_flat, h_final = pl.pallas_call(
        kernel,
        grid_spec=pltpu.PrefetchScalarGridSpec(
            num_scalar_prefetch=0,
            grid=(T_pad // TQ,),
            in_specs=in_specs,
            out_specs=out_specs,
            scratch_shapes=[pltpu.VMEM((NUM_LAYERS, B_pad, H), jnp.float32),   # hidden carry
                            pltpu.VMEM((TQ * B_pad, H), jnp.float32)],         # layer-2 outputs
        ),
        out_shape=(jax.ShapeDtypeStruct((T_pad * B_pad, S_pad), jnp.float32),
                   jax.ShapeDtypeStruct((NUM_LAYERS, B_pad, H), jnp.float32)),
        compiler_params=pltpu.CompilerParams(
            dimension_semantics=("arbitrary",),      # time recurrence is serial
            vmem_limit_bytes=64 * 1024 * 1024),
    )(gi0, h0, *weight_args)

    logp = logp_flat.reshape(T_pad, B_pad, S_pad)[:T, :B, :S]
    return logp, h_final[:, :B, :]


def init_params(key, vocab_size, nr_speakers):
    """Deterministic synthetic parameters (shapes match the PyTorch module, pre-transposed)."""
    E, H = EMBEDDING_DIM, HIDDEN
    keys = jax.random.split(key, 2 + 4 * NUM_LAYERS + 2)
    k_gru = float(1.0 / (H ** 0.5))
    p = {"embedding": jax.random.normal(keys[0], (vocab_size, E), jnp.float32)}
    ki = 1
    for l in range(NUM_LAYERS):
        in_dim = E if l == 0 else H
        # Stored pre-transposed: (in_features, 3H) so compute does x @ W.
        p[f"w_ih{l}"] = jax.random.uniform(keys[ki], (in_dim, 3 * H), jnp.float32, -k_gru, k_gru); ki += 1
        p[f"w_hh{l}"] = jax.random.uniform(keys[ki], (H, 3 * H), jnp.float32, -k_gru, k_gru); ki += 1
        p[f"b_ih{l}"] = jax.random.uniform(keys[ki], (1, 3 * H), jnp.float32, -k_gru, k_gru); ki += 1
        p[f"b_hh{l}"] = jax.random.uniform(keys[ki], (1, 3 * H), jnp.float32, -k_gru, k_gru); ki += 1
    k_lin = float(1.0 / (H ** 0.5))
    p["w_out"] = jax.random.uniform(keys[ki], (H, nr_speakers), jnp.float32, -k_lin, k_lin); ki += 1
    p["b_out"] = jax.random.uniform(keys[ki], (1, nr_speakers), jnp.float32, -k_lin, k_lin)
    return p


def reference_forward(token_ids, hidden, params):
    """Pure-JAX (f32) reference of the PyTorch forward (eval mode), for a sanity check."""
    E, H = EMBEDDING_DIM, HIDDEN
    T = token_ids.shape[0]
    x = jnp.take(params["embedding"], token_ids, axis=0).astype(jnp.float32)   # (T, B, E)
    h = [hidden[l] for l in range(NUM_LAYERS)]
    outs = []
    for t in range(T):
        inp = x[t]
        for l in range(NUM_LAYERS):
            gi = inp @ params[f"w_ih{l}"] + params[f"b_ih{l}"]
            gh = h[l] @ params[f"w_hh{l}"] + params[f"b_hh{l}"]
            r = jax.nn.sigmoid(gi[:, :H] + gh[:, :H])
            z = jax.nn.sigmoid(gi[:, H:2 * H] + gh[:, H:2 * H])
            n = jnp.tanh(gi[:, 2 * H:] + r * gh[:, 2 * H:])
            h[l] = (1.0 - z) * n + z * h[l]
            inp = h[l]
        outs.append(inp)
    y = jnp.stack(outs)                                                         # (T, B, H)
    logits = y @ params["w_out"] + params["b_out"]
    return jax.nn.log_softmax(logits, axis=2), jnp.stack(h)


if __name__ == "__main__":
    vocab_size = 50
    nr_speakers = 8
    T, B = 12, 2   # T=12 with TQ=8 exercises multi-block + padded-tail paths

    key = jax.random.PRNGKey(0)
    pkey, tkey = jax.random.split(key)
    params = init_params(pkey, vocab_size, nr_speakers)

    token_ids = jax.random.randint(tkey, (T, B), 0, vocab_size, dtype=jnp.int32)
    hidden0 = jnp.zeros((NUM_LAYERS, B, HIDDEN), jnp.float32)  # == model.init()

    log_probs, hidden_out = whosaid_forward(token_ids, hidden0, params)
    jax.block_until_ready((log_probs, hidden_out))

    assert log_probs.shape == (T, B, nr_speakers)
    assert hidden_out.shape == (NUM_LAYERS, B, HIDDEN)
    # log_softmax sanity: each row sums to ~1 in probability space.
    assert bool(jnp.all(jnp.abs(jnp.sum(jnp.exp(log_probs), axis=2) - 1.0) < 1e-4))
    assert bool(jnp.all(jnp.isfinite(hidden_out)))

    # Numerical sanity vs. a pure-JAX f32 reference (kernel matmuls run in bf16 on the
    # MXU, so allow a generous tolerance).
    ref_logp, ref_hidden = reference_forward(token_ids, hidden0, params)
    assert bool(jnp.max(jnp.abs(log_probs - ref_logp)) < 1e-1)
    assert bool(jnp.max(jnp.abs(hidden_out - ref_hidden)) < 1e-1)

    print("KERNEL_OK")
</pallas_src>

<mosaic_0001>
module attributes {stable_mosaic.version = 11 : i64} {
  func.func @_whosaid_kernel(%arg0: i32, %arg1: memref<64x384xf32, #tpu.memory_space<vmem>>, %arg2: memref<3x8x128xf32, #tpu.memory_space<vmem>>, %arg3: memref<128x384xbf16, #tpu.memory_space<vmem>>, %arg4: memref<1x128xf32, #tpu.memory_space<vmem>>, %arg5: memref<256x512xbf16, #tpu.memory_space<vmem>>, %arg6: memref<1x512xf32, #tpu.memory_space<vmem>>, %arg7: memref<256x512xbf16, #tpu.memory_space<vmem>>, %arg8: memref<1x512xf32, #tpu.memory_space<vmem>>, %arg9: memref<128x128xbf16, #tpu.memory_space<vmem>>, %arg10: memref<1x128xf32, #tpu.memory_space<vmem>>, %arg11: memref<64x128xf32, #tpu.memory_space<vmem>>, %arg12: memref<3x8x128xf32, #tpu.memory_space<vmem>>, %arg13: memref<3x8x128xf32, #tpu.memory_space<vmem>>, %arg14: memref<64x128xf32, #tpu.memory_space<vmem>>) attributes {dimension_semantics = [#tpu.dimension_semantics<arbitrary>], iteration_bounds = array<i64: 2>, scalar_prefetch = 0 : i64, scratch_operands = 2 : i64, tpu.core_type = #tpu.core_type<tc>, window_params = [{transform_indices = @transform_0, window_bounds = array<i64: 64, 384>}, {pipeline_mode = #tpu.pipeline_mode<synchronous>, transform_indices = @transform_1, window_bounds = array<i64: 3, 8, 128>}, {pipeline_mode = #tpu.pipeline_mode<synchronous>, transform_indices = @transform_2, window_bounds = array<i64: 128, 384>}, {pipeline_mode = #tpu.pipeline_mode<synchronous>, transform_indices = @transform_3, window_bounds = array<i64: 1, 128>}, {pipeline_mode = #tpu.pipeline_mode<synchronous>, transform_indices = @transform_4, window_bounds = array<i64: 256, 512>}, {pipeline_mode = #tpu.pipeline_mode<synchronous>, transform_indices = @transform_5, window_bounds = array<i64: 1, 512>}, {pipeline_mode = #tpu.pipeline_mode<synchronous>, transform_indices = @transform_6, window_bounds = array<i64: 256, 512>}, {pipeline_mode = #tpu.pipeline_mode<synchronous>, transform_indices = @transform_7, window_bounds = array<i64: 1, 512>}, {pipeline_mode = #tpu.pipeline_mode<synchronous>, transform_indices = @transform_8, window_bounds = array<i64: 128, 128>}, {pipeline_mode = #tpu.pipeline_mode<synchronous>, transform_indices = @transform_9, window_bounds = array<i64: 1, 128>}, {transform_indices = @transform_10, window_bounds = array<i64: 64, 128>}, {pipeline_mode = #tpu.pipeline_mode<synchronous>, transform_indices = @transform_11, window_bounds = array<i64: 3, 8, 128>}]} {
    %c0_i32 = arith.constant 0 : i32
    %0 = arith.cmpi eq, %arg0, %c0_i32 : i32
    %1 = arith.extui %0 : i1 to i32
    %c0_i32_0 = arith.constant 0 : i32
    %2 = arith.cmpi ne, %1, %c0_i32_0 : i32
    scf.if %2 {
      %c0_208 = arith.constant 0 : index
      %c0_209 = arith.constant 0 : index
      %c0_210 = arith.constant 0 : index
      %947 = vector.load %arg2[%c0_208, %c0_209, %c0_210] : memref<3x8x128xf32, #tpu.memory_space<vmem>>, vector<3x8x128xf32>
      %c0_211 = arith.constant 0 : index
      %c0_212 = arith.constant 0 : index
      %c0_213 = arith.constant 0 : index
      %948 = vector.load %arg13[%c0_211, %c0_212, %c0_213] : memref<3x8x128xf32, #tpu.memory_space<vmem>>, vector<3x8x128xf32>
      tpu.vector_store %arg13[%c0_211, %c0_212, %c0_213], %947 {strides = array<i32>} : memref<3x8x128xf32, #tpu.memory_space<vmem>>, vector<3x8x128xf32>,
    } else {
    }
    %c0 = arith.constant 0 : index
    %c0_1 = arith.constant 0 : index
    %3 = vector.load %arg3[%c0, %c0_1] : memref<128x384xbf16, #tpu.memory_space<vmem>>, vector<128x384xbf16>
    %c0_2 = arith.constant 0 : index
    %c0_3 = arith.constant 0 : index
    %4 = vector.load %arg4[%c0_2, %c0_3] : memref<1x128xf32, #tpu.memory_space<vmem>>, vector<1x128xf32>
    %5 = vector.shape_cast %4 : vector<1x128xf32> to vector<1x128xf32>
    %6 = vector.broadcast %5 : vector<1x128xf32> to vector<8x128xf32>
    %c0_4 = arith.constant 0 : index
    %c0_5 = arith.constant 0 : index
    %7 = vector.load %arg5[%c0_4, %c0_5] : memref<256x512xbf16, #tpu.memory_space<vmem>>, vector<256x512xbf16>
    %c0_6 = arith.constant 0 : index
    %c0_7 = arith.constant 0 : index
    %8 = vector.load %arg6[%c0_6, %c0_7] : memref<1x512xf32, #tpu.memory_space<vmem>>, vector<1x512xf32>
    %9 = vector.shape_cast %8 : vector<1x512xf32> to vector<1x512xf32>
    %10 = vector.broadcast %9 : vector<1x512xf32> to vector<8x512xf32>
    %c0_8 = arith.constant 0 : index
    %c0_9 = arith.constant 0 : index
    %11 = vector.load %arg7[%c0_8, %c0_9] : memref<256x512xbf16, #tpu.memory_space<vmem>>, vector<256x512xbf16>
    %c0_10 = arith.constant 0 : index
    %c0_11 = arith.constant 0 : index
    %12 = vector.load %arg8[%c0_10, %c0_11] : memref<1x512xf32, #tpu.memory_space<vmem>>, vector<1x512xf32>
    %13 = vector.shape_cast %12 : vector<1x512xf32> to vector<1x512xf32>
    %14 = vector.broadcast %13 : vector<1x512xf32> to vector<8x512xf32>
    %c0_12 = arith.constant 0 : index
    %c0_13 = arith.constant 0 : index
    %c0_14 = arith.constant 0 : index
    %15 = vector.load %arg13[%c0_12, %c0_13, %c0_14] : memref<3x8x128xf32, #tpu.memory_space<vmem>>, vector<1x8x128xf32>
    %16 = vector.shape_cast %15 : vector<1x8x128xf32> to vector<8x128xf32>
    %c1 = arith.constant 1 : index
    %c0_15 = arith.constant 0 : index
    %c0_16 = arith.constant 0 : index
    %17 = vector.load %arg13[%c1, %c0_15, %c0_16] : memref<3x8x128xf32, #tpu.memory_space<vmem>>, vector<1x8x128xf32>
    %18 = vector.shape_cast %17 : vector<1x8x128xf32> to vector<8x128xf32>
    %c2 = arith.constant 2 : index
    %c0_17 = arith.constant 0 : index
    %c0_18 = arith.constant 0 : index
    %19 = vector.load %arg13[%c2, %c0_17, %c0_18] : memref<3x8x128xf32, #tpu.memory_space<vmem>>, vector<1x8x128xf32>
    %20 = vector.shape_cast %19 : vector<1x8x128xf32> to vector<8x128xf32>
    %c0_i32_19 = arith.constant 0 : i32
    %c8_i32 = arith.constant 8 : i32
    %21 = arith.muli %c0_i32_19, %c8_i32 : i32
    %22 = arith.index_cast %21 : i32 to index
    %c0_20 = arith.constant 0 : index
    %23 = vector.load %arg1[%22, %c0_20] : memref<64x384xf32, #tpu.memory_space<vmem>>, vector<8x384xf32>
    %24 = arith.truncf %16 : vector<8x128xf32> to vector<8x128xbf16>
    %cst = arith.constant dense<0.000000e+00> : vector<8x384xf32>
    %25 = tpu.matmul %24, %3, %cst {dimension_numbers = #tpu.dot_dimension_numbers<[1], [0], [0], [1], [0, 0, 1, 1], [], []>} : vector<8x128xbf16>, vector<128x384xbf16>, vector<8x384xf32> -> vector<8x384xf32>
    %26 = vector.extract_strided_slice %23 {offsets = [0, 0], sizes = [8, 128], strides = [1, 1]} : vector<8x384xf32> to vector<8x128xf32>
    %27 = vector.extract_strided_slice %25 {offsets = [0, 0], sizes = [8, 128], strides = [1, 1]} : vector<8x384xf32> to vector<8x128xf32>
    %28 = arith.addf %26, %27 : vector<8x128xf32>
    %29 = arith.negf %28 : vector<8x128xf32>
    %30 = math.exp %29 : vector<8x128xf32>
    %cst_21 = arith.constant 1.000000e+00 : f32
    %31 = vector.broadcast %cst_21 : f32 to vector<8x128xf32>
    %32 = arith.addf %31, %30 : vector<8x128xf32>
    %33 = arith.divf %31, %32 : vector<8x128xf32>
    %34 = vector.extract_strided_slice %23 {offsets = [0, 128], sizes = [8, 128], strides = [1, 1]} : vector<8x384xf32> to vector<8x128xf32>
    %35 = vector.extract_strided_slice %25 {offsets = [0, 128], sizes = [8, 128], strides = [1, 1]} : vector<8x384xf32> to vector<8x128xf32>
    %36 = arith.addf %34, %35 : vector<8x128xf32>
    %37 = arith.negf %36 : vector<8x128xf32>
    %38 = math.exp %37 : vector<8x128xf32>
    %cst_22 = arith.constant 1.000000e+00 : f32
    %39 = vector.broadcast %cst_22 : f32 to vector<8x128xf32>
    %40 = arith.addf %39, %38 : vector<8x128xf32>
    %41 = arith.divf %39, %40 : vector<8x128xf32>
    %42 = vector.extract_strided_slice %23 {offsets = [0, 256], sizes = [8, 128], strides = [1, 1]} : vector<8x384xf32> to vector<8x128xf32>
    %43 = vector.extract_strided_slice %25 {offsets = [0, 256], sizes = [8, 128], strides = [1, 1]} : vector<8x384xf32> to vector<8x128xf32>
    %44 = arith.addf %43, %6 : vector<8x128xf32>
    %45 = arith.mulf %33, %44 : vector<8x128xf32>
    %46 = arith.addf %42, %45 : vector<8x128xf32>
    %47 = math.tanh %46 : vector<8x128xf32>
    %cst_23 = arith.constant 1.000000e+00 : f32
    %48 = vector.broadcast %cst_23 : f32 to vector<8x128xf32>
    %49 = arith.subf %48, %41 : vector<8x128xf32>
    %50 = arith.mulf %49, %47 : vector<8x128xf32>
    %51 = arith.mulf %41, %16 : vector<8x128xf32>
    %52 = arith.addf %50, %51 : vector<8x128xf32>
    %53 = arith.truncf %52 : vector<8x128xf32> to vector<8x128xbf16>
    %54 = arith.truncf %18 : vector<8x128xf32> to vector<8x128xbf16>
    %55 = tpu.concatenate %53, %54 in 1 : vector<8x128xbf16>, vector<8x128xbf16> -> vector<8x256xbf16>
    %cst_24 = arith.constant dense<0.000000e+00> : vector<8x512xf32>
    %56 = tpu.matmul %55, %7, %cst_24 {dimension_numbers = #tpu.dot_dimension_numbers<[1], [0], [0], [1], [0, 0, 1, 1], [], []>} : vector<8x256xbf16>, vector<256x512xbf16>, vector<8x512xf32> -> vector<8x512xf32>
    %57 = arith.addf %56, %10 : vector<8x512xf32>
    %58 = vector.extract_strided_slice %57 {offsets = [0, 0], sizes = [8, 128], strides = [1, 1]} : vector<8x512xf32> to vector<8x128xf32>
    %59 = arith.negf %58 : vector<8x128xf32>
    %60 = math.exp %59 : vector<8x128xf32>
    %cst_25 = arith.constant 1.000000e+00 : f32
    %61 = vector.broadcast %cst_25 : f32 to vector<8x128xf32>
    %62 = arith.addf %61, %60 : vector<8x128xf32>
    %63 = arith.divf %61, %62 : vector<8x128xf32>
    %64 = vector.extract_strided_slice %57 {offsets = [0, 128], sizes = [8, 128], strides = [1, 1]} : vector<8x512xf32> to vector<8x128xf32>
    %65 = arith.negf %64 : vector<8x128xf32>
    %66 = math.exp %65 : vector<8x128xf32>
    %cst_26 = arith.constant 1.000000e+00 : f32
    %67 = vector.broadcast %cst_26 : f32 to vector<8x128xf32>
    %68 = arith.addf %67, %66 : vector<8x128xf32>
    %69 = arith.divf %67, %68 : vector<8x128xf32>
    %70 = vector.extract_strided_slice %57 {offsets = [0, 256], sizes = [8, 128], strides = [1, 1]} : vector<8x512xf32> to vector<8x128xf32>
    %71 = vector.extract_strided_slice %57 {offsets = [0, 384], sizes = [8, 128], strides = [1, 1]} : vector<8x512xf32> to vector<8x128xf32>
    %72 = arith.mulf %63, %71 : vector<8x128xf32>
    %73 = arith.addf %70, %72 : vector<8x128xf32>
    %74 = math.tanh %73 : vector<8x128xf32>
    %cst_27 = arith.constant 1.000000e+00 : f32
    %75 = vector.broadcast %cst_27 : f32 to vector<8x128xf32>
    %76 = arith.subf %75, %69 : vector<8x128xf32>
    %77 = arith.mulf %76, %74 : vector<8x128xf32>
    %78 = arith.mulf %69, %18 : vector<8x128xf32>
    %79 = arith.addf %77, %78 : vector<8x128xf32>
    %80 = arith.truncf %79 : vector<8x128xf32> to vector<8x128xbf16>
    %81 = arith.truncf %20 : vector<8x128xf32> to vector<8x128xbf16>
    %82 = tpu.concatenate %80, %81 in 1 : vector<8x128xbf16>, vector<8x128xbf16> -> vector<8x256xbf16>
    %cst_28 = arith.constant dense<0.000000e+00> : vector<8x512xf32>
    %83 = tpu.matmul %82, %11, %cst_28 {dimension_numbers = #tpu.dot_dimension_numbers<[1], [0], [0], [1], [0, 0, 1, 1], [], []>} : vector<8x256xbf16>, vector<256x512xbf16>, vector<8x512xf32> -> vector<8x512xf32>
    %84 = arith.addf %83, %14 : vector<8x512xf32>
    %85 = vector.extract_strided_slice %84 {offsets = [0, 0], sizes = [8, 128], strides = [1, 1]} : vector<8x512xf32> to vector<8x128xf32>
    %86 = arith.negf %85 : vector<8x128xf32>
    %87 = math.exp %86 : vector<8x128xf32>
    %cst_29 = arith.constant 1.000000e+00 : f32
    %88 = vector.broadcast %cst_29 : f32 to vector<8x128xf32>
    %89 = arith.addf %88, %87 : vector<8x128xf32>
    %90 = arith.divf %88, %89 : vector<8x128xf32>
    %91 = vector.extract_strided_slice %84 {offsets = [0, 128], sizes = [8, 128], strides = [1, 1]} : vector<8x512xf32> to vector<8x128xf32>
    %92 = arith.negf %91 : vector<8x128xf32>
    %93 = math.exp %92 : vector<8x128xf32>
    %cst_30 = arith.constant 1.000000e+00 : f32
    %94 = vector.broadcast %cst_30 : f32 to vector<8x128xf32>
    %95 = arith.addf %94, %93 : vector<8x128xf32>
    %96 = arith.divf %94, %95 : vector<8x128xf32>
    %97 = vector.extract_strided_slice %84 {offsets = [0, 256], sizes = [8, 128], strides = [1, 1]} : vector<8x512xf32> to vector<8x128xf32>
    %98 = vector.extract_strided_slice %84 {offsets = [0, 384], sizes = [8, 128], strides = [1, 1]} : vector<8x512xf32> to vector<8x128xf32>
    %99 = arith.mulf %90, %98 : vector<8x128xf32>
    %100 = arith.addf %97, %99 : vector<8x128xf32>
    %101 = math.tanh %100 : vector<8x128xf32>
    %cst_31 = arith.constant 1.000000e+00 : f32
    %102 = vector.broadcast %cst_31 : f32 to vector<8x128xf32>
    %103 = arith.subf %102, %96 : vector<8x128xf32>
    %104 = arith.mulf %103, %101 : vector<8x128xf32>
    %105 = arith.mulf %96, %20 : vector<8x128xf32>
    %106 = arith.addf %104, %105 : vector<8x128xf32>
    %c8_i32_32 = arith.constant 8 : i32
    %107 = arith.muli %arg0, %c8_i32_32 : i32
    %108 = arith.addi %107, %c0_i32_19 : i32
    %c12_i32 = arith.constant 12 : i32
    %109 = arith.cmpi slt, %108, %c12_i32 : i32
    %110 = arith.extui %109 : i1 to i32
    %111 = arith.sitofp %110 : i32 to f32
    %112 = vector.broadcast %111 : f32 to vector<8x128xf32>
    %113 = arith.mulf %112, %52 : vector<8x128xf32>
    %cst_33 = arith.constant 1.000000e+00 : f32
    %114 = arith.subf %cst_33, %111 : f32
    %115 = vector.broadcast %114 : f32 to vector<8x128xf32>
    %116 = arith.mulf %115, %16 : vector<8x128xf32>
    %117 = arith.addf %113, %116 : vector<8x128xf32>
    %118 = vector.broadcast %111 : f32 to vector<8x128xf32>
    %119 = arith.mulf %118, %79 : vector<8x128xf32>
    %cst_34 = arith.constant 1.000000e+00 : f32
    %120 = arith.subf %cst_34, %111 : f32
    %121 = vector.broadcast %120 : f32 to vector<8x128xf32>
    %122 = arith.mulf %121, %18 : vector<8x128xf32>
    %123 = arith.addf %119, %122 : vector<8x128xf32>
    %124 = vector.broadcast %111 : f32 to vector<8x128xf32>
    %125 = arith.mulf %124, %106 : vector<8x128xf32>
    %cst_35 = arith.constant 1.000000e+00 : f32
    %126 = arith.subf %cst_35, %111 : f32
    %127 = vector.broadcast %126 : f32 to vector<8x128xf32>
    %128 = arith.mulf %127, %20 : vector<8x128xf32>
    %129 = arith.addf %125, %128 : vector<8x128xf32>
    %c8_i32_36 = arith.constant 8 : i32
    %130 = arith.muli %c0_i32_19, %c8_i32_36 : i32
    %131 = arith.index_cast %130 : i32 to index
    %c0_37 = arith.constant 0 : index
    %132 = vector.load %arg14[%131, %c0_37] : memref<64x128xf32, #tpu.memory_space<vmem>>, vector<8x128xf32>
    tpu.vector_store %arg14[%131, %c0_37], %129 {strides = array<i32>} : memref<64x128xf32, #tpu.memory_space<vmem>>, vector<8x128xf32>,
    %c1_i32 = arith.constant 1 : i32
    %c8_i32_38 = arith.constant 8 : i32
    %133 = arith.muli %c1_i32, %c8_i32_38 : i32
    %134 = arith.index_cast %133 : i32 to index
    %c0_39 = arith.constant 0 : index
    %135 = vector.load %arg1[%134, %c0_39] : memref<64x384xf32, #tpu.memory_space<vmem>>, vector<8x384xf32>
    %136 = arith.truncf %117 : vector<8x128xf32> to vector<8x128xbf16>
    %cst_40 = arith.constant dense<0.000000e+00> : vector<8x384xf32>
    %137 = tpu.matmul %136, %3, %cst_40 {dimension_numbers = #tpu.dot_dimension_numbers<[1], [0], [0], [1], [0, 0, 1, 1], [], []>} : vector<8x128xbf16>, vector<128x384xbf16>, vector<8x384xf32> -> vector<8x384xf32>
    %138 = vector.extract_strided_slice %135 {offsets = [0, 0], sizes = [8, 128], strides = [1, 1]} : vector<8x384xf32> to vector<8x128xf32>
    %139 = vector.extract_strided_slice %137 {offsets = [0, 0], sizes = [8, 128], strides = [1, 1]} : vector<8x384xf32> to vector<8x128xf32>
    %140 = arith.addf %138, %139 : vector<8x128xf32>
    %141 = arith.negf %140 : vector<8x128xf32>
    %142 = math.exp %141 : vector<8x128xf32>
    %cst_41 = arith.constant 1.000000e+00 : f32
    %143 = vector.broadcast %cst_41 : f32 to vector<8x128xf32>
    %144 = arith.addf %143, %142 : vector<8x128xf32>
    %145 = arith.divf %143, %144 : vector<8x128xf32>
    %146 = vector.extract_strided_slice %135 {offsets = [0, 128], sizes = [8, 128], strides = [1, 1]} : vector<8x384xf32> to vector<8x128xf32>
    %147 = vector.extract_strided_slice %137 {offsets = [0, 128], sizes = [8, 128], strides = [1, 1]} : vector<8x384xf32> to vector<8x128xf32>
    %148 = arith.addf %146, %147 : vector<8x128xf32>
    %149 = arith.negf %148 : vector<8x128xf32>
    %150 = math.exp %149 : vector<8x128xf32>
    %cst_42 = arith.constant 1.000000e+00 : f32
    %151 = vector.broadcast %cst_42 : f32 to vector<8x128xf32>
    %152 = arith.addf %151, %150 : vector<8x128xf32>
    %153 = arith.divf %151, %152 : vector<8x128xf32>
    %154 = vector.extract_strided_slice %135 {offsets = [0, 256], sizes = [8, 128], strides = [1, 1]} : vector<8x384xf32> to vector<8x128xf32>
    %155 = vector.extract_strided_slice %137 {offsets = [0, 256], sizes = [8, 128], strides = [1, 1]} : vector<8x384xf32> to vector<8x128xf32>
    %156 = arith.addf %155, %6 : vector<8x128xf32>
    %157 = arith.mulf %145, %156 : vector<8x128xf32>
    %158 = arith.addf %154, %157 : vector<8x128xf32>
    %159 = math.tanh %158 : vector<8x128xf32>
    %cst_43 = arith.constant 1.000000e+00 : f32
    %160 = vector.broadcast %cst_43 : f32 to vector<8x128xf32>
    %161 = arith.subf %160, %153 : vector<8x128xf32>
    %162 = arith.mulf %161, %159 : vector<8x128xf32>
    %163 = arith.mulf %153, %117 : vector<8x128xf32>
    %164 = arith.addf %162, %163 : vector<8x128xf32>
    %165 = arith.truncf %164 : vector<8x128xf32> to vector<8x128xbf16>
    %166 = arith.truncf %123 : vector<8x128xf32> to vector<8x128xbf16>
    %167 = tpu.concatenate %165, %166 in 1 : vector<8x128xbf16>, vector<8x128xbf16> -> vector<8x256xbf16>
    %cst_44 = arith.constant dense<0.000000e+00> : vector<8x512xf32>
    %168 = tpu.matmul %167, %7, %cst_44 {dimension_numbers = #tpu.dot_dimension_numbers<[1], [0], [0], [1], [0, 0, 1, 1], [], []>} : vector<8x256xbf16>, vector<256x512xbf16>, vector<8x512xf32> -> vector<8x512xf32>
    %169 = arith.addf %168, %10 : vector<8x512xf32>
    %170 = vector.extract_strided_slice %169 {offsets = [0, 0], sizes = [8, 128], strides = [1, 1]} : vector<8x512xf32> to vector<8x128xf32>
    %171 = arith.negf %170 : vector<8x128xf32>
    %172 = math.exp %171 : vector<8x128xf32>
    %cst_45 = arith.constant 1.000000e+00 : f32
    %173 = vector.broadcast %cst_45 : f32 to vector<8x128xf32>
    %174 = arith.addf %173, %172 : vector<8x128xf32>
    %175 = arith.divf %173, %174 : vector<8x128xf32>
    %176 = vector.extract_strided_slice %169 {offsets = [0, 128], sizes = [8, 128], strides = [1, 1]} : vector<8x512xf32> to vector<8x128xf32>
    %177 = arith.negf %176 : vector<8x128xf32>
    %178 = math.exp %177 : vector<8x128xf32>
    %cst_46 = arith.constant 1.000000e+00 : f32
    %179 = vector.broadcast %cst_46 : f32 to vector<8x128xf32>
    %180 = arith.addf %179, %178 : vector<8x128xf32>
    %181 = arith.divf %179, %180 : vector<8x128xf32>
    %182 = vector.extract_strided_slice %169 {offsets = [0, 256], sizes = [8, 128], strides = [1, 1]} : vector<8x512xf32> to vector<8x128xf32>
    %183 = vector.extract_strided_slice %169 {offsets = [0, 384], sizes = [8, 128], strides = [1, 1]} : vector<8x512xf32> to vector<8x128xf32>
    %184 = arith.mulf %175, %183 : vector<8x128xf32>
    %185 = arith.addf %182, %184 : vector<8x128xf32>
    %186 = math.tanh %185 : vector<8x128xf32>
    %cst_47 = arith.constant 1.000000e+00 : f32
    %187 = vector.broadcast %cst_47 : f32 to vector<8x128xf32>
    %188 = arith.subf %187, %181 : vector<8x128xf32>
    %189 = arith.mulf %188, %186 : vector<8x128xf32>
    %190 = arith.mulf %181, %123 : vector<8x128xf32>
    %191 = arith.addf %189, %190 : vector<8x128xf32>
    %192 = arith.truncf %191 : vector<8x128xf32> to vector<8x128xbf16>
    %193 = arith.truncf %129 : vector<8x128xf32> to vector<8x128xbf16>
    %194 = tpu.concatenate %192, %193 in 1 : vector<8x128xbf16>, vector<8x128xbf16> -> vector<8x256xbf16>
    %cst_48 = arith.constant dense<0.000000e+00> : vector<8x512xf32>
    %195 = tpu.matmul %194, %11, %cst_48 {dimension_numbers = #tpu.dot_dimension_numbers<[1], [0], [0], [1], [0, 0, 1, 1], [], []>} : vector<8x256xbf16>, vector<256x512xbf16>, vector<8x512xf32> -> vector<8x512xf32>
    %196 = arith.addf %195, %14 : vector<8x512xf32>
    %197 = vector.extract_strided_slice %196 {offsets = [0, 0], sizes = [8, 128], strides = [1, 1]} : vector<8x512xf32> to vector<8x128xf32>
    %198 = arith.negf %197 : vector<8x128xf32>
    %199 = math.exp %198 : vector<8x128xf32>
    %cst_49 = arith.constant 1.000000e+00 : f32
    %200 = vector.broadcast %cst_49 : f32 to vector<8x128xf32>
    %201 = arith.addf %200, %199 : vector<8x128xf32>
    %202 = arith.divf %200, %201 : vector<8x128xf32>
    %203 = vector.extract_strided_slice %196 {offsets = [0, 128], sizes = [8, 128], strides = [1, 1]} : vector<8x512xf32> to vector<8x128xf32>
    %204 = arith.negf %203 : vector<8x128xf32>
    %205 = math.exp %204 : vector<8x128xf32>
    %cst_50 = arith.constant 1.000000e+00 : f32
    %206 = vector.broadcast %cst_50 : f32 to vector<8x128xf32>
    %207 = arith.addf %206, %205 : vector<8x128xf32>
    %208 = arith.divf %206, %207 : vector<8x128xf32>
    %209 = vector.extract_strided_slice %196 {offsets = [0, 256], sizes = [8, 128], strides = [1, 1]} : vector<8x512xf32> to vector<8x128xf32>
    %210 = vector.extract_strided_slice %196 {offsets = [0, 384], sizes = [8, 128], strides = [1, 1]} : vector<8x512xf32> to vector<8x128xf32>
    %211 = arith.mulf %202, %210 : vector<8x128xf32>
    %212 = arith.addf %209, %211 : vector<8x128xf32>
    %213 = math.tanh %212 : vector<8x128xf32>
    %cst_51 = arith.constant 1.000000e+00 : f32
    %214 = vector.broadcast %cst_51 : f32 to vector<8x128xf32>
    %215 = arith.subf %214, %208 : vector<8x128xf32>
    %216 = arith.mulf %215, %213 : vector<8x128xf32>
    %217 = arith.mulf %208, %129 : vector<8x128xf32>
    %218 = arith.addf %216, %217 : vector<8x128xf32>
    %c8_i32_52 = arith.constant 8 : i32
    %219 = arith.muli %arg0, %c8_i32_52 : i32
    %220 = arith.addi %219, %c1_i32 : i32
    %c12_i32_53 = arith.constant 12 : i32
    %221 = arith.cmpi slt, %220, %c12_i32_53 : i32
    %222 = arith.extui %221 : i1 to i32
    %223 = arith.sitofp %222 : i32 to f32
    %224 = vector.broadcast %223 : f32 to vector<8x128xf32>
    %225 = arith.mulf %224, %164 : vector<8x128xf32>
    %cst_54 = arith.constant 1.000000e+00 : f32
    %226 = arith.subf %cst_54, %223 : f32
    %227 = vector.broadcast %226 : f32 to vector<8x128xf32>
    %228 = arith.mulf %227, %117 : vector<8x128xf32>
    %229 = arith.addf %225, %228 : vector<8x128xf32>
    %230 = vector.broadcast %223 : f32 to vector<8x128xf32>
    %231 = arith.mulf %230, %191 : vector<8x128xf32>
    %cst_55 = arith.constant 1.000000e+00 : f32
    %232 = arith.subf %cst_55, %223 : f32
    %233 = vector.broadcast %232 : f32 to vector<8x128xf32>
    %234 = arith.mulf %233, %123 : vector<8x128xf32>
    %235 = arith.addf %231, %234 : vector<8x128xf32>
    %236 = vector.broadcast %223 : f32 to vector<8x128xf32>
    %237 = arith.mulf %236, %218 : vector<8x128xf32>
    %cst_56 = arith.constant 1.000000e+00 : f32
    %238 = arith.subf %cst_56, %223 : f32
    %239 = vector.broadcast %238 : f32 to vector<8x128xf32>
    %240 = arith.mulf %239, %129 : vector<8x128xf32>
    %241 = arith.addf %237, %240 : vector<8x128xf32>
    %c8_i32_57 = arith.constant 8 : i32
    %242 = arith.muli %c1_i32, %c8_i32_57 : i32
    %243 = arith.index_cast %242 : i32 to index
    %c0_58 = arith.constant 0 : index
    %244 = vector.load %arg14[%243, %c0_58] : memref<64x128xf32, #tpu.memory_space<vmem>>, vector<8x128xf32>
    tpu.vector_store %arg14[%243, %c0_58], %241 {strides = array<i32>} : memref<64x128xf32, #tpu.memory_space<vmem>>, vector<8x128xf32>,
    %c2_i32 = arith.constant 2 : i32
    %c8_i32_59 = arith.constant 8 : i32
    %245 = arith.muli %c2_i32, %c8_i32_59 : i32
    %246 = arith.index_cast %245 : i32 to index
    %c0_60 = arith.constant 0 : index
    %247 = vector.load %arg1[%246, %c0_60] : memref<64x384xf32, #tpu.memory_space<vmem>>, vector<8x384xf32>
    %248 = arith.truncf %229 : vector<8x128xf32> to vector<8x128xbf16>
    %cst_61 = arith.constant dense<0.000000e+00> : vector<8x384xf32>
    %249 = tpu.matmul %248, %3, %cst_61 {dimension_numbers = #tpu.dot_dimension_numbers<[1], [0], [0], [1], [0, 0, 1, 1], [], []>} : vector<8x128xbf16>, vector<128x384xbf16>, vector<8x384xf32> -> vector<8x384xf32>
    %250 = vector.extract_strided_slice %247 {offsets = [0, 0], sizes = [8, 128], strides = [1, 1]} : vector<8x384xf32> to vector<8x128xf32>
    %251 = vector.extract_strided_slice %249 {offsets = [0, 0], sizes = [8, 128], strides = [1, 1]} : vector<8x384xf32> to vector<8x128xf32>
    %252 = arith.addf %250, %251 : vector<8x128xf32>
    %253 = arith.negf %252 : vector<8x128xf32>
    %254 = math.exp %253 : vector<8x128xf32>
    %cst_62 = arith.constant 1.000000e+00 : f32
    %255 = vector.broadcast %cst_62 : f32 to vector<8x128xf32>
    %256 = arith.addf %255, %254 : vector<8x128xf32>
    %257 = arith.divf %255, %256 : vector<8x128xf32>
    %258 = vector.extract_strided_slice %247 {offsets = [0, 128], sizes = [8, 128], strides = [1, 1]} : vector<8x384xf32> to vector<8x128xf32>
    %259 = vector.extract_strided_slice %249 {offsets = [0, 128], sizes = [8, 128], strides = [1, 1]} : vector<8x384xf32> to vector<8x128xf32>
    %260 = arith.addf %258, %259 : vector<8x128xf32>
    %261 = arith.negf %260 : vector<8x128xf32>
    %262 = math.exp %261 : vector<8x128xf32>
    %cst_63 = arith.constant 1.000000e+00 : f32
    %263 = vector.broadcast %cst_63 : f32 to vector<8x128xf32>
    %264 = arith.addf %263, %262 : vector<8x128xf32>
    %265 = arith.divf %263, %264 : vector<8x128xf32>
    %266 = vector.extract_strided_slice %247 {offsets = [0, 256], sizes = [8, 128], strides = [1, 1]} : vector<8x384xf32> to vector<8x128xf32>
    %267 = vector.extract_strided_slice %249 {offsets = [0, 256], sizes = [8, 128], strides = [1, 1]} : vector<8x384xf32> to vector<8x128xf32>
    %268 = arith.addf %267, %6 : vector<8x128xf32>
    %269 = arith.mulf %257, %268 : vector<8x128xf32>
    %270 = arith.addf %266, %269 : vector<8x128xf32>
    %271 = math.tanh %270 : vector<8x128xf32>
    %cst_64 = arith.constant 1.000000e+00 : f32
    %272 = vector.broadcast %cst_64 : f32 to vector<8x128xf32>
    %273 = arith.subf %272, %265 : vector<8x128xf32>
    %274 = arith.mulf %273, %271 : vector<8x128xf32>
    %275 = arith.mulf %265, %229 : vector<8x128xf32>
    %276 = arith.addf %274, %275 : vector<8x128xf32>
    %277 = arith.truncf %276 : vector<8x128xf32> to vector<8x128xbf16>
    %278 = arith.truncf %235 : vector<8x128xf32> to vector<8x128xbf16>
    %279 = tpu.concatenate %277, %278 in 1 : vector<8x128xbf16>, vector<8x128xbf16> -> vector<8x256xbf16>
    %cst_65 = arith.constant dense<0.000000e+00> : vector<8x512xf32>
    %280 = tpu.matmul %279, %7, %cst_65 {dimension_numbers = #tpu.dot_dimension_numbers<[1], [0], [0], [1], [0, 0, 1, 1], [], []>} : vector<8x256xbf16>, vector<256x512xbf16>, vector<8x512xf32> -> vector<8x512xf32>
    %281 = arith.addf %280, %10 : vector<8x512xf32>
    %282 = vector.extract_strided_slice %281 {offsets = [0, 0], sizes = [8, 128], strides = [1, 1]} : vector<8x512xf32> to vector<8x128xf32>
    %283 = arith.negf %282 : vector<8x128xf32>
    %284 = math.exp %283 : vector<8x128xf32>
    %cst_66 = arith.constant 1.000000e+00 : f32
    %285 = vector.broadcast %cst_66 : f32 to vector<8x128xf32>
    %286 = arith.addf %285, %284 : vector<8x128xf32>
    %287 = arith.divf %285, %286 : vector<8x128xf32>
    %288 = vector.extract_strided_slice %281 {offsets = [0, 128], sizes = [8, 128], strides = [1, 1]} : vector<8x512xf32> to vector<8x128xf32>
    %289 = arith.negf %288 : vector<8x128xf32>
    %290 = math.exp %289 : vector<8x128xf32>
    %cst_67 = arith.constant 1.000000e+00 : f32
    %291 = vector.broadcast %cst_67 : f32 to vector<8x128xf32>
    %292 = arith.addf %291, %290 : vector<8x128xf32>
    %293 = arith.divf %291, %292 : vector<8x128xf32>
    %294 = vector.extract_strided_slice %281 {offsets = [0, 256], sizes = [8, 128], strides = [1, 1]} : vector<8x512xf32> to vector<8x128xf32>
    %295 = vector.extract_strided_slice %281 {offsets = [0, 384], sizes = [8, 128], strides = [1, 1]} : vector<8x512xf32> to vector<8x128xf32>
    %296 = arith.mulf %287, %295 : vector<8x128xf32>
    %297 = arith.addf %294, %296 : vector<8x128xf32>
    %298 = math.tanh %297 : vector<8x128xf32>
    %cst_68 = arith.constant 1.000000e+00 : f32
    %299 = vector.broadcast %cst_68 : f32 to vector<8x128xf32>
    %300 = arith.subf %299, %293 : vector<8x128xf32>
    %301 = arith.mulf %300, %298 : vector<8x128xf32>
    %302 = arith.mulf %293, %235 : vector<8x128xf32>
    %303 = arith.addf %301, %302 : vector<8x128xf32>
    %304 = arith.truncf %303 : vector<8x128xf32> to vector<8x128xbf16>
    %305 = arith.truncf %241 : vector<8x128xf32> to vector<8x128xbf16>
    %306 = tpu.concatenate %304, %305 in 1 : vector<8x128xbf16>, vector<8x128xbf16> -> vector<8x256xbf16>
    %cst_69 = arith.constant dense<0.000000e+00> : vector<8x512xf32>
    %307 = tpu.matmul %306, %11, %cst_69 {dimension_numbers = #tpu.dot_dimension_numbers<[1], [0], [0], [1], [0, 0, 1, 1], [], []>} : vector<8x256xbf16>, vector<256x512xbf16>, vector<8x512xf32> -> vector<8x512xf32>
    %308 = arith.addf %307, %14 : vector<8x512xf32>
    %309 = vector.extract_strided_slice %308 {offsets = [0, 0], sizes = [8, 128], strides = [1, 1]} : vector<8x512xf32> to vector<8x128xf32>
    %310 = arith.negf %309 : vector<8x128xf32>
    %311 = math.exp %310 : vector<8x128xf32>
    %cst_70 = arith.constant 1.000000e+00 : f32
    %312 = vector.broadcast %cst_70 : f32 to vector<8x128xf32>
    %313 = arith.addf %312, %311 : vector<8x128xf32>
    %314 = arith.divf %312, %313 : vector<8x128xf32>
    %315 = vector.extract_strided_slice %308 {offsets = [0, 128], sizes = [8, 128], strides = [1, 1]} : vector<8x512xf32> to vector<8x128xf32>
    %316 = arith.negf %315 : vector<8x128xf32>
    %317 = math.exp %316 : vector<8x128xf32>
    %cst_71 = arith.constant 1.000000e+00 : f32
    %318 = vector.broadcast %cst_71 : f32 to vector<8x128xf32>
    %319 = arith.addf %318, %317 : vector<8x128xf32>
    %320 = arith.divf %318, %319 : vector<8x128xf32>
    %321 = vector.extract_strided_slice %308 {offsets = [0, 256], sizes = [8, 128], strides = [1, 1]} : vector<8x512xf32> to vector<8x128xf32>
    %322 = vector.extract_strided_slice %308 {offsets = [0, 384], sizes = [8, 128], strides = [1, 1]} : vector<8x512xf32> to vector<8x128xf32>
    %323 = arith.mulf %314, %322 : vector<8x128xf32>
    %324 = arith.addf %321, %323 : vector<8x128xf32>
    %325 = math.tanh %324 : vector<8x128xf32>
    %cst_72 = arith.constant 1.000000e+00 : f32
    %326 = vector.broadcast %cst_72 : f32 to vector<8x128xf32>
    %327 = arith.subf %326, %320 : vector<8x128xf32>
    %328 = arith.mulf %327, %325 : vector<8x128xf32>
    %329 = arith.mulf %320, %241 : vector<8x128xf32>
    %330 = arith.addf %328, %329 : vector<8x128xf32>
    %c8_i32_73 = arith.constant 8 : i32
    %331 = arith.muli %arg0, %c8_i32_73 : i32
    %332 = arith.addi %331, %c2_i32 : i32
    %c12_i32_74 = arith.constant 12 : i32
    %333 = arith.cmpi slt, %332, %c12_i32_74 : i32
    %334 = arith.extui %333 : i1 to i32
    %335 = arith.sitofp %334 : i32 to f32
    %336 = vector.broadcast %335 : f32 to vector<8x128xf32>
    %337 = arith.mulf %336, %276 : vector<8x128xf32>
    %cst_75 = arith.constant 1.000000e+00 : f32
    %338 = arith.subf %cst_75, %335 : f32
    %339 = vector.broadcast %338 : f32 to vector<8x128xf32>
    %340 = arith.mulf %339, %229 : vector<8x128xf32>
    %341 = arith.addf %337, %340 : vector<8x128xf32>
    %342 = vector.broadcast %335 : f32 to vector<8x128xf32>
    %343 = arith.mulf %342, %303 : vector<8x128xf32>
    %cst_76 = arith.constant 1.000000e+00 : f32
    %344 = arith.subf %cst_76, %335 : f32
    %345 = vector.broadcast %344 : f32 to vector<8x128xf32>
    %346 = arith.mulf %345, %235 : vector<8x128xf32>
    %347 = arith.addf %343, %346 : vector<8x128xf32>
    %348 = vector.broadcast %335 : f32 to vector<8x128xf32>
    %349 = arith.mulf %348, %330 : vector<8x128xf32>
    %cst_77 = arith.constant 1.000000e+00 : f32
    %350 = arith.subf %cst_77, %335 : f32
    %351 = vector.broadcast %350 : f32 to vector<8x128xf32>
    %352 = arith.mulf %351, %241 : vector<8x128xf32>
    %353 = arith.addf %349, %352 : vector<8x128xf32>
    %c8_i32_78 = arith.constant 8 : i32
    %354 = arith.muli %c2_i32, %c8_i32_78 : i32
    %355 = arith.index_cast %354 : i32 to index
    %c0_79 = arith.constant 0 : index
    %356 = vector.load %arg14[%355, %c0_79] : memref<64x128xf32, #tpu.memory_space<vmem>>, vector<8x128xf32>
    tpu.vector_store %arg14[%355, %c0_79], %353 {strides = array<i32>} : memref<64x128xf32, #tpu.memory_space<vmem>>, vector<8x128xf32>,
    %c3_i32 = arith.constant 3 : i32
    %c8_i32_80 = arith.constant 8 : i32
    %357 = arith.muli %c3_i32, %c8_i32_80 : i32
    %358 = arith.index_cast %357 : i32 to index
    %c0_81 = arith.constant 0 : index
    %359 = vector.load %arg1[%358, %c0_81] : memref<64x384xf32, #tpu.memory_space<vmem>>, vector<8x384xf32>
    %360 = arith.truncf %341 : vector<8x128xf32> to vector<8x128xbf16>
    %cst_82 = arith.constant dense<0.000000e+00> : vector<8x384xf32>
    %361 = tpu.matmul %360, %3, %cst_82 {dimension_numbers = #tpu.dot_dimension_numbers<[1], [0], [0], [1], [0, 0, 1, 1], [], []>} : vector<8x128xbf16>, vector<128x384xbf16>, vector<8x384xf32> -> vector<8x384xf32>
    %362 = vector.extract_strided_slice %359 {offsets = [0, 0], sizes = [8, 128], strides = [1, 1]} : vector<8x384xf32> to vector<8x128xf32>
    %363 = vector.extract_strided_slice %361 {offsets = [0, 0], sizes = [8, 128], strides = [1, 1]} : vector<8x384xf32> to vector<8x128xf32>
    %364 = arith.addf %362, %363 : vector<8x128xf32>
    %365 = arith.negf %364 : vector<8x128xf32>
    %366 = math.exp %365 : vector<8x128xf32>
    %cst_83 = arith.constant 1.000000e+00 : f32
    %367 = vector.broadcast %cst_83 : f32 to vector<8x128xf32>
    %368 = arith.addf %367, %366 : vector<8x128xf32>
    %369 = arith.divf %367, %368 : vector<8x128xf32>
    %370 = vector.extract_strided_slice %359 {offsets = [0, 128], sizes = [8, 128], strides = [1, 1]} : vector<8x384xf32> to vector<8x128xf32>
    %371 = vector.extract_strided_slice %361 {offsets = [0, 128], sizes = [8, 128], strides = [1, 1]} : vector<8x384xf32> to vector<8x128xf32>
    %372 = arith.addf %370, %371 : vector<8x128xf32>
    %373 = arith.negf %372 : vector<8x128xf32>
    %374 = math.exp %373 : vector<8x128xf32>
    %cst_84 = arith.constant 1.000000e+00 : f32
    %375 = vector.broadcast %cst_84 : f32 to vector<8x128xf32>
    %376 = arith.addf %375, %374 : vector<8x128xf32>
    %377 = arith.divf %375, %376 : vector<8x128xf32>
    %378 = vector.extract_strided_slice %359 {offsets = [0, 256], sizes = [8, 128], strides = [1, 1]} : vector<8x384xf32> to vector<8x128xf32>
    %379 = vector.extract_strided_slice %361 {offsets = [0, 256], sizes = [8, 128], strides = [1, 1]} : vector<8x384xf32> to vector<8x128xf32>
    %380 = arith.addf %379, %6 : vector<8x128xf32>
    %381 = arith.mulf %369, %380 : vector<8x128xf32>
    %382 = arith.addf %378, %381 : vector<8x128xf32>
    %383 = math.tanh %382 : vector<8x128xf32>
    %cst_85 = arith.constant 1.000000e+00 : f32
    %384 = vector.broadcast %cst_85 : f32 to vector<8x128xf32>
    %385 = arith.subf %384, %377 : vector<8x128xf32>
    %386 = arith.mulf %385, %383 : vector<8x128xf32>
    %387 = arith.mulf %377, %341 : vector<8x128xf32>
    %388 = arith.addf %386, %387 : vector<8x128xf32>
    %389 = arith.truncf %388 : vector<8x128xf32> to vector<8x128xbf16>
    %390 = arith.truncf %347 : vector<8x128xf32> to vector<8x128xbf16>
    %391 = tpu.concatenate %389, %390 in 1 : vector<8x128xbf16>, vector<8x128xbf16> -> vector<8x256xbf16>
    %cst_86 = arith.constant dense<0.000000e+00> : vector<8x512xf32>
    %392 = tpu.matmul %391, %7, %cst_86 {dimension_numbers = #tpu.dot_dimension_numbers<[1], [0], [0], [1], [0, 0, 1, 1], [], []>} : vector<8x256xbf16>, vector<256x512xbf16>, vector<8x512xf32> -> vector<8x512xf32>
    %393 = arith.addf %392, %10 : vector<8x512xf32>
    %394 = vector.extract_strided_slice %393 {offsets = [0, 0], sizes = [8, 128], strides = [1, 1]} : vector<8x512xf32> to vector<8x128xf32>
    %395 = arith.negf %394 : vector<8x128xf32>
    %396 = math.exp %395 : vector<8x128xf32>
    %cst_87 = arith.constant 1.000000e+00 : f32
    %397 = vector.broadcast %cst_87 : f32 to vector<8x128xf32>
    %398 = arith.addf %397, %396 : vector<8x128xf32>
    %399 = arith.divf %397, %398 : vector<8x128xf32>
    %400 = vector.extract_strided_slice %393 {offsets = [0, 128], sizes = [8, 128], strides = [1, 1]} : vector<8x512xf32> to vector<8x128xf32>
    %401 = arith.negf %400 : vector<8x128xf32>
    %402 = math.exp %401 : vector<8x128xf32>
    %cst_88 = arith.constant 1.000000e+00 : f32
    %403 = vector.broadcast %cst_88 : f32 to vector<8x128xf32>
    %404 = arith.addf %403, %402 : vector<8x128xf32>
    %405 = arith.divf %403, %404 : vector<8x128xf32>
    %406 = vector.extract_strided_slice %393 {offsets = [0, 256], sizes = [8, 128], strides = [1, 1]} : vector<8x512xf32> to vector<8x128xf32>
    %407 = vector.extract_strided_slice %393 {offsets = [0, 384], sizes = [8, 128], strides = [1, 1]} : vector<8x512xf32> to vector<8x128xf32>
    %408 = arith.mulf %399, %407 : vector<8x128xf32>
    %409 = arith.addf %406, %408 : vector<8x128xf32>
    %410 = math.tanh %409 : vector<8x128xf32>
    %cst_89 = arith.constant 1.000000e+00 : f32
    %411 = vector.broadcast %cst_89 : f32 to vector<8x128xf32>
    %412 = arith.subf %411, %405 : vector<8x128xf32>
    %413 = arith.mulf %412, %410 : vector<8x128xf32>
    %414 = arith.mulf %405, %347 : vector<8x128xf32>
    %415 = arith.addf %413, %414 : vector<8x128xf32>
    %416 = arith.truncf %415 : vector<8x128xf32> to vector<8x128xbf16>
    %417 = arith.truncf %353 : vector<8x128xf32> to vector<8x128xbf16>
    %418 = tpu.concatenate %416, %417 in 1 : vector<8x128xbf16>, vector<8x128xbf16> -> vector<8x256xbf16>
    %cst_90 = arith.constant dense<0.000000e+00> : vector<8x512xf32>
    %419 = tpu.matmul %418, %11, %cst_90 {dimension_numbers = #tpu.dot_dimension_numbers<[1], [0], [0], [1], [0, 0, 1, 1], [], []>} : vector<8x256xbf16>, vector<256x512xbf16>, vector<8x512xf32> -> vector<8x512xf32>
    %420 = arith.addf %419, %14 : vector<8x512xf32>
    %421 = vector.extract_strided_slice %420 {offsets = [0, 0], sizes = [8, 128], strides = [1, 1]} : vector<8x512xf32> to vector<8x128xf32>
    %422 = arith.negf %421 : vector<8x128xf32>
    %423 = math.exp %422 : vector<8x128xf32>
    %cst_91 = arith.constant 1.000000e+00 : f32
    %424 = vector.broadcast %cst_91 : f32 to vector<8x128xf32>
    %425 = arith.addf %424, %423 : vector<8x128xf32>
    %426 = arith.divf %424, %425 : vector<8x128xf32>
    %427 = vector.extract_strided_slice %420 {offsets = [0, 128], sizes = [8, 128], strides = [1, 1]} : vector<8x512xf32> to vector<8x128xf32>
    %428 = arith.negf %427 : vector<8x128xf32>
    %429 = math.exp %428 : vector<8x128xf32>
    %cst_92 = arith.constant 1.000000e+00 : f32
    %430 = vector.broadcast %cst_92 : f32 to vector<8x128xf32>
    %431 = arith.addf %430, %429 : vector<8x128xf32>
    %432 = arith.divf %430, %431 : vector<8x128xf32>
    %433 = vector.extract_strided_slice %420 {offsets = [0, 256], sizes = [8, 128], strides = [1, 1]} : vector<8x512xf32> to vector<8x128xf32>
    %434 = vector.extract_strided_slice %420 {offsets = [0, 384], sizes = [8, 128], strides = [1, 1]} : vector<8x512xf32> to vector<8x128xf32>
    %435 = arith.mulf %426, %434 : vector<8x128xf32>
    %436 = arith.addf %433, %435 : vector<8x128xf32>
    %437 = math.tanh %436 : vector<8x128xf32>
    %cst_93 = arith.constant 1.000000e+00 : f32
    %438 = vector.broadcast %cst_93 : f32 to vector<8x128xf32>
    %439 = arith.subf %438, %432 : vector<8x128xf32>
    %440 = arith.mulf %439, %437 : vector<8x128xf32>
    %441 = arith.mulf %432, %353 : vector<8x128xf32>
    %442 = arith.addf %440, %441 : vector<8x128xf32>
    %c8_i32_94 = arith.constant 8 : i32
    %443 = arith.muli %arg0, %c8_i32_94 : i32
    %444 = arith.addi %443, %c3_i32 : i32
    %c12_i32_95 = arith.constant 12 : i32
    %445 = arith.cmpi slt, %444, %c12_i32_95 : i32
    %446 = arith.extui %445 : i1 to i32
    %447 = arith.sitofp %446 : i32 to f32
    %448 = vector.broadcast %447 : f32 to vector<8x128xf32>
    %449 = arith.mulf %448, %388 : vector<8x128xf32>
    %cst_96 = arith.constant 1.000000e+00 : f32
    %450 = arith.subf %cst_96, %447 : f32
    %451 = vector.broadcast %450 : f32 to vector<8x128xf32>
    %452 = arith.mulf %451, %341 : vector<8x128xf32>
    %453 = arith.addf %449, %452 : vector<8x128xf32>
    %454 = vector.broadcast %447 : f32 to vector<8x128xf32>
    %455 = arith.mulf %454, %415 : vector<8x128xf32>
    %cst_97 = arith.constant 1.000000e+00 : f32
    %456 = arith.subf %cst_97, %447 : f32
    %457 = vector.broadcast %456 : f32 to vector<8x128xf32>
    %458 = arith.mulf %457, %347 : vector<8x128xf32>
    %459 = arith.addf %455, %458 : vector<8x128xf32>
    %460 = vector.broadcast %447 : f32 to vector<8x128xf32>
    %461 = arith.mulf %460, %442 : vector<8x128xf32>
    %cst_98 = arith.constant 1.000000e+00 : f32
    %462 = arith.subf %cst_98, %447 : f32
    %463 = vector.broadcast %462 : f32 to vector<8x128xf32>
    %464 = arith.mulf %463, %353 : vector<8x128xf32>
    %465 = arith.addf %461, %464 : vector<8x128xf32>
    %c8_i32_99 = arith.constant 8 : i32
    %466 = arith.muli %c3_i32, %c8_i32_99 : i32
    %467 = arith.index_cast %466 : i32 to index
    %c0_100 = arith.constant 0 : index
    %468 = vector.load %arg14[%467, %c0_100] : memref<64x128xf32, #tpu.memory_space<vmem>>, vector<8x128xf32>
    tpu.vector_store %arg14[%467, %c0_100], %465 {strides = array<i32>} : memref<64x128xf32, #tpu.memory_space<vmem>>, vector<8x128xf32>,
    %c4_i32 = arith.constant 4 : i32
    %c8_i32_101 = arith.constant 8 : i32
    %469 = arith.muli %c4_i32, %c8_i32_101 : i32
    %470 = arith.index_cast %469 : i32 to index
    %c0_102 = arith.constant 0 : index
    %471 = vector.load %arg1[%470, %c0_102] : memref<64x384xf32, #tpu.memory_space<vmem>>, vector<8x384xf32>
    %472 = arith.truncf %453 : vector<8x128xf32> to vector<8x128xbf16>
    %cst_103 = arith.constant dense<0.000000e+00> : vector<8x384xf32>
    %473 = tpu.matmul %472, %3, %cst_103 {dimension_numbers = #tpu.dot_dimension_numbers<[1], [0], [0], [1], [0, 0, 1, 1], [], []>} : vector<8x128xbf16>, vector<128x384xbf16>, vector<8x384xf32> -> vector<8x384xf32>
    %474 = vector.extract_strided_slice %471 {offsets = [0, 0], sizes = [8, 128], strides = [1, 1]} : vector<8x384xf32> to vector<8x128xf32>
    %475 = vector.extract_strided_slice %473 {offsets = [0, 0], sizes = [8, 128], strides = [1, 1]} : vector<8x384xf32> to vector<8x128xf32>
    %476 = arith.addf %474, %475 : vector<8x128xf32>
    %477 = arith.negf %476 : vector<8x128xf32>
    %478 = math.exp %477 : vector<8x128xf32>
    %cst_104 = arith.constant 1.000000e+00 : f32
    %479 = vector.broadcast %cst_104 : f32 to vector<8x128xf32>
    %480 = arith.addf %479, %478 : vector<8x128xf32>
    %481 = arith.divf %479, %480 : vector<8x128xf32>
    %482 = vector.extract_strided_slice %471 {offsets = [0, 128], sizes = [8, 128], strides = [1, 1]} : vector<8x384xf32> to vector<8x128xf32>
    %483 = vector.extract_strided_slice %473 {offsets = [0, 128], sizes = [8, 128], strides = [1, 1]} : vector<8x384xf32> to vector<8x128xf32>
    %484 = arith.addf %482, %483 : vector<8x128xf32>
    %485 = arith.negf %484 : vector<8x128xf32>
    %486 = math.exp %485 : vector<8x128xf32>
    %cst_105 = arith.constant 1.000000e+00 : f32
    %487 = vector.broadcast %cst_105 : f32 to vector<8x128xf32>
    %488 = arith.addf %487, %486 : vector<8x128xf32>
    %489 = arith.divf %487, %488 : vector<8x128xf32>
    %490 = vector.extract_strided_slice %471 {offsets = [0, 256], sizes = [8, 128], strides = [1, 1]} : vector<8x384xf32> to vector<8x128xf32>
    %491 = vector.extract_strided_slice %473 {offsets = [0, 256], sizes = [8, 128], strides = [1, 1]} : vector<8x384xf32> to vector<8x128xf32>
    %492 = arith.addf %491, %6 : vector<8x128xf32>
    %493 = arith.mulf %481, %492 : vector<8x128xf32>
    %494 = arith.addf %490, %493 : vector<8x128xf32>
    %495 = math.tanh %494 : vector<8x128xf32>
    %cst_106 = arith.constant 1.000000e+00 : f32
    %496 = vector.broadcast %cst_106 : f32 to vector<8x128xf32>
    %497 = arith.subf %496, %489 : vector<8x128xf32>
    %498 = arith.mulf %497, %495 : vector<8x128xf32>
    %499 = arith.mulf %489, %453 : vector<8x128xf32>
    %500 = arith.addf %498, %499 : vector<8x128xf32>
    %501 = arith.truncf %500 : vector<8x128xf32> to vector<8x128xbf16>
    %502 = arith.truncf %459 : vector<8x128xf32> to vector<8x128xbf16>
    %503 = tpu.concatenate %501, %502 in 1 : vector<8x128xbf16>, vector<8x128xbf16> -> vector<8x256xbf16>
    %cst_107 = arith.constant dense<0.000000e+00> : vector<8x512xf32>
    %504 = tpu.matmul %503, %7, %cst_107 {dimension_numbers = #tpu.dot_dimension_numbers<[1], [0], [0], [1], [0, 0, 1, 1], [], []>} : vector<8x256xbf16>, vector<256x512xbf16>, vector<8x512xf32> -> vector<8x512xf32>
    %505 = arith.addf %504, %10 : vector<8x512xf32>
    %506 = vector.extract_strided_slice %505 {offsets = [0, 0], sizes = [8, 128], strides = [1, 1]} : vector<8x512xf32> to vector<8x128xf32>
    %507 = arith.negf %506 : vector<8x128xf32>
    %508 = math.exp %507 : vector<8x128xf32>
    %cst_108 = arith.constant 1.000000e+00 : f32
    %509 = vector.broadcast %cst_108 : f32 to vector<8x128xf32>
    %510 = arith.addf %509, %508 : vector<8x128xf32>
    %511 = arith.divf %509, %510 : vector<8x128xf32>
    %512 = vector.extract_strided_slice %505 {offsets = [0, 128], sizes = [8, 128], strides = [1, 1]} : vector<8x512xf32> to vector<8x128xf32>
    %513 = arith.negf %512 : vector<8x128xf32>
    %514 = math.exp %513 : vector<8x128xf32>
    %cst_109 = arith.constant 1.000000e+00 : f32
    %515 = vector.broadcast %cst_109 : f32 to vector<8x128xf32>
    %516 = arith.addf %515, %514 : vector<8x128xf32>
    %517 = arith.divf %515, %516 : vector<8x128xf32>
    %518 = vector.extract_strided_slice %505 {offsets = [0, 256], sizes = [8, 128], strides = [1, 1]} : vector<8x512xf32> to vector<8x128xf32>
    %519 = vector.extract_strided_slice %505 {offsets = [0, 384], sizes = [8, 128], strides = [1, 1]} : vector<8x512xf32> to vector<8x128xf32>
    %520 = arith.mulf %511, %519 : vector<8x128xf32>
    %521 = arith.addf %518, %520 : vector<8x128xf32>
    %522 = math.tanh %521 : vector<8x128xf32>
    %cst_110 = arith.constant 1.000000e+00 : f32
    %523 = vector.broadcast %cst_110 : f32 to vector<8x128xf32>
    %524 = arith.subf %523, %517 : vector<8x128xf32>
    %525 = arith.mulf %524, %522 : vector<8x128xf32>
    %526 = arith.mulf %517, %459 : vector<8x128xf32>
    %527 = arith.addf %525, %526 : vector<8x128xf32>
    %528 = arith.truncf %527 : vector<8x128xf32> to vector<8x128xbf16>
    %529 = arith.truncf %465 : vector<8x128xf32> to vector<8x128xbf16>
    %530 = tpu.concatenate %528, %529 in 1 : vector<8x128xbf16>, vector<8x128xbf16> -> vector<8x256xbf16>
    %cst_111 = arith.constant dense<0.000000e+00> : vector<8x512xf32>
    %531 = tpu.matmul %530, %11, %cst_111 {dimension_numbers = #tpu.dot_dimension_numbers<[1], [0], [0], [1], [0, 0, 1, 1], [], []>} : vector<8x256xbf16>, vector<256x512xbf16>, vector<8x512xf32> -> vector<8x512xf32>
    %532 = arith.addf %531, %14 : vector<8x512xf32>
    %533 = vector.extract_strided_slice %532 {offsets = [0, 0], sizes = [8, 128], strides = [1, 1]} : vector<8x512xf32> to vector<8x128xf32>
    %534 = arith.negf %533 : vector<8x128xf32>
    %535 = math.exp %534 : vector<8x128xf32>
    %cst_112 = arith.constant 1.000000e+00 : f32
    %536 = vector.broadcast %cst_112 : f32 to vector<8x128xf32>
    %537 = arith.addf %536, %535 : vector<8x128xf32>
    %538 = arith.divf %536, %537 : vector<8x128xf32>
    %539 = vector.extract_strided_slice %532 {offsets = [0, 128], sizes = [8, 128], strides = [1, 1]} : vector<8x512xf32> to vector<8x128xf32>
    %540 = arith.negf %539 : vector<8x128xf32>
    %541 = math.exp %540 : vector<8x128xf32>
    %cst_113 = arith.constant 1.000000e+00 : f32
    %542 = vector.broadcast %cst_113 : f32 to vector<8x128xf32>
    %543 = arith.addf %542, %541 : vector<8x128xf32>
    %544 = arith.divf %542, %543 : vector<8x128xf32>
    %545 = vector.extract_strided_slice %532 {offsets = [0, 256], sizes = [8, 128], strides = [1, 1]} : vector<8x512xf32> to vector<8x128xf32>
    %546 = vector.extract_strided_slice %532 {offsets = [0, 384], sizes = [8, 128], strides = [1, 1]} : vector<8x512xf32> to vector<8x128xf32>
    %547 = arith.mulf %538, %546 : vector<8x128xf32>
    %548 = arith.addf %545, %547 : vector<8x128xf32>
    %549 = math.tanh %548 : vector<8x128xf32>
    %cst_114 = arith.constant 1.000000e+00 : f32
    %550 = vector.broadcast %cst_114 : f32 to vector<8x128xf32>
    %551 = arith.subf %550, %544 : vector<8x128xf32>
    %552 = arith.mulf %551, %549 : vector<8x128xf32>
    %553 = arith.mulf %544, %465 : vector<8x128xf32>
    %554 = arith.addf %552, %553 : vector<8x128xf32>
    %c8_i32_115 = arith.constant 8 : i32
    %555 = arith.muli %arg0, %c8_i32_115 : i32
    %556 = arith.addi %555, %c4_i32 : i32
    %c12_i32_116 = arith.constant 12 : i32
    %557 = arith.cmpi slt, %556, %c12_i32_116 : i32
    %558 = arith.extui %557 : i1 to i32
    %559 = arith.sitofp %558 : i32 to f32
    %560 = vector.broadcast %559 : f32 to vector<8x128xf32>
    %561 = arith.mulf %560, %500 : vector<8x128xf32>
    %cst_117 = arith.constant 1.000000e+00 : f32
    %562 = arith.subf %cst_117, %559 : f32
    %563 = vector.broadcast %562 : f32 to vector<8x128xf32>
    %564 = arith.mulf %563, %453 : vector<8x128xf32>
    %565 = arith.addf %561, %564 : vector<8x128xf32>
    %566 = vector.broadcast %559 : f32 to vector<8x128xf32>
    %567 = arith.mulf %566, %527 : vector<8x128xf32>
    %cst_118 = arith.constant 1.000000e+00 : f32
    %568 = arith.subf %cst_118, %559 : f32
    %569 = vector.broadcast %568 : f32 to vector<8x128xf32>
    %570 = arith.mulf %569, %459 : vector<8x128xf32>
    %571 = arith.addf %567, %570 : vector<8x128xf32>
    %572 = vector.broadcast %559 : f32 to vector<8x128xf32>
    %573 = arith.mulf %572, %554 : vector<8x128xf32>
    %cst_119 = arith.constant 1.000000e+00 : f32
    %574 = arith.subf %cst_119, %559 : f32
    %575 = vector.broadcast %574 : f32 to vector<8x128xf32>
    %576 = arith.mulf %575, %465 : vector<8x128xf32>
    %577 = arith.addf %573, %576 : vector<8x128xf32>
    %c8_i32_120 = arith.constant 8 : i32
    %578 = arith.muli %c4_i32, %c8_i32_120 : i32
    %579 = arith.index_cast %578 : i32 to index
    %c0_121 = arith.constant 0 : index
    %580 = vector.load %arg14[%579, %c0_121] : memref<64x128xf32, #tpu.memory_space<vmem>>, vector<8x128xf32>
    tpu.vector_store %arg14[%579, %c0_121], %577 {strides = array<i32>} : memref<64x128xf32, #tpu.memory_space<vmem>>, vector<8x128xf32>,
    %c5_i32 = arith.constant 5 : i32
    %c8_i32_122 = arith.constant 8 : i32
    %581 = arith.muli %c5_i32, %c8_i32_122 : i32
    %582 = arith.index_cast %581 : i32 to index
    %c0_123 = arith.constant 0 : index
    %583 = vector.load %arg1[%582, %c0_123] : memref<64x384xf32, #tpu.memory_space<vmem>>, vector<8x384xf32>
    %584 = arith.truncf %565 : vector<8x128xf32> to vector<8x128xbf16>
    %cst_124 = arith.constant dense<0.000000e+00> : vector<8x384xf32>
    %585 = tpu.matmul %584, %3, %cst_124 {dimension_numbers = #tpu.dot_dimension_numbers<[1], [0], [0], [1], [0, 0, 1, 1], [], []>} : vector<8x128xbf16>, vector<128x384xbf16>, vector<8x384xf32> -> vector<8x384xf32>
    %586 = vector.extract_strided_slice %583 {offsets = [0, 0], sizes = [8, 128], strides = [1, 1]} : vector<8x384xf32> to vector<8x128xf32>
    %587 = vector.extract_strided_slice %585 {offsets = [0, 0], sizes = [8, 128], strides = [1, 1]} : vector<8x384xf32> to vector<8x128xf32>
    %588 = arith.addf %586, %587 : vector<8x128xf32>
    %589 = arith.negf %588 : vector<8x128xf32>
    %590 = math.exp %589 : vector<8x128xf32>
    %cst_125 = arith.constant 1.000000e+00 : f32
    %591 = vector.broadcast %cst_125 : f32 to vector<8x128xf32>
    %592 = arith.addf %591, %590 : vector<8x128xf32>
    %593 = arith.divf %591, %592 : vector<8x128xf32>
    %594 = vector.extract_strided_slice %583 {offsets = [0, 128], sizes = [8, 128], strides = [1, 1]} : vector<8x384xf32> to vector<8x128xf32>
    %595 = vector.extract_strided_slice %585 {offsets = [0, 128], sizes = [8, 128], strides = [1, 1]} : vector<8x384xf32> to vector<8x128xf32>
    %596 = arith.addf %594, %595 : vector<8x128xf32>
    %597 = arith.negf %596 : vector<8x128xf32>
    %598 = math.exp %597 : vector<8x128xf32>
    %cst_126 = arith.constant 1.000000e+00 : f32
    %599 = vector.broadcast %cst_126 : f32 to vector<8x128xf32>
    %600 = arith.addf %599, %598 : vector<8x128xf32>
    %601 = arith.divf %599, %600 : vector<8x128xf32>
    %602 = vector.extract_strided_slice %583 {offsets = [0, 256], sizes = [8, 128], strides = [1, 1]} : vector<8x384xf32> to vector<8x128xf32>
    %603 = vector.extract_strided_slice %585 {offsets = [0, 256], sizes = [8, 128], strides = [1, 1]} : vector<8x384xf32> to vector<8x128xf32>
    %604 = arith.addf %603, %6 : vector<8x128xf32>
    %605 = arith.mulf %593, %604 : vector<8x128xf32>
    %606 = arith.addf %602, %605 : vector<8x128xf32>
    %607 = math.tanh %606 : vector<8x128xf32>
    %cst_127 = arith.constant 1.000000e+00 : f32
    %608 = vector.broadcast %cst_127 : f32 to vector<8x128xf32>
    %609 = arith.subf %608, %601 : vector<8x128xf32>
    %610 = arith.mulf %609, %607 : vector<8x128xf32>
    %611 = arith.mulf %601, %565 : vector<8x128xf32>
    %612 = arith.addf %610, %611 : vector<8x128xf32>
    %613 = arith.truncf %612 : vector<8x128xf32> to vector<8x128xbf16>
    %614 = arith.truncf %571 : vector<8x128xf32> to vector<8x128xbf16>
    %615 = tpu.concatenate %613, %614 in 1 : vector<8x128xbf16>, vector<8x128xbf16> -> vector<8x256xbf16>
    %cst_128 = arith.constant dense<0.000000e+00> : vector<8x512xf32>
    %616 = tpu.matmul %615, %7, %cst_128 {dimension_numbers = #tpu.dot_dimension_numbers<[1], [0], [0], [1], [0, 0, 1, 1], [], []>} : vector<8x256xbf16>, vector<256x512xbf16>, vector<8x512xf32> -> vector<8x512xf32>
    %617 = arith.addf %616, %10 : vector<8x512xf32>
    %618 = vector.extract_strided_slice %617 {offsets = [0, 0], sizes = [8, 128], strides = [1, 1]} : vector<8x512xf32> to vector<8x128xf32>
    %619 = arith.negf %618 : vector<8x128xf32>
    %620 = math.exp %619 : vector<8x128xf32>
    %cst_129 = arith.constant 1.000000e+00 : f32
    %621 = vector.broadcast %cst_129 : f32 to vector<8x128xf32>
    %622 = arith.addf %621, %620 : vector<8x128xf32>
    %623 = arith.divf %621, %622 : vector<8x128xf32>
    %624 = vector.extract_strided_slice %617 {offsets = [0, 128], sizes = [8, 128], strides = [1, 1]} : vector<8x512xf32> to vector<8x128xf32>
    %625 = arith.negf %624 : vector<8x128xf32>
    %626 = math.exp %625 : vector<8x128xf32>
    %cst_130 = arith.constant 1.000000e+00 : f32
    %627 = vector.broadcast %cst_130 : f32 to vector<8x128xf32>
    %628 = arith.addf %627, %626 : vector<8x128xf32>
    %629 = arith.divf %627, %628 : vector<8x128xf32>
    %630 = vector.extract_strided_slice %617 {offsets = [0, 256], sizes = [8, 128], strides = [1, 1]} : vector<8x512xf32> to vector<8x128xf32>
    %631 = vector.extract_strided_slice %617 {offsets = [0, 384], sizes = [8, 128], strides = [1, 1]} : vector<8x512xf32> to vector<8x128xf32>
    %632 = arith.mulf %623, %631 : vector<8x128xf32>
    %633 = arith.addf %630, %632 : vector<8x128xf32>
    %634 = math.tanh %633 : vector<8x128xf32>
    %cst_131 = arith.constant 1.000000e+00 : f32
    %635 = vector.broadcast %cst_131 : f32 to vector<8x128xf32>
    %636 = arith.subf %635, %629 : vector<8x128xf32>
    %637 = arith.mulf %636, %634 : vector<8x128xf32>
    %638 = arith.mulf %629, %571 : vector<8x128xf32>
    %639 = arith.addf %637, %638 : vector<8x128xf32>
    %640 = arith.truncf %639 : vector<8x128xf32> to vector<8x128xbf16>
    %641 = arith.truncf %577 : vector<8x128xf32> to vector<8x128xbf16>
    %642 = tpu.concatenate %640, %641 in 1 : vector<8x128xbf16>, vector<8x128xbf16> -> vector<8x256xbf16>
    %cst_132 = arith.constant dense<0.000000e+00> : vector<8x512xf32>
    %643 = tpu.matmul %642, %11, %cst_132 {dimension_numbers = #tpu.dot_dimension_numbers<[1], [0], [0], [1], [0, 0, 1, 1], [], []>} : vector<8x256xbf16>, vector<256x512xbf16>, vector<8x512xf32> -> vector<8x512xf32>
    %644 = arith.addf %643, %14 : vector<8x512xf32>
    %645 = vector.extract_strided_slice %644 {offsets = [0, 0], sizes = [8, 128], strides = [1, 1]} : vector<8x512xf32> to vector<8x128xf32>
    %646 = arith.negf %645 : vector<8x128xf32>
    %647 = math.exp %646 : vector<8x128xf32>
    %cst_133 = arith.constant 1.000000e+00 : f32
    %648 = vector.broadcast %cst_133 : f32 to vector<8x128xf32>
    %649 = arith.addf %648, %647 : vector<8x128xf32>
    %650 = arith.divf %648, %649 : vector<8x128xf32>
    %651 = vector.extract_strided_slice %644 {offsets = [0, 128], sizes = [8, 128], strides = [1, 1]} : vector<8x512xf32> to vector<8x128xf32>
    %652 = arith.negf %651 : vector<8x128xf32>
    %653 = math.exp %652 : vector<8x128xf32>
    %cst_134 = arith.constant 1.000000e+00 : f32
    %654 = vector.broadcast %cst_134 : f32 to vector<8x128xf32>
    %655 = arith.addf %654, %653 : vector<8x128xf32>
    %656 = arith.divf %654, %655 : vector<8x128xf32>
    %657 = vector.extract_strided_slice %644 {offsets = [0, 256], sizes = [8, 128], strides = [1, 1]} : vector<8x512xf32> to vector<8x128xf32>
    %658 = vector.extract_strided_slice %644 {offsets = [0, 384], sizes = [8, 128], strides = [1, 1]} : vector<8x512xf32> to vector<8x128xf32>
    %659 = arith.mulf %650, %658 : vector<8x128xf32>
    %660 = arith.addf %657, %659 : vector<8x128xf32>
    %661 = math.tanh %660 : vector<8x128xf32>
    %cst_135 = arith.constant 1.000000e+00 : f32
    %662 = vector.broadcast %cst_135 : f32 to vector<8x128xf32>
    %663 = arith.subf %662, %656 : vector<8x128xf32>
    %664 = arith.mulf %663, %661 : vector<8x128xf32>
    %665 = arith.mulf %656, %577 : vector<8x128xf32>
    %666 = arith.addf %664, %665 : vector<8x128xf32>
    %c8_i32_136 = arith.constant 8 : i32
    %667 = arith.muli %arg0, %c8_i32_136 : i32
    %668 = arith.addi %667, %c5_i32 : i32
    %c12_i32_137 = arith.constant 12 : i32
    %669 = arith.cmpi slt, %668, %c12_i32_137 : i32
    %670 = arith.extui %669 : i1 to i32
    %671 = arith.sitofp %670 : i32 to f32
    %672 = vector.broadcast %671 : f32 to vector<8x128xf32>
    %673 = arith.mulf %672, %612 : vector<8x128xf32>
    %cst_138 = arith.constant 1.000000e+00 : f32
    %674 = arith.subf %cst_138, %671 : f32
    %675 = vector.broadcast %674 : f32 to vector<8x128xf32>
    %676 = arith.mulf %675, %565 : vector<8x128xf32>
    %677 = arith.addf %673, %676 : vector<8x128xf32>
    %678 = vector.broadcast %671 : f32 to vector<8x128xf32>
    %679 = arith.mulf %678, %639 : vector<8x128xf32>
    %cst_139 = arith.constant 1.000000e+00 : f32
    %680 = arith.subf %cst_139, %671 : f32
    %681 = vector.broadcast %680 : f32 to vector<8x128xf32>
    %682 = arith.mulf %681, %571 : vector<8x128xf32>
    %683 = arith.addf %679, %682 : vector<8x128xf32>
    %684 = vector.broadcast %671 : f32 to vector<8x128xf32>
    %685 = arith.mulf %684, %666 : vector<8x128xf32>
    %cst_140 = arith.constant 1.000000e+00 : f32
    %686 = arith.subf %cst_140, %671 : f32
    %687 = vector.broadcast %686 : f32 to vector<8x128xf32>
    %688 = arith.mulf %687, %577 : vector<8x128xf32>
    %689 = arith.addf %685, %688 : vector<8x128xf32>
    %c8_i32_141 = arith.constant 8 : i32
    %690 = arith.muli %c5_i32, %c8_i32_141 : i32
    %691 = arith.index_cast %690 : i32 to index
    %c0_142 = arith.constant 0 : index
    %692 = vector.load %arg14[%691, %c0_142] : memref<64x128xf32, #tpu.memory_space<vmem>>, vector<8x128xf32>
    tpu.vector_store %arg14[%691, %c0_142], %689 {strides = array<i32>} : memref<64x128xf32, #tpu.memory_space<vmem>>, vector<8x128xf32>,
    %c6_i32 = arith.constant 6 : i32
    %c8_i32_143 = arith.constant 8 : i32
    %693 = arith.muli %c6_i32, %c8_i32_143 : i32
    %694 = arith.index_cast %693 : i32 to index
    %c0_144 = arith.constant 0 : index
    %695 = vector.load %arg1[%694, %c0_144] : memref<64x384xf32, #tpu.memory_space<vmem>>, vector<8x384xf32>
    %696 = arith.truncf %677 : vector<8x128xf32> to vector<8x128xbf16>
    %cst_145 = arith.constant dense<0.000000e+00> : vector<8x384xf32>
    %697 = tpu.matmul %696, %3, %cst_145 {dimension_numbers = #tpu.dot_dimension_numbers<[1], [0], [0], [1], [0, 0, 1, 1], [], []>} : vector<8x128xbf16>, vector<128x384xbf16>, vector<8x384xf32> -> vector<8x384xf32>
    %698 = vector.extract_strided_slice %695 {offsets = [0, 0], sizes = [8, 128], strides = [1, 1]} : vector<8x384xf32> to vector<8x128xf32>
    %699 = vector.extract_strided_slice %697 {offsets = [0, 0], sizes = [8, 128], strides = [1, 1]} : vector<8x384xf32> to vector<8x128xf32>
    %700 = arith.addf %698, %699 : vector<8x128xf32>
    %701 = arith.negf %700 : vector<8x128xf32>
    %702 = math.exp %701 : vector<8x128xf32>
    %cst_146 = arith.constant 1.000000e+00 : f32
    %703 = vector.broadcast %cst_146 : f32 to vector<8x128xf32>
    %704 = arith.addf %703, %702 : vector<8x128xf32>
    %705 = arith.divf %703, %704 : vector<8x128xf32>
    %706 = vector.extract_strided_slice %695 {offsets = [0, 128], sizes = [8, 128], strides = [1, 1]} : vector<8x384xf32> to vector<8x128xf32>
    %707 = vector.extract_strided_slice %697 {offsets = [0, 128], sizes = [8, 128], strides = [1, 1]} : vector<8x384xf32> to vector<8x128xf32>
    %708 = arith.addf %706, %707 : vector<8x128xf32>
    %709 = arith.negf %708 : vector<8x128xf32>
    %710 = math.exp %709 : vector<8x128xf32>
    %cst_147 = arith.constant 1.000000e+00 : f32
    %711 = vector.broadcast %cst_147 : f32 to vector<8x128xf32>
    %712 = arith.addf %711, %710 : vector<8x128xf32>
    %713 = arith.divf %711, %712 : vector<8x128xf32>
    %714 = vector.extract_strided_slice %695 {offsets = [0, 256], sizes = [8, 128], strides = [1, 1]} : vector<8x384xf32> to vector<8x128xf32>
    %715 = vector.extract_strided_slice %697 {offsets = [0, 256], sizes = [8, 128], strides = [1, 1]} : vector<8x384xf32> to vector<8x128xf32>
    %716 = arith.addf %715, %6 : vector<8x128xf32>
    %717 = arith.mulf %705, %716 : vector<8x128xf32>
    %718 = arith.addf %714, %717 : vector<8x128xf32>
    %719 = math.tanh %718 : vector<8x128xf32>
    %cst_148 = arith.constant 1.000000e+00 : f32
    %720 = vector.broadcast %cst_148 : f32 to vector<8x128xf32>
    %721 = arith.subf %720, %713 : vector<8x128xf32>
    %722 = arith.mulf %721, %719 : vector<8x128xf32>
    %723 = arith.mulf %713, %677 : vector<8x128xf32>
    %724 = arith.addf %722, %723 : vector<8x128xf32>
    %725 = arith.truncf %724 : vector<8x128xf32> to vector<8x128xbf16>
    %726 = arith.truncf %683 : vector<8x128xf32> to vector<8x128xbf16>
    %727 = tpu.concatenate %725, %726 in 1 : vector<8x128xbf16>, vector<8x128xbf16> -> vector<8x256xbf16>
    %cst_149 = arith.constant dense<0.000000e+00> : vector<8x512xf32>
    %728 = tpu.matmul %727, %7, %cst_149 {dimension_numbers = #tpu.dot_dimension_numbers<[1], [0], [0], [1], [0, 0, 1, 1], [], []>} : vector<8x256xbf16>, vector<256x512xbf16>, vector<8x512xf32> -> vector<8x512xf32>
    %729 = arith.addf %728, %10 : vector<8x512xf32>
    %730 = vector.extract_strided_slice %729 {offsets = [0, 0], sizes = [8, 128], strides = [1, 1]} : vector<8x512xf32> to vector<8x128xf32>
    %731 = arith.negf %730 : vector<8x128xf32>
    %732 = math.exp %731 : vector<8x128xf32>
    %cst_150 = arith.constant 1.000000e+00 : f32
    %733 = vector.broadcast %cst_150 : f32 to vector<8x128xf32>
    %734 = arith.addf %733, %732 : vector<8x128xf32>
    %735 = arith.divf %733, %734 : vector<8x128xf32>
    %736 = vector.extract_strided_slice %729 {offsets = [0, 128], sizes = [8, 128], strides = [1, 1]} : vector<8x512xf32> to vector<8x128xf32>
    %737 = arith.negf %736 : vector<8x128xf32>
    %738 = math.exp %737 : vector<8x128xf32>
    %cst_151 = arith.constant 1.000000e+00 : f32
    %739 = vector.broadcast %cst_151 : f32 to vector<8x128xf32>
    %740 = arith.addf %739, %738 : vector<8x128xf32>
    %741 = arith.divf %739, %740 : vector<8x128xf32>
    %742 = vector.extract_strided_slice %729 {offsets = [0, 256], sizes = [8, 128], strides = [1, 1]} : vector<8x512xf32> to vector<8x128xf32>
    %743 = vector.extract_strided_slice %729 {offsets = [0, 384], sizes = [8, 128], strides = [1, 1]} : vector<8x512xf32> to vector<8x128xf32>
    %744 = arith.mulf %735, %743 : vector<8x128xf32>
    %745 = arith.addf %742, %744 : vector<8x128xf32>
    %746 = math.tanh %745 : vector<8x128xf32>
    %cst_152 = arith.constant 1.000000e+00 : f32
    %747 = vector.broadcast %cst_152 : f32 to vector<8x128xf32>
    %748 = arith.subf %747, %741 : vector<8x128xf32>
    %749 = arith.mulf %748, %746 : vector<8x128xf32>
    %750 = arith.mulf %741, %683 : vector<8x128xf32>
    %751 = arith.addf %749, %750 : vector<8x128xf32>
    %752 = arith.truncf %751 : vector<8x128xf32> to vector<8x128xbf16>
    %753 = arith.truncf %689 : vector<8x128xf32> to vector<8x128xbf16>
    %754 = tpu.concatenate %752, %753 in 1 : vector<8x128xbf16>, vector<8x128xbf16> -> vector<8x256xbf16>
    %cst_153 = arith.constant dense<0.000000e+00> : vector<8x512xf32>
    %755 = tpu.matmul %754, %11, %cst_153 {dimension_numbers = #tpu.dot_dimension_numbers<[1], [0], [0], [1], [0, 0, 1, 1], [], []>} : vector<8x256xbf16>, vector<256x512xbf16>, vector<8x512xf32> -> vector<8x512xf32>
    %756 = arith.addf %755, %14 : vector<8x512xf32>
    %757 = vector.extract_strided_slice %756 {offsets = [0, 0], sizes = [8, 128], strides = [1, 1]} : vector<8x512xf32> to vector<8x128xf32>
    %758 = arith.negf %757 : vector<8x128xf32>
    %759 = math.exp %758 : vector<8x128xf32>
    %cst_154 = arith.constant 1.000000e+00 : f32
    %760 = vector.broadcast %cst_154 : f32 to vector<8x128xf32>
    %761 = arith.addf %760, %759 : vector<8x128xf32>
    %762 = arith.divf %760, %761 : vector<8x128xf32>
    %763 = vector.extract_strided_slice %756 {offsets = [0, 128], sizes = [8, 128], strides = [1, 1]} : vector<8x512xf32> to vector<8x128xf32>
    %764 = arith.negf %763 : vector<8x128xf32>
    %765 = math.exp %764 : vector<8x128xf32>
    %cst_155 = arith.constant 1.000000e+00 : f32
    %766 = vector.broadcast %cst_155 : f32 to vector<8x128xf32>
    %767 = arith.addf %766, %765 : vector<8x128xf32>
    %768 = arith.divf %766, %767 : vector<8x128xf32>
    %769 = vector.extract_strided_slice %756 {offsets = [0, 256], sizes = [8, 128], strides = [1, 1]} : vector<8x512xf32> to vector<8x128xf32>
    %770 = vector.extract_strided_slice %756 {offsets = [0, 384], sizes = [8, 128], strides = [1, 1]} : vector<8x512xf32> to vector<8x128xf32>
    %771 = arith.mulf %762, %770 : vector<8x128xf32>
    %772 = arith.addf %769, %771 : vector<8x128xf32>
    %773 = math.tanh %772 : vector<8x128xf32>
    %cst_156 = arith.constant 1.000000e+00 : f32
    %774 = vector.broadcast %cst_156 : f32 to vector<8x128xf32>
    %775 = arith.subf %774, %768 : vector<8x128xf32>
    %776 = arith.mulf %775, %773 : vector<8x128xf32>
    %777 = arith.mulf %768, %689 : vector<8x128xf32>
    %778 = arith.addf %776, %777 : vector<8x128xf32>
    %c8_i32_157 = arith.constant 8 : i32
    %779 = arith.muli %arg0, %c8_i32_157 : i32
    %780 = arith.addi %779, %c6_i32 : i32
    %c12_i32_158 = arith.constant 12 : i32
    %781 = arith.cmpi slt, %780, %c12_i32_158 : i32
    %782 = arith.extui %781 : i1 to i32
    %783 = arith.sitofp %782 : i32 to f32
    %784 = vector.broadcast %783 : f32 to vector<8x128xf32>
    %785 = arith.mulf %784, %724 : vector<8x128xf32>
    %cst_159 = arith.constant 1.000000e+00 : f32
    %786 = arith.subf %cst_159, %783 : f32
    %787 = vector.broadcast %786 : f32 to vector<8x128xf32>
    %788 = arith.mulf %787, %677 : vector<8x128xf32>
    %789 = arith.addf %785, %788 : vector<8x128xf32>
    %790 = vector.broadcast %783 : f32 to vector<8x128xf32>
    %791 = arith.mulf %790, %751 : vector<8x128xf32>
    %cst_160 = arith.constant 1.000000e+00 : f32
    %792 = arith.subf %cst_160, %783 : f32
    %793 = vector.broadcast %792 : f32 to vector<8x128xf32>
    %794 = arith.mulf %793, %683 : vector<8x128xf32>
    %795 = arith.addf %791, %794 : vector<8x128xf32>
    %796 = vector.broadcast %783 : f32 to vector<8x128xf32>
    %797 = arith.mulf %796, %778 : vector<8x128xf32>
    %cst_161 = arith.constant 1.000000e+00 : f32
    %798 = arith.subf %cst_161, %783 : f32
    %799 = vector.broadcast %798 : f32 to vector<8x128xf32>
    %800 = arith.mulf %799, %689 : vector<8x128xf32>
    %801 = arith.addf %797, %800 : vector<8x128xf32>
    %c8_i32_162 = arith.constant 8 : i32
    %802 = arith.muli %c6_i32, %c8_i32_162 : i32
    %803 = arith.index_cast %802 : i32 to index
    %c0_163 = arith.constant 0 : index
    %804 = vector.load %arg14[%803, %c0_163] : memref<64x128xf32, #tpu.memory_space<vmem>>, vector<8x128xf32>
    tpu.vector_store %arg14[%803, %c0_163], %801 {strides = array<i32>} : memref<64x128xf32, #tpu.memory_space<vmem>>, vector<8x128xf32>,
    %c7_i32 = arith.constant 7 : i32
    %c8_i32_164 = arith.constant 8 : i32
    %805 = arith.muli %c7_i32, %c8_i32_164 : i32
    %806 = arith.index_cast %805 : i32 to index
    %c0_165 = arith.constant 0 : index
    %807 = vector.load %arg1[%806, %c0_165] : memref<64x384xf32, #tpu.memory_space<vmem>>, vector<8x384xf32>
    %808 = arith.truncf %789 : vector<8x128xf32> to vector<8x128xbf16>
    %cst_166 = arith.constant dense<0.000000e+00> : vector<8x384xf32>
    %809 = tpu.matmul %808, %3, %cst_166 {dimension_numbers = #tpu.dot_dimension_numbers<[1], [0], [0], [1], [0, 0, 1, 1], [], []>} : vector<8x128xbf16>, vector<128x384xbf16>, vector<8x384xf32> -> vector<8x384xf32>
    %810 = vector.extract_strided_slice %807 {offsets = [0, 0], sizes = [8, 128], strides = [1, 1]} : vector<8x384xf32> to vector<8x128xf32>
    %811 = vector.extract_strided_slice %809 {offsets = [0, 0], sizes = [8, 128], strides = [1, 1]} : vector<8x384xf32> to vector<8x128xf32>
    %812 = arith.addf %810, %811 : vector<8x128xf32>
    %813 = arith.negf %812 : vector<8x128xf32>
    %814 = math.exp %813 : vector<8x128xf32>
    %cst_167 = arith.constant 1.000000e+00 : f32
    %815 = vector.broadcast %cst_167 : f32 to vector<8x128xf32>
    %816 = arith.addf %815, %814 : vector<8x128xf32>
    %817 = arith.divf %815, %816 : vector<8x128xf32>
    %818 = vector.extract_strided_slice %807 {offsets = [0, 128], sizes = [8, 128], strides = [1, 1]} : vector<8x384xf32> to vector<8x128xf32>
    %819 = vector.extract_strided_slice %809 {offsets = [0, 128], sizes = [8, 128], strides = [1, 1]} : vector<8x384xf32> to vector<8x128xf32>
    %820 = arith.addf %818, %819 : vector<8x128xf32>
    %821 = arith.negf %820 : vector<8x128xf32>
    %822 = math.exp %821 : vector<8x128xf32>
    %cst_168 = arith.constant 1.000000e+00 : f32
    %823 = vector.broadcast %cst_168 : f32 to vector<8x128xf32>
    %824 = arith.addf %823, %822 : vector<8x128xf32>
    %825 = arith.divf %823, %824 : vector<8x128xf32>
    %826 = vector.extract_strided_slice %807 {offsets = [0, 256], sizes = [8, 128], strides = [1, 1]} : vector<8x384xf32> to vector<8x128xf32>
    %827 = vector.extract_strided_slice %809 {offsets = [0, 256], sizes = [8, 128], strides = [1, 1]} : vector<8x384xf32> to vector<8x128xf32>
    %828 = arith.addf %827, %6 : vector<8x128xf32>
    %829 = arith.mulf %817, %828 : vector<8x128xf32>
    %830 = arith.addf %826, %829 : vector<8x128xf32>
    %831 = math.tanh %830 : vector<8x128xf32>
    %cst_169 = arith.constant 1.000000e+00 : f32
    %832 = vector.broadcast %cst_169 : f32 to vector<8x128xf32>
    %833 = arith.subf %832, %825 : vector<8x128xf32>
    %834 = arith.mulf %833, %831 : vector<8x128xf32>
    %835 = arith.mulf %825, %789 : vector<8x128xf32>
    %836 = arith.addf %834, %835 : vector<8x128xf32>
    %837 = arith.truncf %836 : vector<8x128xf32> to vector<8x128xbf16>
    %838 = arith.truncf %795 : vector<8x128xf32> to vector<8x128xbf16>
    %839 = tpu.concatenate %837, %838 in 1 : vector<8x128xbf16>, vector<8x128xbf16> -> vector<8x256xbf16>
    %cst_170 = arith.constant dense<0.000000e+00> : vector<8x512xf32>
    %840 = tpu.matmul %839, %7, %cst_170 {dimension_numbers = #tpu.dot_dimension_numbers<[1], [0], [0], [1], [0, 0, 1, 1], [], []>} : vector<8x256xbf16>, vector<256x512xbf16>, vector<8x512xf32> -> vector<8x512xf32>
    %841 = arith.addf %840, %10 : vector<8x512xf32>
    %842 = vector.extract_strided_slice %841 {offsets = [0, 0], sizes = [8, 128], strides = [1, 1]} : vector<8x512xf32> to vector<8x128xf32>
    %843 = arith.negf %842 : vector<8x128xf32>
    %844 = math.exp %843 : vector<8x128xf32>
    %cst_171 = arith.constant 1.000000e+00 : f32
    %845 = vector.broadcast %cst_171 : f32 to vector<8x128xf32>
    %846 = arith.addf %845, %844 : vector<8x128xf32>
    %847 = arith.divf %845, %846 : vector<8x128xf32>
    %848 = vector.extract_strided_slice %841 {offsets = [0, 128], sizes = [8, 128], strides = [1, 1]} : vector<8x512xf32> to vector<8x128xf32>
    %849 = arith.negf %848 : vector<8x128xf32>
    %850 = math.exp %849 : vector<8x128xf32>
    %cst_172 = arith.constant 1.000000e+00 : f32
    %851 = vector.broadcast %cst_172 : f32 to vector<8x128xf32>
    %852 = arith.addf %851, %850 : vector<8x128xf32>
    %853 = arith.divf %851, %852 : vector<8x128xf32>
    %854 = vector.extract_strided_slice %841 {offsets = [0, 256], sizes = [8, 128], strides = [1, 1]} : vector<8x512xf32> to vector<8x128xf32>
    %855 = vector.extract_strided_slice %841 {offsets = [0, 384], sizes = [8, 128], strides = [1, 1]} : vector<8x512xf32> to vector<8x128xf32>
    %856 = arith.mulf %847, %855 : vector<8x128xf32>
    %857 = arith.addf %854, %856 : vector<8x128xf32>
    %858 = math.tanh %857 : vector<8x128xf32>
    %cst_173 = arith.constant 1.000000e+00 : f32
    %859 = vector.broadcast %cst_173 : f32 to vector<8x128xf32>
    %860 = arith.subf %859, %853 : vector<8x128xf32>
    %861 = arith.mulf %860, %858 : vector<8x128xf32>
    %862 = arith.mulf %853, %795 : vector<8x128xf32>
    %863 = arith.addf %861, %862 : vector<8x128xf32>
    %864 = arith.truncf %863 : vector<8x128xf32> to vector<8x128xbf16>
    %865 = arith.truncf %801 : vector<8x128xf32> to vector<8x128xbf16>
    %866 = tpu.concatenate %864, %865 in 1 : vector<8x128xbf16>, vector<8x128xbf16> -> vector<8x256xbf16>
    %cst_174 = arith.constant dense<0.000000e+00> : vector<8x512xf32>
    %867 = tpu.matmul %866, %11, %cst_174 {dimension_numbers = #tpu.dot_dimension_numbers<[1], [0], [0], [1], [0, 0, 1, 1], [], []>} : vector<8x256xbf16>, vector<256x512xbf16>, vector<8x512xf32> -> vector<8x512xf32>
    %868 = arith.addf %867, %14 : vector<8x512xf32>
    %869 = vector.extract_strided_slice %868 {offsets = [0, 0], sizes = [8, 128], strides = [1, 1]} : vector<8x512xf32> to vector<8x128xf32>
    %870 = arith.negf %869 : vector<8x128xf32>
    %871 = math.exp %870 : vector<8x128xf32>
    %cst_175 = arith.constant 1.000000e+00 : f32
    %872 = vector.broadcast %cst_175 : f32 to vector<8x128xf32>
    %873 = arith.addf %872, %871 : vector<8x128xf32>
    %874 = arith.divf %872, %873 : vector<8x128xf32>
    %875 = vector.extract_strided_slice %868 {offsets = [0, 128], sizes = [8, 128], strides = [1, 1]} : vector<8x512xf32> to vector<8x128xf32>
    %876 = arith.negf %875 : vector<8x128xf32>
    %877 = math.exp %876 : vector<8x128xf32>
    %cst_176 = arith.constant 1.000000e+00 : f32
    %878 = vector.broadcast %cst_176 : f32 to vector<8x128xf32>
    %879 = arith.addf %878, %877 : vector<8x128xf32>
    %880 = arith.divf %878, %879 : vector<8x128xf32>
    %881 = vector.extract_strided_slice %868 {offsets = [0, 256], sizes = [8, 128], strides = [1, 1]} : vector<8x512xf32> to vector<8x128xf32>
    %882 = vector.extract_strided_slice %868 {offsets = [0, 384], sizes = [8, 128], strides = [1, 1]} : vector<8x512xf32> to vector<8x128xf32>
    %883 = arith.mulf %874, %882 : vector<8x128xf32>
    %884 = arith.addf %881, %883 : vector<8x128xf32>
    %885 = math.tanh %884 : vector<8x128xf32>
    %cst_177 = arith.constant 1.000000e+00 : f32
    %886 = vector.broadcast %cst_177 : f32 to vector<8x128xf32>
    %887 = arith.subf %886, %880 : vector<8x128xf32>
    %888 = arith.mulf %887, %885 : vector<8x128xf32>
    %889 = arith.mulf %880, %801 : vector<8x128xf32>
    %890 = arith.addf %888, %889 : vector<8x128xf32>
    %c8_i32_178 = arith.constant 8 : i32
    %891 = arith.muli %arg0, %c8_i32_178 : i32
    %892 = arith.addi %891, %c7_i32 : i32
    %c12_i32_179 = arith.constant 12 : i32
    %893 = arith.cmpi slt, %892, %c12_i32_179 : i32
    %894 = arith.extui %893 : i1 to i32
    %895 = arith.sitofp %894 : i32 to f32
    %896 = vector.broadcast %895 : f32 to vector<8x128xf32>
    %897 = arith.mulf %896, %836 : vector<8x128xf32>
    %cst_180 = arith.constant 1.000000e+00 : f32
    %898 = arith.subf %cst_180, %895 : f32
    %899 = vector.broadcast %898 : f32 to vector<8x128xf32>
    %900 = arith.mulf %899, %789 : vector<8x128xf32>
    %901 = arith.addf %897, %900 : vector<8x128xf32>
    %902 = vector.broadcast %895 : f32 to vector<8x128xf32>
    %903 = arith.mulf %902, %863 : vector<8x128xf32>
    %cst_181 = arith.constant 1.000000e+00 : f32
    %904 = arith.subf %cst_181, %895 : f32
    %905 = vector.broadcast %904 : f32 to vector<8x128xf32>
    %906 = arith.mulf %905, %795 : vector<8x128xf32>
    %907 = arith.addf %903, %906 : vector<8x128xf32>
    %908 = vector.broadcast %895 : f32 to vector<8x128xf32>
    %909 = arith.mulf %908, %890 : vector<8x128xf32>
    %cst_182 = arith.constant 1.000000e+00 : f32
    %910 = arith.subf %cst_182, %895 : f32
    %911 = vector.broadcast %910 : f32 to vector<8x128xf32>
    %912 = arith.mulf %911, %801 : vector<8x128xf32>
    %913 = arith.addf %909, %912 : vector<8x128xf32>
    %c8_i32_183 = arith.constant 8 : i32
    %914 = arith.muli %c7_i32, %c8_i32_183 : i32
    %915 = arith.index_cast %914 : i32 to index
    %c0_184 = arith.constant 0 : index
    %916 = vector.load %arg14[%915, %c0_184] : memref<64x128xf32, #tpu.memory_space<vmem>>, vector<8x128xf32>
    tpu.vector_store %arg14[%915, %c0_184], %913 {strides = array<i32>} : memref<64x128xf32, #tpu.memory_space<vmem>>, vector<8x128xf32>,
    %c8_i32_185 = arith.constant 8 : i32
    %c0_186 = arith.constant 0 : index
    %c0_187 = arith.constant 0 : index
    %c0_188 = arith.constant 0 : index
    %917 = vector.load %arg13[%c0_186, %c0_187, %c0_188] : memref<3x8x128xf32, #tpu.memory_space<vmem>>, vector<1x8x128xf32>
    %918 = vector.shape_cast %917 : vector<1x8x128xf32> to vector<8x128xf32>
    %919 = vector.shape_cast %901 : vector<8x128xf32> to vector<1x8x128xf32>
    tpu.vector_store %arg13[%c0_186, %c0_187, %c0_188], %919 {strides = array<i32>} : memref<3x8x128xf32, #tpu.memory_space<vmem>>, vector<1x8x128xf32>,
    %c1_189 = arith.constant 1 : index
    %c0_190 = arith.constant 0 : index
    %c0_191 = arith.constant 0 : index
    %920 = vector.load %arg13[%c1_189, %c0_190, %c0_191] : memref<3x8x128xf32, #tpu.memory_space<vmem>>, vector<1x8x128xf32>
    %921 = vector.shape_cast %920 : vector<1x8x128xf32> to vector<8x128xf32>
    %922 = vector.shape_cast %907 : vector<8x128xf32> to vector<1x8x128xf32>
    tpu.vector_store %arg13[%c1_189, %c0_190, %c0_191], %922 {strides = array<i32>} : memref<3x8x128xf32, #tpu.memory_space<vmem>>, vector<1x8x128xf32>,
    %c2_192 = arith.constant 2 : index
    %c0_193 = arith.constant 0 : index
    %c0_194 = arith.constant 0 : index
    %923 = vector.load %arg13[%c2_192, %c0_193, %c0_194] : memref<3x8x128xf32, #tpu.memory_space<vmem>>, vector<1x8x128xf32>
    %924 = vector.shape_cast %923 : vector<1x8x128xf32> to vector<8x128xf32>
    %925 = vector.shape_cast %913 : vector<8x128xf32> to vector<1x8x128xf32>
    tpu.vector_store %arg13[%c2_192, %c0_193, %c0_194], %925 {strides = array<i32>} : memref<3x8x128xf32, #tpu.memory_space<vmem>>, vector<1x8x128xf32>,
    %c0_195 = arith.constant 0 : index
    %c0_196 = arith.constant 0 : index
    %926 = vector.load %arg14[%c0_195, %c0_196] : memref<64x128xf32, #tpu.memory_space<vmem>>, vector<64x128xf32>
    %927 = arith.truncf %926 : vector<64x128xf32> to vector<64x128xbf16>
    %c0_197 = arith.constant 0 : index
    %c0_198 = arith.constant 0 : index
    %928 = vector.load %arg9[%c0_197, %c0_198] : memref<128x128xbf16, #tpu.memory_space<vmem>>, vector<128x128xbf16>
    %cst_199 = arith.constant dense<0.000000e+00> : vector<64x128xf32>
    %929 = tpu.matmul %927, %928, %cst_199 {dimension_numbers = #tpu.dot_dimension_numbers<[1], [0], [0], [1], [0, 0, 1, 1], [], []>} : vector<64x128xbf16>, vector<128x128xbf16>, vector<64x128xf32> -> vector<64x128xf32>
    %c0_200 = arith.constant 0 : index
    %c0_201 = arith.constant 0 : index
    %930 = vector.load %arg10[%c0_200, %c0_201] : memref<1x128xf32, #tpu.memory_space<vmem>>, vector<1x128xf32>
    %931 = vector.broadcast %930 : vector<1x128xf32> to vector<64x128xf32>
    %932 = arith.addf %929, %931 : vector<64x128xf32>
    %cst_202 = arith.constant dense<0xFF800000> : vector<64xf32>
    %933 = vector.multi_reduction <maximumf>, %932, %cst_202 [1] : vector<64x128xf32> to vector<64xf32>
    %934 = vector.shape_cast %933 : vector<64xf32> to vector<64x1xf32>
    %935 = vector.broadcast %934 : vector<64x1xf32> to vector<64x128xf32>
    %936 = arith.subf %932, %935 : vector<64x128xf32>
    %937 = math.exp %936 : vector<64x128xf32>
    %cst_203 = arith.constant dense<0.000000e+00> : vector<64xf32>
    %938 = vector.multi_reduction <add>, %937, %cst_203 [1] : vector<64x128xf32> to vector<64xf32>
    %939 = vector.shape_cast %938 : vector<64xf32> to vector<64x1xf32>
    %940 = math.log %939 : vector<64x1xf32>
    %941 = vector.broadcast %940 : vector<64x1xf32> to vector<64x128xf32>
    %942 = arith.subf %936, %941 : vector<64x128xf32>
    %c0_204 = arith.constant 0 : index
    %c0_205 = arith.constant 0 : index
    %943 = vector.load %arg11[%c0_204, %c0_205] : memref<64x128xf32, #tpu.memory_space<vmem>>, vector<64x128xf32>
    tpu.vector_store %arg11[%c0_204, %c0_205], %942 {strides = array<i32>} : memref<64x128xf32, #tpu.memory_space<vmem>>, vector<64x128xf32>,
    %c1_i32_206 = arith.constant 1 : i32
    %944 = arith.cmpi eq, %arg0, %c1_i32_206 : i32
    %945 = arith.extui %944 : i1 to i32
    %c0_i32_207 = arith.constant 0 : i32
    %946 = arith.cmpi ne, %945, %c0_i32_207 : i32
    scf.if %946 {
      %c0_208 = arith.constant 0 : index
      %c0_209 = arith.constant 0 : index
      %c0_210 = arith.constant 0 : index
      %947 = vector.load %arg13[%c0_208, %c0_209, %c0_210] : memref<3x8x128xf32, #tpu.memory_space<vmem>>, vector<3x8x128xf32>
      %c0_211 = arith.constant 0 : index
      %c0_212 = arith.constant 0 : index
      %c0_213 = arith.constant 0 : index
      %948 = vector.load %arg12[%c0_211, %c0_212, %c0_213] : memref<3x8x128xf32, #tpu.memory_space<vmem>>, vector<3x8x128xf32>
      tpu.vector_store %arg12[%c0_211, %c0_212, %c0_213], %947 {strides = array<i32>} : memref<3x8x128xf32, #tpu.memory_space<vmem>>, vector<3x8x128xf32>,
    } else {
    }
    return
  }
  func.func @transform_0(%arg0: i32) -> (i32, i32) {
    %c0_i32 = arith.constant 0 : i32
    %c0_i32_0 = arith.constant 0 : i32
    return %arg0, %c0_i32 : i32, i32
  }
  func.func @transform_1(%arg0: i32) -> (i32, i32, i32) {
    %c0_i32 = arith.constant 0 : i32
    %c0_i32_0 = arith.constant 0 : i32
    %c0_i32_1 = arith.constant 0 : i32
    %c0_i32_2 = arith.constant 0 : i32
    return %c0_i32, %c0_i32_0, %c0_i32_1 : i32, i32, i32
  }
  func.func @transform_2(%arg0: i32) -> (i32, i32) {
    %c0_i32 = arith.constant 0 : i32
    %c0_i32_0 = arith.constant 0 : i32
    %c0_i32_1 = arith.constant 0 : i32
    return %c0_i32, %c0_i32_0 : i32, i32
  }
  func.func @transform_3(%arg0: i32) -> (i32, i32) {
    %c0_i32 = arith.constant 0 : i32
    %c0_i32_0 = arith.constant 0 : i32
    %c0_i32_1 = arith.constant 0 : i32
    return %c0_i32, %c0_i32_0 : i32, i32
  }
  func.func @transform_4(%arg0: i32) -> (i32, i32) {
    %c0_i32 = arith.constant 0 : i32
    %c0_i32_0 = arith.constant 0 : i32
    %c0_i32_1 = arith.constant 0 : i32
    return %c0_i32, %c0_i32_0 : i32, i32
  }
  func.func @transform_5(%arg0: i32) -> (i32, i32) {
    %c0_i32 = arith.constant 0 : i32
    %c0_i32_0 = arith.constant 0 : i32
    %c0_i32_1 = arith.constant 0 : i32
    return %c0_i32, %c0_i32_0 : i32, i32
  }
  func.func @transform_6(%arg0: i32) -> (i32, i32) {
    %c0_i32 = arith.constant 0 : i32
    %c0_i32_0 = arith.constant 0 : i32
    %c0_i32_1 = arith.constant 0 : i32
    return %c0_i32, %c0_i32_0 : i32, i32
  }
  func.func @transform_7(%arg0: i32) -> (i32, i32) {
    %c0_i32 = arith.constant 0 : i32
    %c0_i32_0 = arith.constant 0 : i32
    %c0_i32_1 = arith.constant 0 : i32
    return %c0_i32, %c0_i32_0 : i32, i32
  }
  func.func @transform_8(%arg0: i32) -> (i32, i32) {
    %c0_i32 = arith.constant 0 : i32
    %c0_i32_0 = arith.constant 0 : i32
    %c0_i32_1 = arith.constant 0 : i32
    return %c0_i32, %c0_i32_0 : i32, i32
  }
  func.func @transform_9(%arg0: i32) -> (i32, i32) {
    %c0_i32 = arith.constant 0 : i32
    %c0_i32_0 = arith.constant 0 : i32
    %c0_i32_1 = arith.constant 0 : i32
    return %c0_i32, %c0_i32_0 : i32, i32
  }
  func.func @transform_10(%arg0: i32) -> (i32, i32) {
    %c0_i32 = arith.constant 0 : i32
    %c0_i32_0 = arith.constant 0 : i32
    return %arg0, %c0_i32 : i32, i32
  }
  func.func @transform_11(%arg0: i32) -> (i32, i32, i32) {
    %c0_i32 = arith.constant 0 : i32
    %c0_i32_0 = arith.constant 0 : i32
    %c0_i32_1 = arith.constant 0 : i32
    %c0_i32_2 = arith.constant 0 : i32
    return %c0_i32, %c0_i32_0, %c0_i32_1 : i32, i32, i32
  }
}

</mosaic_0001>

<bundles_post_ra>
// kernel: whosaid_forward.1
= control target key start
LH: loop header
LB: loop body
LE: loop exit
PB: predicated region body
PF: predicated region fallthrough
CT: control target
= control target key end

     0   :  { %s10082_s0 = inlined_call_operand.hbm [shape: f32[128,384], index: 0, kind: input, shape index: {}]   ;;  %s10083_s1 = inlined_call_operand.hbm [shape: f32[3,8,128], index: 1, kind: input, shape index: {}]   ;;  %s10084_s2 = inlined_call_operand.hbm [shape: bf16[128,384], index: 2, kind: input, shape index: {}]   ;;  %s10085_s3 = inlined_call_operand.hbm [shape: f32[1,128], index: 3, kind: input, shape index: {}]   ;;  %s10086_s4 = inlined_call_operand.hbm [shape: bf16[256,512], index: 4, kind: input, shape index: {}]   ;;  %s10087_s5 = inlined_call_operand.hbm [shape: f32[1,512], index: 5, kind: input, shape index: {}]   ;;  %s10088_s6 = inlined_call_operand.hbm [shape: bf16[256,512], index: 6, kind: input, shape index: {}]   ;;  %s10089_s7 = inlined_call_operand.hbm [shape: f32[1,512], index: 7, kind: input, shape index: {}]   ;;  %s10090_s8 = inlined_call_operand.hbm [shape: bf16[128,128], index: 8, kind: input, shape index: {}]   ;;  %s10091_s9 = inlined_call_operand.hbm [shape: f32[1,128], index: 9, kind: input, shape index: {}]   ;;  %s10092_s10 = inlined_call_operand.hbm [shape: f32[128,128], index: 10, kind: output, shape index: {0}]   ;;  %s10093_s11 = inlined_call_operand.hbm [shape: f32[3,8,128], index: 11, kind: output, shape index: {1}]  }
   0x1   :  { %10522 = sst [smem:[#allocation139_spill]] %s10083_s1 }
   0x2   :  { %10523 = sst [smem:[#allocation140_spill]] %s10084_s2 }
   0x3   :  { %10524 = sst [smem:[#allocation141_spill]] %s10092_s10 }
   0x4   :  { %10525 = sst [smem:[#allocation142_spill]] %s10093_s11 }
   0x5   :  { %17 = vsyncpa [#allocation5], 0 }
   0x6   :  { %19 = vsyncpa [#allocation5 + $0x1], 0 }
   0x7   :  { %20 = vsyncpa [#allocation8], 0 }
   0x8   :  { %21 = vsyncpa [#allocation11], 0 }
   0x9   :  { %22 = vsyncpa [#allocation14], 0 }
   0xa   :  { %23 = vsyncpa [#allocation17], 0 }
   0xb   :  { %24 = vsyncpa [#allocation20], 0 }
   0xc   :  { %25 = vsyncpa [#allocation6], 0 }
   0xd   :  { %27 = vsyncpa [#allocation6 + $0x1], 0 }
   0xe   :  { %28 = vsyncpa [#allocation23], 0  ;;  %s6759_s17 = smov 0   ;;  %s6761_s18 = smov 0  }
   0xf   :  { %s6763_s19 = smov 0   ;;  %s6765_s20 = smov 0  }
  0x10 LB: > { %s6672_s21 = smov [#allocation7]   ;;  %s6780_s23 = sadd.s32 4294967295, %s6670_s20   ;;  %s6670_s20 = sphi %s6765_s20, %s11377_s20   ;;  %s6666_s19 = sphi %s6763_s19, %s11376_s19   ;;  %s6662_s18 = sphi %s6761_s18, %s11375_s18   ;;  %s6658_s17 = sphi %s6759_s17, %s11374_s17  }
  0x11   : > { %s313_s22 = sshll.u32 %s6672_s21, 4  ;;  %p4612_p0 = scmp.ge.s32.totalorder %s6670_s20, 1  ;;  %s6786_s22 = int_to_ptr.vmem [resolvable:$true] %s313_s22 }
  0x12   : > { %p10097_p1 = scmp.eq.s32.totalorder %s6780_s23, 0  ;;  %p301_p2 = scmp.lt.s32.totalorder %s6670_s20, 3 }
  0x13   : > { %s6673_s25 = smov [#allocation10]   ;;  %s6674_s28 = smov [#allocation13]  }
  0x14   : > { %p6788_p4 = pnand %p4612_p0, %p301_p2  ;;  %s340_s26 = sshll.u32 %s6673_s25, 4  ;;  %s6801_s26 = int_to_ptr.vmem [resolvable:$true] %s340_s26 }
  0x15   : > { %s364_s29 = sshll.u32 %s6674_s28, 4  ;;  %s10529_s1 = sld [smem:[#allocation139_spill]]  ;;  %s6803_s29 = int_to_ptr.vmem [resolvable:$true] %s364_s29 }
  0x16   : > { %s10526_s24 = scalar_select %p6788_p4, 1, 0 }
  0x17   : > { %p5173_p6 = pneg %p6788_p4 }
  0x18   : > { %10527 = sst [smem:[#allocation32_spill]] %s10526_s24 }
  0x19   : > { %p6797_p7 = pnand %p5173_p6, %p10097_p1 }
  0x1b   : > { %s6272_s13 = scalar_lea.hbm %s10529_s1, 384  ;;  %p6813_p9 = pneg %p6797_p7 }
  0x1c   : > { %p6273_p8 = scmp.ne.s32.totalorder %s10529_s1, %s6272_s13  ;;  %p6279_p12 = scmp.lt.u32.totalorder %s6272_s13, %s10529_s1 }
  0x1e   : > { %p6275_p10 = pnand %p6813_p9, %p6273_p8 }
  0x20   : > { %p6276_p11 = pneg %p6275_p10 }
  0x22   : > { %p6281_p13 = pnand %p6279_p12, %p6276_p11 }
  0x24   : > { %6284 = shalt.err (!%p6281_p13)
}
  0x25   : > { %s6285_s28 = scalar_lea.vmem %s6786_s22, 384  ;;  %p6293_p5 = scmp.lt.s32.totalorder %s6786_s22, %s6786_s22 }
  0x26   : > { %p6286_p0 = scmp.ne.s32.totalorder %s6786_s22, %s6285_s28  ;;  %p6294_p3 = scmp.lt.s32.totalorder %s6285_s28, %s6285_s28 }
  0x28   : > { %p6288_p2 = pnand %p6286_p0, %p6813_p9  ;;  %p6295_p8 = por %p6294_p3, %p6293_p5 }
  0x2a   : > { %p6289_p6 = pneg %p6288_p2 }
  0x2c   : > { %p6296_p10 = pnand %p6295_p8, %p6289_p6 }
  0x2e   : > { %6299 = shalt.err (!%p6296_p10)
}
  0x2f   : > { %s6675_s30 = smov 128   ;;  %s6676_s12 = smov 8  }
  0x30   : > { %5176 = dma.hbm_to_vmem [thread:$0]  (!%p6797_p7), %s10529_s1, 384, %s6786_s22, [#allocation8], %s6675_s30, %s6675_s30, %s6676_s12  }
  0x31   : > { %s6300_s25 = scalar_lea.hbm %s10085_s3, 16 }
  0x32   : > { %p6301_p3 = scmp.ne.s32.totalorder %s10085_s3, %s6300_s25  ;;  %p6307_p12 = scmp.lt.u32.totalorder %s6300_s25, %s10085_s3 }
  0x34   : > { %p6303_p5 = pnand %p6301_p3, %p6813_p9 }
  0x36   : > { %p6304_p11 = pneg %p6303_p5 }
  0x38   : > { %p6309_p13 = pnand %p6307_p12, %p6304_p11 }
  0x3a   : > { %6312 = shalt.err (!%p6309_p13)
}
  0x3b   : > { %s6313_s22 = scalar_lea.vmem %s6801_s26, 16  ;;  %s6320_s10 = scalar_lea.vmem %s6801_s26, 32 }
  0x3c   : > { %p6314_p0 = scmp.ne.s32.totalorder %s6801_s26, %s6313_s22  ;;  %p6321_p8 = scmp.lt.s32.totalorder %s6801_s26, %s6801_s26 }
  0x3d   : > { %p6322_p10 = scmp.lt.s32.totalorder %s6320_s10, %s6313_s22 }
  0x3e   : > { %p6316_p2 = pnand %p6314_p0, %p6813_p9 }
  0x3f   : > { %p6323_p3 = por %p6322_p10, %p6321_p8 }
  0x40   : > { %p6317_p6 = pneg %p6316_p2 }
  0x42   : > { %p6324_p5 = pnand %p6323_p3, %p6317_p6 }
  0x44   : > { %6327 = shalt.err (!%p6324_p5)
}
  0x45   : > { %5182 = dma.hbm_to_vmem [thread:$0]  (!%p6797_p7), %s10085_s3, 16, %s6801_s26, [#allocation11]  }
  0x46   : > { %s6328_s13 = scalar_lea.hbm %s10087_s5, 64 }
  0x47   : > { %p6329_p11 = scmp.ne.s32.totalorder %s10087_s5, %s6328_s13  ;;  %p6335_p0 = scmp.lt.u32.totalorder %s6328_s13, %s10087_s5 }
  0x49   : > { %p6331_p12 = pnand %p6329_p11, %p6813_p9 }
  0x4b   : > { %p6332_p13 = pneg %p6331_p12 }
  0x4d   : > { %p6337_p2 = pnand %p6335_p0, %p6332_p13 }
  0x4f   : > { %6340 = shalt.err (!%p6337_p2)
}
  0x50   : > { %s6341_s26 = scalar_lea.vmem %s6803_s29, 64  ;;  %p6349_p3 = scmp.lt.s32.totalorder %s6803_s29, %s6803_s29 }
  0x51   : > { %p6342_p6 = scmp.ne.s32.totalorder %s6803_s29, %s6341_s26  ;;  %p6350_p5 = scmp.lt.s32.totalorder %s6341_s26, %s6341_s26 }
  0x53   : > { %p6344_p8 = pnand %p6342_p6, %p6813_p9  ;;  %p6351_p11 = por %p6350_p5, %p6349_p3 }
  0x55   : > { %p6345_p10 = pneg %p6344_p8 }
  0x57   : > { %p6352_p12 = pnand %p6351_p11, %p6345_p10 }
  0x59   : > { %6355 = shalt.err (!%p6352_p12)
}
  0x5a   : > { %5188 = dma.hbm_to_vmem [thread:$0]  (!%p6797_p7), %s10087_s5, 64, %s6803_s29, [#allocation14]  }
  0x5b   : > { %s6677_s10 = smov [#allocation16]   ;;  %s6678_s24 = smov [#allocation9]  }
  0x5c   : > { %s388_s11 = sshll.u32 %s6677_s10, 4  ;;  %s326_s30 = sshll.u32 %s6678_s24, 4  ;;  %s389_s11 = int_to_ptr.vmem [resolvable:$true] %s388_s11  ;;  %s327_s30 = int_to_ptr.vmem [resolvable:$true] %s326_s30 }
  0x5d   : > { %s6356_s14 = scalar_lea.hbm %s10089_s7, 64 }
  0x5e   : > { %p6357_p13 = scmp.ne.s32.totalorder %s10089_s7, %s6356_s14  ;;  %p6363_p6 = scmp.lt.u32.totalorder %s6356_s14, %s10089_s7 }
  0x60   : > { %p6359_p0 = pnand %p6357_p13, %p6813_p9 }
  0x62   : > { %p6360_p2 = pneg %p6359_p0 }
  0x64   : > { %p6365_p8 = pnand %p6363_p6, %p6360_p2 }
  0x66   : > { %6368 = shalt.err (!%p6365_p8)
}
  0x67   : > { %s6369_s29 = scalar_lea.vmem %s389_s11, 64  ;;  %p6377_p11 = scmp.lt.s32.totalorder %s389_s11, %s389_s11 }
  0x68   : > { %p6370_p10 = scmp.ne.s32.totalorder %s389_s11, %s6369_s29  ;;  %p6378_p12 = scmp.lt.s32.totalorder %s6369_s29, %s6369_s29 }
  0x6a   : > { %p6372_p3 = pnand %p6370_p10, %p6813_p9  ;;  %p6379_p1 = por %p6378_p12, %p6377_p11 }
  0x6c   : > { %p6373_p5 = pneg %p6372_p3 }
  0x6e   : > { %p6380_p4 = pnand %p6379_p1, %p6373_p5 }
  0x70   : > { %6383 = shalt.err (!%p6380_p4)
}
  0x71   : > { %5194 = dma.hbm_to_vmem [thread:$0]  (!%p6797_p7), %s10089_s7, 64, %s389_s11, [#allocation17]  }
  0x72   : > { %s10531_s2 = sld [smem:[#allocation140_spill]] }
  0x78   : > { %s6384_s12 = scalar_lea.hbm %s10531_s2, 3072 }
  0x79   : > { %p6385_p13 = scmp.ne.s32.totalorder %s10531_s2, %s6384_s12  ;;  %p6391_p4 = scmp.lt.u32.totalorder %s6384_s12, %s10531_s2 }
  0x7b   : > { %p6387_p0 = pnand %p6385_p13, %p6813_p9 }
  0x7d   : > { %p6388_p1 = pneg %p6387_p0 }
  0x7f   : > { %p6393_p2 = pnand %p6391_p4, %p6388_p1 }
  0x81   : > { %6396 = shalt.err (!%p6393_p2)
}
  0x82   : > { %s6397_s25 = scalar_lea.vmem %s327_s30, 3072  ;;  %p6405_p3 = scmp.lt.s32.totalorder %s327_s30, %s327_s30 }
  0x83   : > { %p6398_p6 = scmp.ne.s32.totalorder %s327_s30, %s6397_s25  ;;  %p6406_p5 = scmp.lt.s32.totalorder %s6397_s25, %s6397_s25 }
  0x85   : > { %p6400_p8 = pnand %p6398_p6, %p6813_p9  ;;  %p6407_p11 = por %p6406_p5, %p6405_p3 }
  0x87   : > { %p6401_p10 = pneg %p6400_p8 }
  0x89   : > { %p6408_p12 = pnand %p6407_p11, %p6401_p10 }
  0x8b   : > { %6411 = shalt.err (!%p6408_p12)
}
  0x8c   : > { %s6679_s11 = smov 192   ;;  %s6680_s26 = smov 12  }
  0x8d   : > { %5179 = dma.hbm_to_vmem [thread:$0]  (!%p6797_p7), %s10531_s2, 3072, %s327_s30, [#allocation8], %s6679_s11, %s6679_s11, %s6680_s26  }
  0x8e   : > { %s6681_s22 = smov [#allocation12]   ;;  %s6412_s13 = scalar_lea.hbm %s10086_s4, 8192 }
  0x8f   : > { %s350_s10 = sshll.u32 %s6681_s22, 4  ;;  %p6413_p13 = scmp.ne.s32.totalorder %s10086_s4, %s6412_s13  ;;  %s351_s10 = int_to_ptr.vmem [resolvable:$true] %s350_s10 }
  0x90   : > { %p6419_p4 = scmp.lt.u32.totalorder %s6412_s13, %s10086_s4 }
  0x91   : > { %p6415_p0 = pnand %p6413_p13, %p6813_p9 }
  0x93   : > { %p6416_p1 = pneg %p6415_p0 }
  0x95   : > { %p6421_p2 = pnand %p6419_p4, %p6416_p1 }
  0x97   : > { %6424 = shalt.err (!%p6421_p2)
}
  0x98   : > { %s6425_s30 = scalar_lea.vmem %s351_s10, 8192  ;;  %p6433_p3 = scmp.lt.s32.totalorder %s351_s10, %s351_s10 }
  0x99   : > { %p6426_p6 = scmp.ne.s32.totalorder %s351_s10, %s6425_s30  ;;  %p6434_p5 = scmp.lt.s32.totalorder %s6425_s30, %s6425_s30 }
  0x9b   : > { %p6428_p8 = pnand %p6426_p6, %p6813_p9  ;;  %p6435_p11 = por %p6434_p5, %p6433_p3 }
  0x9d   : > { %p6429_p10 = pneg %p6428_p8 }
  0x9f   : > { %p6436_p12 = pnand %p6435_p11, %p6429_p10 }
  0xa1   : > { %6439 = shalt.err (!%p6436_p12)
}
  0xa2   : > { %s6682_s11 = smov 256   ;;  %s6683_s26 = smov 16  }
  0xa3   : > { %5185 = dma.hbm_to_vmem [thread:$0]  (!%p6797_p7), %s10086_s4, 8192, %s351_s10, [#allocation11], %s6682_s11, %s6682_s11, %s6683_s26  }
  0xa4   : > { %s6684_s22 = smov [#allocation15]   ;;  %s6685_s12 = smov [#allocation18]  }
  0xa5   : > { %s374_s24 = sshll.u32 %s6684_s22, 4  ;;  %s398_s13 = sshll.u32 %s6685_s12, 4  ;;  %s375_s24 = int_to_ptr.vmem [resolvable:$true] %s374_s24  ;;  %s6935_s13 = int_to_ptr.vmem [resolvable:$true] %s398_s13 }
  0xa6   : > { %s6440_s21 = scalar_lea.hbm %s10088_s6, 8192 }
  0xa7   : > { %p6441_p13 = scmp.ne.s32.totalorder %s10088_s6, %s6440_s21  ;;  %p6447_p4 = scmp.lt.u32.totalorder %s6440_s21, %s10088_s6 }
  0xa9   : > { %p6443_p0 = pnand %p6441_p13, %p6813_p9 }
  0xab   : > { %p6444_p1 = pneg %p6443_p0 }
  0xad   : > { %p6449_p2 = pnand %p6447_p4, %p6444_p1 }
  0xaf   : > { %6452 = shalt.err (!%p6449_p2)
}
  0xb0   : > { %s6453_s28 = scalar_lea.vmem %s375_s24, 8192  ;;  %p6461_p3 = scmp.lt.s32.totalorder %s375_s24, %s375_s24 }
  0xb1   : > { %p6454_p6 = scmp.ne.s32.totalorder %s375_s24, %s6453_s28  ;;  %p6462_p5 = scmp.lt.s32.totalorder %s6453_s28, %s6453_s28 }
  0xb3   : > { %p6456_p8 = pnand %p6454_p6, %p6813_p9  ;;  %p6463_p11 = por %p6462_p5, %p6461_p3 }
  0xb5   : > { %p6457_p10 = pneg %p6456_p8 }
  0xb7   : > { %p6464_p12 = pnand %p6463_p11, %p6457_p10 }
  0xb9   : > { %6467 = shalt.err (!%p6464_p12)
}
  0xba   : > { %5191 = dma.hbm_to_vmem [thread:$0]  (!%p6797_p7), %s10088_s6, 8192, %s375_s24, [#allocation14], %s6682_s11, %s6682_s11, %s6683_s26  }
  0xbb   : > { %s6468_s21 = scalar_lea.hbm %s10090_s8, 1024 }
  0xbc   : > { %p6469_p13 = scmp.ne.s32.totalorder %s10090_s8, %s6468_s21  ;;  %p6475_p4 = scmp.lt.u32.totalorder %s6468_s21, %s10090_s8 }
  0xbe   : > { %p6471_p0 = pnand %p6469_p13, %p6813_p9 }
  0xc0   : > { %p6472_p1 = pneg %p6471_p0 }
  0xc2   : > { %p6477_p2 = pnand %p6475_p4, %p6472_p1 }
  0xc4   : > { %6480 = shalt.err (!%p6477_p2)
}
  0xc5   : > { %s6481_s11 = scalar_lea.vmem %s6935_s13, 1024  ;;  %p6489_p3 = scmp.lt.s32.totalorder %s6935_s13, %s6935_s13 }
  0xc6   : > { %p6482_p6 = scmp.ne.s32.totalorder %s6935_s13, %s6481_s11  ;;  %p6490_p5 = scmp.lt.s32.totalorder %s6481_s11, %s6481_s11 }
  0xc8   : > { %p6484_p8 = pnand %p6482_p6, %p6813_p9  ;;  %p6491_p11 = por %p6490_p5, %p6489_p3 }
  0xca   : > { %p6485_p10 = pneg %p6484_p8 }
  0xcc   : > { %p6492_p12 = pnand %p6491_p11, %p6485_p10 }
  0xce   : > { %6495 = shalt.err (!%p6492_p12)
}
  0xcf   : > { %s6686_s26 = smov 64   ;;  %s6687_s24 = smov 4  }
  0xd0   : > { %5197 = dma.hbm_to_vmem [thread:$0]  (!%p6797_p7), %s10090_s8, 1024, %s6935_s13, [#allocation17], %s6686_s26, %s6686_s26, %s6687_s24  }
  0xd1   : > { %s6688_s12 = smov [#allocation19]   ;;  %s6496_s25 = scalar_lea.hbm %s10091_s9, 16 }
  0xd2   : > { %s412_s14 = sshll.u32 %s6688_s12, 4  ;;  %p6497_p13 = scmp.ne.s32.totalorder %s10091_s9, %s6496_s25  ;;  %s413_s14 = int_to_ptr.vmem [resolvable:$true] %s412_s14 }
  0xd3   : > { %p6503_p4 = scmp.lt.u32.totalorder %s6496_s25, %s10091_s9 }
  0xd4   : > { %p6499_p0 = pnand %p6497_p13, %p6813_p9 }
  0xd6   : > { %p6500_p1 = pneg %p6499_p0 }
  0xd8   : > { %p6505_p2 = pnand %p6503_p4, %p6500_p1 }
  0xda   : > { %6508 = shalt.err (!%p6505_p2)
}
  0xdb   : > { %s6509_s13 = scalar_lea.vmem %s413_s14, 16  ;;  %s6516_s26 = scalar_lea.vmem %s413_s14, 32 }
  0xdc   : > { %p6510_p6 = scmp.ne.s32.totalorder %s413_s14, %s6509_s13  ;;  %p6517_p3 = scmp.lt.s32.totalorder %s413_s14, %s413_s14 }
  0xdd   : > { %p6518_p5 = scmp.lt.s32.totalorder %s6516_s26, %s6509_s13 }
  0xde   : > { %p6512_p8 = pnand %p6510_p6, %p6813_p9 }
  0xdf   : > { %p6519_p11 = por %p6518_p5, %p6517_p3 }
  0xe0   : > { %p6513_p10 = pneg %p6512_p8 }
  0xe2   : > { %p6520_p12 = pnand %p6519_p11, %p6513_p10 }
  0xe4   : > { %6523 = shalt.err (!%p6520_p12)
}
  0xe5   : > { %5200 = dma.hbm_to_vmem [thread:$0]  (!%p6797_p7), %s10091_s9, 16, %s413_s14, [#allocation20]  }
  0xe6   : > { %s4611_s27 = sadd.s32 4294967294, %s6670_s20   ;;  %s6998_s16 = sadd.s32 1, %s6670_s20  }
  0xe7   : > { %s41_s22 = sadd.s32 1, %s6666_s19  ;;  %s38_s12 = ssub.s32 %s6670_s20, %s6998_s16 }
  0xe8   : > { %p48_p9 = scmp.ne.s32.totalorder %s6666_s19, %s6662_s18  ;;  %p39_p13 = scmp.eq.s32.totalorder %s38_s12, 0 }
  0xe9   : > { %p49_p0 = scmp.eq.s32.totalorder %s6670_s20, 0  ;;  %p54_p1 = scmp.ne.s32.totalorder %s6662_s18, %s6658_s17 }
  0xea   : > { %p10099_p4 = scmp.eq.s32.totalorder %s6780_s23, 1  ;;  %p10532_p6 = scmp.eq.s32.totalorder %s6780_s23, 0 }
  0xeb   : > { %s7010_s15 = scalar_select %p39_p13, %s6666_s19, %s41_s22  }
  0xec   : > { %p50_p2 = por %p49_p0, %p48_p9  ;;  %p7014_p8 = por %p10532_p6, %p54_p1 }
  0xed   : > { %p7020_p7 = por %p10099_p4, %p48_p9  ;;  %p273_p10 = scmp.eq.s32.totalorder %s4611_s27, 1 }
  0xee   : > { %p5218_p3 = scmp.lt.s32.totalorder %s6670_s20, 2  ;;  %s423_s25 = sand.u32 1, %s6666_s19  }
  0xef   : > { %s10534_s14 = scalar_select %p7020_p7, 1, 0 }
  0xf0   : > { %p7026_p5 = por %p273_p10, %p54_p1  ;;  %s5126_s29 = smul.u32 192, %s423_s25 }
  0xf1   : > { %p7030_p11 = pnand %p5218_p3, %p50_p2  ;;  %s5127_s11 = smul.u32 3072, %s6670_s20 }
  0xf2   : > { %s10535_s30 = scalar_select %p7026_p5, 1, 0 }
  0xf3   : > { %s7038_s24 = scalar_lea.hbm %s10082_s0, %s5127_s11  ;;  %s427_s28 = scalar_lea.vmem [#allocation4], %s5126_s29 }
  0xf4   : > { %s435_s27 = sshll.u32 %s427_s28, 4  ;;  %s7042_s22 = scalar_lea.sflag [#allocation5], %s423_s25  ;;  %s7040_s27 = int_to_ptr.vmem [resolvable:$true] %s435_s27 }
  0xf5   : > { %s6524_s12 = scalar_lea.hbm %s7038_s24, 3072  ;;  %p6526_p9 = pneg %p7030_p11 }
  0xf6   : > { %p6525_p12 = scmp.ne.s32.totalorder %s7038_s24, %s6524_s12  ;;  %s6529_s26 = scalar_lea.hbm %s10082_s0, 6144 }
  0xf7   : > { %p6530_p1 = scmp.lt.u32.totalorder %s7038_s24, %s10082_s0  ;;  %p6531_p2 = scmp.lt.u32.totalorder %s6529_s26, %s6524_s12 }
  0xf8   : > { %p6527_p13 = pnand %p6526_p9, %p6525_p12  ;;  %p6533_p10 = scmp.lt.u32.totalorder %s6524_s12, %s7038_s24 }
  0xf9   : > { %p6532_p6 = por %p6531_p2, %p6530_p1 }
  0xfa   : > { %p6528_p0 = pneg %p6527_p13 }
  0xfb   : > { %p6534_p3 = por %p6533_p10, %p6532_p6 }
  0xfd   : > { %p6535_p4 = pnand %p6534_p3, %p6528_p0 }
  0xff   : > { %6538 = shalt.err (!%p6535_p4)
}
 0x100   : > { %s6539_s25 = scalar_lea.vmem %s7040_s27, 3072  ;;  %s6689_s29 = smov [#allocation4]  }
 0x101   : > { %p6540_p12 = scmp.ne.s32.totalorder %s7040_s27, %s6539_s25  ;;  %s6544_s28 = sshll.u32 %s6689_s29, 4  ;;  %s6545_s28 = int_to_ptr.vmem [resolvable:$false] %s6544_s28 }
 0x102   : > { %s6546_s1 = scalar_lea.vmem %s6545_s28, 6144  ;;  %p6547_p7 = scmp.lt.s32.totalorder %s7040_s27, %s6545_s28 }
 0x103   : > { %p6542_p13 = pnand %p6540_p12, %p6526_p9  ;;  %p6548_p1 = scmp.lt.s32.totalorder %s6546_s1, %s6539_s25 }
 0x105   : > { %p6543_p5 = pneg %p6542_p13  ;;  %p6549_p2 = por %p6548_p1, %p6547_p7 }
 0x107   : > { %p6550_p6 = pnand %p6549_p2, %p6543_p5 }
 0x109   : > { %6553 = shalt.err (!%p6550_p6)
}
 0x10a   : > { %s6690_s2 = smov 384   ;;  %s6691_s12 = smov 24  }
 0x10b   : > { %5204 = dma.hbm_to_vmem [thread:$0]  (!%p7030_p11), %s7038_s24, 3072, %s7040_s27, %s7042_s22, %s6690_s2, %s6690_s2, %s6691_s12  }
 0x10c   : > { %s10537_s11 = sld [smem:[#allocation32_spill]] }
 0x112   : > { %p10538_p4 = scmp.ne.s32.totalorder %s10537_s11, 0 }
 0x114   : > { %447 = sbr.rel (%p10538_p4) target bundleno = 5614 (0x15ee), region = 60 }
 0x11b   : > { %s7073_s13 = sand.u32 1, %s6662_s18  }
 0x11c   : > { %s5128_s26 = smul.u32 192, %s7073_s13  ;;  %s450_s25 = scalar_lea.sflag [#allocation5], %s7073_s13 }
 0x11e   : > { %s7077_s29 = scalar_lea.vmem [#allocation4], %s5128_s26 }
 0x11f   : > { %6625 = dma.done.wait (%p7014_p8), %s450_s25, 3072  }
 0x120   : > { %6627 = vsyncadd (%p7014_p8), %s450_s25, 4294964224  ;;  %p10539_p7 = scmp.eq.s32.totalorder %s6780_s23, 0 }
 0x122   : > { %6629 = dma.done.wait (%p10539_p7), [#allocation8], 3456   ;;  %p10540_p5 = pmov %p10539_p7 }
 0x124   : > { %6631 = vsyncadd (%p10540_p5), [#allocation8], 4294963840  ;;  %p10541_p11 = pmov %p10540_p5 }
 0x125   : > { %p10542_p9 = pmov %p10540_p5 }
 0x126   : > { %6633 = dma.done.wait (%p10541_p11), [#allocation11], 8208  }
 0x127   : > { %6635 = vsyncadd (%p10542_p9), [#allocation11], 4294959088  ;;  %p10543_p0 = pmov %p10540_p5 }
 0x129   : > { %6637 = dma.done.wait (%p10543_p0), [#allocation14], 8256   ;;  %p10544_p10 = pmov %p10543_p0 }
 0x12a   : > { %p10545_p8 = pmov %p10543_p0 }
 0x12b   : > { %6639 = vsyncadd (%p10544_p10), [#allocation14], 4294959040 }
 0x12c   : > { %6641 = dma.done.wait (%p10545_p8), [#allocation17], 1088   ;;  %p10546_p3 = pmov %p10543_p0 }
 0x12d   : > { %p10547_p12 = pmov %p10543_p0 }
 0x12e   : > { %6643 = vsyncadd (%p10546_p3), [#allocation17], 4294966208 }
 0x12f   : > { %6645 = dma.done.wait (%p10547_p12), [#allocation20], 16   ;;  %p10548_p13 = pmov %p10543_p0 }
 0x130   : > { %s4636_s21 = sshll.u32 %s7073_s13, 6  ;;  %p10549_p1 = scmp.ne.s32.totalorder %s6780_s23, 0 }
 0x131   : > { %6647 = vsyncadd (%p10548_p13), [#allocation20], 4294967280  ;;  %s7104_s10 = scalar_lea.vmem [#allocation21], %s4636_s21  ;;  %v535_v0 = vld [vmem:[#allocation7] sm:$0xff] (!%p10549_p1)  ;;  %v536_v1 = vld [vmem:[#allocation7 + $0x8] sm:$0xff] (!%p10549_p1) }
 0x132   : > { %534 = sbr.rel (%p10549_p1) target bundleno = 313 (0x139), region = 104  ;;  %v537_v2 = vld [vmem:[#allocation7 + $0x10] sm:$0xff] (!%p10549_p1)  ;;  %538 = vst [vmem:[#allocation2] sm:$0xff] (!%p10549_p1), %v535_v0  ;;  %539 = vst [vmem:[#allocation2 + $0x8] sm:$0xff] (!%p10549_p1), %v536_v1 }
 0x133   : > { %540 = vst [vmem:[#allocation2 + $0x10] sm:$0xff] (!%p10549_p1), %v537_v2 }
 0x139 PF: > { %v5288_v3 = vld [vmem:[#allocation9 + $0x4] ss:$12 sps:$4 sm:$0xff]   ;;  %v5290_v4 = vld [vmem:[#allocation9] ss:$12 sps:$4 sm:$0xff]   ;;  %v10101_v5 = vmov 0   ;;  %v10103_v27 = vmov 0.0  }
 0x13a   : > { %921 = vmatprep.mubr.bf16.mxu1 %v10101_v5  ;;  %889 = vmatprep.subr.bf16.mxu1 %v5288_v3  ;;  %v5291_v6 = vld [vmem:[#allocation9 + $0x1c] ss:$12 sps:$4 sm:$0xff]   ;;  %v5293_v7 = vld [vmem:[#allocation9 + $0x18] ss:$12 sps:$4 sm:$0xff]   ;;  %v5294_v8 = vld [vmem:[#allocation9 + $0x34] ss:$12 sps:$4 sm:$0xff]  }
 0x13b   : > { %890 = vmatpush1.bf16.msra.mxu1 %v5290_v4  ;;  %v5296_v9 = vld [vmem:[#allocation9 + $0x30] ss:$12 sps:$4 sm:$0xff]   ;;  %v5297_v10 = vld [vmem:[#allocation9 + $0x4c] ss:$12 sps:$4 sm:$0xff]   ;;  %v5299_v11 = vld [vmem:[#allocation9 + $0x48] ss:$12 sps:$4 sm:$0xff]  }
 0x13c   : > { %891 = vmatprep.subr.bf16.mxu1 %v5291_v6  ;;  %v5300_v12 = vld [vmem:[#allocation9 + $0x64] ss:$12 sps:$4 sm:$0xff]   ;;  %v5302_v13 = vld [vmem:[#allocation9 + $0x60] ss:$12 sps:$4 sm:$0xff]   ;;  %v5303_v14 = vld [vmem:[#allocation9 + $0x7c] ss:$12 sps:$4 sm:$0xff]  }
 0x13d   : > { %v5305_v15 = vld [vmem:[#allocation9 + $0x78] ss:$12 sps:$4 sm:$0xff]   ;;  %v5306_v17 = vld [vmem:[#allocation9 + $0x94] ss:$12 sps:$4 sm:$0xff]   ;;  %v5308_v20 = vld [vmem:[#allocation9 + $0x90] ss:$12 sps:$4 sm:$0xff]  }
 0x13e   : > { %v5320_v16 = vld [vmem:[#allocation12 + $0x4] ss:$16 sps:$4 sm:$0xff]   ;;  %v5324_v18 = vld [vmem:[#allocation12] ss:$16 sps:$4 sm:$0xff]   ;;  %vm6694_vm0 = vmmov 0   ;;  %s7570_s24 = sshll.u32 %s6780_s23, 3 }
 0x13f   : > { %892 = vmatpush1.bf16.msra.mxu1 %v5293_v7  ;;  %1314 = vmatprep.subr.bf16.mxu0 %v5320_v16  ;;  %v5326_v19 = vld [vmem:[#allocation12 + $0x24] ss:$16 sps:$4 sm:$0xff]   ;;  %v5330_v21 = vld [vmem:[#allocation12 + $0x20] ss:$16 sps:$4 sm:$0xff]   ;;  %v7144_v35 = vld [vmem:[#allocation12 + $0xc] ss:$16 sps:$4 sm:$0xff]  }
 0x140   : > { %893 = vmatprep.subr.bf16.mxu1 %v5294_v8  ;;  %1315 = vmatpush1.bf16.msra.mxu0 %v5324_v18  ;;  %v5309_v22 = vld [vmem:[#allocation9 + $0xac] ss:$12 sps:$4 sm:$0xff]   ;;  %v5311_v23 = vld [vmem:[#allocation9 + $0xa8] ss:$12 sps:$4 sm:$0xff]   ;;  %v7126_v30 = vld [vmem:[#allocation9 + $0x50] ss:$12 sps:$4 sm:$0xff]  }
 0x141   : > { %1316 = vmatprep.subr.bf16.mxu0 %v5326_v19  ;;  %v7109_v24 = vld [vmem:[#allocation2] sm:$0xff]  ;;  %v7116_v28 = vld [vmem:[#allocation9 + $0x20] ss:$12 sps:$4 sm:$0xff]   ;;  %v7122_v29 = vld [vmem:[#allocation9 + $0x38] ss:$12 sps:$4 sm:$0xff]   ;;  %p1839_p2 = scmp.lt.s32.totalorder %s7570_s24, 12 }
 0x142   : > { %v7111_v25 = vld [vmem:[#allocation9 + $0x8] ss:$12 sps:$4 sm:$0xff]   ;;  %v760_v26 = vpack.c.bf16 %v7109_v24, %v7109_v24  ;;  %v7134_v32 = vld [vmem:[#allocation9 + $0x80] ss:$12 sps:$4 sm:$0xff]   ;;  %v7138_v33 = vld [vmem:[#allocation9 + $0x98] ss:$12 sps:$4 sm:$0xff]  }
 0x143   : > { %894 = vmatpush1.bf16.msra.mxu1 %v5296_v9  ;;  %v7130_v31 = vld [vmem:[#allocation9 + $0x68] ss:$12 sps:$4 sm:$0xff]   ;;  %v7142_v34 = vld [vmem:[#allocation9 + $0xb0] ss:$12 sps:$4 sm:$0xff]   ;;  %s1840_s27 = scalar_select %p1839_p2, 1, 0 }
 0x144   : > { %895 = vmatprep.subr.bf16.mxu1 %v5297_v10  ;;  %1317 = vmatpush1.bf16.msra.mxu0 %v5330_v21  ;;  %v7148_v36 = vld [vmem:[#allocation12 + $0x8] ss:$16 sps:$4 sm:$0xff]   ;;  %v7150_v37 = vld [vmem:[#allocation12 + $0x2c] ss:$16 sps:$4 sm:$0xff]   ;;  %v7159_v39 = vld [vmem:[#allocation12 + $0x44] ss:$16 sps:$4 sm:$0xff]  }
 0x145   : > { %v7154_v38 = vld [vmem:[#allocation12 + $0x28] ss:$16 sps:$4 sm:$0xff]   ;;  %v7161_v40 = vld [vmem:[#allocation12 + $0x4c] ss:$16 sps:$4 sm:$0xff]   ;;  %v7163_v41 = vld [vmem:[#allocation12 + $0x40] ss:$16 sps:$4 sm:$0xff]   ;;  %1318 = vmatprep.subr.bf16.mxu0 %v7159_v39  ;;  %s1841_s22 = scvt.s32.f32 %s1840_s27 }
 0x146   : > { %v7165_v42 = vld [vmem:[#allocation12 + $0x48] ss:$16 sps:$4 sm:$0xff]   ;;  %v7171_v43 = vld [vmem:[#allocation12 + $0x64] ss:$16 sps:$4 sm:$0xff]   ;;  %v7173_v44 = vld [vmem:[#allocation12 + $0x6c] ss:$16 sps:$4 sm:$0xff]  }
 0x147   : > { %896 = vmatpush1.bf16.msra.mxu1 %v5299_v11  ;;  %v7175_v45 = vld [vmem:[#allocation12 + $0x60] ss:$16 sps:$4 sm:$0xff]   ;;  %v7177_v46 = vld [vmem:[#allocation12 + $0x68] ss:$16 sps:$4 sm:$0xff]   ;;  %v7183_v47 = vld [vmem:[#allocation12 + $0x84] ss:$16 sps:$4 sm:$0xff]  }
 0x148   : > { %897 = vmatprep.subr.bf16.mxu1 %v5300_v12  ;;  %1319 = vmatpush1.bf16.msra.mxu0 %v7163_v41  ;;  %v7185_v48 = vld [vmem:[#allocation12 + $0x8c] ss:$16 sps:$4 sm:$0xff]   ;;  %v7187_v49 = vld [vmem:[#allocation12 + $0x80] ss:$16 sps:$4 sm:$0xff]   ;;  %v7189_v50 = vld [vmem:[#allocation12 + $0x88] ss:$16 sps:$4 sm:$0xff]  }
 0x149   : > { %1320 = vmatprep.subr.bf16.mxu0 %v7171_v43  ;;  %v7195_v51 = vld [vmem:[#allocation12 + $0xa4] ss:$16 sps:$4 sm:$0xff]   ;;  %v7197_v52 = vld [vmem:[#allocation12 + $0xac] ss:$16 sps:$4 sm:$0xff]   ;;  %v7199_v53 = vld [vmem:[#allocation12 + $0xa0] ss:$16 sps:$4 sm:$0xff]  }
 0x14a   : > { %v7201_v54 = vld [vmem:[#allocation12 + $0xa8] ss:$16 sps:$4 sm:$0xff]   ;;  %v7207_v55 = vld [vmem:[#allocation12 + $0xc4] ss:$16 sps:$4 sm:$0xff]   ;;  %v7209_v56 = vld [vmem:[#allocation12 + $0xcc] ss:$16 sps:$4 sm:$0xff]  }
 0x14b   : > { %898 = vmatpush1.bf16.msra.mxu1 %v5302_v13  ;;  %v7211_v57 = vld [vmem:[#allocation12 + $0xc0] ss:$16 sps:$4 sm:$0xff]   ;;  %v7213_v58 = vld [vmem:[#allocation12 + $0xc8] ss:$16 sps:$4 sm:$0xff]   ;;  %v7219_v59 = vld [vmem:[#allocation12 + $0xe4] ss:$16 sps:$4 sm:$0xff]  }
 0x14c   : > { %899 = vmatprep.subr.bf16.mxu1 %v5303_v14  ;;  %1321 = vmatpush1.bf16.msra.mxu0 %v7175_v45  ;;  %v7221_v60 = vld [vmem:[#allocation12 + $0xec] ss:$16 sps:$4 sm:$0xff]   ;;  %v7223_v61 = vld [vmem:[#allocation12 + $0xe0] ss:$16 sps:$4 sm:$0xff]   ;;  %v7225_v62 = vld [vmem:[#allocation12 + $0xe8] ss:$16 sps:$4 sm:$0xff]  }
 0x14d   : > { %1322 = vmatprep.subr.bf16.mxu0 %v7183_v47  ;;  %v7227_v63 = vld [vmem:[#allocation12 + $0x104] ss:$16 sps:$4 sm:$0xff]   ;;  %v7231_v0 = vld [vmem:[#allocation12 + $0x10c] ss:$16 sps:$4 sm:$0xff]   ;;  %v7235_v1 = vld [vmem:[#allocation12 + $0x100] ss:$16 sps:$4 sm:$0xff]  }
 0x14e   : > { %v7237_v2 = vld [vmem:[#allocation12 + $0x108] ss:$16 sps:$4 sm:$0xff]   ;;  %v7241_v3 = vld [vmem:[#allocation12 + $0x124] ss:$16 sps:$4 sm:$0xff]   ;;  %v7243_v4 = vld [vmem:[#allocation12 + $0x12c] ss:$16 sps:$4 sm:$0xff]  }
 0x14f   : > { %900 = vmatpush1.bf16.msra.mxu1 %v5305_v15  ;;  %10550 = vst [vmem:[#allocation33_spill] sm:$0xff] %v7243_v4  ;;  %v7247_v6 = vld [vmem:[#allocation12 + $0x120] ss:$16 sps:$4 sm:$0xff]   ;;  %v7249_v7 = vld [vmem:[#allocation12 + $0x128] ss:$16 sps:$4 sm:$0xff]   ;;  %s1844_s28 = ssub.f32 1.0, %s1841_s22 }
 0x150   : > { %901 = vmatprep.subr.bf16.mxu1 %v5306_v17  ;;  %1323 = vmatpush1.bf16.msra.mxu0 %v7187_v49  ;;  %10551 = vst [vmem:[#allocation34_spill] sm:$0xff] %v7247_v6  ;;  %10552 = vst [vmem:[#allocation35_spill] sm:$0xff] %v7249_v7  ;;  %v7255_v8 = vld [vmem:[#allocation12 + $0x144] ss:$16 sps:$4 sm:$0xff]   ;;  %v7257_v9 = vld [vmem:[#allocation12 + $0x14c] ss:$16 sps:$4 sm:$0xff]  }
 0x151   : > { %1324 = vmatprep.subr.bf16.mxu0 %v7195_v51  ;;  %10553 = vst [vmem:[#allocation36_spill] sm:$0xff] %v7255_v8  ;;  %10554 = vst [vmem:[#allocation37_spill] sm:$0xff] %v7257_v9  ;;  %v7259_v10 = vld [vmem:[#allocation12 + $0x140] ss:$16 sps:$4 sm:$0xff]   ;;  %v7261_v11 = vld [vmem:[#allocation12 + $0x148] ss:$16 sps:$4 sm:$0xff]  }
 0x152   : > { %10555 = vst [vmem:[#allocation38_spill] sm:$0xff] %v7259_v10  ;;  %10556 = vst [vmem:[#allocation39_spill] sm:$0xff] %v7261_v11  ;;  %v7267_v12 = vld [vmem:[#allocation12 + $0x164] ss:$16 sps:$4 sm:$0xff]   ;;  %v7269_v13 = vld [vmem:[#allocation12 + $0x16c] ss:$16 sps:$4 sm:$0xff]  }
 0x153   : > { %902 = vmatpush1.bf16.msra.mxu1 %v5308_v20  ;;  %10557 = vst [vmem:[#allocation40_spill] sm:$0xff] %v7267_v12  ;;  %10558 = vst [vmem:[#allocation41_spill] sm:$0xff] %v7269_v13  ;;  %v7271_v14 = vld [vmem:[#allocation12 + $0x160] ss:$16 sps:$4 sm:$0xff]   ;;  %v7273_v15 = vld [vmem:[#allocation12 + $0x168] ss:$16 sps:$4 sm:$0xff]  }
 0x154   : > { %903 = vmatprep.subr.bf16.mxu1 %v5309_v22  ;;  %1325 = vmatpush1.bf16.msra.mxu0 %v7199_v53  ;;  %10559 = vst [vmem:[#allocation42_spill] sm:$0xff] %v7271_v14  ;;  %10560 = vst [vmem:[#allocation43_spill] sm:$0xff] %v7273_v15  ;;  %v7279_v16 = vld [vmem:[#allocation12 + $0x184] ss:$16 sps:$4 sm:$0xff]   ;;  %v7281_v17 = vld [vmem:[#allocation12 + $0x18c] ss:$16 sps:$4 sm:$0xff]  }
 0x155   : > { %1326 = vmatprep.subr.bf16.mxu0 %v7207_v55  ;;  %10561 = vst [vmem:[#allocation44_spill] sm:$0xff] %v7279_v16  ;;  %10562 = vst [vmem:[#allocation45_spill] sm:$0xff] %v7281_v17  ;;  %v7283_v18 = vld [vmem:[#allocation12 + $0x180] ss:$16 sps:$4 sm:$0xff]   ;;  %v7285_v19 = vld [vmem:[#allocation12 + $0x188] ss:$16 sps:$4 sm:$0xff]  }
 0x156   : > { %10563 = vst [vmem:[#allocation46_spill] sm:$0xff] %v7283_v18  ;;  %10564 = vst [vmem:[#allocation47_spill] sm:$0xff] %v7285_v19  ;;  %v7287_v20 = vld [vmem:[#allocation12 + $0x1a4] ss:$16 sps:$4 sm:$0xff]   ;;  %v7291_v21 = vld [vmem:[#allocation12 + $0x1ac] ss:$16 sps:$4 sm:$0xff]  }
 0x157   : > { %904 = vmatpush1.bf16.msra.mxu1 %v5311_v23  ;;  %10565 = vst [vmem:[#allocation48_spill] sm:$0xff] %v7287_v20  ;;  %10566 = vst [vmem:[#allocation49_spill] sm:$0xff] %v7291_v21  ;;  %v7295_v22 = vld [vmem:[#allocation12 + $0x1a0] ss:$16 sps:$4 sm:$0xff]   ;;  %v7297_v23 = vld [vmem:[#allocation12 + $0x1a8] ss:$16 sps:$4 sm:$0xff]  }
 0x158   : > { %4942 = vmatprep.subr.bf16.mxu1 %v10103_v27  ;;  %1327 = vmatpush1.bf16.msra.mxu0 %v7211_v57  ;;  %10567 = vst [vmem:[#allocation50_spill] sm:$0xff] %v7295_v22  ;;  %10568 = vst [vmem:[#allocation51_spill] sm:$0xff] %v7297_v23  ;;  %v7303_v5 = vld [vmem:[#allocation12 + $0x1cc] ss:$16 sps:$4 sm:$0xff]   ;;  %s2168_s1 = sadd.s32 1, %s7570_s24  ;;  %s2498_s26 = sadd.s32 2, %s7570_s24 }
 0x159   : > { %1328 = vmatprep.subr.bf16.mxu0 %v7219_v59  ;;  %10570 = vst [vmem:[#allocation53_spill] sm:$0xff] %v7303_v5  ;;  %p2169_p6 = scmp.lt.s32.totalorder %s2168_s1, 12  ;;  %p8323_p4 = scmp.lt.s32.totalorder %s2498_s26, 12 }
 0x15a   : > { %922 = vmatmul.mubr.bf16.vlgmr.msra.gmra.mrb[0].mxu1 %v760_v26  ;;  %p4849_p10 = scmp.ne.s32.totalorder %s6780_s23, 1 }
 0x15b   : > { %4943 = vmatpush3.bf16.msra.mxu1 %v7111_v25  ;;  %4958 = vmatprep.mubr.msk.bf16.mxu1 %vm6694_vm0, %v10103_v27  ;;  %s2170_s2 = scalar_select %p2169_p6, 1, 0 }
 0x15c   : > { %4944 = vmatprep.subr.bf16.mxu1 %v10103_v27  ;;  %1329 = vmatpush1.bf16.msra.mxu0 %v7223_v61  ;;  %s2500_s21 = scalar_select %p8323_p4, 1, 0 }
 0x15d   : > { %1330 = vmatprep.subr.bf16.mxu0 %v7227_v63  ;;  %s2171_s12 = scvt.s32.f32 %s2170_s2 }
 0x15e   : > { %s2501_s27 = scvt.s32.f32 %s2500_s21 }
 0x15f   : > { %4945 = vmatpush3.bf16.msra.mxu1 %v7116_v28  ;;  %s2174_s11 = ssub.f32 1.0, %s2171_s12 }
 0x160   : > { %4946 = vmatprep.subr.bf16.mxu1 %v10103_v27  ;;  %1331 = vmatpush1.bf16.msra.mxu0 %v7235_v1 }
 0x161   : > { %1332 = vmatprep.subr.bf16.mxu0 %v7241_v3 }
 0x163   : > { %4947 = vmatpush3.bf16.msra.mxu1 %v7122_v29 }
 0x164   : > { %4948 = vmatprep.subr.bf16.mxu1 %v10103_v27  ;;  %1333 = vmatpush1.bf16.msra.mxu0 %v7247_v6 }
 0x165   : > { %1334 = vmatprep.subr.bf16.mxu0 %v7255_v8 }
 0x167   : > { %4949 = vmatpush3.bf16.msra.mxu1 %v7126_v30 }
 0x168   : > { %4950 = vmatprep.subr.bf16.mxu1 %v10103_v27  ;;  %1335 = vmatpush1.bf16.msra.mxu0 %v7259_v10 }
 0x169   : > { %1336 = vmatprep.subr.bf16.mxu0 %v7267_v12 }
 0x16b   : > { %4951 = vmatpush3.bf16.msra.mxu1 %v7130_v31 }
 0x16c   : > { %4952 = vmatprep.subr.bf16.mxu1 %v10103_v27  ;;  %1337 = vmatpush1.bf16.msra.mxu0 %v7271_v14 }
 0x16d   : > { %1338 = vmatprep.subr.bf16.mxu0 %v7279_v16 }
 0x16f   : > { %4953 = vmatpush3.bf16.msra.mxu1 %v7134_v32 }
 0x170   : > { %4954 = vmatprep.subr.bf16.mxu1 %v10103_v27  ;;  %1339 = vmatpush1.bf16.msra.mxu0 %v7283_v18  ;;  %v7313_v18 = vld [vmem:[#allocation12 + $0x1c8] ss:$16 sps:$4 sm:$0xff]  }
 0x171   : > { %1340 = vmatprep.subr.bf16.mxu0 %v7287_v20  ;;  %10572 = vst [vmem:[#allocation55_spill] sm:$0xff] %v7313_v18  ;;  %v7319_v20 = vld [vmem:[#allocation12 + $0x1ec] ss:$16 sps:$4 sm:$0xff]  }
 0x172   : > { %10574 = vst [vmem:[#allocation57_spill] sm:$0xff] %v7319_v20 }
 0x173   : > { %4955 = vmatpush3.bf16.msra.mxu1 %v7138_v33 }
 0x174   : > { %4956 = vmatprep.subr.bf16.mxu1 %v10103_v27  ;;  %v7305_v27 = vld [vmem:[#allocation2 + $0x8] sm:$0xff]  ;;  %1341 = vmatpush1.bf16.msra.mxu0 %v7295_v22 }
 0x175   : > { %v7325_v22 = vld [vmem:[#allocation12 + $0x1e8] ss:$16 sps:$4 sm:$0xff]  }
 0x176   : > { %10576 = vst [vmem:[#allocation59_spill] sm:$0xff] %v7325_v22 }
 0x177   : > { %4957 = vmatpush3.bf16.msra.mxu1 %v7142_v34 }
 0x178   : > { %1355 = vmatprep.subr.bf16.mxu1 %v7144_v35 }
 0x17a   : > { %4959 = vmatmul.mubr.bf16.vlgmr.msra.gmra.mrb[4].mxu1 %v760_v26  ;;  %v7301_v26 = vld [vmem:[#allocation12 + $0x1c4] ss:$16 sps:$4 sm:$0xff]  }
 0x17b   : > { %1356 = vmatpush1.bf16.msra.mxu1 %v7148_v36  ;;  %10569 = vst [vmem:[#allocation52_spill] sm:$0xff] %v7301_v26  ;;  %1342 = vmatprep.subr.bf16.mxu0 %v7301_v26 }
 0x17c   : > { %1357 = vmatprep.subr.bf16.mxu1 %v7150_v37 }
 0x17f   : > { %1358 = vmatpush1.bf16.msra.mxu1 %v7154_v38 }
 0x180   : > { %1359 = vmatprep.subr.bf16.mxu1 %v7161_v40 }
 0x183   : > { %1360 = vmatpush1.bf16.msra.mxu1 %v7165_v42 }
 0x184   : > { %1361 = vmatprep.subr.bf16.mxu1 %v7173_v44 }
 0x187   : > { %1362 = vmatpush1.bf16.msra.mxu1 %v7177_v46 }
 0x188   : > { %1363 = vmatprep.subr.bf16.mxu1 %v7185_v48 }
 0x18b   : > { %1364 = vmatpush1.bf16.msra.mxu1 %v7189_v50 }
 0x18c   : > { %1365 = vmatprep.subr.bf16.mxu1 %v7197_v52 }
 0x18f   : > { %1366 = vmatpush1.bf16.msra.mxu1 %v7201_v54 }
 0x190   : > { %1367 = vmatprep.subr.bf16.mxu1 %v7209_v56 }
 0x193   : > { %1368 = vmatpush1.bf16.msra.mxu1 %v7213_v58 }
 0x194   : > { %1369 = vmatprep.subr.bf16.mxu1 %v7221_v60 }
 0x197   : > { %1370 = vmatpush1.bf16.msra.mxu1 %v7225_v62 }
 0x198   : > { %1371 = vmatprep.subr.bf16.mxu1 %v7231_v0 }
 0x19b   : > { %1372 = vmatpush1.bf16.msra.mxu1 %v7237_v2 }
 0x19c   : > { %1373 = vmatprep.subr.bf16.mxu1 %v7243_v4 }
 0x19f   : > { %1374 = vmatpush1.bf16.msra.mxu1 %v7249_v7 }
 0x1a0   : > { %1375 = vmatprep.subr.bf16.mxu1 %v7257_v9 }
 0x1a3   : > { %1376 = vmatpush1.bf16.msra.mxu1 %v7261_v11 }
 0x1a4   : > { %1377 = vmatprep.subr.bf16.mxu1 %v7269_v13 }
 0x1a7   : > { %1378 = vmatpush1.bf16.msra.mxu1 %v7273_v15 }
 0x1a8   : > { %1379 = vmatprep.subr.bf16.mxu1 %v7281_v17  ;;  %v993_v17 = vpack.c.bf16 %v7305_v27, %v7305_v27 }
 0x1aa   : > { %1346 = vmatprep.mubr.bf16.mxu0 %v993_v17  ;;  %1387 = vmatprep.mubr.bf16.mxu1 %v993_v17  ;;  %v7333_v17 = vld [vmem:[#allocation15 + $0xc] ss:$16 sps:$4 sm:$0xff]  }
 0x1ab   : > { %1380 = vmatpush1.bf16.msra.mxu1 %v7285_v19  ;;  %v7311_v19 = vld [vmem:[#allocation12 + $0x1c0] ss:$16 sps:$4 sm:$0xff]   ;;  %10578 = vst [vmem:[#allocation61_spill] sm:$0xff] %v7333_v17 }
 0x1ac   : > { %1381 = vmatprep.subr.bf16.mxu1 %v7291_v21  ;;  %10571 = vst [vmem:[#allocation54_spill] sm:$0xff] %v7311_v19  ;;  %v7317_v21 = vld [vmem:[#allocation12 + $0x1e4] ss:$16 sps:$4 sm:$0xff]   ;;  %1343 = vmatpush1.bf16.msra.mxu0 %v7311_v19 }
 0x1ad   : > { %10573 = vst [vmem:[#allocation56_spill] sm:$0xff] %v7317_v21  ;;  %1344 = vmatprep.subr.bf16.mxu0 %v7317_v21 }
 0x1af   : > { %1382 = vmatpush1.bf16.msra.mxu1 %v7297_v23  ;;  %v7323_v23 = vld [vmem:[#allocation12 + $0x1e0] ss:$16 sps:$4 sm:$0xff]  }
 0x1b0   : > { %1383 = vmatprep.subr.bf16.mxu1 %v7303_v5  ;;  %10575 = vst [vmem:[#allocation58_spill] sm:$0xff] %v7323_v23  ;;  %1345 = vmatpush1.bf16.msra.mxu0 %v7323_v23  ;;  %v7331_v5 = vld [vmem:[#allocation15 + $0x4] ss:$16 sps:$4 sm:$0xff]   ;;  %v758_v23 = vld [vmem:[%s7077_s29 + $0x8] sm:$0xff] }
 0x1b1   : > { %10577 = vst [vmem:[#allocation60_spill] sm:$0xff] %v7331_v5  ;;  %1737 = vmatprep.subr.bf16.mxu0 %v7331_v5  ;;  %v7339_v5 = vld [vmem:[#allocation10] ss:$0 sm:$0xff] }
 0x1b2   : > { %10579 = vst [vmem:[#allocation62_spill] sm:$0xff] %v7339_v5 }
 0x1b3   : > { %1384 = vmatpush1.bf16.msra.mxu1 %v7313_v18  ;;  %v757_v18 = vld [vmem:[%s7077_s29] sm:$0xff] }
 0x1b4   : > { %1385 = vmatprep.subr.bf16.mxu1 %v7319_v20 }
 0x1b7   : > { %1386 = vmatpush1.bf16.msra.mxu1 %v7325_v22 }
 0x1b8   : > { %1778 = vmatprep.subr.bf16.mxu1 %v7333_v17 }
 0x22d   : > { %v923_v19 = vpop.f32.mrb[0].mxu1 }
 0x22e   : > { %v970_v26 = vadd.f32 %v923_v19, %v757_v18  ;;  %v925_v16 = vpop.f32.mrb[1].mxu1 }
 0x22f   : > { %v927_v21 = vpop.f32.mrb[2].mxu1  ;;  %v977_v20 = vadd.f32 %v925_v16, %v758_v23 }
 0x230   : > { %v4663_v15 = vmul.f32 -1.442695, %v970_v26  ;;  %v928_v14 = vpop.f32.mrb[3].mxu1  ;;  %v759_v26 = vld [vmem:[%s7077_s29 + $0x10] sm:$0xff] }
 0x231   : > { %v4664_v22 = vmul.f32 -1.442695, %v977_v20 }
 0x232   : > { %5520 = vpow2.f32 %v4663_v15 }
 0x233   : > { %5522 = vpow2.f32 %v4664_v22 }
 0x23c   : > { %v5521_v13 = vpop.eup %5520 }
 0x23d   : > { %v974_v12 = vadd.f32 1.0, %v5521_v13  ;;  %v5523_v11 = vpop.eup %5522 }
 0x23e   : > { %v981_v17 = vadd.f32 1.0, %v5523_v11  ;;  %v7346_v11 = vld [vmem:[#allocation15] ss:$16 sps:$4 sm:$0xff]  }
 0x23f   : > { %5524 = vrcp.f32 %v974_v12  ;;  %10580 = vst [vmem:[#allocation63_spill] sm:$0xff] %v7346_v11 }
 0x240   : > { %5526 = vrcp.f32 %v981_v17  ;;  %v7352_v17 = vld [vmem:[#allocation15 + $0x24] ss:$16 sps:$4 sm:$0xff]  }
 0x241   : > { %10582 = vst [vmem:[#allocation65_spill] sm:$0xff] %v7352_v17 }
 0x249   : > { %v5525_v21 = vpop.eup %5524 }
 0x24a   : > { %v5527_v20 = vpop.eup %5526 }
 0x24b   : > { %v988_v22 = vsub.f32 1.0, %v5527_v20  ;;  %v990_v23 = vmul.f32 %v5527_v20, %v7109_v24  ;;  %v7358_v24 = vld [vmem:[#allocation15 + $0x20] ss:$16 sps:$4 sm:$0xff]   ;;  %v7378_v20 = vld [vmem:[#allocation15 + $0x6c] ss:$16 sps:$4 sm:$0xff]  }
 0x24c   : > { %10584 = vst [vmem:[#allocation67_spill] sm:$0xff] %v7358_v24  ;;  %10591 = vst [vmem:[#allocation74_spill] sm:$0xff] %v7378_v20 }
 0x24d   : > { %v964_v10 = vpop.f32.mrb[4].mxu1 }
 0x24e   : > { %v984_v18 = vadd.f32 %v7339_v5, %v964_v10  ;;  %v4960_v19 = vpop.f32.mrb[5].mxu1  ;;  %v7348_v10 = vld [vmem:[#allocation15 + $0x8] ss:$16 sps:$4 sm:$0xff]  }
 0x24f   : > { %v967_v14 = vpop.f32.mrb[6].mxu1  ;;  %10581 = vst [vmem:[#allocation64_spill] sm:$0xff] %v7348_v10 }
 0x250   : > { %v985_v15 = vmul.f32 %v5525_v21, %v984_v18  ;;  %v4961_v9 = vpop.f32.mrb[7].mxu1  ;;  %v7360_v18 = vld [vmem:[#allocation15 + $0x28] ss:$16 sps:$4 sm:$0xff]   ;;  %v7364_v21 = vld [vmem:[#allocation15 + $0x44] ss:$16 sps:$4 sm:$0xff]  }
 0x251   : > { %v7354_v9 = vld [vmem:[#allocation15 + $0x2c] ss:$16 sps:$4 sm:$0xff]   ;;  %10585 = vst [vmem:[#allocation68_spill] sm:$0xff] %v7360_v18  ;;  %10586 = vst [vmem:[#allocation69_spill] sm:$0xff] %v7364_v21  ;;  %v7370_v14 = vld [vmem:[#allocation15 + $0x40] ss:$16 sps:$4 sm:$0xff]  }
 0x252   : > { %v986_v16 = vadd.f32 %v985_v15, %v759_v26  ;;  %10583 = vst [vmem:[#allocation66_spill] sm:$0xff] %v7354_v9  ;;  %v7366_v26 = vld [vmem:[#allocation15 + $0x4c] ss:$16 sps:$4 sm:$0xff]   ;;  %10588 = vst [vmem:[#allocation71_spill] sm:$0xff] %v7370_v14  ;;  %v7372_v15 = vld [vmem:[#allocation15 + $0x48] ss:$16 sps:$4 sm:$0xff]  }
 0x253   : > { %10587 = vst [vmem:[#allocation70_spill] sm:$0xff] %v7366_v26  ;;  %10589 = vst [vmem:[#allocation72_spill] sm:$0xff] %v7372_v15 }
 0x254   : > { %5528 = vtanh.f32 %v986_v16  ;;  %v7376_v16 = vld [vmem:[#allocation15 + $0x64] ss:$16 sps:$4 sm:$0xff]  }
 0x255   : > { %10590 = vst [vmem:[#allocation73_spill] sm:$0xff] %v7376_v16 }
 0x25e   : > { %v5529_v13 = vpop.eup %5528 }
 0x25f   : > { %v989_v12 = vmul.f32 %v5529_v13, %v988_v22  ;;  %v7382_v22 = vld [vmem:[#allocation15 + $0x60] ss:$16 sps:$4 sm:$0xff]   ;;  %v7384_v13 = vld [vmem:[#allocation15 + $0x68] ss:$16 sps:$4 sm:$0xff]  }
 0x260   : > { %10592 = vst [vmem:[#allocation75_spill] sm:$0xff] %v7382_v22  ;;  %10593 = vst [vmem:[#allocation76_spill] sm:$0xff] %v7384_v13 }
 0x261   : > { %v7344_v8 = vadd.f32 %v990_v23, %v989_v12  ;;  %v7390_v12 = vld [vmem:[#allocation15 + $0x84] ss:$16 sps:$4 sm:$0xff]   ;;  %v7392_v23 = vld [vmem:[#allocation15 + $0x8c] ss:$16 sps:$4 sm:$0xff]  }
 0x262   : > { %10594 = vst [vmem:[#allocation77_spill] sm:$0xff] %v7390_v12  ;;  %10595 = vst [vmem:[#allocation78_spill] sm:$0xff] %v7392_v23 }
 0x263   : > { %v992_v19 = vpack.c.bf16 %v7344_v8, %v7344_v8 }
 0x265   : > { %1347 = vmatmul.mubr.bf16.vlgmr.msra.gmra.mrb[0].mxu0 %v992_v19  ;;  %1388 = vmatmul.mubr.bf16.vlgmr.msra.gmra.mrb[8].mxu1 %v992_v19  ;;  %v7394_v19 = vld [vmem:[#allocation15 + $0x80] ss:$16 sps:$4 sm:$0xff]  }
 0x266   : > { %1738 = vmatpush1.bf16.msra.mxu0 %v7346_v11  ;;  %1779 = vmatpush1.bf16.msra.mxu1 %v7348_v10  ;;  %10596 = vst [vmem:[#allocation79_spill] sm:$0xff] %v7394_v19 }
 0x267   : > { %1739 = vmatprep.subr.bf16.mxu0 %v7352_v17  ;;  %1780 = vmatprep.subr.bf16.mxu1 %v7354_v9 }
 0x26a   : > { %1740 = vmatpush1.bf16.msra.mxu0 %v7358_v24  ;;  %1781 = vmatpush1.bf16.msra.mxu1 %v7360_v18 }
 0x26b   : > { %1741 = vmatprep.subr.bf16.mxu0 %v7364_v21  ;;  %1782 = vmatprep.subr.bf16.mxu1 %v7366_v26  ;;  %v644_v21 = vld [vmem:[#allocation13] sm:$0xf] }
 0x26e   : > { %1742 = vmatpush1.bf16.msra.mxu0 %v7370_v14  ;;  %1783 = vmatpush1.bf16.msra.mxu1 %v7372_v15  ;;  %v7396_v14 = vld [vmem:[#allocation15 + $0x88] ss:$16 sps:$4 sm:$0xff]   ;;  %v7496_v15 = vld [vmem:[#allocation15 + $0x1a4] ss:$16 sps:$4 sm:$0xff]  }
 0x26f   : > { %1743 = vmatprep.subr.bf16.mxu0 %v7376_v16  ;;  %1784 = vmatprep.subr.bf16.mxu1 %v7378_v20  ;;  %10597 = vst [vmem:[#allocation80_spill] sm:$0xff] %v7396_v14  ;;  %v7402_v20 = vld [vmem:[#allocation15 + $0xa4] ss:$16 sps:$4 sm:$0xff]   ;;  %v7408_v16 = vld [vmem:[#allocation15 + $0xa8] ss:$16 sps:$4 sm:$0xff]   ;;  %10630 = vst [vmem:[#allocation113_spill] sm:$0xff] %v7496_v15 }
 0x270   : > { %10598 = vst [vmem:[#allocation81_spill] sm:$0xff] %v7402_v20  ;;  %10601 = vst [vmem:[#allocation84_spill] sm:$0xff] %v7408_v16 }
 0x272   : > { %1744 = vmatpush1.bf16.msra.mxu0 %v7382_v22  ;;  %1785 = vmatpush1.bf16.msra.mxu1 %v7384_v13  ;;  %v7404_v22 = vld [vmem:[#allocation15 + $0xac] ss:$16 sps:$4 sm:$0xff]   ;;  %v7406_v13 = vld [vmem:[#allocation15 + $0xa0] ss:$16 sps:$4 sm:$0xff]  }
 0x273   : > { %1745 = vmatprep.subr.bf16.mxu0 %v7390_v12  ;;  %1786 = vmatprep.subr.bf16.mxu1 %v7392_v23  ;;  %10599 = vst [vmem:[#allocation82_spill] sm:$0xff] %v7404_v22  ;;  %10600 = vst [vmem:[#allocation83_spill] sm:$0xff] %v7406_v13  ;;  %v7414_v23 = vld [vmem:[#allocation15 + $0xc4] ss:$16 sps:$4 sm:$0xff]   ;;  %v7420_v12 = vld [vmem:[#allocation15 + $0xc8] ss:$16 sps:$4 sm:$0xff]  }
 0x274   : > { %10602 = vst [vmem:[#allocation85_spill] sm:$0xff] %v7414_v23  ;;  %10605 = vst [vmem:[#allocation88_spill] sm:$0xff] %v7420_v12 }
 0x276   : > { %1746 = vmatpush1.bf16.msra.mxu0 %v7394_v19  ;;  %1787 = vmatpush1.bf16.msra.mxu1 %v7396_v14  ;;  %v7416_v19 = vld [vmem:[#allocation15 + $0xcc] ss:$16 sps:$4 sm:$0xff]   ;;  %v7418_v14 = vld [vmem:[#allocation15 + $0xc0] ss:$16 sps:$4 sm:$0xff]  }
 0x277   : > { %1747 = vmatprep.subr.bf16.mxu0 %v7402_v20  ;;  %1788 = vmatprep.subr.bf16.mxu1 %v7404_v22  ;;  %10603 = vst [vmem:[#allocation86_spill] sm:$0xff] %v7416_v19  ;;  %10604 = vst [vmem:[#allocation87_spill] sm:$0xff] %v7418_v14  ;;  %v7426_v22 = vld [vmem:[#allocation15 + $0xe4] ss:$16 sps:$4 sm:$0xff]   ;;  %v7432_v20 = vld [vmem:[#allocation15 + $0xe8] ss:$16 sps:$4 sm:$0xff]  }
 0x278   : > { %10606 = vst [vmem:[#allocation89_spill] sm:$0xff] %v7426_v22  ;;  %10609 = vst [vmem:[#allocation92_spill] sm:$0xff] %v7432_v20 }
 0x27a   : > { %1748 = vmatpush1.bf16.msra.mxu0 %v7406_v13  ;;  %1789 = vmatpush1.bf16.msra.mxu1 %v7408_v16  ;;  %v7428_v13 = vld [vmem:[#allocation15 + $0xec] ss:$16 sps:$4 sm:$0xff]   ;;  %v7430_v16 = vld [vmem:[#allocation15 + $0xe0] ss:$16 sps:$4 sm:$0xff]  }
 0x27b   : > { %1749 = vmatprep.subr.bf16.mxu0 %v7414_v23  ;;  %1790 = vmatprep.subr.bf16.mxu1 %v7416_v19  ;;  %10607 = vst [vmem:[#allocation90_spill] sm:$0xff] %v7428_v13  ;;  %10608 = vst [vmem:[#allocation91_spill] sm:$0xff] %v7430_v16  ;;  %v7438_v19 = vld [vmem:[#allocation15 + $0x104] ss:$16 sps:$4 sm:$0xff]   ;;  %v7444_v23 = vld [vmem:[#allocation15 + $0x108] ss:$16 sps:$4 sm:$0xff]  }
 0x27c   : > { %10610 = vst [vmem:[#allocation93_spill] sm:$0xff] %v7438_v19  ;;  %10613 = vst [vmem:[#allocation96_spill] sm:$0xff] %v7444_v23 }
 0x27e   : > { %1750 = vmatpush1.bf16.msra.mxu0 %v7418_v14  ;;  %1791 = vmatpush1.bf16.msra.mxu1 %v7420_v12  ;;  %v7440_v14 = vld [vmem:[#allocation15 + $0x10c] ss:$16 sps:$4 sm:$0xff]   ;;  %v7442_v12 = vld [vmem:[#allocation15 + $0x100] ss:$16 sps:$4 sm:$0xff]  }
 0x27f   : > { %1751 = vmatprep.subr.bf16.mxu0 %v7426_v22  ;;  %1792 = vmatprep.subr.bf16.mxu1 %v7428_v13  ;;  %10611 = vst [vmem:[#allocation94_spill] sm:$0xff] %v7440_v14  ;;  %10612 = vst [vmem:[#allocation95_spill] sm:$0xff] %v7442_v12  ;;  %v7450_v13 = vld [vmem:[#allocation15 + $0x124] ss:$16 sps:$4 sm:$0xff]   ;;  %v7456_v22 = vld [vmem:[#allocation15 + $0x128] ss:$16 sps:$4 sm:$0xff]  }
 0x280   : > { %10614 = vst [vmem:[#allocation97_spill] sm:$0xff] %v7450_v13  ;;  %10617 = vst [vmem:[#allocation100_spill] sm:$0xff] %v7456_v22 }
 0x282   : > { %1752 = vmatpush1.bf16.msra.mxu0 %v7430_v16  ;;  %1793 = vmatpush1.bf16.msra.mxu1 %v7432_v20  ;;  %v7452_v16 = vld [vmem:[#allocation15 + $0x12c] ss:$16 sps:$4 sm:$0xff]   ;;  %v7454_v20 = vld [vmem:[#allocation15 + $0x120] ss:$16 sps:$4 sm:$0xff]  }
 0x283   : > { %1753 = vmatprep.subr.bf16.mxu0 %v7438_v19  ;;  %1794 = vmatprep.subr.bf16.mxu1 %v7440_v14  ;;  %10615 = vst [vmem:[#allocation98_spill] sm:$0xff] %v7452_v16  ;;  %10616 = vst [vmem:[#allocation99_spill] sm:$0xff] %v7454_v20  ;;  %v7462_v14 = vld [vmem:[#allocation15 + $0x144] ss:$16 sps:$4 sm:$0xff]   ;;  %v7468_v19 = vld [vmem:[#allocation15 + $0x148] ss:$16 sps:$4 sm:$0xff]  }
 0x284   : > { %10618 = vst [vmem:[#allocation101_spill] sm:$0xff] %v7462_v14  ;;  %10621 = vst [vmem:[#allocation104_spill] sm:$0xff] %v7468_v19 }
 0x286   : > { %1754 = vmatpush1.bf16.msra.mxu0 %v7442_v12  ;;  %1795 = vmatpush1.bf16.msra.mxu1 %v7444_v23  ;;  %v7464_v12 = vld [vmem:[#allocation15 + $0x14c] ss:$16 sps:$4 sm:$0xff]   ;;  %v7466_v23 = vld [vmem:[#allocation15 + $0x140] ss:$16 sps:$4 sm:$0xff]  }
 0x287   : > { %1755 = vmatprep.subr.bf16.mxu0 %v7450_v13  ;;  %1796 = vmatprep.subr.bf16.mxu1 %v7452_v16  ;;  %10619 = vst [vmem:[#allocation102_spill] sm:$0xff] %v7464_v12  ;;  %10620 = vst [vmem:[#allocation103_spill] sm:$0xff] %v7466_v23  ;;  %v7474_v16 = vld [vmem:[#allocation15 + $0x164] ss:$16 sps:$4 sm:$0xff]   ;;  %v7480_v13 = vld [vmem:[#allocation15 + $0x168] ss:$16 sps:$4 sm:$0xff]  }
 0x288   : > { %10622 = vst [vmem:[#allocation105_spill] sm:$0xff] %v7474_v16  ;;  %10625 = vst [vmem:[#allocation108_spill] sm:$0xff] %v7480_v13 }
 0x28a   : > { %1756 = vmatpush1.bf16.msra.mxu0 %v7454_v20  ;;  %1797 = vmatpush1.bf16.msra.mxu1 %v7456_v22  ;;  %v7476_v20 = vld [vmem:[#allocation15 + $0x16c] ss:$16 sps:$4 sm:$0xff]   ;;  %v7478_v22 = vld [vmem:[#allocation15 + $0x160] ss:$16 sps:$4 sm:$0xff]  }
 0x28b   : > { %1757 = vmatprep.subr.bf16.mxu0 %v7462_v14  ;;  %1798 = vmatprep.subr.bf16.mxu1 %v7464_v12  ;;  %10623 = vst [vmem:[#allocation106_spill] sm:$0xff] %v7476_v20  ;;  %10624 = vst [vmem:[#allocation107_spill] sm:$0xff] %v7478_v22  ;;  %v7486_v12 = vld [vmem:[#allocation15 + $0x184] ss:$16 sps:$4 sm:$0xff]   ;;  %v7492_v14 = vld [vmem:[#allocation15 + $0x188] ss:$16 sps:$4 sm:$0xff]  }
 0x28c   : > { %10626 = vst [vmem:[#allocation109_spill] sm:$0xff] %v7486_v12  ;;  %10629 = vst [vmem:[#allocation112_spill] sm:$0xff] %v7492_v14 }
 0x28e   : > { %1758 = vmatpush1.bf16.msra.mxu0 %v7466_v23  ;;  %1799 = vmatpush1.bf16.msra.mxu1 %v7468_v19  ;;  %v7488_v23 = vld [vmem:[#allocation15 + $0x18c] ss:$16 sps:$4 sm:$0xff]   ;;  %v7490_v19 = vld [vmem:[#allocation15 + $0x180] ss:$16 sps:$4 sm:$0xff]  }
 0x28f   : > { %1759 = vmatprep.subr.bf16.mxu0 %v7474_v16  ;;  %1800 = vmatprep.subr.bf16.mxu1 %v7476_v20  ;;  %10627 = vst [vmem:[#allocation110_spill] sm:$0xff] %v7488_v23  ;;  %10628 = vst [vmem:[#allocation111_spill] sm:$0xff] %v7490_v19  ;;  %v7498_v16 = vld [vmem:[#allocation15 + $0x1ac] ss:$16 sps:$4 sm:$0xff]   ;;  %v7508_v20 = vld [vmem:[#allocation15 + $0x1c4] ss:$16 sps:$4 sm:$0xff]  }
 0x290   : > { %10631 = vst [vmem:[#allocation114_spill] sm:$0xff] %v7498_v16  ;;  %10634 = vst [vmem:[#allocation117_spill] sm:$0xff] %v7508_v20 }
 0x292   : > { %1760 = vmatpush1.bf16.msra.mxu0 %v7478_v22  ;;  %1801 = vmatpush1.bf16.msra.mxu1 %v7480_v13  ;;  %v7502_v13 = vld [vmem:[#allocation15 + $0x1a0] ss:$16 sps:$4 sm:$0xff]   ;;  %v7504_v22 = vld [vmem:[#allocation15 + $0x1a8] ss:$16 sps:$4 sm:$0xff]  }
 0x293   : > { %1761 = vmatprep.subr.bf16.mxu0 %v7486_v12  ;;  %1802 = vmatprep.subr.bf16.mxu1 %v7488_v23  ;;  %10632 = vst [vmem:[#allocation115_spill] sm:$0xff] %v7502_v13  ;;  %10633 = vst [vmem:[#allocation116_spill] sm:$0xff] %v7504_v22  ;;  %v7510_v12 = vld [vmem:[#allocation15 + $0x1cc] ss:$16 sps:$4 sm:$0xff]  }
 0x294   : > { %10635 = vst [vmem:[#allocation118_spill] sm:$0xff] %v7510_v12  ;;  %v7512_v23 = vld [vmem:[#allocation2 + $0x10] sm:$0xff] }
 0x295   : > { %10636 = vst [vmem:[#allocation119_spill] sm:$0xff] %v7512_v23  ;;  %v1416_v26 = vpack.c.bf16 %v7512_v23, %v7512_v23 }
 0x296   : > { %1762 = vmatpush1.bf16.msra.mxu0 %v7490_v19  ;;  %1803 = vmatpush1.bf16.msra.mxu1 %v7492_v14  ;;  %v7516_v19 = vld [vmem:[#allocation15 + $0x1c0] ss:$16 sps:$4 sm:$0xff]   ;;  %v7518_v14 = vld [vmem:[#allocation15 + $0x1c8] ss:$16 sps:$4 sm:$0xff]  }
 0x297   : > { %1763 = vmatprep.subr.bf16.mxu0 %v7496_v15  ;;  %1804 = vmatprep.subr.bf16.mxu1 %v7498_v16  ;;  %10637 = vst [vmem:[#allocation120_spill] sm:$0xff] %v7516_v19  ;;  %10638 = vst [vmem:[#allocation121_spill] sm:$0xff] %v7518_v14  ;;  %v7524_v16 = vld [vmem:[#allocation15 + $0x1e4] ss:$16 sps:$4 sm:$0xff]   ;;  %v7526_v15 = vld [vmem:[#allocation15 + $0x1ec] ss:$16 sps:$4 sm:$0xff]  }
 0x298   : > { %10639 = vst [vmem:[#allocation122_spill] sm:$0xff] %v7524_v16  ;;  %10640 = vst [vmem:[#allocation123_spill] sm:$0xff] %v7526_v15  ;;  %1769 = vmatprep.mubr.bf16.mxu0 %v1416_v26  ;;  %1810 = vmatprep.mubr.bf16.mxu1 %v1416_v26  ;;  %v10644_v26 = vmov 0.0  }
 0x29a   : > { %1764 = vmatpush1.bf16.msra.mxu0 %v7502_v13  ;;  %1805 = vmatpush1.bf16.msra.mxu1 %v7504_v22  ;;  %v7530_v22 = vld [vmem:[#allocation15 + $0x1e0] ss:$16 sps:$4 sm:$0xff]   ;;  %v7532_v13 = vld [vmem:[#allocation15 + $0x1e8] ss:$16 sps:$4 sm:$0xff]  }
 0x29b   : > { %1765 = vmatprep.subr.bf16.mxu0 %v7508_v20  ;;  %1806 = vmatprep.subr.bf16.mxu1 %v7510_v12  ;;  %10641 = vst [vmem:[#allocation124_spill] sm:$0xff] %v7530_v22  ;;  %10642 = vst [vmem:[#allocation125_spill] sm:$0xff] %v7532_v13  ;;  %v7538_v12 = vld [vmem:[#allocation9 + $0x4] ss:$12 sps:$4 sm:$0xff]  }
 0x29c   : > { %10643 = vst [vmem:[#allocation126_spill] sm:$0xff] %v7538_v12 }
 0x29e   : > { %1766 = vmatpush1.bf16.msra.mxu0 %v7516_v19  ;;  %1807 = vmatpush1.bf16.msra.mxu1 %v7518_v14  ;;  %v646_v19 = vlaneseq }
 0x29f   : > { %1767 = vmatprep.subr.bf16.mxu0 %v7524_v16  ;;  %1808 = vmatprep.subr.bf16.mxu1 %v7526_v15 }
 0x2a0   : > { %v7542_v14 = vshrl.u32 %v646_v19, 7 }
 0x2a2   : > { %1768 = vmatpush1.bf16.msra.mxu0 %v7530_v22  ;;  %1809 = vmatpush1.bf16.msra.mxu1 %v7532_v13  ;;  %v10197_v20 = vsub.s32 0, %v7542_v14  ;;  %v10200_v16 = vsub.s32 1, %v7542_v14  ;;  %v10207_v4 = vsub.s32 2, %v7542_v14 }
 0x2a3   : > { %1859 = vmatprep.subr.bf16.mxu0 %v7538_v12  ;;  %4962 = vmatprep.subr.bf16.mxu1 %v10644_v26 }
 0x2a4   : > { %v7548_v15 = vrot.slane %v644_v21, %v10197_v20  ;;  %v7552_v18 = vrot.slane %v644_v21, %v10200_v16  ;;  %v10202_v16 = vsub.s32 3, %v7542_v14 }
 0x2a6   : > { %10645 = vst [vmem:[#allocation127_spill] sm:$0xff] %v7548_v15  ;;  %10646 = vst [vmem:[#allocation128_spill] sm:$0xff] %v7552_v18 }
 0x338   : > { %v1348_v22 = vpop.f32.mrb[0].mxu0  ;;  %v1389_v13 = vpop.f32.mrb[8].mxu1 }
 0x339   : > { %v1349_v12 = vadd.f32 %v1348_v22, %v7548_v15  ;;  %v1350_v24 = vpop.f32.mrb[1].mxu0  ;;  %v1391_v19 = vpop.f32.mrb[9].mxu1 }
 0x33a   : > { %v1352_v9 = vpop.f32.mrb[2].mxu0  ;;  %v1393_v17 = vpop.f32.mrb[10].mxu1  ;;  %v1351_v23 = vadd.f32 %v1350_v24, %v7552_v18 }
 0x33b   : > { %v4729_v10 = vmul.f32 -1.442695, %v1349_v12  ;;  %v1353_v11 = vpop.f32.mrb[3].mxu0  ;;  %v1394_v5 = vpop.f32.mrb[11].mxu1  ;;  %v7560_v9 = vrot.slane %v644_v21, %v10202_v16 }
 0x33c   : > { %v4730_v20 = vmul.f32 -1.442695, %v1351_v23  ;;  %v7564_v5 = vrot.slane %v644_v21, %v10207_v4  ;;  %v7634_v4 = vld [vmem:[#allocation9 + $0x90] ss:$12 sps:$4 sm:$0xff]  }
 0x33d   : > { %5530 = vpow2.f32 %v4729_v10  ;;  %v1392_v10 = vadd.f32 %v1391_v19, %v7560_v9  ;;  %v7572_v19 = vld [vmem:[#allocation9] ss:$12 sps:$4 sm:$0xff]  }
 0x33e   : > { %5532 = vpow2.f32 %v4730_v20 }
 0x347   : > { %v5531_v7 = vpop.eup %5530 }
 0x348   : > { %v1399_v6 = vadd.f32 1.0, %v5531_v7  ;;  %v5533_v22 = vpop.eup %5532 }
 0x349   : > { %v1405_v11 = vadd.f32 1.0, %v5533_v22  ;;  %v7588_v22 = vld [vmem:[#allocation9 + $0x34] ss:$12 sps:$4 sm:$0xff]  }
 0x34a   : > { %5534 = vrcp.f32 %v1399_v6  ;;  %v1390_v6 = vadd.f32 %v1389_v13, %v7564_v5  ;;  %v7576_v13 = vld [vmem:[#allocation9 + $0x1c] ss:$12 sps:$4 sm:$0xff]  }
 0x34b   : > { %5536 = vrcp.f32 %v1405_v11  ;;  %v7596_v11 = vld [vmem:[#allocation9 + $0x4c] ss:$12 sps:$4 sm:$0xff]  }
 0x354   : > { %v5535_v17 = vpop.eup %5534 }
 0x355   : > { %v1408_v7 = vmul.f32 %v5535_v17, %v1392_v10  ;;  %v5537_v20 = vpop.eup %5536  ;;  %v7604_v10 = vld [vmem:[#allocation9 + $0x64] ss:$12 sps:$4 sm:$0xff]   ;;  %v7612_v17 = vld [vmem:[#allocation9 + $0x7c] ss:$12 sps:$4 sm:$0xff]  }
 0x356   : > { %v1411_v12 = vsub.f32 1.0, %v5537_v20  ;;  %v1413_v18 = vmul.f32 %v5537_v20, %v7305_v27 }
 0x357   : > { %v1409_v24 = vadd.f32 %v1408_v7, %v1390_v6  ;;  %v7618_v6 = vstv %s1841_s22  ;;  %v7620_v7 = vld [vmem:[#allocation9 + $0x78] ss:$12 sps:$4 sm:$0xff]   ;;  %s2504_s22 = ssub.f32 1.0, %s2501_s27 }
 0x359   : > { %5538 = vtanh.f32 %v1409_v24  ;;  %v1843_v24 = vmul.f32 %v7618_v6, %v7344_v8  ;;  %v7640_v8 = vld [vmem:[#allocation9 + $0xac] ss:$12 sps:$4 sm:$0xff]  }
 0x363   : > { %v5539_v23 = vpop.eup %5538 }
 0x364   : > { %v1412_v16 = vmul.f32 %v5539_v23, %v1411_v12  ;;  %v7627_v12 = vld [vmem:[#allocation9 + $0x94] ss:$12 sps:$4 sm:$0xff]  }
 0x365   : > { %10648 = vst [vmem:[#allocation129_spill] sm:$0xff] %v7627_v12 }
 0x366   : > { %v1414_v15 = vadd.f32 %v1413_v18, %v1412_v16  ;;  %v10647_v18 = vmov 0   ;;  %v7584_v16 = vld [vmem:[#allocation9 + $0x18] ss:$12 sps:$4 sm:$0xff]  }
 0x368   : > { %v1415_v21 = vpack.c.bf16 %v1414_v15, %v1414_v15 }
 0x36a   : > { %1770 = vmatmul.mubr.bf16.vlgmr.msra.gmra.mrb[4].mxu0 %v1415_v21  ;;  %1811 = vmatmul.mubr.bf16.vlgmr.msra.gmra.mrb[12].mxu1 %v1415_v21  ;;  %v1848_v21 = vmul.f32 %v7618_v6, %v1414_v15 }
 0x36b   : > { %1860 = vmatpush1.bf16.msra.mxu0 %v7572_v19  ;;  %4963 = vmatpush3.bf16.msra.mxu1 %v7111_v25  ;;  %v7592_v25 = vld [vmem:[#allocation9 + $0x30] ss:$12 sps:$4 sm:$0xff]  }
 0x36c   : > { %1861 = vmatprep.subr.bf16.mxu0 %v7576_v13  ;;  %4964 = vmatprep.subr.bf16.mxu1 %v10644_v26 }
 0x36d   : > { %1891 = vmatprep.mubr.bf16.mxu0 %v10647_v18  ;;  %4978 = vmatprep.mubr.msk.bf16.mxu1 %vm6694_vm0, %v10644_v26 }
 0x36f   : > { %1862 = vmatpush1.bf16.msra.mxu0 %v7584_v16  ;;  %4965 = vmatpush3.bf16.msra.mxu1 %v7116_v28  ;;  %v7600_v28 = vld [vmem:[#allocation9 + $0x48] ss:$12 sps:$4 sm:$0xff]  }
 0x370   : > { %1863 = vmatprep.subr.bf16.mxu0 %v7588_v22  ;;  %4966 = vmatprep.subr.bf16.mxu1 %v10644_v26 }
 0x373   : > { %1864 = vmatpush1.bf16.msra.mxu0 %v7592_v25  ;;  %4967 = vmatpush3.bf16.msra.mxu1 %v7122_v29  ;;  %v7608_v29 = vld [vmem:[#allocation9 + $0x60] ss:$12 sps:$4 sm:$0xff]  }
 0x374   : > { %1865 = vmatprep.subr.bf16.mxu0 %v7596_v11  ;;  %4968 = vmatprep.subr.bf16.mxu1 %v10644_v26 }
 0x377   : > { %1866 = vmatpush1.bf16.msra.mxu0 %v7600_v28  ;;  %4969 = vmatpush3.bf16.msra.mxu1 %v7126_v30  ;;  %v7616_v30 = vstv %s1844_s28  ;;  %s2828_s28 = sadd.s32 3, %s7570_s24 }
 0x378   : > { %1867 = vmatprep.subr.bf16.mxu0 %v7604_v10  ;;  %4970 = vmatprep.subr.bf16.mxu1 %v10644_v26  ;;  %v1849_v23 = vmul.f32 %v7616_v30, %v7305_v27  ;;  %p2829_p7 = scmp.lt.s32.totalorder %s2828_s28, 12 }
 0x37a   : > { %s2830_s1 = scalar_select %p2829_p7, 1, 0 }
 0x37b   : > { %1868 = vmatpush1.bf16.msra.mxu0 %v7608_v29  ;;  %4971 = vmatpush3.bf16.msra.mxu1 %v7130_v31  ;;  %v5804_v31 = vld [vmem:[#allocation2] sm:$0xff] }
 0x37c   : > { %1869 = vmatprep.subr.bf16.mxu0 %v7612_v17  ;;  %4972 = vmatprep.subr.bf16.mxu1 %v10644_v26  ;;  %v1846_v20 = vmul.f32 %v5804_v31, %v7616_v30  ;;  %v7644_v31 = vadd.f32 %v1849_v23, %v1848_v21  ;;  %v10680_v21 = vsub.s32 1, %v7542_v14  ;;  %s2831_s2 = scvt.s32.f32 %s2830_s1 }
 0x37e   : > { %v1963_v15 = vpack.c.bf16 %v7644_v31, %v7644_v31 }
 0x37f   : > { %1870 = vmatpush1.bf16.msra.mxu0 %v7620_v7  ;;  %4973 = vmatpush3.bf16.msra.mxu1 %v7134_v32  ;;  %v7638_v32 = vadd.f32 %v1846_v20, %v1843_v24  ;;  %v7658_v24 = vld [vmem:[#allocation12] ss:$16 sps:$4 sm:$0xff]  }
 0x380   : > { %1871 = vmatprep.subr.bf16.mxu0 %v7627_v12  ;;  %4974 = vmatprep.subr.bf16.mxu1 %v10644_v26  ;;  %v7646_v12 = vld [vmem:[#allocation9 + $0xa8] ss:$12 sps:$4 sm:$0xff]  }
 0x381   : > { %v1858_v27 = vpack.c.bf16 %v7638_v32, %v7638_v32 }
 0x383   : > { %1872 = vmatpush1.bf16.msra.mxu0 %v7634_v4  ;;  %4975 = vmatpush3.bf16.msra.mxu1 %v7138_v33  ;;  %v7652_v33 = vld [vmem:[#allocation12 + $0x4] ss:$16 sps:$4 sm:$0xff]  }
 0x384   : > { %1873 = vmatprep.subr.bf16.mxu0 %v7640_v8  ;;  %4976 = vmatprep.subr.bf16.mxu1 %v10644_v26 }
 0x387   : > { %1874 = vmatpush1.bf16.msra.mxu0 %v7646_v12  ;;  %4977 = vmatpush3.bf16.msra.mxu1 %v7142_v34  ;;  %v7662_v34 = vld [vmem:[#allocation12 + $0x24] ss:$16 sps:$4 sm:$0xff]  }
 0x388   : > { %1964 = vmatprep.subr.bf16.mxu0 %v7652_v33  ;;  %2005 = vmatprep.subr.bf16.mxu1 %v7144_v35  ;;  %v7666_v35 = vld [vmem:[#allocation12 + $0x20] ss:$16 sps:$4 sm:$0xff]  }
 0x38a   : > { %1892 = vmatmul.mubr.bf16.vlgmr.msra.gmra.mrb[8].mxu0 %v1858_v27  ;;  %4979 = vmatmul.mubr.bf16.vlgmr.msra.gmra.mrb[16].mxu1 %v1858_v27 }
 0x38b   : > { %1996 = vmatprep.mubr.bf16.mxu0 %v1963_v15  ;;  %2037 = vmatprep.mubr.bf16.mxu1 %v1963_v15 }
 0x38c   : > { %1965 = vmatpush1.bf16.msra.mxu0 %v7658_v24  ;;  %2006 = vmatpush1.bf16.msra.mxu1 %v7148_v36  ;;  %v10649_v36 = vld [vmem:[#allocation33_spill] sm:$0xff] }
 0x38d   : > { %1966 = vmatprep.subr.bf16.mxu0 %v7662_v34  ;;  %2007 = vmatprep.subr.bf16.mxu1 %v7150_v37  ;;  %v10650_v37 = vld [vmem:[#allocation34_spill] sm:$0xff] }
 0x390   : > { %1967 = vmatpush1.bf16.msra.mxu0 %v7666_v35  ;;  %2008 = vmatpush1.bf16.msra.mxu1 %v7154_v38  ;;  %v10651_v38 = vld [vmem:[#allocation35_spill] sm:$0xff] }
 0x391   : > { %1968 = vmatprep.subr.bf16.mxu0 %v7159_v39  ;;  %2009 = vmatprep.subr.bf16.mxu1 %v7161_v40  ;;  %v10652_v39 = vld [vmem:[#allocation36_spill] sm:$0xff]  ;;  %v10653_v40 = vld [vmem:[#allocation37_spill] sm:$0xff] }
 0x394   : > { %1969 = vmatpush1.bf16.msra.mxu0 %v7163_v41  ;;  %2010 = vmatpush1.bf16.msra.mxu1 %v7165_v42  ;;  %v10654_v41 = vld [vmem:[#allocation38_spill] sm:$0xff]  ;;  %v10655_v42 = vld [vmem:[#allocation39_spill] sm:$0xff] }
 0x395   : > { %1970 = vmatprep.subr.bf16.mxu0 %v7171_v43  ;;  %2011 = vmatprep.subr.bf16.mxu1 %v7173_v44  ;;  %v10656_v43 = vld [vmem:[#allocation40_spill] sm:$0xff]  ;;  %v10657_v44 = vld [vmem:[#allocation41_spill] sm:$0xff] }
 0x398   : > { %1971 = vmatpush1.bf16.msra.mxu0 %v7175_v45  ;;  %2012 = vmatpush1.bf16.msra.mxu1 %v7177_v46  ;;  %v10658_v45 = vld [vmem:[#allocation42_spill] sm:$0xff]  ;;  %v10659_v46 = vld [vmem:[#allocation43_spill] sm:$0xff] }
 0x399   : > { %1972 = vmatprep.subr.bf16.mxu0 %v7183_v47  ;;  %2013 = vmatprep.subr.bf16.mxu1 %v7185_v48  ;;  %v10660_v47 = vld [vmem:[#allocation44_spill] sm:$0xff]  ;;  %v10661_v48 = vld [vmem:[#allocation45_spill] sm:$0xff] }
 0x39c   : > { %1973 = vmatpush1.bf16.msra.mxu0 %v7187_v49  ;;  %2014 = vmatpush1.bf16.msra.mxu1 %v7189_v50  ;;  %v10662_v49 = vld [vmem:[#allocation46_spill] sm:$0xff]  ;;  %v10663_v50 = vld [vmem:[#allocation47_spill] sm:$0xff] }
 0x39d   : > { %1974 = vmatprep.subr.bf16.mxu0 %v7195_v51  ;;  %2015 = vmatprep.subr.bf16.mxu1 %v7197_v52  ;;  %v10664_v51 = vld [vmem:[#allocation48_spill] sm:$0xff]  ;;  %v10665_v52 = vld [vmem:[#allocation49_spill] sm:$0xff] }
 0x3a0   : > { %1975 = vmatpush1.bf16.msra.mxu0 %v7199_v53  ;;  %2016 = vmatpush1.bf16.msra.mxu1 %v7201_v54  ;;  %v10666_v53 = vld [vmem:[#allocation50_spill] sm:$0xff]  ;;  %v10667_v54 = vld [vmem:[#allocation51_spill] sm:$0xff] }
 0x3a1   : > { %1976 = vmatprep.subr.bf16.mxu0 %v7207_v55  ;;  %2017 = vmatprep.subr.bf16.mxu1 %v7209_v56  ;;  %v10668_v55 = vld [vmem:[#allocation52_spill] sm:$0xff]  ;;  %v10669_v56 = vld [vmem:[#allocation53_spill] sm:$0xff] }
 0x3a4   : > { %1977 = vmatpush1.bf16.msra.mxu0 %v7211_v57  ;;  %2018 = vmatpush1.bf16.msra.mxu1 %v7213_v58  ;;  %v10670_v57 = vld [vmem:[#allocation54_spill] sm:$0xff]  ;;  %v10671_v58 = vld [vmem:[#allocation55_spill] sm:$0xff] }
 0x3a5   : > { %1978 = vmatprep.subr.bf16.mxu0 %v7219_v59  ;;  %2019 = vmatprep.subr.bf16.mxu1 %v7221_v60  ;;  %v10672_v59 = vld [vmem:[#allocation56_spill] sm:$0xff]  ;;  %v10673_v60 = vld [vmem:[#allocation57_spill] sm:$0xff] }
 0x3a8   : > { %1979 = vmatpush1.bf16.msra.mxu0 %v7223_v61  ;;  %2020 = vmatpush1.bf16.msra.mxu1 %v7225_v62  ;;  %v10674_v61 = vld [vmem:[#allocation58_spill] sm:$0xff]  ;;  %v10675_v62 = vld [vmem:[#allocation59_spill] sm:$0xff] }
 0x3a9   : > { %1980 = vmatprep.subr.bf16.mxu0 %v7227_v63  ;;  %2021 = vmatprep.subr.bf16.mxu1 %v7231_v0  ;;  %v10676_v63 = vld [vmem:[#allocation60_spill] sm:$0xff]  ;;  %v10677_v0 = vld [vmem:[#allocation61_spill] sm:$0xff] }
 0x3ac   : > { %1981 = vmatpush1.bf16.msra.mxu0 %v7235_v1  ;;  %2022 = vmatpush1.bf16.msra.mxu1 %v7237_v2  ;;  %v730_v1 = vld [vmem:[#allocation16] sm:$0xf]  ;;  %v10678_v2 = vsub.s32 0, %v7542_v14 }
 0x3ad   : > { %1982 = vmatprep.subr.bf16.mxu0 %v7241_v3  ;;  %2023 = vmatprep.subr.bf16.mxu1 %v10649_v36  ;;  %v7734_v27 = vrot.slane %v730_v1, %v10680_v21 }
 0x3ae   : > { %v7730_v3 = vrot.slane %v730_v1, %v10678_v2 }
 0x3af   : > { %10681 = vst [vmem:[#allocation34_spill] sm:$0xff] %v7734_v27 }
 0x3b0   : > { %1983 = vmatpush1.bf16.msra.mxu0 %v10650_v37  ;;  %2024 = vmatpush1.bf16.msra.mxu1 %v10651_v38  ;;  %10679 = vst [vmem:[#allocation33_spill] sm:$0xff] %v7730_v3 }
 0x3b1   : > { %1984 = vmatprep.subr.bf16.mxu0 %v10652_v39  ;;  %2025 = vmatprep.subr.bf16.mxu1 %v10653_v40 }
 0x3b4   : > { %1985 = vmatpush1.bf16.msra.mxu0 %v10654_v41  ;;  %2026 = vmatpush1.bf16.msra.mxu1 %v10655_v42 }
 0x3b5   : > { %1986 = vmatprep.subr.bf16.mxu0 %v10656_v43  ;;  %2027 = vmatprep.subr.bf16.mxu1 %v10657_v44 }
 0x3b8   : > { %1987 = vmatpush1.bf16.msra.mxu0 %v10658_v45  ;;  %2028 = vmatpush1.bf16.msra.mxu1 %v10659_v46 }
 0x3b9   : > { %1988 = vmatprep.subr.bf16.mxu0 %v10660_v47  ;;  %2029 = vmatprep.subr.bf16.mxu1 %v10661_v48  ;;  %v10682_v48 = vsub.s32 3, %v7542_v14 }
 0x3bc   : > { %1989 = vmatpush1.bf16.msra.mxu0 %v10662_v49  ;;  %2030 = vmatpush1.bf16.msra.mxu1 %v10663_v50  ;;  %v7740_v49 = vrot.slane %v730_v1, %v10682_v48  ;;  %v10684_v50 = vsub.s32 2, %v7542_v14 }
 0x3bd   : > { %1990 = vmatprep.subr.bf16.mxu0 %v10664_v51  ;;  %2031 = vmatprep.subr.bf16.mxu1 %v10665_v52 }
 0x3be   : > { %10683 = vst [vmem:[#allocation35_spill] sm:$0xff] %v7740_v49  ;;  %v7744_v51 = vrot.slane %v730_v1, %v10684_v50 }
 0x3c0   : > { %1991 = vmatpush1.bf16.msra.mxu0 %v10666_v53  ;;  %2032 = vmatpush1.bf16.msra.mxu1 %v10667_v54 }
 0x3c1   : > { %1992 = vmatprep.subr.bf16.mxu0 %v10668_v55  ;;  %2033 = vmatprep.subr.bf16.mxu1 %v10669_v56 }
 0x3c4   : > { %1993 = vmatpush1.bf16.msra.mxu0 %v10670_v57  ;;  %2034 = vmatpush1.bf16.msra.mxu1 %v10671_v58  ;;  %v1855_v57 = vld [vmem:[%s7077_s29 + $0x18] sm:$0xff] }
 0x3c5   : > { %1994 = vmatprep.subr.bf16.mxu0 %v10672_v59  ;;  %2035 = vmatprep.subr.bf16.mxu1 %v10673_v60 }
 0x3c8   : > { %1995 = vmatpush1.bf16.msra.mxu0 %v10674_v61  ;;  %2036 = vmatpush1.bf16.msra.mxu1 %v10675_v62  ;;  %v1856_v62 = vld [vmem:[%s7077_s29 + $0x20] sm:$0xff] }
 0x3c9   : > { %2067 = vmatprep.subr.bf16.mxu0 %v10676_v63  ;;  %2108 = vmatprep.subr.bf16.mxu1 %v10677_v0 }
 0x43d   : > { %v1771_v20 = vpop.f32.mrb[4].mxu0  ;;  %v1812_v23 = vpop.f32.mrb[12].mxu1 }
 0x43e   : > { %v1772_v15 = vadd.f32 %v1771_v20, %v7730_v3  ;;  %v1773_v36 = vpop.f32.mrb[5].mxu0  ;;  %v1814_v37 = vpop.f32.mrb[13].mxu1  ;;  %v1813_v55 = vadd.f32 %v1812_v23, %v7744_v51 }
 0x43f   : > { %v1775_v38 = vpop.f32.mrb[6].mxu0  ;;  %v1816_v39 = vpop.f32.mrb[14].mxu1  ;;  %v1774_v43 = vadd.f32 %v1773_v36, %v7734_v27  ;;  %v1815_v53 = vadd.f32 %v1814_v37, %v7740_v49 }
 0x440   : > { %v4795_v40 = vmul.f32 -1.442695, %v1772_v15  ;;  %v1776_v41 = vpop.f32.mrb[7].mxu0  ;;  %v1817_v42 = vpop.f32.mrb[15].mxu1  ;;  %v10685_v39 = vld [vmem:[#allocation119_spill] sm:$0xff] }
 0x441   : > { %v4796_v44 = vmul.f32 -1.442695, %v1774_v43 }
 0x442   : > { %5540 = vpow2.f32 %v4795_v40 }
 0x443   : > { %5542 = vpow2.f32 %v4796_v44 }
 0x44c   : > { %v5541_v45 = vpop.eup %5540 }
 0x44d   : > { %v1822_v46 = vadd.f32 1.0, %v5541_v45  ;;  %v5543_v47 = vpop.eup %5542 }
 0x44e   : > { %v1828_v52 = vadd.f32 1.0, %v5543_v47  ;;  %v10686_v47 = vld [vmem:[#allocation62_spill] sm:$0xff] }
 0x44f   : > { %5544 = vrcp.f32 %v1822_v46 }
 0x450   : > { %5546 = vrcp.f32 %v1828_v52  ;;  %v1857_v52 = vld [vmem:[%s7077_s29 + $0x28] sm:$0xff] }
 0x459   : > { %v5545_v54 = vpop.eup %5544 }
 0x45a   : > { %v1831_v56 = vmul.f32 %v5545_v54, %v1815_v53  ;;  %v5547_v23 = vpop.eup %5546 }
 0x45b   : > { %v1834_v37 = vsub.f32 1.0, %v5547_v23  ;;  %v1836_v40 = vmul.f32 %v5547_v23, %v10685_v39  ;;  %v10695_v23 = vld [vmem:[#allocation70_spill] sm:$0xff] }
 0x45c   : > { %v1832_v58 = vadd.f32 %v1831_v56, %v1813_v55  ;;  %v1852_v56 = vmul.f32 %v7616_v30, %v10685_v39  ;;  %v10688_v30 = vld [vmem:[#allocation63_spill] sm:$0xff]  ;;  %v10699_v39 = vld [vmem:[#allocation74_spill] sm:$0xff] }
 0x45d   : > { %v1893_v59 = vpop.f32.mrb[8].mxu0  ;;  %v1934_v60 = vpop.f32.mrb[16].mxu1 }
 0x45e   : > { %5548 = vtanh.f32 %v1832_v58  ;;  %v1940_v61 = vadd.f32 %v1893_v59, %v1855_v57  ;;  %v1895_v63 = vpop.f32.mrb[9].mxu0  ;;  %v4980_v0 = vpop.f32.mrb[17].mxu1  ;;  %v1954_v48 = vadd.f32 %v10686_v47, %v1934_v60  ;;  %v10707_v47 = vld [vmem:[#allocation82_spill] sm:$0xff] }
 0x45f   : > { %v1897_v14 = vpop.f32.mrb[10].mxu0  ;;  %v1937_v1 = vpop.f32.mrb[18].mxu1  ;;  %v1947_v15 = vadd.f32 %v1895_v63, %v1856_v62 }
 0x460   : > { %v4798_v2 = vmul.f32 -1.442695, %v1940_v61  ;;  %v1898_v20 = vpop.f32.mrb[11].mxu0  ;;  %v4981_v21 = vpop.f32.mrb[19].mxu1  ;;  %v10690_v1 = vld [vmem:[#allocation65_spill] sm:$0xff] }
 0x461   : > { %v4799_v36 = vmul.f32 -1.442695, %v1947_v15  ;;  %v10692_v20 = vld [vmem:[#allocation67_spill] sm:$0xff]  ;;  %v10693_v21 = vld [vmem:[#allocation68_spill] sm:$0xff]  ;;  %v10694_v15 = vld [vmem:[#allocation69_spill] sm:$0xff] }
 0x462   : > { %5550 = vpow2.f32 %v4798_v2  ;;  %v10691_v2 = vld [vmem:[#allocation66_spill] sm:$0xff] }
 0x463   : > { %5552 = vpow2.f32 %v4799_v36  ;;  %v10696_v36 = vld [vmem:[#allocation71_spill] sm:$0xff] }
 0x468   : > { %v5549_v38 = vpop.eup %5548 }
 0x469   : > { %v1835_v41 = vmul.f32 %v5549_v38, %v1834_v37  ;;  %v10697_v37 = vld [vmem:[#allocation72_spill] sm:$0xff]  ;;  %v10698_v38 = vld [vmem:[#allocation73_spill] sm:$0xff] }
 0x46b   : > { %v1837_v42 = vadd.f32 %v1836_v40, %v1835_v41  ;;  %v10700_v40 = vld [vmem:[#allocation75_spill] sm:$0xff]  ;;  %v10701_v41 = vld [vmem:[#allocation76_spill] sm:$0xff] }
 0x46c   : > { %v5551_v43 = vpop.eup %5550 }
 0x46d   : > { %v1944_v44 = vadd.f32 1.0, %v5551_v43  ;;  %v5553_v45 = vpop.eup %5552  ;;  %v1851_v57 = vmul.f32 %v7618_v6, %v1837_v42  ;;  %v10689_v6 = vld [vmem:[#allocation64_spill] sm:$0xff]  ;;  %v10702_v42 = vld [vmem:[#allocation77_spill] sm:$0xff]  ;;  %v10703_v43 = vld [vmem:[#allocation78_spill] sm:$0xff] }
 0x46e   : > { %v1951_v46 = vadd.f32 1.0, %v5553_v45  ;;  %v10705_v45 = vld [vmem:[#allocation80_spill] sm:$0xff] }
 0x46f   : > { %5554 = vrcp.f32 %v1944_v44  ;;  %v7757_v63 = vadd.f32 %v1852_v56, %v1851_v57  ;;  %v10704_v44 = vld [vmem:[#allocation79_spill] sm:$0xff]  ;;  %v10714_v56 = vld [vmem:[#allocation89_spill] sm:$0xff]  ;;  %v10715_v57 = vld [vmem:[#allocation90_spill] sm:$0xff] }
 0x470   : > { %5556 = vrcp.f32 %v1951_v46  ;;  %v10706_v46 = vld [vmem:[#allocation81_spill] sm:$0xff] }
 0x471   : > { %10687 = vst [vmem:[#allocation36_spill] sm:$0xff] %v7757_v63  ;;  %v2066_v14 = vpack.c.bf16 %v7757_v63, %v7757_v63 }
 0x479   : > { %v5555_v50 = vpop.eup %5554 }
 0x47a   : > { %v1955_v53 = vmul.f32 %v5555_v50, %v1954_v48  ;;  %v5557_v55 = vpop.eup %5556  ;;  %v10708_v48 = vld [vmem:[#allocation83_spill] sm:$0xff]  ;;  %v10709_v50 = vld [vmem:[#allocation84_spill] sm:$0xff] }
 0x47b   : > { %v1958_v58 = vsub.f32 1.0, %v5557_v55  ;;  %v1960_v62 = vmul.f32 %v5557_v55, %v7638_v32  ;;  %v10713_v55 = vld [vmem:[#allocation88_spill] sm:$0xff] }
 0x47c   : > { %v1956_v54 = vadd.f32 %v1955_v53, %v1857_v52  ;;  %v10710_v52 = vld [vmem:[#allocation85_spill] sm:$0xff]  ;;  %v10711_v53 = vld [vmem:[#allocation86_spill] sm:$0xff] }
 0x47e   : > { %5558 = vtanh.f32 %v1956_v54  ;;  %v10712_v54 = vld [vmem:[#allocation87_spill] sm:$0xff] }
 0x488   : > { %v5559_v59 = vpop.eup %5558 }
 0x489   : > { %v1959_v61 = vmul.f32 %v5559_v59, %v1958_v58  ;;  %v10716_v58 = vld [vmem:[#allocation91_spill] sm:$0xff]  ;;  %v10717_v59 = vld [vmem:[#allocation92_spill] sm:$0xff] }
 0x48b   : > { %v7759_v60 = vadd.f32 %v1960_v62, %v1959_v61  ;;  %v10718_v61 = vld [vmem:[#allocation93_spill] sm:$0xff]  ;;  %v10719_v62 = vld [vmem:[#allocation94_spill] sm:$0xff] }
 0x48d   : > { %v1962_v0 = vpack.c.bf16 %v7759_v60, %v7759_v60 }
 0x48f   : > { %1997 = vmatmul.mubr.bf16.vlgmr.msra.gmra.mrb[12].mxu0 %v1962_v0  ;;  %2038 = vmatmul.mubr.bf16.vlgmr.msra.gmra.mrb[20].mxu1 %v1962_v0  ;;  %v10720_v0 = vld [vmem:[#allocation95_spill] sm:$0xff] }
 0x490   : > { %2099 = vmatprep.mubr.bf16.mxu0 %v2066_v14  ;;  %2140 = vmatprep.mubr.bf16.mxu1 %v2066_v14  ;;  %v10721_v14 = vld [vmem:[#allocation96_spill] sm:$0xff] }
 0x491   : > { %2068 = vmatpush1.bf16.msra.mxu0 %v10688_v30  ;;  %2109 = vmatpush1.bf16.msra.mxu1 %v10689_v6  ;;  %v10722_v30 = vld [vmem:[#allocation97_spill] sm:$0xff]  ;;  %v10723_v6 = vld [vmem:[#allocation98_spill] sm:$0xff] }
 0x492   : > { %2069 = vmatprep.subr.bf16.mxu0 %v10690_v1  ;;  %2110 = vmatprep.subr.bf16.mxu1 %v10691_v2  ;;  %v10724_v1 = vld [vmem:[#allocation99_spill] sm:$0xff]  ;;  %v10725_v2 = vld [vmem:[#allocation100_spill] sm:$0xff] }
 0x495   : > { %2070 = vmatpush1.bf16.msra.mxu0 %v10692_v20  ;;  %2111 = vmatpush1.bf16.msra.mxu1 %v10693_v21  ;;  %v10726_v20 = vld [vmem:[#allocation101_spill] sm:$0xff]  ;;  %v10727_v21 = vld [vmem:[#allocation102_spill] sm:$0xff] }
 0x496   : > { %2071 = vmatprep.subr.bf16.mxu0 %v10694_v15  ;;  %2112 = vmatprep.subr.bf16.mxu1 %v10695_v23  ;;  %v10728_v15 = vld [vmem:[#allocation103_spill] sm:$0xff]  ;;  %v10729_v23 = vld [vmem:[#allocation104_spill] sm:$0xff] }
 0x499   : > { %2072 = vmatpush1.bf16.msra.mxu0 %v10696_v36  ;;  %2113 = vmatpush1.bf16.msra.mxu1 %v10697_v37  ;;  %v10730_v36 = vld [vmem:[#allocation105_spill] sm:$0xff]  ;;  %v10731_v37 = vld [vmem:[#allocation106_spill] sm:$0xff] }
 0x49a   : > { %2073 = vmatprep.subr.bf16.mxu0 %v10698_v38  ;;  %2114 = vmatprep.subr.bf16.mxu1 %v10699_v39  ;;  %v10732_v38 = vld [vmem:[#allocation107_spill] sm:$0xff]  ;;  %v10733_v39 = vld [vmem:[#allocation108_spill] sm:$0xff] }
 0x49d   : > { %2074 = vmatpush1.bf16.msra.mxu0 %v10700_v40  ;;  %2115 = vmatpush1.bf16.msra.mxu1 %v10701_v41  ;;  %v10734_v40 = vld [vmem:[#allocation109_spill] sm:$0xff]  ;;  %v10735_v41 = vld [vmem:[#allocation110_spill] sm:$0xff] }
 0x49e   : > { %2075 = vmatprep.subr.bf16.mxu0 %v10702_v42  ;;  %2116 = vmatprep.subr.bf16.mxu1 %v10703_v43  ;;  %v10736_v42 = vld [vmem:[#allocation111_spill] sm:$0xff]  ;;  %v10737_v43 = vld [vmem:[#allocation112_spill] sm:$0xff] }
 0x4a1   : > { %2076 = vmatpush1.bf16.msra.mxu0 %v10704_v44  ;;  %2117 = vmatpush1.bf16.msra.mxu1 %v10705_v45  ;;  %v10738_v44 = vld [vmem:[#allocation113_spill] sm:$0xff]  ;;  %v10739_v45 = vld [vmem:[#allocation114_spill] sm:$0xff] }
 0x4a2   : > { %2077 = vmatprep.subr.bf16.mxu0 %v10706_v46  ;;  %2118 = vmatprep.subr.bf16.mxu1 %v10707_v47  ;;  %v10740_v46 = vld [vmem:[#allocation115_spill] sm:$0xff]  ;;  %v10741_v47 = vld [vmem:[#allocation116_spill] sm:$0xff] }
 0x4a5   : > { %2078 = vmatpush1.bf16.msra.mxu0 %v10708_v48  ;;  %2119 = vmatpush1.bf16.msra.mxu1 %v10709_v50  ;;  %v10742_v48 = vld [vmem:[#allocation117_spill] sm:$0xff]  ;;  %v10743_v50 = vld [vmem:[#allocation118_spill] sm:$0xff] }
 0x4a6   : > { %2079 = vmatprep.subr.bf16.mxu0 %v10710_v52  ;;  %2120 = vmatprep.subr.bf16.mxu1 %v10711_v53  ;;  %v10744_v52 = vld [vmem:[#allocation120_spill] sm:$0xff]  ;;  %v10745_v53 = vld [vmem:[#allocation121_spill] sm:$0xff] }
 0x4a9   : > { %2080 = vmatpush1.bf16.msra.mxu0 %v10712_v54  ;;  %2121 = vmatpush1.bf16.msra.mxu1 %v10713_v55  ;;  %v10746_v54 = vld [vmem:[#allocation122_spill] sm:$0xff]  ;;  %v10747_v55 = vld [vmem:[#allocation123_spill] sm:$0xff] }
 0x4aa   : > { %2081 = vmatprep.subr.bf16.mxu0 %v10714_v56  ;;  %2122 = vmatprep.subr.bf16.mxu1 %v10715_v57  ;;  %v10748_v56 = vld [vmem:[#allocation124_spill] sm:$0xff]  ;;  %v10749_v57 = vld [vmem:[#allocation125_spill] sm:$0xff] }
 0x4ad   : > { %2082 = vmatpush1.bf16.msra.mxu0 %v10716_v58  ;;  %2123 = vmatpush1.bf16.msra.mxu1 %v10717_v59  ;;  %v10750_v58 = vld [vmem:[#allocation126_spill] sm:$0xff] }
 0x4ae   : > { %2083 = vmatprep.subr.bf16.mxu0 %v10718_v61  ;;  %2124 = vmatprep.subr.bf16.mxu1 %v10719_v62  ;;  %v10751_v62 = vld [vmem:[#allocation127_spill] sm:$0xff] }
 0x4b1   : > { %2084 = vmatpush1.bf16.msra.mxu0 %v10720_v0  ;;  %2125 = vmatpush1.bf16.msra.mxu1 %v10721_v14 }
 0x4b2   : > { %2085 = vmatprep.subr.bf16.mxu0 %v10722_v30  ;;  %2126 = vmatprep.subr.bf16.mxu1 %v10723_v6 }
 0x4b5   : > { %2086 = vmatpush1.bf16.msra.mxu0 %v10724_v1  ;;  %2127 = vmatpush1.bf16.msra.mxu1 %v10725_v2 }
 0x4b6   : > { %2087 = vmatprep.subr.bf16.mxu0 %v10726_v20  ;;  %2128 = vmatprep.subr.bf16.mxu1 %v10727_v21 }
 0x4b9   : > { %2088 = vmatpush1.bf16.msra.mxu0 %v10728_v15  ;;  %2129 = vmatpush1.bf16.msra.mxu1 %v10729_v23  ;;  %v10752_v15 = vld [vmem:[#allocation128_spill] sm:$0xff] }
 0x4ba   : > { %2089 = vmatprep.subr.bf16.mxu0 %v10730_v36  ;;  %2130 = vmatprep.subr.bf16.mxu1 %v10731_v37 }
 0x4bd   : > { %2090 = vmatpush1.bf16.msra.mxu0 %v10732_v38  ;;  %2131 = vmatpush1.bf16.msra.mxu1 %v10733_v39 }
 0x4be   : > { %2091 = vmatprep.subr.bf16.mxu0 %v10734_v40  ;;  %2132 = vmatprep.subr.bf16.mxu1 %v10735_v41 }
 0x4c1   : > { %2092 = vmatpush1.bf16.msra.mxu0 %v10736_v42  ;;  %2133 = vmatpush1.bf16.msra.mxu1 %v10737_v43 }
 0x4c2   : > { %2093 = vmatprep.subr.bf16.mxu0 %v10738_v44  ;;  %2134 = vmatprep.subr.bf16.mxu1 %v10739_v45 }
 0x4c5   : > { %2094 = vmatpush1.bf16.msra.mxu0 %v10740_v46  ;;  %2135 = vmatpush1.bf16.msra.mxu1 %v10741_v47 }
 0x4c6   : > { %2095 = vmatprep.subr.bf16.mxu0 %v10742_v48  ;;  %2136 = vmatprep.subr.bf16.mxu1 %v10743_v50 }
 0x4c9   : > { %2096 = vmatpush1.bf16.msra.mxu0 %v10744_v52  ;;  %2137 = vmatpush1.bf16.msra.mxu1 %v10745_v53 }
 0x4ca   : > { %2097 = vmatprep.subr.bf16.mxu0 %v10746_v54  ;;  %2138 = vmatprep.subr.bf16.mxu1 %v10747_v55  ;;  %v7835_v55 = vld [vmem:[#allocation9 + $0x8] ss:$12 sps:$4 sm:$0xff]  }
 0x4cd   : > { %2098 = vmatpush1.bf16.msra.mxu0 %v10748_v56  ;;  %2139 = vmatpush1.bf16.msra.mxu1 %v10749_v57  ;;  %v7845_v56 = vld [vmem:[#allocation9 + $0x20] ss:$12 sps:$4 sm:$0xff]  }
 0x4ce   : > { %2189 = vmatprep.subr.bf16.mxu0 %v10750_v58  ;;  %4982 = vmatprep.subr.bf16.mxu1 %v10644_v26 }
 0x562   : > { %v1998_v59 = vpop.f32.mrb[12].mxu0  ;;  %v2039_v61 = vpop.f32.mrb[20].mxu1 }
 0x563   : > { %v1999_v0 = vadd.f32 %v1998_v59, %v10751_v62  ;;  %v2000_v14 = vpop.f32.mrb[13].mxu0  ;;  %v2041_v30 = vpop.f32.mrb[21].mxu1  ;;  %v2040_v43 = vadd.f32 %v2039_v61, %v7564_v5  ;;  %v7916_v59 = vld [vmem:[#allocation12 + $0x28] ss:$16 sps:$4 sm:$0xff]   ;;  %v7919_v61 = vld [vmem:[#allocation12 + $0x44] ss:$16 sps:$4 sm:$0xff]  }
 0x564   : > { %v2002_v6 = vpop.f32.mrb[14].mxu0  ;;  %v2043_v1 = vpop.f32.mrb[22].mxu1  ;;  %v2001_v23 = vadd.f32 %v2000_v14, %v10752_v15  ;;  %v2042_v41 = vadd.f32 %v2041_v30, %v7560_v9  ;;  %v7934_v14 = vld [vmem:[#allocation12 + $0x6c] ss:$16 sps:$4 sm:$0xff]   ;;  %v7937_v30 = vld [vmem:[#allocation12 + $0x60] ss:$16 sps:$4 sm:$0xff]  }
 0x565   : > { %v4800_v2 = vmul.f32 -1.442695, %v1999_v0  ;;  %v2003_v20 = vpop.f32.mrb[15].mxu0  ;;  %v2044_v21 = vpop.f32.mrb[23].mxu1  ;;  %v7925_v0 = vld [vmem:[#allocation12 + $0x40] ss:$16 sps:$4 sm:$0xff]  }
 0x566   : > { %v4801_v36 = vmul.f32 -1.442695, %v2001_v23  ;;  %v7940_v6 = vld [vmem:[#allocation12 + $0x68] ss:$16 sps:$4 sm:$0xff]   ;;  %v7943_v1 = vld [vmem:[#allocation12 + $0x84] ss:$16 sps:$4 sm:$0xff]  }
 0x567   : > { %5560 = vpow2.f32 %v4800_v2  ;;  %v7946_v2 = vld [vmem:[#allocation12 + $0x8c] ss:$16 sps:$4 sm:$0xff]   ;;  %v7949_v20 = vld [vmem:[#allocation12 + $0x80] ss:$16 sps:$4 sm:$0xff]   ;;  %v7952_v21 = vld [vmem:[#allocation12 + $0x88] ss:$16 sps:$4 sm:$0xff]  }
 0x568   : > { %5562 = vpow2.f32 %v4801_v36  ;;  %v7955_v23 = vld [vmem:[#allocation12 + $0xa4] ss:$16 sps:$4 sm:$0xff]   ;;  %v7958_v36 = vld [vmem:[#allocation12 + $0xac] ss:$16 sps:$4 sm:$0xff]  }
 0x571   : > { %v5561_v37 = vpop.eup %5560 }
 0x572   : > { %v2049_v38 = vadd.f32 1.0, %v5561_v37  ;;  %v5563_v39 = vpop.eup %5562  ;;  %v7961_v37 = vld [vmem:[#allocation12 + $0xa0] ss:$16 sps:$4 sm:$0xff]  }
 0x573   : > { %v2055_v40 = vadd.f32 1.0, %v5563_v39  ;;  %v7967_v39 = vld [vmem:[#allocation12 + $0xc4] ss:$16 sps:$4 sm:$0xff]  }
 0x574   : > { %5564 = vrcp.f32 %v2049_v38  ;;  %v7964_v38 = vld [vmem:[#allocation12 + $0xa8] ss:$16 sps:$4 sm:$0xff]  }
 0x575   : > { %5566 = vrcp.f32 %v2055_v40  ;;  %v7970_v40 = vld [vmem:[#allocation12 + $0xcc] ss:$16 sps:$4 sm:$0xff]  }
 0x57e   : > { %v5565_v42 = vpop.eup %5564 }
 0x57f   : > { %v2058_v44 = vmul.f32 %v5565_v42, %v2042_v41  ;;  %v5567_v46 = vpop.eup %5566  ;;  %v7973_v41 = vld [vmem:[#allocation12 + $0xc0] ss:$16 sps:$4 sm:$0xff]   ;;  %v7976_v42 = vld [vmem:[#allocation12 + $0xc8] ss:$16 sps:$4 sm:$0xff]  }
 0x580   : > { %v2061_v47 = vsub.f32 1.0, %v5567_v46  ;;  %v2063_v52 = vmul.f32 %v5567_v46, %v7644_v31  ;;  %10754 = vst [vmem:[#allocation37_spill] sm:$0xff] %v7976_v42  ;;  %v7988_v46 = vld [vmem:[#allocation12 + $0xe8] ss:$16 sps:$4 sm:$0xff]  }
 0x581   : > { %v2059_v45 = vadd.f32 %v2058_v44, %v2040_v43  ;;  %v7979_v43 = vld [vmem:[#allocation12 + $0xe4] ss:$16 sps:$4 sm:$0xff]   ;;  %v7982_v44 = vld [vmem:[#allocation12 + $0xec] ss:$16 sps:$4 sm:$0xff]   ;;  %10758 = vst [vmem:[#allocation41_spill] sm:$0xff] %v7988_v46 }
 0x582   : > { %10755 = vst [vmem:[#allocation38_spill] sm:$0xff] %v7979_v43  ;;  %10756 = vst [vmem:[#allocation39_spill] sm:$0xff] %v7982_v44 }
 0x583   : > { %5568 = vtanh.f32 %v2059_v45  ;;  %v7985_v45 = vld [vmem:[#allocation12 + $0xe0] ss:$16 sps:$4 sm:$0xff]  }
 0x584   : > { %10757 = vst [vmem:[#allocation40_spill] sm:$0xff] %v7985_v45 }
 0x58d   : > { %v5569_v48 = vpop.eup %5568 }
 0x58e   : > { %v2062_v50 = vmul.f32 %v5569_v48, %v2061_v47  ;;  %v7991_v47 = vld [vmem:[#allocation12 + $0x104] ss:$16 sps:$4 sm:$0xff]   ;;  %v7994_v48 = vld [vmem:[#allocation12 + $0x10c] ss:$16 sps:$4 sm:$0xff]  }
 0x58f   : > { %10759 = vst [vmem:[#allocation42_spill] sm:$0xff] %v7991_v47  ;;  %10760 = vst [vmem:[#allocation43_spill] sm:$0xff] %v7994_v48 }
 0x590   : > { %v2064_v53 = vadd.f32 %v2063_v52, %v2062_v50  ;;  %v7997_v50 = vld [vmem:[#allocation12 + $0x100] ss:$16 sps:$4 sm:$0xff]   ;;  %v8000_v52 = vld [vmem:[#allocation12 + $0x108] ss:$16 sps:$4 sm:$0xff]  }
 0x591   : > { %10761 = vst [vmem:[#allocation44_spill] sm:$0xff] %v7997_v50  ;;  %10762 = vst [vmem:[#allocation45_spill] sm:$0xff] %v8000_v52 }
 0x592   : > { %v2065_v54 = vpack.c.bf16 %v2064_v53, %v2064_v53 }
 0x594   : > { %2100 = vmatmul.mubr.bf16.vlgmr.msra.gmra.mrb[16].mxu0 %v2065_v54  ;;  %2141 = vmatmul.mubr.bf16.vlgmr.msra.gmra.mrb[24].mxu1 %v2065_v54  ;;  %v8006_v54 = vld [vmem:[#allocation12 + $0x12c] ss:$16 sps:$4 sm:$0xff]  }
 0x595   : > { %2190 = vmatpush1.bf16.msra.mxu0 %v7572_v19  ;;  %4983 = vmatpush3.bf16.msra.mxu1 %v7835_v55  ;;  %v7851_v19 = vld [vmem:[#allocation9 + $0x38] ss:$12 sps:$4 sm:$0xff]   ;;  %10764 = vst [vmem:[#allocation47_spill] sm:$0xff] %v8006_v54 }
 0x596   : > { %2191 = vmatprep.subr.bf16.mxu0 %v7576_v13  ;;  %4984 = vmatprep.subr.bf16.mxu1 %v10644_v26  ;;  %v7857_v13 = vld [vmem:[#allocation9 + $0x50] ss:$12 sps:$4 sm:$0xff]  }
 0x597   : > { %2221 = vmatprep.mubr.bf16.mxu0 %v10647_v18  ;;  %4998 = vmatprep.mubr.msk.bf16.mxu1 %vm6694_vm0, %v10644_v26 }
 0x599   : > { %2192 = vmatpush1.bf16.msra.mxu0 %v7584_v16  ;;  %4985 = vmatpush3.bf16.msra.mxu1 %v7845_v56  ;;  %v7863_v16 = vld [vmem:[#allocation9 + $0x68] ss:$12 sps:$4 sm:$0xff]  }
 0x59a   : > { %2193 = vmatprep.subr.bf16.mxu0 %v7588_v22  ;;  %4986 = vmatprep.subr.bf16.mxu1 %v10644_v26  ;;  %v7868_v22 = vstv %s2171_s12  ;;  %s2834_s12 = ssub.f32 1.0, %s2831_s2 }
 0x59d   : > { %2194 = vmatpush1.bf16.msra.mxu0 %v7592_v25  ;;  %4987 = vmatpush3.bf16.msra.mxu1 %v7851_v19  ;;  %v7871_v25 = vld [vmem:[#allocation9 + $0x80] ss:$12 sps:$4 sm:$0xff]  }
 0x59e   : > { %2195 = vmatprep.subr.bf16.mxu0 %v7596_v11  ;;  %4988 = vmatprep.subr.bf16.mxu1 %v10644_v26  ;;  %v7874_v11 = vstv %s2174_s11  ;;  %s3158_s11 = sadd.s32 4, %s7570_s24 }
 0x59f   : > { %v2179_v57 = vmul.f32 %v7874_v11, %v7644_v31  ;;  %v7902_v31 = vld [vmem:[#allocation12 + $0xc] ss:$16 sps:$4 sm:$0xff]   ;;  %p9053_p5 = scmp.lt.s32.totalorder %s3158_s11, 12 }
 0x5a1   : > { %2196 = vmatpush1.bf16.msra.mxu0 %v7600_v28  ;;  %4989 = vmatpush3.bf16.msra.mxu1 %v7857_v13  ;;  %v2173_v28 = vmul.f32 %v7868_v22, %v7759_v60  ;;  %s3160_s25 = scalar_select %p9053_p5, 1, 0 }
 0x5a2   : > { %2197 = vmatprep.subr.bf16.mxu0 %v7604_v10  ;;  %4990 = vmatprep.subr.bf16.mxu1 %v10644_v26  ;;  %v10753_v10 = vld [vmem:[#allocation129_spill] sm:$0xff] }
 0x5a3   : > { %s3161_s21 = scvt.s32.f32 %s3160_s25 }
 0x5a5   : > { %2198 = vmatpush1.bf16.msra.mxu0 %v7608_v29  ;;  %4991 = vmatpush3.bf16.msra.mxu1 %v7863_v16  ;;  %v2178_v29 = vmul.f32 %v7868_v22, %v2064_v53  ;;  %v8003_v53 = vld [vmem:[#allocation12 + $0x124] ss:$16 sps:$4 sm:$0xff]  }
 0x5a6   : > { %2199 = vmatprep.subr.bf16.mxu0 %v7612_v17  ;;  %4992 = vmatprep.subr.bf16.mxu1 %v10644_v26  ;;  %v2176_v17 = vmul.f32 %v7874_v11, %v7638_v32  ;;  %v7896_v32 = vld [vmem:[#allocation9 + $0xb0] ss:$12 sps:$4 sm:$0xff]   ;;  %10763 = vst [vmem:[#allocation46_spill] sm:$0xff] %v8003_v53 }
 0x5a7   : > { %v7893_v58 = vadd.f32 %v2179_v57, %v2178_v29  ;;  %v8015_v29 = vld [vmem:[#allocation12 + $0x144] ss:$16 sps:$4 sm:$0xff]   ;;  %v8021_v57 = vld [vmem:[#allocation12 + $0x140] ss:$16 sps:$4 sm:$0xff]  }
 0x5a8   : > { %v7891_v60 = vadd.f32 %v2176_v17, %v2173_v28  ;;  %v8009_v28 = vld [vmem:[#allocation12 + $0x120] ss:$16 sps:$4 sm:$0xff]   ;;  %10767 = vst [vmem:[#allocation50_spill] sm:$0xff] %v8015_v29  ;;  %v8018_v17 = vld [vmem:[#allocation12 + $0x14c] ss:$16 sps:$4 sm:$0xff]   ;;  %10769 = vst [vmem:[#allocation52_spill] sm:$0xff] %v8021_v57 }
 0x5a9   : > { %2200 = vmatpush1.bf16.msra.mxu0 %v7620_v7  ;;  %4993 = vmatpush3.bf16.msra.mxu1 %v7871_v25  ;;  %v7884_v7 = vld [vmem:[#allocation9 + $0x98] ss:$12 sps:$4 sm:$0xff]   ;;  %10765 = vst [vmem:[#allocation48_spill] sm:$0xff] %v8009_v28  ;;  %10768 = vst [vmem:[#allocation51_spill] sm:$0xff] %v8018_v17 }
 0x5aa   : > { %2201 = vmatprep.subr.bf16.mxu0 %v10753_v10  ;;  %4994 = vmatprep.subr.bf16.mxu1 %v10644_v26  ;;  %v8012_v10 = vld [vmem:[#allocation12 + $0x128] ss:$16 sps:$4 sm:$0xff]  }
 0x5ab   : > { %10766 = vst [vmem:[#allocation49_spill] sm:$0xff] %v8012_v10 }
 0x5ad   : > { %2202 = vmatpush1.bf16.msra.mxu0 %v7634_v4  ;;  %4995 = vmatpush3.bf16.msra.mxu1 %v7884_v7  ;;  %v2188_v4 = vpack.c.bf16 %v7891_v60, %v7891_v60 }
 0x5ae   : > { %2203 = vmatprep.subr.bf16.mxu0 %v7640_v8  ;;  %4996 = vmatprep.subr.bf16.mxu1 %v10644_v26  ;;  %v2293_v8 = vpack.c.bf16 %v7893_v58, %v7893_v58 }
 0x5b1   : > { %2204 = vmatpush1.bf16.msra.mxu0 %v7646_v12  ;;  %4997 = vmatpush3.bf16.msra.mxu1 %v7896_v32  ;;  %v7908_v12 = vld [vmem:[#allocation12 + $0x8] ss:$16 sps:$4 sm:$0xff]  }
 0x5b2   : > { %2294 = vmatprep.subr.bf16.mxu0 %v7652_v33  ;;  %2335 = vmatprep.subr.bf16.mxu1 %v7902_v31  ;;  %v7912_v33 = vld [vmem:[#allocation12 + $0x2c] ss:$16 sps:$4 sm:$0xff]  }
 0x5b4   : > { %2222 = vmatmul.mubr.bf16.vlgmr.msra.gmra.mrb[20].mxu0 %v2188_v4  ;;  %4999 = vmatmul.mubr.bf16.vlgmr.msra.gmra.mrb[28].mxu1 %v2188_v4  ;;  %v8024_v4 = vld [vmem:[#allocation12 + $0x148] ss:$16 sps:$4 sm:$0xff]  }
 0x5b5   : > { %2326 = vmatprep.mubr.bf16.mxu0 %v2293_v8  ;;  %2367 = vmatprep.mubr.bf16.mxu1 %v2293_v8  ;;  %10770 = vst [vmem:[#allocation53_spill] sm:$0xff] %v8024_v4  ;;  %v8027_v8 = vld [vmem:[#allocation12 + $0x164] ss:$16 sps:$4 sm:$0xff]  }
 0x5b6   : > { %2295 = vmatpush1.bf16.msra.mxu0 %v7658_v24  ;;  %2336 = vmatpush1.bf16.msra.mxu1 %v7908_v12  ;;  %v7922_v24 = vld [vmem:[#allocation12 + $0x4c] ss:$16 sps:$4 sm:$0xff]   ;;  %10771 = vst [vmem:[#allocation54_spill] sm:$0xff] %v8027_v8 }
 0x5b7   : > { %2296 = vmatprep.subr.bf16.mxu0 %v7662_v34  ;;  %2337 = vmatprep.subr.bf16.mxu1 %v7912_v33  ;;  %v7928_v34 = vld [vmem:[#allocation12 + $0x48] ss:$16 sps:$4 sm:$0xff]  }
 0x5ba   : > { %2297 = vmatpush1.bf16.msra.mxu0 %v7666_v35  ;;  %2338 = vmatpush1.bf16.msra.mxu1 %v7916_v59  ;;  %v7931_v35 = vld [vmem:[#allocation12 + $0x64] ss:$16 sps:$4 sm:$0xff]  }
 0x5bb   : > { %2298 = vmatprep.subr.bf16.mxu0 %v7919_v61  ;;  %2339 = vmatprep.subr.bf16.mxu1 %v7922_v24 }
 0x5be   : > { %2299 = vmatpush1.bf16.msra.mxu0 %v7925_v0  ;;  %2340 = vmatpush1.bf16.msra.mxu1 %v7928_v34 }
 0x5bf   : > { %2300 = vmatprep.subr.bf16.mxu0 %v7931_v35  ;;  %2341 = vmatprep.subr.bf16.mxu1 %v7934_v14 }
 0x5c2   : > { %2301 = vmatpush1.bf16.msra.mxu0 %v7937_v30  ;;  %2342 = vmatpush1.bf16.msra.mxu1 %v7940_v6 }
 0x5c3   : > { %2302 = vmatprep.subr.bf16.mxu0 %v7943_v1  ;;  %2343 = vmatprep.subr.bf16.mxu1 %v7946_v2 }
 0x5c6   : > { %2303 = vmatpush1.bf16.msra.mxu0 %v7949_v20  ;;  %2344 = vmatpush1.bf16.msra.mxu1 %v7952_v21 }
 0x5c7   : > { %2304 = vmatprep.subr.bf16.mxu0 %v7955_v23  ;;  %2345 = vmatprep.subr.bf16.mxu1 %v7958_v36 }
 0x5ca   : > { %2305 = vmatpush1.bf16.msra.mxu0 %v7961_v37  ;;  %2346 = vmatpush1.bf16.msra.mxu1 %v7964_v38 }
 0x5cb   : > { %2306 = vmatprep.subr.bf16.mxu0 %v7967_v39  ;;  %2347 = vmatprep.subr.bf16.mxu1 %v7970_v40 }
 0x5ce   : > { %2307 = vmatpush1.bf16.msra.mxu0 %v7973_v41  ;;  %2348 = vmatpush1.bf16.msra.mxu1 %v7976_v42 }
 0x5cf   : > { %2308 = vmatprep.subr.bf16.mxu0 %v7979_v43  ;;  %2349 = vmatprep.subr.bf16.mxu1 %v7982_v44 }
 0x5d2   : > { %2309 = vmatpush1.bf16.msra.mxu0 %v7985_v45  ;;  %2350 = vmatpush1.bf16.msra.mxu1 %v7988_v46 }
 0x5d3   : > { %2310 = vmatprep.subr.bf16.mxu0 %v7991_v47  ;;  %2351 = vmatprep.subr.bf16.mxu1 %v7994_v48 }
 0x5d6   : > { %2311 = vmatpush1.bf16.msra.mxu0 %v7997_v50  ;;  %2352 = vmatpush1.bf16.msra.mxu1 %v8000_v52 }
 0x5d7   : > { %2312 = vmatprep.subr.bf16.mxu0 %v8003_v53  ;;  %2353 = vmatprep.subr.bf16.mxu1 %v8006_v54 }
 0x5da   : > { %2313 = vmatpush1.bf16.msra.mxu0 %v8009_v28  ;;  %2354 = vmatpush1.bf16.msra.mxu1 %v8012_v10  ;;  %v8030_v10 = vld [vmem:[#allocation12 + $0x16c] ss:$16 sps:$4 sm:$0xff]  }
 0x5db   : > { %2314 = vmatprep.subr.bf16.mxu0 %v8015_v29  ;;  %2355 = vmatprep.subr.bf16.mxu1 %v8018_v17  ;;  %10772 = vst [vmem:[#allocation55_spill] sm:$0xff] %v8030_v10  ;;  %v8033_v29 = vld [vmem:[#allocation12 + $0x160] ss:$16 sps:$4 sm:$0xff]   ;;  %v8036_v17 = vld [vmem:[#allocation12 + $0x168] ss:$16 sps:$4 sm:$0xff]  }
 0x5dc   : > { %10773 = vst [vmem:[#allocation56_spill] sm:$0xff] %v8033_v29  ;;  %10774 = vst [vmem:[#allocation57_spill] sm:$0xff] %v8036_v17 }
 0x5de   : > { %2315 = vmatpush1.bf16.msra.mxu0 %v8021_v57  ;;  %2356 = vmatpush1.bf16.msra.mxu1 %v8024_v4  ;;  %v8039_v57 = vld [vmem:[#allocation12 + $0x184] ss:$16 sps:$4 sm:$0xff]   ;;  %v8042_v4 = vld [vmem:[#allocation12 + $0x18c] ss:$16 sps:$4 sm:$0xff]  }
 0x5df   : > { %2316 = vmatprep.subr.bf16.mxu0 %v8027_v8  ;;  %2357 = vmatprep.subr.bf16.mxu1 %v8030_v10  ;;  %10775 = vst [vmem:[#allocation58_spill] sm:$0xff] %v8039_v57  ;;  %10776 = vst [vmem:[#allocation59_spill] sm:$0xff] %v8042_v4  ;;  %v8045_v8 = vld [vmem:[#allocation12 + $0x180] ss:$16 sps:$4 sm:$0xff]   ;;  %v8048_v10 = vld [vmem:[#allocation12 + $0x188] ss:$16 sps:$4 sm:$0xff]  }
 0x5e0   : > { %10777 = vst [vmem:[#allocation60_spill] sm:$0xff] %v8045_v8  ;;  %10778 = vst [vmem:[#allocation61_spill] sm:$0xff] %v8048_v10 }
 0x5e2   : > { %2317 = vmatpush1.bf16.msra.mxu0 %v8033_v29  ;;  %2358 = vmatpush1.bf16.msra.mxu1 %v8036_v17  ;;  %v8051_v29 = vld [vmem:[#allocation12 + $0x1a4] ss:$16 sps:$4 sm:$0xff]   ;;  %v8054_v17 = vld [vmem:[#allocation12 + $0x1ac] ss:$16 sps:$4 sm:$0xff]  }
 0x5e3   : > { %2318 = vmatprep.subr.bf16.mxu0 %v8039_v57  ;;  %2359 = vmatprep.subr.bf16.mxu1 %v8042_v4  ;;  %10779 = vst [vmem:[#allocation119_spill] sm:$0xff] %v8051_v29  ;;  %10780 = vst [vmem:[#allocation62_spill] sm:$0xff] %v8054_v17  ;;  %v8057_v57 = vld [vmem:[#allocation12 + $0x1a0] ss:$16 sps:$4 sm:$0xff]   ;;  %v8060_v4 = vld [vmem:[#allocation12 + $0x1a8] ss:$16 sps:$4 sm:$0xff]  }
 0x5e4   : > { %10781 = vst [vmem:[#allocation63_spill] sm:$0xff] %v8057_v57  ;;  %10782 = vst [vmem:[#allocation64_spill] sm:$0xff] %v8060_v4 }
 0x5e6   : > { %2319 = vmatpush1.bf16.msra.mxu0 %v8045_v8  ;;  %2360 = vmatpush1.bf16.msra.mxu1 %v8048_v10  ;;  %v8063_v8 = vld [vmem:[#allocation12 + $0x1c4] ss:$16 sps:$4 sm:$0xff]   ;;  %v8066_v10 = vld [vmem:[#allocation12 + $0x1cc] ss:$16 sps:$4 sm:$0xff]  }
 0x5e7   : > { %2320 = vmatprep.subr.bf16.mxu0 %v8051_v29  ;;  %2361 = vmatprep.subr.bf16.mxu1 %v8054_v17  ;;  %10783 = vst [vmem:[#allocation65_spill] sm:$0xff] %v8063_v8  ;;  %10784 = vst [vmem:[#allocation66_spill] sm:$0xff] %v8066_v10  ;;  %v8069_v29 = vld [vmem:[#allocation12 + $0x1c0] ss:$16 sps:$4 sm:$0xff]   ;;  %v8072_v17 = vld [vmem:[#allocation12 + $0x1c8] ss:$16 sps:$4 sm:$0xff]  }
 0x5e8   : > { %10785 = vst [vmem:[#allocation67_spill] sm:$0xff] %v8069_v29  ;;  %10786 = vst [vmem:[#allocation68_spill] sm:$0xff] %v8072_v17 }
 0x5ea   : > { %2321 = vmatpush1.bf16.msra.mxu0 %v8057_v57  ;;  %2362 = vmatpush1.bf16.msra.mxu1 %v8060_v4  ;;  %v8075_v57 = vld [vmem:[#allocation12 + $0x1e4] ss:$16 sps:$4 sm:$0xff]   ;;  %v8078_v4 = vld [vmem:[#allocation12 + $0x1ec] ss:$16 sps:$4 sm:$0xff]  }
 0x5eb   : > { %2322 = vmatprep.subr.bf16.mxu0 %v8063_v8  ;;  %2363 = vmatprep.subr.bf16.mxu1 %v8066_v10  ;;  %10787 = vst [vmem:[#allocation69_spill] sm:$0xff] %v8075_v57  ;;  %10788 = vst [vmem:[#allocation70_spill] sm:$0xff] %v8078_v4  ;;  %v8081_v8 = vld [vmem:[#allocation12 + $0x1e0] ss:$16 sps:$4 sm:$0xff]   ;;  %v8084_v10 = vld [vmem:[#allocation12 + $0x1e8] ss:$16 sps:$4 sm:$0xff]  }
 0x5ec   : > { %10789 = vst [vmem:[#allocation71_spill] sm:$0xff] %v8081_v8  ;;  %10790 = vst [vmem:[#allocation72_spill] sm:$0xff] %v8084_v10 }
 0x5ee   : > { %2323 = vmatpush1.bf16.msra.mxu0 %v8069_v29  ;;  %2364 = vmatpush1.bf16.msra.mxu1 %v8072_v17  ;;  %v8087_v29 = vld [vmem:[#allocation15 + $0x4] ss:$16 sps:$4 sm:$0xff]   ;;  %v8090_v17 = vld [vmem:[#allocation15 + $0xc] ss:$16 sps:$4 sm:$0xff]  }
 0x5ef   : > { %2324 = vmatprep.subr.bf16.mxu0 %v8075_v57  ;;  %2365 = vmatprep.subr.bf16.mxu1 %v8078_v4  ;;  %10791 = vst [vmem:[#allocation73_spill] sm:$0xff] %v8087_v29  ;;  %10792 = vst [vmem:[#allocation74_spill] sm:$0xff] %v8090_v17 }
 0x5f2   : > { %2325 = vmatpush1.bf16.msra.mxu0 %v8081_v8  ;;  %2366 = vmatpush1.bf16.msra.mxu1 %v8084_v10 }
 0x5f3   : > { %2397 = vmatprep.subr.bf16.mxu0 %v8087_v29  ;;  %2438 = vmatprep.subr.bf16.mxu1 %v8090_v17 }
 0x667   : > { %v2101_v57 = vpop.f32.mrb[16].mxu0  ;;  %v2142_v28 = vpop.f32.mrb[24].mxu1 }
 0x668   : > { %v2102_v4 = vadd.f32 %v2101_v57, %v7730_v3  ;;  %v2103_v54 = vpop.f32.mrb[17].mxu0  ;;  %v2144_v53 = vpop.f32.mrb[25].mxu1 }
 0x669   : > { %v2105_v52 = vpop.f32.mrb[18].mxu0  ;;  %v2146_v8 = vpop.f32.mrb[26].mxu1  ;;  %v2104_v47 = vadd.f32 %v2103_v54, %v7734_v27  ;;  %v2145_v57 = vadd.f32 %v2144_v53, %v7740_v49 }
 0x66a   : > { %v4802_v50 = vmul.f32 -1.442695, %v2102_v4  ;;  %v2106_v48 = vpop.f32.mrb[19].mxu0  ;;  %v2147_v10 = vpop.f32.mrb[27].mxu1  ;;  %v2143_v52 = vadd.f32 %v2142_v28, %v7744_v51  ;;  %v2185_v4 = vld [vmem:[%s7077_s29 + $0x30] sm:$0xff] }
 0x66b   : > { %v4803_v29 = vmul.f32 -1.442695, %v2104_v47 }
 0x66c   : > { %5570 = vpow2.f32 %v4802_v50  ;;  %v2186_v50 = vld [vmem:[%s7077_s29 + $0x38] sm:$0xff] }
 0x66d   : > { %5572 = vpow2.f32 %v4803_v29 }
 0x676   : > { %v5571_v46 = vpop.eup %5570 }
 0x677   : > { %v2152_v17 = vadd.f32 1.0, %v5571_v46  ;;  %v5573_v45 = vpop.eup %5572 }
 0x678   : > { %v2158_v44 = vadd.f32 1.0, %v5573_v45 }
 0x679   : > { %5574 = vrcp.f32 %v2152_v17 }
 0x67a   : > { %5576 = vrcp.f32 %v2158_v44 }
 0x683   : > { %v5575_v3 = vpop.eup %5574 }
 0x684   : > { %v2161_v48 = vmul.f32 %v5575_v3, %v2145_v57  ;;  %v5577_v49 = vpop.eup %5576 }
 0x685   : > { %v2164_v3 = vsub.f32 1.0, %v5577_v49  ;;  %v2166_v57 = vmul.f32 %v5577_v49, %v7757_v63 }
 0x686   : > { %v2162_v10 = vadd.f32 %v2161_v48, %v2143_v52 }
 0x687   : > { %v2223_v8 = vpop.f32.mrb[20].mxu0  ;;  %v2264_v54 = vpop.f32.mrb[28].mxu1 }
 0x688   : > { %5578 = vtanh.f32 %v2162_v10  ;;  %v2270_v47 = vadd.f32 %v2223_v8, %v2185_v4  ;;  %v2225_v29 = vpop.f32.mrb[21].mxu0  ;;  %v5000_v27 = vpop.f32.mrb[29].mxu1 }
 0x689   : > { %v2227_v46 = vpop.f32.mrb[22].mxu0  ;;  %v2267_v17 = vpop.f32.mrb[30].mxu1  ;;  %v2277_v53 = vadd.f32 %v2225_v29, %v2186_v50  ;;  %v2187_v50 = vld [vmem:[%s7077_s29 + $0x40] sm:$0xff] }
 0x68a   : > { %v4804_v43 = vmul.f32 -1.442695, %v2270_v47  ;;  %v2228_v45 = vpop.f32.mrb[23].mxu0  ;;  %v5001_v42 = vpop.f32.mrb[31].mxu1  ;;  %v8100_v47 = vld [vmem:[#allocation10] ss:$0 sm:$0xff] }
 0x68b   : > { %v4805_v44 = vmul.f32 -1.442695, %v2277_v53  ;;  %v2284_v42 = vadd.f32 %v8100_v47, %v2264_v54 }
 0x68c   : > { %5580 = vpow2.f32 %v4804_v43 }
 0x68d   : > { %5582 = vpow2.f32 %v4805_v44  ;;  %v2182_v44 = vmul.f32 %v7874_v11, %v7757_v63  ;;  %v8119_v11 = vld [vmem:[#allocation15 + $0x8] ss:$16 sps:$4 sm:$0xff]   ;;  %v8176_v63 = vld [vmem:[#allocation15 + $0xa0] ss:$16 sps:$4 sm:$0xff]  }
 0x68e   : > { %10810 = vst [vmem:[#allocation92_spill] sm:$0xff] %v8176_v63 }
 0x692   : > { %v5579_v28 = vpop.eup %5578 }
 0x693   : > { %v2165_v52 = vmul.f32 %v5579_v28, %v2164_v3 }
 0x695   : > { %v2167_v48 = vadd.f32 %v2166_v57, %v2165_v52 }
 0x696   : > { %v5581_v4 = vpop.eup %5580 }
 0x697   : > { %v2274_v10 = vadd.f32 1.0, %v5581_v4  ;;  %v5583_v27 = vpop.eup %5582  ;;  %v2181_v49 = vmul.f32 %v7868_v22, %v2167_v48  ;;  %v8116_v22 = vld [vmem:[#allocation15] ss:$16 sps:$4 sm:$0xff]   ;;  %v8122_v48 = vld [vmem:[#allocation15 + $0x24] ss:$16 sps:$4 sm:$0xff]  }
 0x698   : > { %v2281_v8 = vadd.f32 1.0, %v5583_v27  ;;  %v8128_v27 = vld [vmem:[#allocation15 + $0x20] ss:$16 sps:$4 sm:$0xff]  }
 0x699   : > { %5584 = vrcp.f32 %v2274_v10  ;;  %v8108_v57 = vadd.f32 %v2182_v44, %v2181_v49  ;;  %v8125_v10 = vld [vmem:[#allocation15 + $0x2c] ss:$16 sps:$4 sm:$0xff]   ;;  %10794 = vst [vmem:[#allocation76_spill] sm:$0xff] %v8128_v27  ;;  %v8152_v49 = vld [vmem:[#allocation15 + $0x60] ss:$16 sps:$4 sm:$0xff]  }
 0x69a   : > { %5586 = vrcp.f32 %v2281_v8  ;;  %v8131_v8 = vld [vmem:[#allocation15 + $0x28] ss:$16 sps:$4 sm:$0xff]   ;;  %10802 = vst [vmem:[#allocation84_spill] sm:$0xff] %v8152_v49  ;;  %v8161_v44 = vld [vmem:[#allocation15 + $0x8c] ss:$16 sps:$4 sm:$0xff]  }
 0x69b   : > { %10793 = vst [vmem:[#allocation75_spill] sm:$0xff] %v8108_v57  ;;  %v2396_v4 = vpack.c.bf16 %v8108_v57, %v8108_v57  ;;  %10795 = vst [vmem:[#allocation77_spill] sm:$0xff] %v8131_v8 }
 0x69c   : > { %10805 = vst [vmem:[#allocation87_spill] sm:$0xff] %v8161_v44 }
 0x6a3   : > { %v5585_v43 = vpop.eup %5584 }
 0x6a4   : > { %v2285_v29 = vmul.f32 %v5585_v43, %v2284_v42  ;;  %v5587_v17 = vpop.eup %5586  ;;  %v8134_v42 = vld [vmem:[#allocation15 + $0x44] ss:$16 sps:$4 sm:$0xff]   ;;  %v8137_v43 = vld [vmem:[#allocation15 + $0x4c] ss:$16 sps:$4 sm:$0xff]  }
 0x6a5   : > { %v2288_v45 = vsub.f32 1.0, %v5587_v17  ;;  %v2290_v28 = vmul.f32 %v5587_v17, %v7891_v60  ;;  %10796 = vst [vmem:[#allocation78_spill] sm:$0xff] %v8134_v42  ;;  %10797 = vst [vmem:[#allocation79_spill] sm:$0xff] %v8137_v43  ;;  %v8149_v17 = vld [vmem:[#allocation15 + $0x6c] ss:$16 sps:$4 sm:$0xff]  }
 0x6a6   : > { %v2286_v46 = vadd.f32 %v2285_v29, %v2187_v50  ;;  %v8140_v50 = vld [vmem:[#allocation15 + $0x40] ss:$16 sps:$4 sm:$0xff]   ;;  %v8143_v29 = vld [vmem:[#allocation15 + $0x48] ss:$16 sps:$4 sm:$0xff]   ;;  %10801 = vst [vmem:[#allocation83_spill] sm:$0xff] %v8149_v17 }
 0x6a7   : > { %10798 = vst [vmem:[#allocation80_spill] sm:$0xff] %v8140_v50  ;;  %10799 = vst [vmem:[#allocation81_spill] sm:$0xff] %v8143_v29 }
 0x6a8   : > { %5588 = vtanh.f32 %v2286_v46  ;;  %v8146_v46 = vld [vmem:[#allocation15 + $0x64] ss:$16 sps:$4 sm:$0xff]  }
 0x6a9   : > { %10800 = vst [vmem:[#allocation82_spill] sm:$0xff] %v8146_v46 }
 0x6b2   : > { %v5589_v53 = vpop.eup %5588 }
 0x6b3   : > { %v2289_v3 = vmul.f32 %v5589_v53, %v2288_v45  ;;  %v8155_v45 = vld [vmem:[#allocation15 + $0x68] ss:$16 sps:$4 sm:$0xff]   ;;  %v8158_v53 = vld [vmem:[#allocation15 + $0x84] ss:$16 sps:$4 sm:$0xff]  }
 0x6b4   : > { %10803 = vst [vmem:[#allocation85_spill] sm:$0xff] %v8155_v45  ;;  %10804 = vst [vmem:[#allocation86_spill] sm:$0xff] %v8158_v53 }
 0x6b5   : > { %v8110_v54 = vadd.f32 %v2290_v28, %v2289_v3  ;;  %v8164_v3 = vld [vmem:[#allocation15 + $0x80] ss:$16 sps:$4 sm:$0xff]   ;;  %v8167_v28 = vld [vmem:[#allocation15 + $0x88] ss:$16 sps:$4 sm:$0xff]  }
 0x6b6   : > { %10806 = vst [vmem:[#allocation88_spill] sm:$0xff] %v8164_v3  ;;  %10807 = vst [vmem:[#allocation89_spill] sm:$0xff] %v8167_v28 }
 0x6b7   : > { %v2292_v52 = vpack.c.bf16 %v8110_v54, %v8110_v54 }
 0x6b9   : > { %2327 = vmatmul.mubr.bf16.vlgmr.msra.gmra.mrb[24].mxu0 %v2292_v52  ;;  %2368 = vmatmul.mubr.bf16.vlgmr.msra.gmra.mrb[32].mxu1 %v2292_v52  ;;  %v8170_v52 = vld [vmem:[#allocation15 + $0xa4] ss:$16 sps:$4 sm:$0xff]  }
 0x6ba   : > { %2429 = vmatprep.mubr.bf16.mxu0 %v2396_v4  ;;  %2470 = vmatprep.mubr.bf16.mxu1 %v2396_v4  ;;  %10808 = vst [vmem:[#allocation90_spill] sm:$0xff] %v8170_v52  ;;  %v8173_v4 = vld [vmem:[#allocation15 + $0xac] ss:$16 sps:$4 sm:$0xff]  }
 0x6bb   : > { %2398 = vmatpush1.bf16.msra.mxu0 %v8116_v22  ;;  %2439 = vmatpush1.bf16.msra.mxu1 %v8119_v11  ;;  %10809 = vst [vmem:[#allocation91_spill] sm:$0xff] %v8173_v4 }
 0x6bc   : > { %2399 = vmatprep.subr.bf16.mxu0 %v8122_v48  ;;  %2440 = vmatprep.subr.bf16.mxu1 %v8125_v10 }
 0x6bf   : > { %2400 = vmatpush1.bf16.msra.mxu0 %v8128_v27  ;;  %2441 = vmatpush1.bf16.msra.mxu1 %v8131_v8 }
 0x6c0   : > { %2401 = vmatprep.subr.bf16.mxu0 %v8134_v42  ;;  %2442 = vmatprep.subr.bf16.mxu1 %v8137_v43 }
 0x6c3   : > { %2402 = vmatpush1.bf16.msra.mxu0 %v8140_v50  ;;  %2443 = vmatpush1.bf16.msra.mxu1 %v8143_v29 }
 0x6c4   : > { %2403 = vmatprep.subr.bf16.mxu0 %v8146_v46  ;;  %2444 = vmatprep.subr.bf16.mxu1 %v8149_v17 }
 0x6c7   : > { %2404 = vmatpush1.bf16.msra.mxu0 %v8152_v49  ;;  %2445 = vmatpush1.bf16.msra.mxu1 %v8155_v45 }
 0x6c8   : > { %2405 = vmatprep.subr.bf16.mxu0 %v8158_v53  ;;  %2446 = vmatprep.subr.bf16.mxu1 %v8161_v44  ;;  %v8179_v44 = vld [vmem:[#allocation15 + $0xa8] ss:$16 sps:$4 sm:$0xff]  }
 0x6c9   : > { %10811 = vst [vmem:[#allocation93_spill] sm:$0xff] %v8179_v44 }
 0x6cb   : > { %2406 = vmatpush1.bf16.msra.mxu0 %v8164_v3  ;;  %2447 = vmatpush1.bf16.msra.mxu1 %v8167_v28  ;;  %v8182_v3 = vld [vmem:[#allocation15 + $0xc4] ss:$16 sps:$4 sm:$0xff]   ;;  %v8185_v28 = vld [vmem:[#allocation15 + $0xcc] ss:$16 sps:$4 sm:$0xff]  }
 0x6cc   : > { %2407 = vmatprep.subr.bf16.mxu0 %v8170_v52  ;;  %2448 = vmatprep.subr.bf16.mxu1 %v8173_v4  ;;  %10812 = vst [vmem:[#allocation94_spill] sm:$0xff] %v8182_v3  ;;  %10813 = vst [vmem:[#allocation95_spill] sm:$0xff] %v8185_v28  ;;  %v8188_v52 = vld [vmem:[#allocation15 + $0xc0] ss:$16 sps:$4 sm:$0xff]   ;;  %v8191_v4 = vld [vmem:[#allocation15 + $0xc8] ss:$16 sps:$4 sm:$0xff]  }
 0x6cd   : > { %10814 = vst [vmem:[#allocation96_spill] sm:$0xff] %v8188_v52  ;;  %10815 = vst [vmem:[#allocation97_spill] sm:$0xff] %v8191_v4 }
 0x6cf   : > { %2408 = vmatpush1.bf16.msra.mxu0 %v8176_v63  ;;  %2449 = vmatpush1.bf16.msra.mxu1 %v8179_v44  ;;  %v8194_v63 = vld [vmem:[#allocation15 + $0xe4] ss:$16 sps:$4 sm:$0xff]   ;;  %v8197_v44 = vld [vmem:[#allocation15 + $0xec] ss:$16 sps:$4 sm:$0xff]  }
 0x6d0   : > { %2409 = vmatprep.subr.bf16.mxu0 %v8182_v3  ;;  %2450 = vmatprep.subr.bf16.mxu1 %v8185_v28  ;;  %10816 = vst [vmem:[#allocation98_spill] sm:$0xff] %v8194_v63  ;;  %10817 = vst [vmem:[#allocation99_spill] sm:$0xff] %v8197_v44  ;;  %v8200_v3 = vld [vmem:[#allocation15 + $0xe0] ss:$16 sps:$4 sm:$0xff]   ;;  %v8203_v28 = vld [vmem:[#allocation15 + $0xe8] ss:$16 sps:$4 sm:$0xff]  }
 0x6d1   : > { %10818 = vst [vmem:[#allocation100_spill] sm:$0xff] %v8200_v3  ;;  %10819 = vst [vmem:[#allocation101_spill] sm:$0xff] %v8203_v28 }
 0x6d3   : > { %2410 = vmatpush1.bf16.msra.mxu0 %v8188_v52  ;;  %2451 = vmatpush1.bf16.msra.mxu1 %v8191_v4  ;;  %v8206_v52 = vld [vmem:[#allocation15 + $0x104] ss:$16 sps:$4 sm:$0xff]   ;;  %v8209_v4 = vld [vmem:[#allocation15 + $0x10c] ss:$16 sps:$4 sm:$0xff]  }
 0x6d4   : > { %2411 = vmatprep.subr.bf16.mxu0 %v8194_v63  ;;  %2452 = vmatprep.subr.bf16.mxu1 %v8197_v44  ;;  %10820 = vst [vmem:[#allocation102_spill] sm:$0xff] %v8206_v52  ;;  %10821 = vst [vmem:[#allocation103_spill] sm:$0xff] %v8209_v4  ;;  %v8212_v63 = vld [vmem:[#allocation15 + $0x100] ss:$16 sps:$4 sm:$0xff]   ;;  %v8215_v44 = vld [vmem:[#allocation15 + $0x108] ss:$16 sps:$4 sm:$0xff]  }
 0x6d5   : > { %10822 = vst [vmem:[#allocation104_spill] sm:$0xff] %v8212_v63  ;;  %10823 = vst [vmem:[#allocation105_spill] sm:$0xff] %v8215_v44 }
 0x6d7   : > { %2412 = vmatpush1.bf16.msra.mxu0 %v8200_v3  ;;  %2453 = vmatpush1.bf16.msra.mxu1 %v8203_v28  ;;  %v8218_v3 = vld [vmem:[#allocation15 + $0x124] ss:$16 sps:$4 sm:$0xff]   ;;  %v8221_v28 = vld [vmem:[#allocation15 + $0x12c] ss:$16 sps:$4 sm:$0xff]  }
 0x6d8   : > { %2413 = vmatprep.subr.bf16.mxu0 %v8206_v52  ;;  %2454 = vmatprep.subr.bf16.mxu1 %v8209_v4  ;;  %10824 = vst [vmem:[#allocation106_spill] sm:$0xff] %v8218_v3  ;;  %10825 = vst [vmem:[#allocation107_spill] sm:$0xff] %v8221_v28  ;;  %v8224_v52 = vld [vmem:[#allocation15 + $0x120] ss:$16 sps:$4 sm:$0xff]   ;;  %v8227_v4 = vld [vmem:[#allocation15 + $0x128] ss:$16 sps:$4 sm:$0xff]  }
 0x6d9   : > { %10826 = vst [vmem:[#allocation108_spill] sm:$0xff] %v8224_v52  ;;  %10827 = vst [vmem:[#allocation109_spill] sm:$0xff] %v8227_v4 }
 0x6db   : > { %2414 = vmatpush1.bf16.msra.mxu0 %v8212_v63  ;;  %2455 = vmatpush1.bf16.msra.mxu1 %v8215_v44  ;;  %v8230_v63 = vld [vmem:[#allocation15 + $0x144] ss:$16 sps:$4 sm:$0xff]   ;;  %v8233_v44 = vld [vmem:[#allocation15 + $0x14c] ss:$16 sps:$4 sm:$0xff]  }
 0x6dc   : > { %2415 = vmatprep.subr.bf16.mxu0 %v8218_v3  ;;  %2456 = vmatprep.subr.bf16.mxu1 %v8221_v28  ;;  %10828 = vst [vmem:[#allocation110_spill] sm:$0xff] %v8230_v63  ;;  %10829 = vst [vmem:[#allocation111_spill] sm:$0xff] %v8233_v44  ;;  %v8236_v3 = vld [vmem:[#allocation15 + $0x140] ss:$16 sps:$4 sm:$0xff]   ;;  %v8239_v28 = vld [vmem:[#allocation15 + $0x148] ss:$16 sps:$4 sm:$0xff]  }
 0x6dd   : > { %10830 = vst [vmem:[#allocation112_spill] sm:$0xff] %v8236_v3  ;;  %10831 = vst [vmem:[#allocation113_spill] sm:$0xff] %v8239_v28 }
 0x6df   : > { %2416 = vmatpush1.bf16.msra.mxu0 %v8224_v52  ;;  %2457 = vmatpush1.bf16.msra.mxu1 %v8227_v4  ;;  %v8242_v52 = vld [vmem:[#allocation15 + $0x164] ss:$16 sps:$4 sm:$0xff]   ;;  %v8245_v4 = vld [vmem:[#allocation15 + $0x16c] ss:$16 sps:$4 sm:$0xff]  }
 0x6e0   : > { %2417 = vmatprep.subr.bf16.mxu0 %v8230_v63  ;;  %2458 = vmatprep.subr.bf16.mxu1 %v8233_v44  ;;  %10832 = vst [vmem:[#allocation114_spill] sm:$0xff] %v8242_v52  ;;  %10833 = vst [vmem:[#allocation115_spill] sm:$0xff] %v8245_v4  ;;  %v8248_v63 = vld [vmem:[#allocation15 + $0x160] ss:$16 sps:$4 sm:$0xff]   ;;  %v8251_v44 = vld [vmem:[#allocation15 + $0x168] ss:$16 sps:$4 sm:$0xff]  }
 0x6e1   : > { %10834 = vst [vmem:[#allocation116_spill] sm:$0xff] %v8248_v63  ;;  %10835 = vst [vmem:[#allocation117_spill] sm:$0xff] %v8251_v44 }
 0x6e3   : > { %2418 = vmatpush1.bf16.msra.mxu0 %v8236_v3  ;;  %2459 = vmatpush1.bf16.msra.mxu1 %v8239_v28  ;;  %v8254_v3 = vld [vmem:[#allocation15 + $0x184] ss:$16 sps:$4 sm:$0xff]   ;;  %v8257_v28 = vld [vmem:[#allocation15 + $0x18c] ss:$16 sps:$4 sm:$0xff]  }
 0x6e4   : > { %2419 = vmatprep.subr.bf16.mxu0 %v8242_v52  ;;  %2460 = vmatprep.subr.bf16.mxu1 %v8245_v4  ;;  %10836 = vst [vmem:[#allocation118_spill] sm:$0xff] %v8254_v3  ;;  %10837 = vst [vmem:[#allocation120_spill] sm:$0xff] %v8257_v28  ;;  %v8260_v52 = vld [vmem:[#allocation15 + $0x180] ss:$16 sps:$4 sm:$0xff]   ;;  %v8263_v4 = vld [vmem:[#allocation15 + $0x188] ss:$16 sps:$4 sm:$0xff]  }
 0x6e5   : > { %10838 = vst [vmem:[#allocation121_spill] sm:$0xff] %v8260_v52  ;;  %10839 = vst [vmem:[#allocation122_spill] sm:$0xff] %v8263_v4 }
 0x6e7   : > { %2420 = vmatpush1.bf16.msra.mxu0 %v8248_v63  ;;  %2461 = vmatpush1.bf16.msra.mxu1 %v8251_v44  ;;  %v8266_v63 = vld [vmem:[#allocation15 + $0x1a4] ss:$16 sps:$4 sm:$0xff]   ;;  %v8269_v44 = vld [vmem:[#allocation15 + $0x1ac] ss:$16 sps:$4 sm:$0xff]  }
 0x6e8   : > { %2421 = vmatprep.subr.bf16.mxu0 %v8254_v3  ;;  %2462 = vmatprep.subr.bf16.mxu1 %v8257_v28  ;;  %10840 = vst [vmem:[#allocation123_spill] sm:$0xff] %v8266_v63  ;;  %10841 = vst [vmem:[#allocation124_spill] sm:$0xff] %v8269_v44  ;;  %v8272_v3 = vld [vmem:[#allocation15 + $0x1a0] ss:$16 sps:$4 sm:$0xff]   ;;  %v8275_v28 = vld [vmem:[#allocation15 + $0x1a8] ss:$16 sps:$4 sm:$0xff]  }
 0x6e9   : > { %10842 = vst [vmem:[#allocation125_spill] sm:$0xff] %v8272_v3  ;;  %10843 = vst [vmem:[#allocation126_spill] sm:$0xff] %v8275_v28 }
 0x6eb   : > { %2422 = vmatpush1.bf16.msra.mxu0 %v8260_v52  ;;  %2463 = vmatpush1.bf16.msra.mxu1 %v8263_v4  ;;  %v8278_v52 = vld [vmem:[#allocation15 + $0x1c4] ss:$16 sps:$4 sm:$0xff]   ;;  %v8281_v4 = vld [vmem:[#allocation15 + $0x1cc] ss:$16 sps:$4 sm:$0xff]  }
 0x6ec   : > { %2423 = vmatprep.subr.bf16.mxu0 %v8266_v63  ;;  %2464 = vmatprep.subr.bf16.mxu1 %v8269_v44  ;;  %10844 = vst [vmem:[#allocation128_spill] sm:$0xff] %v8278_v52  ;;  %10845 = vst [vmem:[#allocation129_spill] sm:$0xff] %v8281_v4  ;;  %v8284_v63 = vld [vmem:[#allocation15 + $0x1c0] ss:$16 sps:$4 sm:$0xff]   ;;  %v8287_v44 = vld [vmem:[#allocation15 + $0x1c8] ss:$16 sps:$4 sm:$0xff]  }
 0x6ed   : > { %10846 = vst [vmem:[#allocation130_spill] sm:$0xff] %v8284_v63  ;;  %10847 = vst [vmem:[#allocation131_spill] sm:$0xff] %v8287_v44 }
 0x6ef   : > { %2424 = vmatpush1.bf16.msra.mxu0 %v8272_v3  ;;  %2465 = vmatpush1.bf16.msra.mxu1 %v8275_v28  ;;  %v8290_v3 = vld [vmem:[#allocation15 + $0x1e4] ss:$16 sps:$4 sm:$0xff]   ;;  %v8293_v28 = vld [vmem:[#allocation15 + $0x1ec] ss:$16 sps:$4 sm:$0xff]  }
 0x6f0   : > { %2425 = vmatprep.subr.bf16.mxu0 %v8278_v52  ;;  %2466 = vmatprep.subr.bf16.mxu1 %v8281_v4  ;;  %10848 = vst [vmem:[#allocation132_spill] sm:$0xff] %v8290_v3  ;;  %10849 = vst [vmem:[#allocation133_spill] sm:$0xff] %v8293_v28  ;;  %v8296_v52 = vld [vmem:[#allocation15 + $0x1e0] ss:$16 sps:$4 sm:$0xff]   ;;  %v8299_v4 = vld [vmem:[#allocation15 + $0x1e8] ss:$16 sps:$4 sm:$0xff]  }
 0x6f1   : > { %10850 = vst [vmem:[#allocation134_spill] sm:$0xff] %v8296_v52  ;;  %10851 = vst [vmem:[#allocation135_spill] sm:$0xff] %v8299_v4 }
 0x6f3   : > { %2426 = vmatpush1.bf16.msra.mxu0 %v8284_v63  ;;  %2467 = vmatpush1.bf16.msra.mxu1 %v8287_v44  ;;  %v8302_v63 = vld [vmem:[#allocation9 + $0x4] ss:$12 sps:$4 sm:$0xff]  }
 0x6f4   : > { %2427 = vmatprep.subr.bf16.mxu0 %v8290_v3  ;;  %2468 = vmatprep.subr.bf16.mxu1 %v8293_v28  ;;  %10852 = vst [vmem:[#allocation136_spill] sm:$0xff] %v8302_v63 }
 0x6f7   : > { %2428 = vmatpush1.bf16.msra.mxu0 %v8296_v52  ;;  %2469 = vmatpush1.bf16.msra.mxu1 %v8299_v4 }
 0x6f8   : > { %2519 = vmatprep.subr.bf16.mxu0 %v8302_v63  ;;  %5002 = vmatprep.subr.bf16.mxu1 %v10644_v26 }
 0x78c   : > { %v2328_v44 = vpop.f32.mrb[24].mxu0  ;;  %v2369_v3 = vpop.f32.mrb[32].mxu1 }
 0x78d   : > { %v2329_v53 = vadd.f32 %v2328_v44, %v10751_v62  ;;  %v2330_v45 = vpop.f32.mrb[25].mxu0  ;;  %v2371_v28 = vpop.f32.mrb[33].mxu1  ;;  %v2370_v62 = vadd.f32 %v2369_v3, %v7564_v5  ;;  %v8341_v3 = vld [vmem:[#allocation9 + $0x4c] ss:$12 sps:$4 sm:$0xff]  }
 0x78e   : > { %v2332_v49 = vpop.f32.mrb[26].mxu0  ;;  %v2373_v17 = vpop.f32.mrb[34].mxu1  ;;  %v2331_v50 = vadd.f32 %v2330_v45, %v10752_v15  ;;  %v2372_v27 = vadd.f32 %v2371_v28, %v7560_v9  ;;  %v8349_v28 = vld [vmem:[#allocation9 + $0x64] ss:$12 sps:$4 sm:$0xff]  }
 0x78f   : > { %v4806_v46 = vmul.f32 -1.442695, %v2329_v53  ;;  %v2333_v52 = vpop.f32.mrb[27].mxu0  ;;  %v2374_v29 = vpop.f32.mrb[35].mxu1 }
 0x790   : > { %v4807_v4 = vmul.f32 -1.442695, %v2331_v50  ;;  %v8357_v52 = vld [vmem:[#allocation9 + $0x7c] ss:$12 sps:$4 sm:$0xff]  }
 0x791   : > { %5590 = vpow2.f32 %v4806_v46 }
 0x792   : > { %5592 = vpow2.f32 %v4807_v4  ;;  %v8363_v4 = vld [vmem:[#allocation9 + $0x78] ss:$12 sps:$4 sm:$0xff]  }
 0x79b   : > { %v5591_v43 = vpop.eup %5590 }
 0x79c   : > { %v2379_v63 = vadd.f32 1.0, %v5591_v43  ;;  %v5593_v42 = vpop.eup %5592 }
 0x79d   : > { %v2385_v8 = vadd.f32 1.0, %v5593_v42  ;;  %v8311_v42 = vld [vmem:[#allocation9] ss:$12 sps:$4 sm:$0xff]  }
 0x79e   : > { %5594 = vrcp.f32 %v2379_v63 }
 0x79f   : > { %5596 = vrcp.f32 %v2385_v8  ;;  %v8337_v8 = vld [vmem:[#allocation9 + $0x30] ss:$12 sps:$4 sm:$0xff]  }
 0x7a8   : > { %v5595_v44 = vpop.eup %5594 }
 0x7a9   : > { %v2388_v17 = vmul.f32 %v5595_v44, %v2372_v27  ;;  %v5597_v29 = vpop.eup %5596  ;;  %v8316_v27 = vld [vmem:[#allocation9 + $0x1c] ss:$12 sps:$4 sm:$0xff]   ;;  %v8367_v44 = vstv %s2504_s22  ;;  %s3488_s22 = sadd.s32 5, %s7570_s24 }
 0x7aa   : > { %v2391_v45 = vsub.f32 1.0, %v5597_v29  ;;  %v2393_v53 = vmul.f32 %v5597_v29, %v7893_v58  ;;  %v2506_v29 = vmul.f32 %v8367_v44, %v7891_v60  ;;  %v8392_v60 = vld [vmem:[#allocation9 + $0xa8] ss:$12 sps:$4 sm:$0xff]   ;;  %p3489_p11 = scmp.lt.s32.totalorder %s3488_s22, 12 }
 0x7ab   : > { %v2389_v49 = vadd.f32 %v2388_v17, %v2370_v62  ;;  %v8327_v62 = vld [vmem:[#allocation9 + $0x18] ss:$12 sps:$4 sm:$0xff]   ;;  %v8371_v17 = vld [vmem:[#allocation9 + $0x94] ss:$12 sps:$4 sm:$0xff]  }
 0x7ac   : > { %s3490_s28 = scalar_select %p3489_p11, 1, 0 }
 0x7ad   : > { %5598 = vtanh.f32 %v2389_v49 }
 0x7ae   : > { %s3491_s1 = scvt.s32.f32 %s3490_s28 }
 0x7b7   : > { %v5599_v46 = vpop.eup %5598 }
 0x7b8   : > { %v2392_v50 = vmul.f32 %v5599_v46, %v2391_v45  ;;  %v8378_v45 = vld [vmem:[#allocation9 + $0x90] ss:$12 sps:$4 sm:$0xff]  }
 0x7ba   : > { %v2394_v43 = vadd.f32 %v2393_v53, %v2392_v50 }
 0x7bc   : > { %v2395_v63 = vpack.c.bf16 %v2394_v43, %v2394_v43 }
 0x7be   : > { %2430 = vmatmul.mubr.bf16.vlgmr.msra.gmra.mrb[28].mxu0 %v2395_v63  ;;  %2471 = vmatmul.mubr.bf16.vlgmr.msra.gmra.mrb[36].mxu1 %v2395_v63  ;;  %v10876_v63 = vld [vmem:[#allocation59_spill] sm:$0xff] }
 0x7bf   : > { %2520 = vmatpush1.bf16.msra.mxu0 %v8311_v42  ;;  %5003 = vmatpush3.bf16.msra.mxu1 %v7835_v55  ;;  %v8331_v55 = vld [vmem:[#allocation9 + $0x34] ss:$12 sps:$4 sm:$0xff]  }
 0x7c0   : > { %2521 = vmatprep.subr.bf16.mxu0 %v8316_v27  ;;  %5004 = vmatprep.subr.bf16.mxu1 %v10644_v26 }
 0x7c1   : > { %2551 = vmatprep.mubr.bf16.mxu0 %v10647_v18  ;;  %5018 = vmatprep.mubr.msk.bf16.mxu1 %vm6694_vm0, %v10644_v26 }
 0x7c3   : > { %2522 = vmatpush1.bf16.msra.mxu0 %v8327_v62  ;;  %5005 = vmatpush3.bf16.msra.mxu1 %v7845_v56  ;;  %v8345_v56 = vld [vmem:[#allocation9 + $0x48] ss:$12 sps:$4 sm:$0xff]  }
 0x7c4   : > { %2523 = vmatprep.subr.bf16.mxu0 %v8331_v55  ;;  %5006 = vmatprep.subr.bf16.mxu1 %v10644_v26 }
 0x7c7   : > { %2524 = vmatpush1.bf16.msra.mxu0 %v8337_v8  ;;  %5007 = vmatpush3.bf16.msra.mxu1 %v7851_v19  ;;  %v8353_v19 = vld [vmem:[#allocation9 + $0x60] ss:$12 sps:$4 sm:$0xff]  }
 0x7c8   : > { %2525 = vmatprep.subr.bf16.mxu0 %v8341_v3  ;;  %5008 = vmatprep.subr.bf16.mxu1 %v10644_v26 }
 0x7cb   : > { %2526 = vmatpush1.bf16.msra.mxu0 %v8345_v56  ;;  %5009 = vmatpush3.bf16.msra.mxu1 %v7857_v13  ;;  %v8361_v13 = vstv %s2501_s27  ;;  %s3164_s27 = ssub.f32 1.0, %s3161_s21 }
 0x7cc   : > { %2527 = vmatprep.subr.bf16.mxu0 %v8349_v28  ;;  %5010 = vmatprep.subr.bf16.mxu1 %v10644_v26  ;;  %v2508_v49 = vmul.f32 %v8361_v13, %v2394_v43  ;;  %v8404_v43 = vld [vmem:[#allocation12] ss:$16 sps:$4 sm:$0xff]  }
 0x7cf   : > { %2528 = vmatpush1.bf16.msra.mxu0 %v8353_v19  ;;  %5011 = vmatpush3.bf16.msra.mxu1 %v7863_v16  ;;  %v2503_v16 = vmul.f32 %v8361_v13, %v8110_v54  ;;  %v8384_v54 = vld [vmem:[#allocation9 + $0xac] ss:$12 sps:$4 sm:$0xff]  }
 0x7d0   : > { %2529 = vmatprep.subr.bf16.mxu0 %v8357_v52  ;;  %5012 = vmatprep.subr.bf16.mxu1 %v10644_v26 }
 0x7d1   : > { %v8388_v46 = vadd.f32 %v2506_v29, %v2503_v16  ;;  %v10877_v16 = vld [vmem:[#allocation60_spill] sm:$0xff]  ;;  %v10879_v29 = vld [vmem:[#allocation119_spill] sm:$0xff] }
 0x7d3   : > { %2530 = vmatpush1.bf16.msra.mxu0 %v8363_v4  ;;  %5013 = vmatpush3.bf16.msra.mxu1 %v7871_v25  ;;  %v2509_v25 = vmul.f32 %v8367_v44, %v7893_v58  ;;  %v8398_v58 = vld [vmem:[#allocation12 + $0x4] ss:$16 sps:$4 sm:$0xff]  }
 0x7d4   : > { %2531 = vmatprep.subr.bf16.mxu0 %v8371_v17  ;;  %5014 = vmatprep.subr.bf16.mxu1 %v10644_v26 }
 0x7d5   : > { %v8390_v50 = vadd.f32 %v2509_v25, %v2508_v49  ;;  %v10878_v49 = vld [vmem:[#allocation61_spill] sm:$0xff]  ;;  %v10880_v25 = vld [vmem:[#allocation62_spill] sm:$0xff] }
 0x7d7   : > { %2532 = vmatpush1.bf16.msra.mxu0 %v8378_v45  ;;  %5015 = vmatpush3.bf16.msra.mxu1 %v7884_v7  ;;  %v2518_v7 = vpack.c.bf16 %v8388_v46, %v8388_v46  ;;  %v2623_v53 = vpack.c.bf16 %v8390_v50, %v8390_v50 }
 0x7d8   : > { %2533 = vmatprep.subr.bf16.mxu0 %v8384_v54  ;;  %5016 = vmatprep.subr.bf16.mxu1 %v10644_v26 }
 0x7db   : > { %2534 = vmatpush1.bf16.msra.mxu0 %v8392_v60  ;;  %5017 = vmatpush3.bf16.msra.mxu1 %v7896_v32  ;;  %v8408_v32 = vld [vmem:[#allocation12 + $0x24] ss:$16 sps:$4 sm:$0xff]  }
 0x7dc   : > { %2624 = vmatprep.subr.bf16.mxu0 %v8398_v58  ;;  %2665 = vmatprep.subr.bf16.mxu1 %v7902_v31  ;;  %v8412_v31 = vld [vmem:[#allocation12 + $0x20] ss:$16 sps:$4 sm:$0xff]  }
 0x7de   : > { %2552 = vmatmul.mubr.bf16.vlgmr.msra.gmra.mrb[32].mxu0 %v2518_v7  ;;  %5019 = vmatmul.mubr.bf16.vlgmr.msra.gmra.mrb[40].mxu1 %v2518_v7  ;;  %v10881_v7 = vld [vmem:[#allocation63_spill] sm:$0xff] }
 0x7df   : > { %2656 = vmatprep.mubr.bf16.mxu0 %v2623_v53  ;;  %2697 = vmatprep.mubr.bf16.mxu1 %v2623_v53  ;;  %v10882_v53 = vld [vmem:[#allocation64_spill] sm:$0xff] }
 0x7e0   : > { %2625 = vmatpush1.bf16.msra.mxu0 %v8404_v43  ;;  %2666 = vmatpush1.bf16.msra.mxu1 %v7908_v12  ;;  %v10854_v12 = vld [vmem:[#allocation37_spill] sm:$0xff] }
 0x7e1   : > { %2626 = vmatprep.subr.bf16.mxu0 %v8408_v32  ;;  %2667 = vmatprep.subr.bf16.mxu1 %v7912_v33  ;;  %v10855_v33 = vld [vmem:[#allocation38_spill] sm:$0xff] }
 0x7e4   : > { %2627 = vmatpush1.bf16.msra.mxu0 %v8412_v31  ;;  %2668 = vmatpush1.bf16.msra.mxu1 %v7916_v59  ;;  %v10856_v59 = vld [vmem:[#allocation39_spill] sm:$0xff] }
 0x7e5   : > { %2628 = vmatprep.subr.bf16.mxu0 %v7919_v61  ;;  %2669 = vmatprep.subr.bf16.mxu1 %v7922_v24  ;;  %v10857_v61 = vld [vmem:[#allocation40_spill] sm:$0xff]  ;;  %v10858_v24 = vld [vmem:[#allocation41_spill] sm:$0xff] }
 0x7e8   : > { %2629 = vmatpush1.bf16.msra.mxu0 %v7925_v0  ;;  %2670 = vmatpush1.bf16.msra.mxu1 %v7928_v34  ;;  %v10859_v0 = vld [vmem:[#allocation42_spill] sm:$0xff]  ;;  %v10860_v34 = vld [vmem:[#allocation43_spill] sm:$0xff] }
 0x7e9   : > { %2630 = vmatprep.subr.bf16.mxu0 %v7931_v35  ;;  %2671 = vmatprep.subr.bf16.mxu1 %v7934_v14  ;;  %v10861_v35 = vld [vmem:[#allocation44_spill] sm:$0xff]  ;;  %v10862_v14 = vld [vmem:[#allocation45_spill] sm:$0xff] }
 0x7ec   : > { %2631 = vmatpush1.bf16.msra.mxu0 %v7937_v30  ;;  %2672 = vmatpush1.bf16.msra.mxu1 %v7940_v6  ;;  %v10863_v30 = vld [vmem:[#allocation46_spill] sm:$0xff]  ;;  %v10864_v6 = vld [vmem:[#allocation47_spill] sm:$0xff] }
 0x7ed   : > { %2632 = vmatprep.subr.bf16.mxu0 %v7943_v1  ;;  %2673 = vmatprep.subr.bf16.mxu1 %v7946_v2  ;;  %v10865_v1 = vld [vmem:[#allocation48_spill] sm:$0xff]  ;;  %v10866_v2 = vld [vmem:[#allocation49_spill] sm:$0xff] }
 0x7f0   : > { %2633 = vmatpush1.bf16.msra.mxu0 %v7949_v20  ;;  %2674 = vmatpush1.bf16.msra.mxu1 %v7952_v21  ;;  %v10867_v20 = vld [vmem:[#allocation50_spill] sm:$0xff]  ;;  %v10868_v21 = vld [vmem:[#allocation51_spill] sm:$0xff] }
 0x7f1   : > { %2634 = vmatprep.subr.bf16.mxu0 %v7955_v23  ;;  %2675 = vmatprep.subr.bf16.mxu1 %v7958_v36  ;;  %v10869_v23 = vld [vmem:[#allocation52_spill] sm:$0xff]  ;;  %v10870_v36 = vld [vmem:[#allocation53_spill] sm:$0xff] }
 0x7f4   : > { %2635 = vmatpush1.bf16.msra.mxu0 %v7961_v37  ;;  %2676 = vmatpush1.bf16.msra.mxu1 %v7964_v38  ;;  %v10871_v37 = vld [vmem:[#allocation54_spill] sm:$0xff]  ;;  %v10872_v38 = vld [vmem:[#allocation55_spill] sm:$0xff] }
 0x7f5   : > { %2636 = vmatprep.subr.bf16.mxu0 %v7967_v39  ;;  %2677 = vmatprep.subr.bf16.mxu1 %v7970_v40  ;;  %v10873_v39 = vld [vmem:[#allocation56_spill] sm:$0xff]  ;;  %v10874_v40 = vld [vmem:[#allocation57_spill] sm:$0xff] }
 0x7f8   : > { %2637 = vmatpush1.bf16.msra.mxu0 %v7973_v41  ;;  %2678 = vmatpush1.bf16.msra.mxu1 %v10854_v12  ;;  %v10875_v41 = vld [vmem:[#allocation58_spill] sm:$0xff]  ;;  %v10883_v12 = vld [vmem:[#allocation65_spill] sm:$0xff] }
 0x7f9   : > { %2638 = vmatprep.subr.bf16.mxu0 %v10855_v33  ;;  %2679 = vmatprep.subr.bf16.mxu1 %v10856_v59  ;;  %v10884_v33 = vld [vmem:[#allocation66_spill] sm:$0xff]  ;;  %v10885_v59 = vld [vmem:[#allocation67_spill] sm:$0xff] }
 0x7fc   : > { %2639 = vmatpush1.bf16.msra.mxu0 %v10857_v61  ;;  %2680 = vmatpush1.bf16.msra.mxu1 %v10858_v24  ;;  %v10886_v61 = vld [vmem:[#allocation68_spill] sm:$0xff]  ;;  %v10887_v24 = vld [vmem:[#allocation69_spill] sm:$0xff] }
 0x7fd   : > { %2640 = vmatprep.subr.bf16.mxu0 %v10859_v0  ;;  %2681 = vmatprep.subr.bf16.mxu1 %v10860_v34  ;;  %v10888_v0 = vld [vmem:[#allocation70_spill] sm:$0xff]  ;;  %v10889_v34 = vld [vmem:[#allocation71_spill] sm:$0xff] }
 0x800   : > { %2641 = vmatpush1.bf16.msra.mxu0 %v10861_v35  ;;  %2682 = vmatpush1.bf16.msra.mxu1 %v10862_v14  ;;  %v10890_v35 = vld [vmem:[#allocation72_spill] sm:$0xff]  ;;  %v10891_v14 = vld [vmem:[#allocation73_spill] sm:$0xff] }
 0x801   : > { %2642 = vmatprep.subr.bf16.mxu0 %v10863_v30  ;;  %2683 = vmatprep.subr.bf16.mxu1 %v10864_v6  ;;  %v10892_v30 = vld [vmem:[#allocation74_spill] sm:$0xff] }
 0x804   : > { %2643 = vmatpush1.bf16.msra.mxu0 %v10865_v1  ;;  %2684 = vmatpush1.bf16.msra.mxu1 %v10866_v2  ;;  %v10893_v2 = vld [vmem:[#allocation33_spill] sm:$0xff] }
 0x805   : > { %2644 = vmatprep.subr.bf16.mxu0 %v10867_v20  ;;  %2685 = vmatprep.subr.bf16.mxu1 %v10868_v21 }
 0x808   : > { %2645 = vmatpush1.bf16.msra.mxu0 %v10869_v23  ;;  %2686 = vmatpush1.bf16.msra.mxu1 %v10870_v36 }
 0x809   : > { %2646 = vmatprep.subr.bf16.mxu0 %v10871_v37  ;;  %2687 = vmatprep.subr.bf16.mxu1 %v10872_v38 }
 0x80c   : > { %2647 = vmatpush1.bf16.msra.mxu0 %v10873_v39  ;;  %2688 = vmatpush1.bf16.msra.mxu1 %v10874_v40 }
 0x80d   : > { %2648 = vmatprep.subr.bf16.mxu0 %v10875_v41  ;;  %2689 = vmatprep.subr.bf16.mxu1 %v10876_v63  ;;  %v10894_v41 = vld [vmem:[#allocation34_spill] sm:$0xff] }
 0x810   : > { %2649 = vmatpush1.bf16.msra.mxu0 %v10877_v16  ;;  %2690 = vmatpush1.bf16.msra.mxu1 %v10878_v49 }
 0x811   : > { %2650 = vmatprep.subr.bf16.mxu0 %v10879_v29  ;;  %2691 = vmatprep.subr.bf16.mxu1 %v10880_v25 }
 0x814   : > { %2651 = vmatpush1.bf16.msra.mxu0 %v10881_v7  ;;  %2692 = vmatpush1.bf16.msra.mxu1 %v10882_v53  ;;  %v10895_v53 = vld [vmem:[#allocation35_spill] sm:$0xff] }
 0x815   : > { %2652 = vmatprep.subr.bf16.mxu0 %v10883_v12  ;;  %2693 = vmatprep.subr.bf16.mxu1 %v10884_v33 }
 0x818   : > { %2653 = vmatpush1.bf16.msra.mxu0 %v10885_v59  ;;  %2694 = vmatpush1.bf16.msra.mxu1 %v10886_v61 }
 0x819   : > { %2654 = vmatprep.subr.bf16.mxu0 %v10887_v24  ;;  %2695 = vmatprep.subr.bf16.mxu1 %v10888_v0  ;;  %v2515_v24 = vld [vmem:[%s7077_s29 + $0x48] sm:$0xff] }
 0x81c   : > { %2655 = vmatpush1.bf16.msra.mxu0 %v10889_v34  ;;  %2696 = vmatpush1.bf16.msra.mxu1 %v10890_v35 }
 0x81d   : > { %2727 = vmatprep.subr.bf16.mxu0 %v10891_v14  ;;  %2768 = vmatprep.subr.bf16.mxu1 %v10892_v30  ;;  %v2516_v30 = vld [vmem:[%s7077_s29 + $0x50] sm:$0xff] }
 0x891   : > { %v2431_v6 = vpop.f32.mrb[28].mxu0  ;;  %v2472_v1 = vpop.f32.mrb[36].mxu1 }
 0x892   : > { %v2432_v20 = vadd.f32 %v2431_v6, %v10893_v2  ;;  %v2433_v21 = vpop.f32.mrb[29].mxu0  ;;  %v2474_v23 = vpop.f32.mrb[37].mxu1  ;;  %v2473_v59 = vadd.f32 %v2472_v1, %v7744_v51 }
 0x893   : > { %v2435_v36 = vpop.f32.mrb[30].mxu0  ;;  %v2476_v37 = vpop.f32.mrb[38].mxu1  ;;  %v2434_v63 = vadd.f32 %v2433_v21, %v10894_v41  ;;  %v2475_v12 = vadd.f32 %v2474_v23, %v10895_v53 }
 0x894   : > { %v4808_v38 = vmul.f32 -1.442695, %v2432_v20  ;;  %v2436_v39 = vpop.f32.mrb[31].mxu0  ;;  %v2477_v40 = vpop.f32.mrb[39].mxu1 }
 0x895   : > { %v4809_v16 = vmul.f32 -1.442695, %v2434_v63 }
 0x896   : > { %5600 = vpow2.f32 %v4808_v38 }
 0x897   : > { %5602 = vpow2.f32 %v4809_v16 }
 0x8a0   : > { %v5601_v49 = vpop.eup %5600 }
 0x8a1   : > { %v2482_v29 = vadd.f32 1.0, %v5601_v49  ;;  %v5603_v25 = vpop.eup %5602 }
 0x8a2   : > { %v2488_v7 = vadd.f32 1.0, %v5603_v25 }
 0x8a3   : > { %5604 = vrcp.f32 %v2482_v29 }
 0x8a4   : > { %5606 = vrcp.f32 %v2488_v7 }
 0x8ad   : > { %v5605_v33 = vpop.eup %5604 }
 0x8ae   : > { %v2491_v61 = vmul.f32 %v5605_v33, %v2475_v12  ;;  %v5607_v1 = vpop.eup %5606 }
 0x8af   : > { %v2494_v63 = vsub.f32 1.0, %v5607_v1  ;;  %v2496_v49 = vmul.f32 %v5607_v1, %v8108_v57  ;;  %v10899_v1 = vld [vmem:[#allocation78_spill] sm:$0xff] }
 0x8b0   : > { %v2492_v0 = vadd.f32 %v2491_v61, %v2473_v59 }
 0x8b1   : > { %v2553_v34 = vpop.f32.mrb[32].mxu0  ;;  %v2594_v35 = vpop.f32.mrb[40].mxu1 }
 0x8b2   : > { %5608 = vtanh.f32 %v2492_v0  ;;  %v2600_v14 = vadd.f32 %v2553_v34, %v2515_v24  ;;  %v2555_v6 = vpop.f32.mrb[33].mxu0  ;;  %v5020_v20 = vpop.f32.mrb[41].mxu1  ;;  %v2614_v61 = vadd.f32 %v8100_v47, %v2594_v35  ;;  %v2517_v0 = vld [vmem:[%s7077_s29 + $0x58] sm:$0xff] }
 0x8b3   : > { %v2557_v21 = vpop.f32.mrb[34].mxu0  ;;  %v2597_v36 = vpop.f32.mrb[42].mxu1  ;;  %v2607_v23 = vadd.f32 %v2555_v6, %v2516_v30 }
 0x8b4   : > { %v4810_v37 = vmul.f32 -1.442695, %v2600_v14  ;;  %v2558_v38 = vpop.f32.mrb[35].mxu0  ;;  %v5021_v39 = vpop.f32.mrb[43].mxu1  ;;  %v2512_v36 = vmul.f32 %v8367_v44, %v8108_v57  ;;  %v10898_v44 = vld [vmem:[#allocation77_spill] sm:$0xff] }
 0x8b5   : > { %v4811_v40 = vmul.f32 -1.442695, %v2607_v23  ;;  %v8757_v57 = vld [vmem:[#allocation12 + $0x164] ss:$16 sps:$4 sm:$0xff]  }
 0x8b6   : > { %5610 = vpow2.f32 %v4810_v37  ;;  %10974 = vst [vmem:[#allocation55_spill] sm:$0xff] %v8757_v57 }
 0x8b7   : > { %5612 = vpow2.f32 %v4811_v40  ;;  %v10900_v40 = vld [vmem:[#allocation79_spill] sm:$0xff] }
 0x8bc   : > { %v5609_v16 = vpop.eup %5608 }
 0x8bd   : > { %v2495_v29 = vmul.f32 %v5609_v16, %v2494_v63  ;;  %v10901_v63 = vld [vmem:[#allocation80_spill] sm:$0xff]  ;;  %v10902_v16 = vld [vmem:[#allocation81_spill] sm:$0xff] }
 0x8bf   : > { %v2497_v25 = vadd.f32 %v2496_v49, %v2495_v29  ;;  %v10903_v49 = vld [vmem:[#allocation82_spill] sm:$0xff]  ;;  %v10908_v29 = vld [vmem:[#allocation87_spill] sm:$0xff] }
 0x8c0   : > { %v5611_v7 = vpop.eup %5610 }
 0x8c1   : > { %v2604_v12 = vadd.f32 1.0, %v5611_v7  ;;  %v5613_v33 = vpop.eup %5612  ;;  %v2511_v6 = vmul.f32 %v8361_v13, %v2497_v25  ;;  %v10897_v13 = vld [vmem:[#allocation76_spill] sm:$0xff]  ;;  %v10910_v7 = vld [vmem:[#allocation89_spill] sm:$0xff] }
 0x8c2   : > { %v2611_v59 = vadd.f32 1.0, %v5613_v33  ;;  %v10909_v25 = vld [vmem:[#allocation88_spill] sm:$0xff]  ;;  %v10912_v33 = vld [vmem:[#allocation91_spill] sm:$0xff] }
 0x8c3   : > { %5614 = vrcp.f32 %v2604_v12  ;;  %v8487_v39 = vadd.f32 %v2512_v36, %v2511_v6  ;;  %v10911_v12 = vld [vmem:[#allocation90_spill] sm:$0xff]  ;;  %v10920_v6 = vld [vmem:[#allocation99_spill] sm:$0xff] }
 0x8c4   : > { %5616 = vrcp.f32 %v2611_v59  ;;  %v10913_v59 = vld [vmem:[#allocation92_spill] sm:$0xff]  ;;  %v10923_v36 = vld [vmem:[#allocation102_spill] sm:$0xff] }
 0x8c5   : > { %10896 = vst [vmem:[#allocation37_spill] sm:$0xff] %v8487_v39  ;;  %v2726_v23 = vpack.c.bf16 %v8487_v39, %v8487_v39 }
 0x8cd   : > { %v5615_v24 = vpop.eup %5614 }
 0x8ce   : > { %v2615_v34 = vmul.f32 %v5615_v24, %v2614_v61  ;;  %v5617_v30 = vpop.eup %5616  ;;  %v10914_v61 = vld [vmem:[#allocation93_spill] sm:$0xff]  ;;  %v10915_v24 = vld [vmem:[#allocation94_spill] sm:$0xff] }
 0x8cf   : > { %v2618_v20 = vsub.f32 1.0, %v5617_v30  ;;  %v2620_v38 = vmul.f32 %v5617_v30, %v8388_v46  ;;  %v10919_v30 = vld [vmem:[#allocation98_spill] sm:$0xff] }
 0x8d0   : > { %v2616_v14 = vadd.f32 %v2615_v34, %v2517_v0  ;;  %v10916_v0 = vld [vmem:[#allocation95_spill] sm:$0xff]  ;;  %v10917_v34 = vld [vmem:[#allocation96_spill] sm:$0xff] }
 0x8d2   : > { %5618 = vtanh.f32 %v2616_v14  ;;  %v10918_v14 = vld [vmem:[#allocation97_spill] sm:$0xff] }
 0x8dc   : > { %v5619_v21 = vpop.eup %5618 }
 0x8dd   : > { %v2619_v37 = vmul.f32 %v5619_v21, %v2618_v20  ;;  %v10921_v20 = vld [vmem:[#allocation100_spill] sm:$0xff]  ;;  %v10922_v21 = vld [vmem:[#allocation101_spill] sm:$0xff] }
 0x8df   : > { %v8489_v47 = vadd.f32 %v2620_v38, %v2619_v37  ;;  %v10924_v37 = vld [vmem:[#allocation103_spill] sm:$0xff]  ;;  %v10925_v38 = vld [vmem:[#allocation104_spill] sm:$0xff] }
 0x8e1   : > { %v2622_v35 = vpack.c.bf16 %v8489_v47, %v8489_v47 }
 0x8e3   : > { %2657 = vmatmul.mubr.bf16.vlgmr.msra.gmra.mrb[36].mxu0 %v2622_v35  ;;  %2698 = vmatmul.mubr.bf16.vlgmr.msra.gmra.mrb[44].mxu1 %v2622_v35  ;;  %v10926_v35 = vld [vmem:[#allocation105_spill] sm:$0xff] }
 0x8e4   : > { %2759 = vmatprep.mubr.bf16.mxu0 %v2726_v23  ;;  %2800 = vmatprep.mubr.bf16.mxu1 %v2726_v23  ;;  %v10927_v23 = vld [vmem:[#allocation106_spill] sm:$0xff] }
 0x8e5   : > { %2728 = vmatpush1.bf16.msra.mxu0 %v8116_v22  ;;  %2769 = vmatpush1.bf16.msra.mxu1 %v8119_v11  ;;  %v10904_v22 = vld [vmem:[#allocation83_spill] sm:$0xff]  ;;  %v10905_v11 = vld [vmem:[#allocation84_spill] sm:$0xff] }
 0x8e6   : > { %2729 = vmatprep.subr.bf16.mxu0 %v8122_v48  ;;  %2770 = vmatprep.subr.bf16.mxu1 %v8125_v10  ;;  %v10906_v48 = vld [vmem:[#allocation85_spill] sm:$0xff]  ;;  %v10907_v10 = vld [vmem:[#allocation86_spill] sm:$0xff] }
 0x8e9   : > { %2730 = vmatpush1.bf16.msra.mxu0 %v10897_v13  ;;  %2771 = vmatpush1.bf16.msra.mxu1 %v10898_v44  ;;  %v10928_v13 = vld [vmem:[#allocation107_spill] sm:$0xff]  ;;  %v10929_v44 = vld [vmem:[#allocation108_spill] sm:$0xff] }
 0x8ea   : > { %2731 = vmatprep.subr.bf16.mxu0 %v10899_v1  ;;  %2772 = vmatprep.subr.bf16.mxu1 %v10900_v40  ;;  %v10930_v1 = vld [vmem:[#allocation109_spill] sm:$0xff]  ;;  %v10931_v40 = vld [vmem:[#allocation110_spill] sm:$0xff] }
 0x8ed   : > { %2732 = vmatpush1.bf16.msra.mxu0 %v10901_v63  ;;  %2773 = vmatpush1.bf16.msra.mxu1 %v10902_v16  ;;  %v10932_v63 = vld [vmem:[#allocation111_spill] sm:$0xff]  ;;  %v10933_v16 = vld [vmem:[#allocation112_spill] sm:$0xff] }
 0x8ee   : > { %2733 = vmatprep.subr.bf16.mxu0 %v10903_v49  ;;  %2774 = vmatprep.subr.bf16.mxu1 %v10904_v22  ;;  %v10934_v49 = vld [vmem:[#allocation113_spill] sm:$0xff]  ;;  %v10935_v22 = vld [vmem:[#allocation114_spill] sm:$0xff] }
 0x8f1   : > { %2734 = vmatpush1.bf16.msra.mxu0 %v10905_v11  ;;  %2775 = vmatpush1.bf16.msra.mxu1 %v10906_v48  ;;  %v10936_v11 = vld [vmem:[#allocation115_spill] sm:$0xff]  ;;  %v10937_v48 = vld [vmem:[#allocation116_spill] sm:$0xff] }
 0x8f2   : > { %2735 = vmatprep.subr.bf16.mxu0 %v10907_v10  ;;  %2776 = vmatprep.subr.bf16.mxu1 %v10908_v29  ;;  %v10938_v10 = vld [vmem:[#allocation117_spill] sm:$0xff]  ;;  %v10939_v29 = vld [vmem:[#allocation118_spill] sm:$0xff] }
 0x8f5   : > { %2736 = vmatpush1.bf16.msra.mxu0 %v10909_v25  ;;  %2777 = vmatpush1.bf16.msra.mxu1 %v10910_v7  ;;  %v10940_v25 = vld [vmem:[#allocation120_spill] sm:$0xff]  ;;  %v10941_v7 = vld [vmem:[#allocation121_spill] sm:$0xff] }
 0x8f6   : > { %2737 = vmatprep.subr.bf16.mxu0 %v10911_v12  ;;  %2778 = vmatprep.subr.bf16.mxu1 %v10912_v33  ;;  %v10942_v12 = vld [vmem:[#allocation122_spill] sm:$0xff]  ;;  %v10943_v33 = vld [vmem:[#allocation123_spill] sm:$0xff] }
 0x8f9   : > { %2738 = vmatpush1.bf16.msra.mxu0 %v10913_v59  ;;  %2779 = vmatpush1.bf16.msra.mxu1 %v10914_v61  ;;  %v10944_v59 = vld [vmem:[#allocation124_spill] sm:$0xff]  ;;  %v10945_v61 = vld [vmem:[#allocation125_spill] sm:$0xff] }
 0x8fa   : > { %2739 = vmatprep.subr.bf16.mxu0 %v10915_v24  ;;  %2780 = vmatprep.subr.bf16.mxu1 %v10916_v0  ;;  %v10946_v24 = vld [vmem:[#allocation126_spill] sm:$0xff]  ;;  %v10947_v0 = vld [vmem:[#allocation128_spill] sm:$0xff] }
 0x8fd   : > { %2740 = vmatpush1.bf16.msra.mxu0 %v10917_v34  ;;  %2781 = vmatpush1.bf16.msra.mxu1 %v10918_v14  ;;  %v10948_v34 = vld [vmem:[#allocation129_spill] sm:$0xff]  ;;  %v10949_v14 = vld [vmem:[#allocation130_spill] sm:$0xff] }
 0x8fe   : > { %2741 = vmatprep.subr.bf16.mxu0 %v10919_v30  ;;  %2782 = vmatprep.subr.bf16.mxu1 %v10920_v6  ;;  %v10950_v30 = vld [vmem:[#allocation131_spill] sm:$0xff]  ;;  %v10951_v6 = vld [vmem:[#allocation132_spill] sm:$0xff] }
 0x901   : > { %2742 = vmatpush1.bf16.msra.mxu0 %v10921_v20  ;;  %2783 = vmatpush1.bf16.msra.mxu1 %v10922_v21  ;;  %v10952_v20 = vld [vmem:[#allocation133_spill] sm:$0xff]  ;;  %v10953_v21 = vld [vmem:[#allocation134_spill] sm:$0xff] }
 0x902   : > { %2743 = vmatprep.subr.bf16.mxu0 %v10923_v36  ;;  %2784 = vmatprep.subr.bf16.mxu1 %v10924_v37  ;;  %v10954_v36 = vld [vmem:[#allocation135_spill] sm:$0xff]  ;;  %v10955_v37 = vld [vmem:[#allocation136_spill] sm:$0xff] }
 0x905   : > { %2744 = vmatpush1.bf16.msra.mxu0 %v10925_v38  ;;  %2785 = vmatpush1.bf16.msra.mxu1 %v10926_v35 }
 0x906   : > { %2745 = vmatprep.subr.bf16.mxu0 %v10927_v23  ;;  %2786 = vmatprep.subr.bf16.mxu1 %v10928_v13  ;;  %v10956_v23 = vld [vmem:[#allocation127_spill] sm:$0xff] }
 0x909   : > { %2746 = vmatpush1.bf16.msra.mxu0 %v10929_v44  ;;  %2787 = vmatpush1.bf16.msra.mxu1 %v10930_v1 }
 0x90a   : > { %2747 = vmatprep.subr.bf16.mxu0 %v10931_v40  ;;  %2788 = vmatprep.subr.bf16.mxu1 %v10932_v63 }
 0x90d   : > { %2748 = vmatpush1.bf16.msra.mxu0 %v10933_v16  ;;  %2789 = vmatpush1.bf16.msra.mxu1 %v10934_v49 }
 0x90e   : > { %2749 = vmatprep.subr.bf16.mxu0 %v10935_v22  ;;  %2790 = vmatprep.subr.bf16.mxu1 %v10936_v11 }
 0x911   : > { %2750 = vmatpush1.bf16.msra.mxu0 %v10937_v48  ;;  %2791 = vmatpush1.bf16.msra.mxu1 %v10938_v10 }
 0x912   : > { %2751 = vmatprep.subr.bf16.mxu0 %v10939_v29  ;;  %2792 = vmatprep.subr.bf16.mxu1 %v10940_v25 }
 0x915   : > { %2752 = vmatpush1.bf16.msra.mxu0 %v10941_v7  ;;  %2793 = vmatpush1.bf16.msra.mxu1 %v10942_v12 }
 0x916   : > { %2753 = vmatprep.subr.bf16.mxu0 %v10943_v33  ;;  %2794 = vmatprep.subr.bf16.mxu1 %v10944_v59 }
 0x919   : > { %2754 = vmatpush1.bf16.msra.mxu0 %v10945_v61  ;;  %2795 = vmatpush1.bf16.msra.mxu1 %v10946_v24 }
 0x91a   : > { %2755 = vmatprep.subr.bf16.mxu0 %v10947_v0  ;;  %2796 = vmatprep.subr.bf16.mxu1 %v10948_v34 }
 0x91d   : > { %2756 = vmatpush1.bf16.msra.mxu0 %v10949_v14  ;;  %2797 = vmatpush1.bf16.msra.mxu1 %v10950_v30 }
 0x91e   : > { %2757 = vmatprep.subr.bf16.mxu0 %v10951_v6  ;;  %2798 = vmatprep.subr.bf16.mxu1 %v10952_v20 }
 0x921   : > { %2758 = vmatpush1.bf16.msra.mxu0 %v10953_v21  ;;  %2799 = vmatpush1.bf16.msra.mxu1 %v10954_v36  ;;  %v8565_v36 = vld [vmem:[#allocation9 + $0x8] ss:$12 sps:$4 sm:$0xff]  }
 0x922   : > { %2849 = vmatprep.subr.bf16.mxu0 %v10955_v37  ;;  %5022 = vmatprep.subr.bf16.mxu1 %v10644_v26  ;;  %v8575_v37 = vld [vmem:[#allocation9 + $0x20] ss:$12 sps:$4 sm:$0xff]  }
 0x9b6   : > { %v2658_v38 = vpop.f32.mrb[36].mxu0  ;;  %v2699_v35 = vpop.f32.mrb[44].mxu1 }
 0x9b7   : > { %v2659_v13 = vadd.f32 %v2658_v38, %v10956_v23  ;;  %v2660_v44 = vpop.f32.mrb[37].mxu0  ;;  %v2701_v1 = vpop.f32.mrb[45].mxu1  ;;  %v2700_v59 = vadd.f32 %v2699_v35, %v7564_v5  ;;  %v8646_v38 = vld [vmem:[#allocation12 + $0x28] ss:$16 sps:$4 sm:$0xff]   ;;  %v8649_v35 = vld [vmem:[#allocation12 + $0x44] ss:$16 sps:$4 sm:$0xff]  }
 0x9b8   : > { %v2662_v40 = vpop.f32.mrb[38].mxu0  ;;  %v2703_v63 = vpop.f32.mrb[46].mxu1  ;;  %v2661_v11 = vadd.f32 %v2660_v44, %v10752_v15  ;;  %v2702_v12 = vadd.f32 %v2701_v1, %v7560_v9  ;;  %v8664_v44 = vld [vmem:[#allocation12 + $0x6c] ss:$16 sps:$4 sm:$0xff]   ;;  %v8667_v1 = vld [vmem:[#allocation12 + $0x60] ss:$16 sps:$4 sm:$0xff]  }
 0x9b9   : > { %v4812_v16 = vmul.f32 -1.442695, %v2659_v13  ;;  %v2663_v49 = vpop.f32.mrb[39].mxu0  ;;  %v2704_v22 = vpop.f32.mrb[47].mxu1  ;;  %v8655_v13 = vld [vmem:[#allocation12 + $0x40] ss:$16 sps:$4 sm:$0xff]  }
 0x9ba   : > { %v4813_v48 = vmul.f32 -1.442695, %v2661_v11  ;;  %v8670_v40 = vld [vmem:[#allocation12 + $0x68] ss:$16 sps:$4 sm:$0xff]   ;;  %v8673_v63 = vld [vmem:[#allocation12 + $0x84] ss:$16 sps:$4 sm:$0xff]  }
 0x9bb   : > { %5620 = vpow2.f32 %v4812_v16  ;;  %v8676_v16 = vld [vmem:[#allocation12 + $0x8c] ss:$16 sps:$4 sm:$0xff]   ;;  %v8679_v49 = vld [vmem:[#allocation12 + $0x80] ss:$16 sps:$4 sm:$0xff]   ;;  %v8682_v22 = vld [vmem:[#allocation12 + $0x88] ss:$16 sps:$4 sm:$0xff]  }
 0x9bc   : > { %5622 = vpow2.f32 %v4813_v48  ;;  %v8685_v11 = vld [vmem:[#allocation12 + $0xa4] ss:$16 sps:$4 sm:$0xff]   ;;  %v8688_v48 = vld [vmem:[#allocation12 + $0xac] ss:$16 sps:$4 sm:$0xff]  }
 0x9c5   : > { %v5621_v10 = vpop.eup %5620 }
 0x9c6   : > { %v2709_v29 = vadd.f32 1.0, %v5621_v10  ;;  %v5623_v25 = vpop.eup %5622  ;;  %v8691_v10 = vld [vmem:[#allocation12 + $0xa0] ss:$16 sps:$4 sm:$0xff]  }
 0x9c7   : > { %v2715_v7 = vadd.f32 1.0, %v5623_v25  ;;  %v8697_v25 = vld [vmem:[#allocation12 + $0xc4] ss:$16 sps:$4 sm:$0xff]  }
 0x9c8   : > { %5624 = vrcp.f32 %v2709_v29  ;;  %v8694_v29 = vld [vmem:[#allocation12 + $0xa8] ss:$16 sps:$4 sm:$0xff]  }
 0x9c9   : > { %5626 = vrcp.f32 %v2715_v7  ;;  %v8700_v7 = vld [vmem:[#allocation12 + $0xcc] ss:$16 sps:$4 sm:$0xff]  }
 0x9d2   : > { %v5625_v33 = vpop.eup %5624 }
 0x9d3   : > { %v2718_v61 = vmul.f32 %v5625_v33, %v2702_v12  ;;  %v5627_v0 = vpop.eup %5626  ;;  %v8703_v12 = vld [vmem:[#allocation12 + $0xc0] ss:$16 sps:$4 sm:$0xff]   ;;  %v8706_v33 = vld [vmem:[#allocation12 + $0xc8] ss:$16 sps:$4 sm:$0xff]  }
 0x9d4   : > { %v2721_v34 = vsub.f32 1.0, %v5627_v0  ;;  %v2723_v6 = vmul.f32 %v5627_v0, %v8390_v50  ;;  %10957 = vst [vmem:[#allocation38_spill] sm:$0xff] %v8706_v33  ;;  %v8718_v0 = vld [vmem:[#allocation12 + $0xe8] ss:$16 sps:$4 sm:$0xff]  }
 0x9d5   : > { %v2719_v24 = vadd.f32 %v2718_v61, %v2700_v59  ;;  %v8709_v59 = vld [vmem:[#allocation12 + $0xe4] ss:$16 sps:$4 sm:$0xff]   ;;  %v8712_v61 = vld [vmem:[#allocation12 + $0xec] ss:$16 sps:$4 sm:$0xff]   ;;  %10961 = vst [vmem:[#allocation42_spill] sm:$0xff] %v8718_v0 }
 0x9d6   : > { %10958 = vst [vmem:[#allocation39_spill] sm:$0xff] %v8709_v59  ;;  %10959 = vst [vmem:[#allocation40_spill] sm:$0xff] %v8712_v61 }
 0x9d7   : > { %5628 = vtanh.f32 %v2719_v24  ;;  %v8715_v24 = vld [vmem:[#allocation12 + $0xe0] ss:$16 sps:$4 sm:$0xff]  }
 0x9d8   : > { %10960 = vst [vmem:[#allocation41_spill] sm:$0xff] %v8715_v24 }
 0x9e1   : > { %v5629_v14 = vpop.eup %5628 }
 0x9e2   : > { %v2722_v30 = vmul.f32 %v5629_v14, %v2721_v34  ;;  %v8721_v34 = vld [vmem:[#allocation12 + $0x104] ss:$16 sps:$4 sm:$0xff]   ;;  %v8724_v14 = vld [vmem:[#allocation12 + $0x10c] ss:$16 sps:$4 sm:$0xff]  }
 0x9e3   : > { %10962 = vst [vmem:[#allocation43_spill] sm:$0xff] %v8721_v34  ;;  %10963 = vst [vmem:[#allocation44_spill] sm:$0xff] %v8724_v14 }
 0x9e4   : > { %v2724_v20 = vadd.f32 %v2723_v6, %v2722_v30  ;;  %v8727_v30 = vld [vmem:[#allocation12 + $0x100] ss:$16 sps:$4 sm:$0xff]   ;;  %v8730_v6 = vld [vmem:[#allocation12 + $0x108] ss:$16 sps:$4 sm:$0xff]  }
 0x9e5   : > { %10964 = vst [vmem:[#allocation45_spill] sm:$0xff] %v8727_v30  ;;  %10965 = vst [vmem:[#allocation46_spill] sm:$0xff] %v8730_v6 }
 0x9e6   : > { %v2725_v21 = vpack.c.bf16 %v2724_v20, %v2724_v20 }
 0x9e8   : > { %2760 = vmatmul.mubr.bf16.vlgmr.msra.gmra.mrb[40].mxu0 %v2725_v21  ;;  %2801 = vmatmul.mubr.bf16.vlgmr.msra.gmra.mrb[48].mxu1 %v2725_v21  ;;  %v8736_v21 = vld [vmem:[#allocation12 + $0x12c] ss:$16 sps:$4 sm:$0xff]  }
 0x9e9   : > { %2850 = vmatpush1.bf16.msra.mxu0 %v8311_v42  ;;  %5023 = vmatpush3.bf16.msra.mxu1 %v8565_v36  ;;  %v8581_v42 = vld [vmem:[#allocation9 + $0x38] ss:$12 sps:$4 sm:$0xff]   ;;  %10967 = vst [vmem:[#allocation48_spill] sm:$0xff] %v8736_v21 }
 0x9ea   : > { %2851 = vmatprep.subr.bf16.mxu0 %v8316_v27  ;;  %5024 = vmatprep.subr.bf16.mxu1 %v10644_v26  ;;  %v8587_v27 = vld [vmem:[#allocation9 + $0x50] ss:$12 sps:$4 sm:$0xff]  }
 0x9eb   : > { %2881 = vmatprep.mubr.bf16.mxu0 %v10647_v18  ;;  %5038 = vmatprep.mubr.msk.bf16.mxu1 %vm6694_vm0, %v10644_v26 }
 0x9ed   : > { %2852 = vmatpush1.bf16.msra.mxu0 %v8327_v62  ;;  %5025 = vmatpush3.bf16.msra.mxu1 %v8575_v37  ;;  %v8593_v62 = vld [vmem:[#allocation9 + $0x68] ss:$12 sps:$4 sm:$0xff]  }
 0x9ee   : > { %2853 = vmatprep.subr.bf16.mxu0 %v8331_v55  ;;  %5026 = vmatprep.subr.bf16.mxu1 %v10644_v26  ;;  %v8598_v55 = vstv %s2831_s2  ;;  %s3494_s2 = ssub.f32 1.0, %s3491_s1 }
 0x9f1   : > { %2854 = vmatpush1.bf16.msra.mxu0 %v8337_v8  ;;  %5027 = vmatpush3.bf16.msra.mxu1 %v8581_v42  ;;  %v8601_v8 = vld [vmem:[#allocation9 + $0x80] ss:$12 sps:$4 sm:$0xff]  }
 0x9f2   : > { %2855 = vmatprep.subr.bf16.mxu0 %v8341_v3  ;;  %5028 = vmatprep.subr.bf16.mxu1 %v10644_v26  ;;  %v8604_v3 = vstv %s2834_s12  ;;  %s3818_s12 = sadd.s32 6, %s7570_s24 }
 0x9f3   : > { %p9774_p9 = scmp.lt.s32.totalorder %s3818_s12, 12 }
 0x9f5   : > { %2856 = vmatpush1.bf16.msra.mxu0 %v8345_v56  ;;  %5029 = vmatpush3.bf16.msra.mxu1 %v8587_v27  ;;  %v2833_v56 = vmul.f32 %v8598_v55, %v8489_v47  ;;  %s3820_s26 = scalar_select %p9774_p9, 1, 0 }
 0x9f6   : > { %2857 = vmatprep.subr.bf16.mxu0 %v8349_v28  ;;  %5030 = vmatprep.subr.bf16.mxu1 %v10644_v26  ;;  %v2838_v28 = vmul.f32 %v8598_v55, %v2724_v20  ;;  %v8733_v20 = vld [vmem:[#allocation12 + $0x124] ss:$16 sps:$4 sm:$0xff]  }
 0x9f7   : > { %10966 = vst [vmem:[#allocation47_spill] sm:$0xff] %v8733_v20  ;;  %s3821_s25 = scvt.s32.f32 %s3820_s26 }
 0x9f9   : > { %2858 = vmatpush1.bf16.msra.mxu0 %v8353_v19  ;;  %5031 = vmatpush3.bf16.msra.mxu1 %v8593_v62  ;;  %v2836_v19 = vmul.f32 %v8604_v3, %v8388_v46  ;;  %v8626_v46 = vld [vmem:[#allocation9 + $0xb0] ss:$12 sps:$4 sm:$0xff]  }
 0x9fa   : > { %2859 = vmatprep.subr.bf16.mxu0 %v8357_v52  ;;  %5032 = vmatprep.subr.bf16.mxu1 %v10644_v26  ;;  %v8614_v52 = vld [vmem:[#allocation9 + $0x98] ss:$12 sps:$4 sm:$0xff]  }
 0x9fd   : > { %2860 = vmatpush1.bf16.msra.mxu0 %v8363_v4  ;;  %5033 = vmatpush3.bf16.msra.mxu1 %v8601_v8  ;;  %v2839_v4 = vmul.f32 %v8604_v3, %v8390_v50  ;;  %v8632_v50 = vld [vmem:[#allocation12 + $0xc] ss:$16 sps:$4 sm:$0xff]  }
 0x9fe   : > { %2861 = vmatprep.subr.bf16.mxu0 %v8371_v17  ;;  %5034 = vmatprep.subr.bf16.mxu1 %v10644_v26  ;;  %v8621_v17 = vadd.f32 %v2836_v19, %v2833_v56  ;;  %v8739_v56 = vld [vmem:[#allocation12 + $0x120] ss:$16 sps:$4 sm:$0xff]   ;;  %v8745_v19 = vld [vmem:[#allocation12 + $0x144] ss:$16 sps:$4 sm:$0xff]  }
 0x9ff   : > { %v8623_v47 = vadd.f32 %v2839_v4, %v2838_v28  ;;  %10968 = vst [vmem:[#allocation49_spill] sm:$0xff] %v8739_v56  ;;  %v8742_v28 = vld [vmem:[#allocation12 + $0x128] ss:$16 sps:$4 sm:$0xff]   ;;  %10970 = vst [vmem:[#allocation51_spill] sm:$0xff] %v8745_v19  ;;  %v8748_v4 = vld [vmem:[#allocation12 + $0x14c] ss:$16 sps:$4 sm:$0xff]  }
 0xa00   : > { %10969 = vst [vmem:[#allocation50_spill] sm:$0xff] %v8742_v28  ;;  %10971 = vst [vmem:[#allocation52_spill] sm:$0xff] %v8748_v4 }
 0xa01   : > { %2862 = vmatpush1.bf16.msra.mxu0 %v8378_v45  ;;  %5035 = vmatpush3.bf16.msra.mxu1 %v8614_v52  ;;  %v2848_v45 = vpack.c.bf16 %v8621_v17, %v8621_v17 }
 0xa02   : > { %2863 = vmatprep.subr.bf16.mxu0 %v8384_v54  ;;  %5036 = vmatprep.subr.bf16.mxu1 %v10644_v26  ;;  %v2953_v54 = vpack.c.bf16 %v8623_v47, %v8623_v47 }
 0xa05   : > { %2864 = vmatpush1.bf16.msra.mxu0 %v8392_v60  ;;  %5037 = vmatpush3.bf16.msra.mxu1 %v8626_v46  ;;  %v8638_v60 = vld [vmem:[#allocation12 + $0x8] ss:$16 sps:$4 sm:$0xff]  }
 0xa06   : > { %2954 = vmatprep.subr.bf16.mxu0 %v8398_v58  ;;  %2995 = vmatprep.subr.bf16.mxu1 %v8632_v50  ;;  %v8642_v58 = vld [vmem:[#allocation12 + $0x2c] ss:$16 sps:$4 sm:$0xff]  }
 0xa08   : > { %2882 = vmatmul.mubr.bf16.vlgmr.msra.gmra.mrb[44].mxu0 %v2848_v45  ;;  %5039 = vmatmul.mubr.bf16.vlgmr.msra.gmra.mrb[52].mxu1 %v2848_v45  ;;  %v8751_v45 = vld [vmem:[#allocation12 + $0x140] ss:$16 sps:$4 sm:$0xff]  }
 0xa09   : > { %2986 = vmatprep.mubr.bf16.mxu0 %v2953_v54  ;;  %3027 = vmatprep.mubr.bf16.mxu1 %v2953_v54  ;;  %10972 = vst [vmem:[#allocation53_spill] sm:$0xff] %v8751_v45  ;;  %v8754_v54 = vld [vmem:[#allocation12 + $0x148] ss:$16 sps:$4 sm:$0xff]  }
 0xa0a   : > { %2955 = vmatpush1.bf16.msra.mxu0 %v8404_v43  ;;  %2996 = vmatpush1.bf16.msra.mxu1 %v8638_v60  ;;  %v8652_v43 = vld [vmem:[#allocation12 + $0x4c] ss:$16 sps:$4 sm:$0xff]   ;;  %10973 = vst [vmem:[#allocation54_spill] sm:$0xff] %v8754_v54 }
 0xa0b   : > { %2956 = vmatprep.subr.bf16.mxu0 %v8408_v32  ;;  %2997 = vmatprep.subr.bf16.mxu1 %v8642_v58  ;;  %v8658_v32 = vld [vmem:[#allocation12 + $0x48] ss:$16 sps:$4 sm:$0xff]  }
 0xa0e   : > { %2957 = vmatpush1.bf16.msra.mxu0 %v8412_v31  ;;  %2998 = vmatpush1.bf16.msra.mxu1 %v8646_v38  ;;  %v8661_v31 = vld [vmem:[#allocation12 + $0x64] ss:$16 sps:$4 sm:$0xff]  }
 0xa0f   : > { %2958 = vmatprep.subr.bf16.mxu0 %v8649_v35  ;;  %2999 = vmatprep.subr.bf16.mxu1 %v8652_v43 }
 0xa12   : > { %2959 = vmatpush1.bf16.msra.mxu0 %v8655_v13  ;;  %3000 = vmatpush1.bf16.msra.mxu1 %v8658_v32 }
 0xa13   : > { %2960 = vmatprep.subr.bf16.mxu0 %v8661_v31  ;;  %3001 = vmatprep.subr.bf16.mxu1 %v8664_v44 }
 0xa16   : > { %2961 = vmatpush1.bf16.msra.mxu0 %v8667_v1  ;;  %3002 = vmatpush1.bf16.msra.mxu1 %v8670_v40 }
 0xa17   : > { %2962 = vmatprep.subr.bf16.mxu0 %v8673_v63  ;;  %3003 = vmatprep.subr.bf16.mxu1 %v8676_v16 }
 0xa1a   : > { %2963 = vmatpush1.bf16.msra.mxu0 %v8679_v49  ;;  %3004 = vmatpush1.bf16.msra.mxu1 %v8682_v22 }
 0xa1b   : > { %2964 = vmatprep.subr.bf16.mxu0 %v8685_v11  ;;  %3005 = vmatprep.subr.bf16.mxu1 %v8688_v48 }
 0xa1e   : > { %2965 = vmatpush1.bf16.msra.mxu0 %v8691_v10  ;;  %3006 = vmatpush1.bf16.msra.mxu1 %v8694_v29 }
 0xa1f   : > { %2966 = vmatprep.subr.bf16.mxu0 %v8697_v25  ;;  %3007 = vmatprep.subr.bf16.mxu1 %v8700_v7 }
 0xa22   : > { %2967 = vmatpush1.bf16.msra.mxu0 %v8703_v12  ;;  %3008 = vmatpush1.bf16.msra.mxu1 %v8706_v33 }
 0xa23   : > { %2968 = vmatprep.subr.bf16.mxu0 %v8709_v59  ;;  %3009 = vmatprep.subr.bf16.mxu1 %v8712_v61 }
 0xa26   : > { %2969 = vmatpush1.bf16.msra.mxu0 %v8715_v24  ;;  %3010 = vmatpush1.bf16.msra.mxu1 %v8718_v0 }
 0xa27   : > { %2970 = vmatprep.subr.bf16.mxu0 %v8721_v34  ;;  %3011 = vmatprep.subr.bf16.mxu1 %v8724_v14 }
 0xa2a   : > { %2971 = vmatpush1.bf16.msra.mxu0 %v8727_v30  ;;  %3012 = vmatpush1.bf16.msra.mxu1 %v8730_v6 }
 0xa2b   : > { %2972 = vmatprep.subr.bf16.mxu0 %v8733_v20  ;;  %3013 = vmatprep.subr.bf16.mxu1 %v8736_v21 }
 0xa2e   : > { %2973 = vmatpush1.bf16.msra.mxu0 %v8739_v56  ;;  %3014 = vmatpush1.bf16.msra.mxu1 %v8742_v28  ;;  %v8760_v28 = vld [vmem:[#allocation12 + $0x16c] ss:$16 sps:$4 sm:$0xff]  }
 0xa2f   : > { %2974 = vmatprep.subr.bf16.mxu0 %v8745_v19  ;;  %3015 = vmatprep.subr.bf16.mxu1 %v8748_v4  ;;  %10975 = vst [vmem:[#allocation56_spill] sm:$0xff] %v8760_v28  ;;  %v8763_v19 = vld [vmem:[#allocation12 + $0x160] ss:$16 sps:$4 sm:$0xff]   ;;  %v8766_v4 = vld [vmem:[#allocation12 + $0x168] ss:$16 sps:$4 sm:$0xff]  }
 0xa30   : > { %10976 = vst [vmem:[#allocation57_spill] sm:$0xff] %v8763_v19  ;;  %10977 = vst [vmem:[#allocation58_spill] sm:$0xff] %v8766_v4 }
 0xa32   : > { %2975 = vmatpush1.bf16.msra.mxu0 %v8751_v45  ;;  %3016 = vmatpush1.bf16.msra.mxu1 %v8754_v54  ;;  %v8769_v45 = vld [vmem:[#allocation12 + $0x184] ss:$16 sps:$4 sm:$0xff]   ;;  %v8772_v54 = vld [vmem:[#allocation12 + $0x18c] ss:$16 sps:$4 sm:$0xff]  }
 0xa33   : > { %2976 = vmatprep.subr.bf16.mxu0 %v8757_v57  ;;  %3017 = vmatprep.subr.bf16.mxu1 %v8760_v28  ;;  %10978 = vst [vmem:[#allocation59_spill] sm:$0xff] %v8769_v45  ;;  %10979 = vst [vmem:[#allocation60_spill] sm:$0xff] %v8772_v54  ;;  %v8775_v57 = vld [vmem:[#allocation12 + $0x180] ss:$16 sps:$4 sm:$0xff]   ;;  %v8778_v28 = vld [vmem:[#allocation12 + $0x188] ss:$16 sps:$4 sm:$0xff]  }
 0xa34   : > { %10980 = vst [vmem:[#allocation61_spill] sm:$0xff] %v8775_v57  ;;  %10981 = vst [vmem:[#allocation119_spill] sm:$0xff] %v8778_v28 }
 0xa36   : > { %2977 = vmatpush1.bf16.msra.mxu0 %v8763_v19  ;;  %3018 = vmatpush1.bf16.msra.mxu1 %v8766_v4  ;;  %v8781_v19 = vld [vmem:[#allocation12 + $0x1a4] ss:$16 sps:$4 sm:$0xff]   ;;  %v8784_v4 = vld [vmem:[#allocation12 + $0x1ac] ss:$16 sps:$4 sm:$0xff]  }
 0xa37   : > { %2978 = vmatprep.subr.bf16.mxu0 %v8769_v45  ;;  %3019 = vmatprep.subr.bf16.mxu1 %v8772_v54  ;;  %10982 = vst [vmem:[#allocation62_spill] sm:$0xff] %v8781_v19  ;;  %10983 = vst [vmem:[#allocation63_spill] sm:$0xff] %v8784_v4  ;;  %v8787_v45 = vld [vmem:[#allocation12 + $0x1a0] ss:$16 sps:$4 sm:$0xff]   ;;  %v8790_v54 = vld [vmem:[#allocation12 + $0x1a8] ss:$16 sps:$4 sm:$0xff]  }
 0xa38   : > { %10984 = vst [vmem:[#allocation64_spill] sm:$0xff] %v8787_v45  ;;  %10985 = vst [vmem:[#allocation65_spill] sm:$0xff] %v8790_v54 }
 0xa3a   : > { %2979 = vmatpush1.bf16.msra.mxu0 %v8775_v57  ;;  %3020 = vmatpush1.bf16.msra.mxu1 %v8778_v28  ;;  %v8793_v57 = vld [vmem:[#allocation12 + $0x1c4] ss:$16 sps:$4 sm:$0xff]   ;;  %v8796_v28 = vld [vmem:[#allocation12 + $0x1cc] ss:$16 sps:$4 sm:$0xff]  }
 0xa3b   : > { %2980 = vmatprep.subr.bf16.mxu0 %v8781_v19  ;;  %3021 = vmatprep.subr.bf16.mxu1 %v8784_v4  ;;  %10986 = vst [vmem:[#allocation66_spill] sm:$0xff] %v8793_v57  ;;  %10987 = vst [vmem:[#allocation67_spill] sm:$0xff] %v8796_v28  ;;  %v8799_v19 = vld [vmem:[#allocation12 + $0x1c0] ss:$16 sps:$4 sm:$0xff]   ;;  %v8802_v4 = vld [vmem:[#allocation12 + $0x1c8] ss:$16 sps:$4 sm:$0xff]  }
 0xa3c   : > { %10988 = vst [vmem:[#allocation68_spill] sm:$0xff] %v8799_v19  ;;  %10989 = vst [vmem:[#allocation69_spill] sm:$0xff] %v8802_v4 }
 0xa3e   : > { %2981 = vmatpush1.bf16.msra.mxu0 %v8787_v45  ;;  %3022 = vmatpush1.bf16.msra.mxu1 %v8790_v54  ;;  %v8805_v45 = vld [vmem:[#allocation12 + $0x1e4] ss:$16 sps:$4 sm:$0xff]   ;;  %v8808_v54 = vld [vmem:[#allocation12 + $0x1ec] ss:$16 sps:$4 sm:$0xff]  }
 0xa3f   : > { %2982 = vmatprep.subr.bf16.mxu0 %v8793_v57  ;;  %3023 = vmatprep.subr.bf16.mxu1 %v8796_v28  ;;  %10990 = vst [vmem:[#allocation70_spill] sm:$0xff] %v8805_v45  ;;  %10991 = vst [vmem:[#allocation71_spill] sm:$0xff] %v8808_v54  ;;  %v8811_v57 = vld [vmem:[#allocation12 + $0x1e0] ss:$16 sps:$4 sm:$0xff]   ;;  %v8814_v28 = vld [vmem:[#allocation12 + $0x1e8] ss:$16 sps:$4 sm:$0xff]  }
 0xa40   : > { %10992 = vst [vmem:[#allocation72_spill] sm:$0xff] %v8811_v57  ;;  %10993 = vst [vmem:[#allocation73_spill] sm:$0xff] %v8814_v28 }
 0xa42   : > { %2983 = vmatpush1.bf16.msra.mxu0 %v8799_v19  ;;  %3024 = vmatpush1.bf16.msra.mxu1 %v8802_v4  ;;  %v8817_v19 = vld [vmem:[#allocation15 + $0x4] ss:$16 sps:$4 sm:$0xff]   ;;  %v8820_v4 = vld [vmem:[#allocation15 + $0xc] ss:$16 sps:$4 sm:$0xff]  }
 0xa43   : > { %2984 = vmatprep.subr.bf16.mxu0 %v8805_v45  ;;  %3025 = vmatprep.subr.bf16.mxu1 %v8808_v54  ;;  %10994 = vst [vmem:[#allocation74_spill] sm:$0xff] %v8817_v19  ;;  %10995 = vst [vmem:[#allocation76_spill] sm:$0xff] %v8820_v4 }
 0xa46   : > { %2985 = vmatpush1.bf16.msra.mxu0 %v8811_v57  ;;  %3026 = vmatpush1.bf16.msra.mxu1 %v8814_v28 }
 0xa47   : > { %3057 = vmatprep.subr.bf16.mxu0 %v8817_v19  ;;  %3098 = vmatprep.subr.bf16.mxu1 %v8820_v4 }
 0xabb   : > { %v2761_v45 = vpop.f32.mrb[40].mxu0  ;;  %v2802_v56 = vpop.f32.mrb[48].mxu1 }
 0xabc   : > { %v2762_v54 = vadd.f32 %v2761_v45, %v10893_v2  ;;  %v2763_v21 = vpop.f32.mrb[41].mxu0  ;;  %v2804_v20 = vpop.f32.mrb[49].mxu1 }
 0xabd   : > { %v2765_v6 = vpop.f32.mrb[42].mxu0  ;;  %v2806_v57 = vpop.f32.mrb[50].mxu1  ;;  %v2764_v34 = vadd.f32 %v2763_v21, %v10894_v41  ;;  %v2805_v45 = vadd.f32 %v2804_v20, %v10895_v53 }
 0xabe   : > { %v4814_v30 = vmul.f32 -1.442695, %v2762_v54  ;;  %v2766_v14 = vpop.f32.mrb[43].mxu0  ;;  %v2807_v28 = vpop.f32.mrb[51].mxu1  ;;  %v2803_v57 = vadd.f32 %v2802_v56, %v7744_v51  ;;  %v2845_v6 = vld [vmem:[%s7077_s29 + $0x60] sm:$0xff] }
 0xabf   : > { %v4815_v19 = vmul.f32 -1.442695, %v2764_v34 }
 0xac0   : > { %5630 = vpow2.f32 %v4814_v30  ;;  %v2846_v30 = vld [vmem:[%s7077_s29 + $0x68] sm:$0xff] }
 0xac1   : > { %5632 = vpow2.f32 %v4815_v19 }
 0xaca   : > { %v5631_v0 = vpop.eup %5630 }
 0xacb   : > { %v2812_v4 = vadd.f32 1.0, %v5631_v0  ;;  %v5633_v24 = vpop.eup %5632 }
 0xacc   : > { %v2818_v61 = vadd.f32 1.0, %v5633_v24 }
 0xacd   : > { %5634 = vrcp.f32 %v2812_v4 }
 0xace   : > { %5636 = vrcp.f32 %v2818_v61 }
 0xad7   : > { %v5635_v2 = vpop.eup %5634 }
 0xad8   : > { %v2821_v14 = vmul.f32 %v5635_v2, %v2805_v45  ;;  %v5637_v53 = vpop.eup %5636 }
 0xad9   : > { %v2824_v2 = vsub.f32 1.0, %v5637_v53  ;;  %v2826_v45 = vmul.f32 %v5637_v53, %v8487_v39 }
 0xada   : > { %v2822_v28 = vadd.f32 %v2821_v14, %v2803_v57 }
 0xadb   : > { %v2883_v54 = vpop.f32.mrb[44].mxu0  ;;  %v2924_v21 = vpop.f32.mrb[52].mxu1 }
 0xadc   : > { %5638 = vtanh.f32 %v2822_v28  ;;  %v2930_v34 = vadd.f32 %v2883_v54, %v2845_v6  ;;  %v2885_v19 = vpop.f32.mrb[45].mxu0  ;;  %v5040_v41 = vpop.f32.mrb[53].mxu1 }
 0xadd   : > { %v2887_v0 = vpop.f32.mrb[46].mxu0  ;;  %v2927_v4 = vpop.f32.mrb[54].mxu1  ;;  %v2937_v20 = vadd.f32 %v2885_v19, %v2846_v30  ;;  %v2847_v30 = vld [vmem:[%s7077_s29 + $0x70] sm:$0xff] }
 0xade   : > { %v4816_v59 = vmul.f32 -1.442695, %v2930_v34  ;;  %v2888_v24 = vpop.f32.mrb[47].mxu0  ;;  %v5041_v33 = vpop.f32.mrb[55].mxu1  ;;  %v8830_v34 = vld [vmem:[#allocation10] ss:$0 sm:$0xff] }
 0xadf   : > { %v4817_v61 = vmul.f32 -1.442695, %v2937_v20  ;;  %v2944_v33 = vadd.f32 %v8830_v34, %v2924_v21 }
 0xae0   : > { %5640 = vpow2.f32 %v4816_v59 }
 0xae1   : > { %5642 = vpow2.f32 %v4817_v61  ;;  %v2842_v61 = vmul.f32 %v8604_v3, %v8487_v39  ;;  %v8849_v3 = vld [vmem:[#allocation15 + $0x8] ss:$16 sps:$4 sm:$0xff]   ;;  %v8906_v39 = vld [vmem:[#allocation15 + $0xa0] ss:$16 sps:$4 sm:$0xff]  }
 0xae2   : > { %11013 = vst [vmem:[#allocation94_spill] sm:$0xff] %v8906_v39 }
 0xae6   : > { %v5639_v56 = vpop.eup %5638 }
 0xae7   : > { %v2825_v57 = vmul.f32 %v5639_v56, %v2824_v2 }
 0xae9   : > { %v2827_v14 = vadd.f32 %v2826_v45, %v2825_v57 }
 0xaea   : > { %v5641_v6 = vpop.eup %5640 }
 0xaeb   : > { %v2934_v28 = vadd.f32 1.0, %v5641_v6  ;;  %v5643_v41 = vpop.eup %5642  ;;  %v2841_v53 = vmul.f32 %v8598_v55, %v2827_v14  ;;  %v8846_v55 = vld [vmem:[#allocation15] ss:$16 sps:$4 sm:$0xff]   ;;  %v8852_v14 = vld [vmem:[#allocation15 + $0x24] ss:$16 sps:$4 sm:$0xff]  }
 0xaec   : > { %v2941_v54 = vadd.f32 1.0, %v5643_v41  ;;  %v8858_v41 = vld [vmem:[#allocation15 + $0x20] ss:$16 sps:$4 sm:$0xff]  }
 0xaed   : > { %5644 = vrcp.f32 %v2934_v28  ;;  %v8838_v45 = vadd.f32 %v2842_v61, %v2841_v53  ;;  %v8855_v28 = vld [vmem:[#allocation15 + $0x2c] ss:$16 sps:$4 sm:$0xff]   ;;  %10997 = vst [vmem:[#allocation78_spill] sm:$0xff] %v8858_v41  ;;  %v8882_v53 = vld [vmem:[#allocation15 + $0x60] ss:$16 sps:$4 sm:$0xff]  }
 0xaee   : > { %5646 = vrcp.f32 %v2941_v54  ;;  %v8861_v54 = vld [vmem:[#allocation15 + $0x28] ss:$16 sps:$4 sm:$0xff]   ;;  %11005 = vst [vmem:[#allocation86_spill] sm:$0xff] %v8882_v53  ;;  %v8891_v61 = vld [vmem:[#allocation15 + $0x8c] ss:$16 sps:$4 sm:$0xff]  }
 0xaef   : > { %10996 = vst [vmem:[#allocation77_spill] sm:$0xff] %v8838_v45  ;;  %v3056_v6 = vpack.c.bf16 %v8838_v45, %v8838_v45  ;;  %10998 = vst [vmem:[#allocation79_spill] sm:$0xff] %v8861_v54 }
 0xaf0   : > { %11008 = vst [vmem:[#allocation89_spill] sm:$0xff] %v8891_v61 }
 0xaf7   : > { %v5645_v59 = vpop.eup %5644 }
 0xaf8   : > { %v2945_v19 = vmul.f32 %v5645_v59, %v2944_v33  ;;  %v5647_v4 = vpop.eup %5646  ;;  %v8864_v33 = vld [vmem:[#allocation15 + $0x44] ss:$16 sps:$4 sm:$0xff]   ;;  %v8867_v59 = vld [vmem:[#allocation15 + $0x4c] ss:$16 sps:$4 sm:$0xff]  }
 0xaf9   : > { %v2948_v24 = vsub.f32 1.0, %v5647_v4  ;;  %v2950_v56 = vmul.f32 %v5647_v4, %v8621_v17  ;;  %10999 = vst [vmem:[#allocation80_spill] sm:$0xff] %v8864_v33  ;;  %11000 = vst [vmem:[#allocation81_spill] sm:$0xff] %v8867_v59  ;;  %v8879_v4 = vld [vmem:[#allocation15 + $0x6c] ss:$16 sps:$4 sm:$0xff]  }
 0xafa   : > { %v2946_v0 = vadd.f32 %v2945_v19, %v2847_v30  ;;  %v8870_v30 = vld [vmem:[#allocation15 + $0x40] ss:$16 sps:$4 sm:$0xff]   ;;  %v8873_v19 = vld [vmem:[#allocation15 + $0x48] ss:$16 sps:$4 sm:$0xff]   ;;  %11004 = vst [vmem:[#allocation85_spill] sm:$0xff] %v8879_v4 }
 0xafb   : > { %11001 = vst [vmem:[#allocation82_spill] sm:$0xff] %v8870_v30  ;;  %11002 = vst [vmem:[#allocation83_spill] sm:$0xff] %v8873_v19 }
 0xafc   : > { %5648 = vtanh.f32 %v2946_v0  ;;  %v8876_v0 = vld [vmem:[#allocation15 + $0x64] ss:$16 sps:$4 sm:$0xff]  }
 0xafd   : > { %11003 = vst [vmem:[#allocation84_spill] sm:$0xff] %v8876_v0 }
 0xb06   : > { %v5649_v20 = vpop.eup %5648 }
 0xb07   : > { %v2949_v2 = vmul.f32 %v5649_v20, %v2948_v24  ;;  %v8885_v24 = vld [vmem:[#allocation15 + $0x68] ss:$16 sps:$4 sm:$0xff]   ;;  %v8888_v20 = vld [vmem:[#allocation15 + $0x84] ss:$16 sps:$4 sm:$0xff]  }
 0xb08   : > { %11006 = vst [vmem:[#allocation87_spill] sm:$0xff] %v8885_v24  ;;  %11007 = vst [vmem:[#allocation88_spill] sm:$0xff] %v8888_v20 }
 0xb09   : > { %v8840_v21 = vadd.f32 %v2950_v56, %v2949_v2  ;;  %v8894_v2 = vld [vmem:[#allocation15 + $0x80] ss:$16 sps:$4 sm:$0xff]   ;;  %v8897_v56 = vld [vmem:[#allocation15 + $0x88] ss:$16 sps:$4 sm:$0xff]  }
 0xb0a   : > { %11009 = vst [vmem:[#allocation90_spill] sm:$0xff] %v8894_v2  ;;  %11010 = vst [vmem:[#allocation91_spill] sm:$0xff] %v8897_v56 }
 0xb0b   : > { %v2952_v57 = vpack.c.bf16 %v8840_v21, %v8840_v21 }
 0xb0d   : > { %2987 = vmatmul.mubr.bf16.vlgmr.msra.gmra.mrb[48].mxu0 %v2952_v57  ;;  %3028 = vmatmul.mubr.bf16.vlgmr.msra.gmra.mrb[56].mxu1 %v2952_v57  ;;  %v8900_v57 = vld [vmem:[#allocation15 + $0xa4] ss:$16 sps:$4 sm:$0xff]  }
 0xb0e   : > { %3089 = vmatprep.mubr.bf16.mxu0 %v3056_v6  ;;  %3130 = vmatprep.mubr.bf16.mxu1 %v3056_v6  ;;  %11011 = vst [vmem:[#allocation92_spill] sm:$0xff] %v8900_v57  ;;  %v8903_v6 = vld [vmem:[#allocation15 + $0xac] ss:$16 sps:$4 sm:$0xff]  }
 0xb0f   : > { %3058 = vmatpush1.bf16.msra.mxu0 %v8846_v55  ;;  %3099 = vmatpush1.bf16.msra.mxu1 %v8849_v3  ;;  %11012 = vst [vmem:[#allocation93_spill] sm:$0xff] %v8903_v6 }
 0xb10   : > { %3059 = vmatprep.subr.bf16.mxu0 %v8852_v14  ;;  %3100 = vmatprep.subr.bf16.mxu1 %v8855_v28 }
 0xb13   : > { %3060 = vmatpush1.bf16.msra.mxu0 %v8858_v41  ;;  %3101 = vmatpush1.bf16.msra.mxu1 %v8861_v54 }
 0xb14   : > { %3061 = vmatprep.subr.bf16.mxu0 %v8864_v33  ;;  %3102 = vmatprep.subr.bf16.mxu1 %v8867_v59 }
 0xb17   : > { %3062 = vmatpush1.bf16.msra.mxu0 %v8870_v30  ;;  %3103 = vmatpush1.bf16.msra.mxu1 %v8873_v19 }
 0xb18   : > { %3063 = vmatprep.subr.bf16.mxu0 %v8876_v0  ;;  %3104 = vmatprep.subr.bf16.mxu1 %v8879_v4 }
 0xb1b   : > { %3064 = vmatpush1.bf16.msra.mxu0 %v8882_v53  ;;  %3105 = vmatpush1.bf16.msra.mxu1 %v8885_v24 }
 0xb1c   : > { %3065 = vmatprep.subr.bf16.mxu0 %v8888_v20  ;;  %3106 = vmatprep.subr.bf16.mxu1 %v8891_v61  ;;  %v8909_v61 = vld [vmem:[#allocation15 + $0xa8] ss:$16 sps:$4 sm:$0xff]  }
 0xb1d   : > { %11014 = vst [vmem:[#allocation95_spill] sm:$0xff] %v8909_v61 }
 0xb1f   : > { %3066 = vmatpush1.bf16.msra.mxu0 %v8894_v2  ;;  %3107 = vmatpush1.bf16.msra.mxu1 %v8897_v56  ;;  %v8912_v2 = vld [vmem:[#allocation15 + $0xc4] ss:$16 sps:$4 sm:$0xff]   ;;  %v8915_v56 = vld [vmem:[#allocation15 + $0xcc] ss:$16 sps:$4 sm:$0xff]  }
 0xb20   : > { %3067 = vmatprep.subr.bf16.mxu0 %v8900_v57  ;;  %3108 = vmatprep.subr.bf16.mxu1 %v8903_v6  ;;  %11015 = vst [vmem:[#allocation96_spill] sm:$0xff] %v8912_v2  ;;  %11016 = vst [vmem:[#allocation97_spill] sm:$0xff] %v8915_v56  ;;  %v8918_v57 = vld [vmem:[#allocation15 + $0xc0] ss:$16 sps:$4 sm:$0xff]   ;;  %v8921_v6 = vld [vmem:[#allocation15 + $0xc8] ss:$16 sps:$4 sm:$0xff]  }
 0xb21   : > { %11017 = vst [vmem:[#allocation98_spill] sm:$0xff] %v8918_v57  ;;  %11018 = vst [vmem:[#allocation99_spill] sm:$0xff] %v8921_v6 }
 0xb23   : > { %3068 = vmatpush1.bf16.msra.mxu0 %v8906_v39  ;;  %3109 = vmatpush1.bf16.msra.mxu1 %v8909_v61  ;;  %v8924_v39 = vld [vmem:[#allocation15 + $0xe4] ss:$16 sps:$4 sm:$0xff]   ;;  %v8927_v61 = vld [vmem:[#allocation15 + $0xec] ss:$16 sps:$4 sm:$0xff]  }
 0xb24   : > { %3069 = vmatprep.subr.bf16.mxu0 %v8912_v2  ;;  %3110 = vmatprep.subr.bf16.mxu1 %v8915_v56  ;;  %11019 = vst [vmem:[#allocation100_spill] sm:$0xff] %v8924_v39  ;;  %11020 = vst [vmem:[#allocation101_spill] sm:$0xff] %v8927_v61  ;;  %v8930_v2 = vld [vmem:[#allocation15 + $0xe0] ss:$16 sps:$4 sm:$0xff]   ;;  %v8933_v56 = vld [vmem:[#allocation15 + $0xe8] ss:$16 sps:$4 sm:$0xff]  }
 0xb25   : > { %11021 = vst [vmem:[#allocation102_spill] sm:$0xff] %v8930_v2  ;;  %11022 = vst [vmem:[#allocation103_spill] sm:$0xff] %v8933_v56 }
 0xb27   : > { %3070 = vmatpush1.bf16.msra.mxu0 %v8918_v57  ;;  %3111 = vmatpush1.bf16.msra.mxu1 %v8921_v6  ;;  %v8936_v57 = vld [vmem:[#allocation15 + $0x104] ss:$16 sps:$4 sm:$0xff]   ;;  %v8939_v6 = vld [vmem:[#allocation15 + $0x10c] ss:$16 sps:$4 sm:$0xff]  }
 0xb28   : > { %3071 = vmatprep.subr.bf16.mxu0 %v8924_v39  ;;  %3112 = vmatprep.subr.bf16.mxu1 %v8927_v61  ;;  %11023 = vst [vmem:[#allocation104_spill] sm:$0xff] %v8936_v57  ;;  %11024 = vst [vmem:[#allocation105_spill] sm:$0xff] %v8939_v6  ;;  %v8942_v39 = vld [vmem:[#allocation15 + $0x100] ss:$16 sps:$4 sm:$0xff]   ;;  %v8945_v61 = vld [vmem:[#allocation15 + $0x108] ss:$16 sps:$4 sm:$0xff]  }
 0xb29   : > { %11025 = vst [vmem:[#allocation106_spill] sm:$0xff] %v8942_v39  ;;  %11026 = vst [vmem:[#allocation107_spill] sm:$0xff] %v8945_v61 }
 0xb2b   : > { %3072 = vmatpush1.bf16.msra.mxu0 %v8930_v2  ;;  %3113 = vmatpush1.bf16.msra.mxu1 %v8933_v56  ;;  %v8948_v2 = vld [vmem:[#allocation15 + $0x124] ss:$16 sps:$4 sm:$0xff]   ;;  %v8951_v56 = vld [vmem:[#allocation15 + $0x12c] ss:$16 sps:$4 sm:$0xff]  }
 0xb2c   : > { %3073 = vmatprep.subr.bf16.mxu0 %v8936_v57  ;;  %3114 = vmatprep.subr.bf16.mxu1 %v8939_v6  ;;  %11027 = vst [vmem:[#allocation108_spill] sm:$0xff] %v8948_v2  ;;  %11028 = vst [vmem:[#allocation109_spill] sm:$0xff] %v8951_v56  ;;  %v8954_v57 = vld [vmem:[#allocation15 + $0x120] ss:$16 sps:$4 sm:$0xff]   ;;  %v8957_v6 = vld [vmem:[#allocation15 + $0x128] ss:$16 sps:$4 sm:$0xff]  }
 0xb2d   : > { %11029 = vst [vmem:[#allocation110_spill] sm:$0xff] %v8954_v57  ;;  %11030 = vst [vmem:[#allocation111_spill] sm:$0xff] %v8957_v6 }
 0xb2f   : > { %3074 = vmatpush1.bf16.msra.mxu0 %v8942_v39  ;;  %3115 = vmatpush1.bf16.msra.mxu1 %v8945_v61  ;;  %v8960_v39 = vld [vmem:[#allocation15 + $0x144] ss:$16 sps:$4 sm:$0xff]   ;;  %v8963_v61 = vld [vmem:[#allocation15 + $0x14c] ss:$16 sps:$4 sm:$0xff]  }
 0xb30   : > { %3075 = vmatprep.subr.bf16.mxu0 %v8948_v2  ;;  %3116 = vmatprep.subr.bf16.mxu1 %v8951_v56  ;;  %11031 = vst [vmem:[#allocation112_spill] sm:$0xff] %v8960_v39  ;;  %11032 = vst [vmem:[#allocation113_spill] sm:$0xff] %v8963_v61  ;;  %v8966_v2 = vld [vmem:[#allocation15 + $0x140] ss:$16 sps:$4 sm:$0xff]   ;;  %v8969_v56 = vld [vmem:[#allocation15 + $0x148] ss:$16 sps:$4 sm:$0xff]  }
 0xb31   : > { %11033 = vst [vmem:[#allocation114_spill] sm:$0xff] %v8966_v2  ;;  %11034 = vst [vmem:[#allocation115_spill] sm:$0xff] %v8969_v56 }
 0xb33   : > { %3076 = vmatpush1.bf16.msra.mxu0 %v8954_v57  ;;  %3117 = vmatpush1.bf16.msra.mxu1 %v8957_v6  ;;  %v8972_v57 = vld [vmem:[#allocation15 + $0x164] ss:$16 sps:$4 sm:$0xff]   ;;  %v8975_v6 = vld [vmem:[#allocation15 + $0x16c] ss:$16 sps:$4 sm:$0xff]  }
 0xb34   : > { %3077 = vmatprep.subr.bf16.mxu0 %v8960_v39  ;;  %3118 = vmatprep.subr.bf16.mxu1 %v8963_v61  ;;  %11035 = vst [vmem:[#allocation116_spill] sm:$0xff] %v8972_v57  ;;  %11036 = vst [vmem:[#allocation117_spill] sm:$0xff] %v8975_v6  ;;  %v8978_v39 = vld [vmem:[#allocation15 + $0x160] ss:$16 sps:$4 sm:$0xff]   ;;  %v8981_v61 = vld [vmem:[#allocation15 + $0x168] ss:$16 sps:$4 sm:$0xff]  }
 0xb35   : > { %11037 = vst [vmem:[#allocation118_spill] sm:$0xff] %v8978_v39  ;;  %11038 = vst [vmem:[#allocation120_spill] sm:$0xff] %v8981_v61 }
 0xb37   : > { %3078 = vmatpush1.bf16.msra.mxu0 %v8966_v2  ;;  %3119 = vmatpush1.bf16.msra.mxu1 %v8969_v56  ;;  %v8984_v2 = vld [vmem:[#allocation15 + $0x184] ss:$16 sps:$4 sm:$0xff]   ;;  %v8987_v56 = vld [vmem:[#allocation15 + $0x18c] ss:$16 sps:$4 sm:$0xff]  }
 0xb38   : > { %3079 = vmatprep.subr.bf16.mxu0 %v8972_v57  ;;  %3120 = vmatprep.subr.bf16.mxu1 %v8975_v6  ;;  %11039 = vst [vmem:[#allocation121_spill] sm:$0xff] %v8984_v2  ;;  %11040 = vst [vmem:[#allocation122_spill] sm:$0xff] %v8987_v56  ;;  %v8990_v57 = vld [vmem:[#allocation15 + $0x180] ss:$16 sps:$4 sm:$0xff]   ;;  %v8993_v6 = vld [vmem:[#allocation15 + $0x188] ss:$16 sps:$4 sm:$0xff]  }
 0xb39   : > { %11041 = vst [vmem:[#allocation123_spill] sm:$0xff] %v8990_v57  ;;  %11042 = vst [vmem:[#allocation124_spill] sm:$0xff] %v8993_v6 }
 0xb3b   : > { %3080 = vmatpush1.bf16.msra.mxu0 %v8978_v39  ;;  %3121 = vmatpush1.bf16.msra.mxu1 %v8981_v61  ;;  %v8996_v39 = vld [vmem:[#allocation15 + $0x1a4] ss:$16 sps:$4 sm:$0xff]   ;;  %v8999_v61 = vld [vmem:[#allocation15 + $0x1ac] ss:$16 sps:$4 sm:$0xff]  }
 0xb3c   : > { %3081 = vmatprep.subr.bf16.mxu0 %v8984_v2  ;;  %3122 = vmatprep.subr.bf16.mxu1 %v8987_v56  ;;  %11043 = vst [vmem:[#allocation125_spill] sm:$0xff] %v8996_v39  ;;  %11044 = vst [vmem:[#allocation126_spill] sm:$0xff] %v8999_v61  ;;  %v9002_v2 = vld [vmem:[#allocation15 + $0x1a0] ss:$16 sps:$4 sm:$0xff]   ;;  %v9005_v56 = vld [vmem:[#allocation15 + $0x1a8] ss:$16 sps:$4 sm:$0xff]  }
 0xb3d   : > { %11045 = vst [vmem:[#allocation128_spill] sm:$0xff] %v9002_v2  ;;  %11046 = vst [vmem:[#allocation129_spill] sm:$0xff] %v9005_v56 }
 0xb3f   : > { %3082 = vmatpush1.bf16.msra.mxu0 %v8990_v57  ;;  %3123 = vmatpush1.bf16.msra.mxu1 %v8993_v6  ;;  %v9008_v57 = vld [vmem:[#allocation15 + $0x1c4] ss:$16 sps:$4 sm:$0xff]   ;;  %v9011_v6 = vld [vmem:[#allocation15 + $0x1cc] ss:$16 sps:$4 sm:$0xff]  }
 0xb40   : > { %3083 = vmatprep.subr.bf16.mxu0 %v8996_v39  ;;  %3124 = vmatprep.subr.bf16.mxu1 %v8999_v61  ;;  %11047 = vst [vmem:[#allocation130_spill] sm:$0xff] %v9008_v57  ;;  %11048 = vst [vmem:[#allocation131_spill] sm:$0xff] %v9011_v6  ;;  %v9014_v39 = vld [vmem:[#allocation15 + $0x1c0] ss:$16 sps:$4 sm:$0xff]   ;;  %v9017_v61 = vld [vmem:[#allocation15 + $0x1c8] ss:$16 sps:$4 sm:$0xff]  }
 0xb41   : > { %11049 = vst [vmem:[#allocation132_spill] sm:$0xff] %v9014_v39  ;;  %11050 = vst [vmem:[#allocation133_spill] sm:$0xff] %v9017_v61 }
 0xb43   : > { %3084 = vmatpush1.bf16.msra.mxu0 %v9002_v2  ;;  %3125 = vmatpush1.bf16.msra.mxu1 %v9005_v56  ;;  %v9020_v2 = vld [vmem:[#allocation15 + $0x1e4] ss:$16 sps:$4 sm:$0xff]   ;;  %v9023_v56 = vld [vmem:[#allocation15 + $0x1ec] ss:$16 sps:$4 sm:$0xff]  }
 0xb44   : > { %3085 = vmatprep.subr.bf16.mxu0 %v9008_v57  ;;  %3126 = vmatprep.subr.bf16.mxu1 %v9011_v6  ;;  %11051 = vst [vmem:[#allocation134_spill] sm:$0xff] %v9020_v2  ;;  %11052 = vst [vmem:[#allocation135_spill] sm:$0xff] %v9023_v56  ;;  %v9026_v57 = vld [vmem:[#allocation15 + $0x1e0] ss:$16 sps:$4 sm:$0xff]   ;;  %v9029_v6 = vld [vmem:[#allocation15 + $0x1e8] ss:$16 sps:$4 sm:$0xff]  }
 0xb45   : > { %11053 = vst [vmem:[#allocation136_spill] sm:$0xff] %v9026_v57  ;;  %11054 = vst [vmem:[#allocation137_spill] sm:$0xff] %v9029_v6 }
 0xb47   : > { %3086 = vmatpush1.bf16.msra.mxu0 %v9014_v39  ;;  %3127 = vmatpush1.bf16.msra.mxu1 %v9017_v61  ;;  %v9032_v39 = vld [vmem:[#allocation9 + $0x4] ss:$12 sps:$4 sm:$0xff]  }
 0xb48   : > { %3087 = vmatprep.subr.bf16.mxu0 %v9020_v2  ;;  %3128 = vmatprep.subr.bf16.mxu1 %v9023_v56  ;;  %11055 = vst [vmem:[#allocation138_spill] sm:$0xff] %v9032_v39 }
 0xb4b   : > { %3088 = vmatpush1.bf16.msra.mxu0 %v9026_v57  ;;  %3129 = vmatpush1.bf16.msra.mxu1 %v9029_v6 }
 0xb4c   : > { %3179 = vmatprep.subr.bf16.mxu0 %v9032_v39  ;;  %5042 = vmatprep.subr.bf16.mxu1 %v10644_v26 }
 0xbe0   : > { %v2988_v61 = vpop.f32.mrb[48].mxu0  ;;  %v3029_v2 = vpop.f32.mrb[56].mxu1 }
 0xbe1   : > { %v2989_v20 = vadd.f32 %v2988_v61, %v10956_v23  ;;  %v2990_v24 = vpop.f32.mrb[49].mxu0  ;;  %v3031_v56 = vpop.f32.mrb[57].mxu1  ;;  %v3030_v23 = vadd.f32 %v3029_v2, %v7564_v5  ;;  %v9071_v2 = vld [vmem:[#allocation9 + $0x4c] ss:$12 sps:$4 sm:$0xff]  }
 0xbe2   : > { %v2992_v53 = vpop.f32.mrb[50].mxu0  ;;  %v3033_v4 = vpop.f32.mrb[58].mxu1  ;;  %v2991_v30 = vadd.f32 %v2990_v24, %v10752_v15  ;;  %v3032_v41 = vadd.f32 %v3031_v56, %v7560_v9  ;;  %v9079_v56 = vld [vmem:[#allocation9 + $0x64] ss:$12 sps:$4 sm:$0xff]  }
 0xbe3   : > { %v4818_v0 = vmul.f32 -1.442695, %v2989_v20  ;;  %v2993_v57 = vpop.f32.mrb[51].mxu0  ;;  %v3034_v19 = vpop.f32.mrb[59].mxu1 }
 0xbe4   : > { %v4819_v6 = vmul.f32 -1.442695, %v2991_v30  ;;  %v9087_v57 = vld [vmem:[#allocation9 + $0x7c] ss:$12 sps:$4 sm:$0xff]  }
 0xbe5   : > { %5650 = vpow2.f32 %v4818_v0 }
 0xbe6   : > { %5652 = vpow2.f32 %v4819_v6  ;;  %v9093_v6 = vld [vmem:[#allocation9 + $0x78] ss:$12 sps:$4 sm:$0xff]  }
 0xbef   : > { %v5651_v59 = vpop.eup %5650 }
 0xbf0   : > { %v3039_v39 = vadd.f32 1.0, %v5651_v59  ;;  %v5653_v33 = vpop.eup %5652 }
 0xbf1   : > { %v3045_v54 = vadd.f32 1.0, %v5653_v33  ;;  %v9041_v33 = vld [vmem:[#allocation9] ss:$12 sps:$4 sm:$0xff]  }
 0xbf2   : > { %5654 = vrcp.f32 %v3039_v39 }
 0xbf3   : > { %5656 = vrcp.f32 %v3045_v54  ;;  %v9067_v54 = vld [vmem:[#allocation9 + $0x30] ss:$12 sps:$4 sm:$0xff]  }
 0xbfc   : > { %v5655_v61 = vpop.eup %5654 }
 0xbfd   : > { %v3048_v4 = vmul.f32 %v5655_v61, %v3032_v41  ;;  %v5657_v19 = vpop.eup %5656  ;;  %v9046_v41 = vld [vmem:[#allocation9 + $0x1c] ss:$12 sps:$4 sm:$0xff]   ;;  %v9097_v61 = vstv %s3164_s27  ;;  %s4148_s27 = sadd.s32 7, %s7570_s24 }
 0xbfe   : > { %v3051_v24 = vsub.f32 1.0, %v5657_v19  ;;  %v3053_v20 = vmul.f32 %v5657_v19, %v8623_v47  ;;  %v3166_v19 = vmul.f32 %v9097_v61, %v8621_v17  ;;  %v9122_v17 = vld [vmem:[#allocation9 + $0xa8] ss:$12 sps:$4 sm:$0xff]   ;;  %p4149_p0 = scmp.lt.s32.totalorder %s4148_s27, 12 }
 0xbff   : > { %v3049_v53 = vadd.f32 %v3048_v4, %v3030_v23  ;;  %v9057_v23 = vld [vmem:[#allocation9 + $0x18] ss:$12 sps:$4 sm:$0xff]   ;;  %v9101_v4 = vld [vmem:[#allocation9 + $0x94] ss:$12 sps:$4 sm:$0xff]  }
 0xc00   : > { %s4150_s22 = scalar_select %p4149_p0, 1, 0 }
 0xc01   : > { %5658 = vtanh.f32 %v3049_v53 }
 0xc02   : > { %s4151_s28 = scvt.s32.f32 %s4150_s22 }
 0xc0b   : > { %v5659_v0 = vpop.eup %5658 }
 0xc0c   : > { %v3052_v30 = vmul.f32 %v5659_v0, %v3051_v24  ;;  %v9108_v24 = vld [vmem:[#allocation9 + $0x90] ss:$12 sps:$4 sm:$0xff]  }
 0xc0e   : > { %v3054_v59 = vadd.f32 %v3053_v20, %v3052_v30 }
 0xc10   : > { %v3055_v39 = vpack.c.bf16 %v3054_v59, %v3054_v59 }
 0xc12   : > { %3090 = vmatmul.mubr.bf16.vlgmr.msra.gmra.mrb[52].mxu0 %v3055_v39  ;;  %3131 = vmatmul.mubr.bf16.vlgmr.msra.gmra.mrb[60].mxu1 %v3055_v39  ;;  %v11079_v39 = vld [vmem:[#allocation60_spill] sm:$0xff] }
 0xc13   : > { %3180 = vmatpush1.bf16.msra.mxu0 %v9041_v33  ;;  %5043 = vmatpush3.bf16.msra.mxu1 %v8565_v36  ;;  %v9061_v36 = vld [vmem:[#allocation9 + $0x34] ss:$12 sps:$4 sm:$0xff]  }
 0xc14   : > { %3181 = vmatprep.subr.bf16.mxu0 %v9046_v41  ;;  %5044 = vmatprep.subr.bf16.mxu1 %v10644_v26 }
 0xc15   : > { %3211 = vmatprep.mubr.bf16.mxu0 %v10647_v18  ;;  %5058 = vmatprep.mubr.msk.bf16.mxu1 %vm6694_vm0, %v10644_v26 }
 0xc17   : > { %3182 = vmatpush1.bf16.msra.mxu0 %v9057_v23  ;;  %5045 = vmatpush3.bf16.msra.mxu1 %v8575_v37  ;;  %v9075_v37 = vld [vmem:[#allocation9 + $0x48] ss:$12 sps:$4 sm:$0xff]  }
 0xc18   : > { %3183 = vmatprep.subr.bf16.mxu0 %v9061_v36  ;;  %5046 = vmatprep.subr.bf16.mxu1 %v10644_v26 }
 0xc1b   : > { %3184 = vmatpush1.bf16.msra.mxu0 %v9067_v54  ;;  %5047 = vmatpush3.bf16.msra.mxu1 %v8581_v42  ;;  %v9083_v42 = vld [vmem:[#allocation9 + $0x60] ss:$12 sps:$4 sm:$0xff]  }
 0xc1c   : > { %3185 = vmatprep.subr.bf16.mxu0 %v9071_v2  ;;  %5048 = vmatprep.subr.bf16.mxu1 %v10644_v26 }
 0xc1f   : > { %3186 = vmatpush1.bf16.msra.mxu0 %v9075_v37  ;;  %5049 = vmatpush3.bf16.msra.mxu1 %v8587_v27  ;;  %v9091_v27 = vstv %s3161_s21  ;;  %s3824_s21 = ssub.f32 1.0, %s3821_s25 }
 0xc20   : > { %3187 = vmatprep.subr.bf16.mxu0 %v9079_v56  ;;  %5050 = vmatprep.subr.bf16.mxu1 %v10644_v26  ;;  %v3168_v53 = vmul.f32 %v9091_v27, %v3054_v59  ;;  %v9134_v59 = vld [vmem:[#allocation12] ss:$16 sps:$4 sm:$0xff]  }
 0xc23   : > { %3188 = vmatpush1.bf16.msra.mxu0 %v9083_v42  ;;  %5051 = vmatpush3.bf16.msra.mxu1 %v8593_v62  ;;  %v3163_v62 = vmul.f32 %v9091_v27, %v8840_v21  ;;  %v9114_v21 = vld [vmem:[#allocation9 + $0xac] ss:$12 sps:$4 sm:$0xff]  }
 0xc24   : > { %3189 = vmatprep.subr.bf16.mxu0 %v9087_v57  ;;  %5052 = vmatprep.subr.bf16.mxu1 %v10644_v26 }
 0xc25   : > { %v9118_v0 = vadd.f32 %v3166_v19, %v3163_v62  ;;  %v11080_v62 = vld [vmem:[#allocation61_spill] sm:$0xff]  ;;  %v11082_v19 = vld [vmem:[#allocation62_spill] sm:$0xff] }
 0xc27   : > { %3190 = vmatpush1.bf16.msra.mxu0 %v9093_v6  ;;  %5053 = vmatpush3.bf16.msra.mxu1 %v8601_v8  ;;  %v3169_v8 = vmul.f32 %v9097_v61, %v8623_v47  ;;  %v9128_v47 = vld [vmem:[#allocation12 + $0x4] ss:$16 sps:$4 sm:$0xff]  }
 0xc28   : > { %3191 = vmatprep.subr.bf16.mxu0 %v9101_v4  ;;  %5054 = vmatprep.subr.bf16.mxu1 %v10644_v26 }
 0xc29   : > { %v9120_v30 = vadd.f32 %v3169_v8, %v3168_v53  ;;  %v11081_v53 = vld [vmem:[#allocation119_spill] sm:$0xff] }
 0xc2a   : > { %v11083_v8 = vld [vmem:[#allocation63_spill] sm:$0xff] }
 0xc2b   : > { %3192 = vmatpush1.bf16.msra.mxu0 %v9108_v24  ;;  %5055 = vmatpush3.bf16.msra.mxu1 %v8614_v52  ;;  %v3178_v52 = vpack.c.bf16 %v9118_v0, %v9118_v0  ;;  %v3283_v20 = vpack.c.bf16 %v9120_v30, %v9120_v30 }
 0xc2c   : > { %3193 = vmatprep.subr.bf16.mxu0 %v9114_v21  ;;  %5056 = vmatprep.subr.bf16.mxu1 %v10644_v26 }
 0xc2f   : > { %3194 = vmatpush1.bf16.msra.mxu0 %v9122_v17  ;;  %5057 = vmatpush3.bf16.msra.mxu1 %v8626_v46  ;;  %v9138_v46 = vld [vmem:[#allocation12 + $0x24] ss:$16 sps:$4 sm:$0xff]  }
 0xc30   : > { %3284 = vmatprep.subr.bf16.mxu0 %v9128_v47  ;;  %3325 = vmatprep.subr.bf16.mxu1 %v8632_v50  ;;  %v9142_v50 = vld [vmem:[#allocation12 + $0x20] ss:$16 sps:$4 sm:$0xff]  }
 0xc32   : > { %3212 = vmatmul.mubr.bf16.vlgmr.msra.gmra.mrb[56].mxu0 %v3178_v52  ;;  %5059 = vmatmul.mubr.bf16.vlgmr.msra.gmra.mrb[64].mxu1 %v3178_v52  ;;  %v11084_v52 = vld [vmem:[#allocation64_spill] sm:$0xff] }
 0xc33   : > { %3316 = vmatprep.mubr.bf16.mxu0 %v3283_v20  ;;  %3357 = vmatprep.mubr.bf16.mxu1 %v3283_v20  ;;  %v11085_v20 = vld [vmem:[#allocation65_spill] sm:$0xff] }
 0xc34   : > { %3285 = vmatpush1.bf16.msra.mxu0 %v9134_v59  ;;  %3326 = vmatpush1.bf16.msra.mxu1 %v8638_v60  ;;  %v11057_v60 = vld [vmem:[#allocation38_spill] sm:$0xff] }
 0xc35   : > { %3286 = vmatprep.subr.bf16.mxu0 %v9138_v46  ;;  %3327 = vmatprep.subr.bf16.mxu1 %v8642_v58  ;;  %v11058_v58 = vld [vmem:[#allocation39_spill] sm:$0xff] }
 0xc38   : > { %3287 = vmatpush1.bf16.msra.mxu0 %v9142_v50  ;;  %3328 = vmatpush1.bf16.msra.mxu1 %v8646_v38  ;;  %v11059_v38 = vld [vmem:[#allocation40_spill] sm:$0xff] }
 0xc39   : > { %3288 = vmatprep.subr.bf16.mxu0 %v8649_v35  ;;  %3329 = vmatprep.subr.bf16.mxu1 %v8652_v43  ;;  %v11060_v35 = vld [vmem:[#allocation41_spill] sm:$0xff]  ;;  %v11061_v43 = vld [vmem:[#allocation42_spill] sm:$0xff] }
 0xc3c   : > { %3289 = vmatpush1.bf16.msra.mxu0 %v8655_v13  ;;  %3330 = vmatpush1.bf16.msra.mxu1 %v8658_v32  ;;  %v11062_v13 = vld [vmem:[#allocation43_spill] sm:$0xff]  ;;  %v11063_v32 = vld [vmem:[#allocation44_spill] sm:$0xff] }
 0xc3d   : > { %3290 = vmatprep.subr.bf16.mxu0 %v8661_v31  ;;  %3331 = vmatprep.subr.bf16.mxu1 %v8664_v44  ;;  %v11064_v31 = vld [vmem:[#allocation45_spill] sm:$0xff]  ;;  %v11065_v44 = vld [vmem:[#allocation46_spill] sm:$0xff] }
 0xc40   : > { %3291 = vmatpush1.bf16.msra.mxu0 %v8667_v1  ;;  %3332 = vmatpush1.bf16.msra.mxu1 %v8670_v40  ;;  %v11066_v1 = vld [vmem:[#allocation47_spill] sm:$0xff]  ;;  %v11067_v40 = vld [vmem:[#allocation48_spill] sm:$0xff] }
 0xc41   : > { %3292 = vmatprep.subr.bf16.mxu0 %v8673_v63  ;;  %3333 = vmatprep.subr.bf16.mxu1 %v8676_v16  ;;  %v11068_v63 = vld [vmem:[#allocation49_spill] sm:$0xff]  ;;  %v11069_v16 = vld [vmem:[#allocation50_spill] sm:$0xff] }
 0xc44   : > { %3293 = vmatpush1.bf16.msra.mxu0 %v8679_v49  ;;  %3334 = vmatpush1.bf16.msra.mxu1 %v8682_v22  ;;  %v11070_v49 = vld [vmem:[#allocation51_spill] sm:$0xff]  ;;  %v11071_v22 = vld [vmem:[#allocation52_spill] sm:$0xff] }
 0xc45   : > { %3294 = vmatprep.subr.bf16.mxu0 %v8685_v11  ;;  %3335 = vmatprep.subr.bf16.mxu1 %v8688_v48  ;;  %v11072_v11 = vld [vmem:[#allocation53_spill] sm:$0xff]  ;;  %v11073_v48 = vld [vmem:[#allocation54_spill] sm:$0xff] }
 0xc48   : > { %3295 = vmatpush1.bf16.msra.mxu0 %v8691_v10  ;;  %3336 = vmatpush1.bf16.msra.mxu1 %v8694_v29  ;;  %v11074_v10 = vld [vmem:[#allocation55_spill] sm:$0xff]  ;;  %v11075_v29 = vld [vmem:[#allocation56_spill] sm:$0xff] }
 0xc49   : > { %3296 = vmatprep.subr.bf16.mxu0 %v8697_v25  ;;  %3337 = vmatprep.subr.bf16.mxu1 %v8700_v7  ;;  %v11076_v25 = vld [vmem:[#allocation57_spill] sm:$0xff]  ;;  %v11077_v7 = vld [vmem:[#allocation58_spill] sm:$0xff] }
 0xc4c   : > { %3297 = vmatpush1.bf16.msra.mxu0 %v8703_v12  ;;  %3338 = vmatpush1.bf16.msra.mxu1 %v11057_v60  ;;  %v11078_v12 = vld [vmem:[#allocation59_spill] sm:$0xff]  ;;  %v11086_v60 = vld [vmem:[#allocation66_spill] sm:$0xff] }
 0xc4d   : > { %3298 = vmatprep.subr.bf16.mxu0 %v11058_v58  ;;  %3339 = vmatprep.subr.bf16.mxu1 %v11059_v38  ;;  %v11087_v58 = vld [vmem:[#allocation67_spill] sm:$0xff]  ;;  %v11088_v38 = vld [vmem:[#allocation68_spill] sm:$0xff] }
 0xc50   : > { %3299 = vmatpush1.bf16.msra.mxu0 %v11060_v35  ;;  %3340 = vmatpush1.bf16.msra.mxu1 %v11061_v43  ;;  %v11089_v35 = vld [vmem:[#allocation69_spill] sm:$0xff]  ;;  %v11090_v43 = vld [vmem:[#allocation70_spill] sm:$0xff] }
 0xc51   : > { %3300 = vmatprep.subr.bf16.mxu0 %v11062_v13  ;;  %3341 = vmatprep.subr.bf16.mxu1 %v11063_v32  ;;  %v11091_v13 = vld [vmem:[#allocation71_spill] sm:$0xff]  ;;  %v11092_v32 = vld [vmem:[#allocation72_spill] sm:$0xff] }
 0xc54   : > { %3301 = vmatpush1.bf16.msra.mxu0 %v11064_v31  ;;  %3342 = vmatpush1.bf16.msra.mxu1 %v11065_v44  ;;  %v11093_v31 = vld [vmem:[#allocation73_spill] sm:$0xff]  ;;  %v11094_v44 = vld [vmem:[#allocation74_spill] sm:$0xff] }
 0xc55   : > { %3302 = vmatprep.subr.bf16.mxu0 %v11066_v1  ;;  %3343 = vmatprep.subr.bf16.mxu1 %v11067_v40  ;;  %v11095_v1 = vld [vmem:[#allocation76_spill] sm:$0xff] }
 0xc58   : > { %3303 = vmatpush1.bf16.msra.mxu0 %v11068_v63  ;;  %3344 = vmatpush1.bf16.msra.mxu1 %v11069_v16  ;;  %v11096_v16 = vld [vmem:[#allocation33_spill] sm:$0xff] }
 0xc59   : > { %3304 = vmatprep.subr.bf16.mxu0 %v11070_v49  ;;  %3345 = vmatprep.subr.bf16.mxu1 %v11071_v22 }
 0xc5c   : > { %3305 = vmatpush1.bf16.msra.mxu0 %v11072_v11  ;;  %3346 = vmatpush1.bf16.msra.mxu1 %v11073_v48 }
 0xc5d   : > { %3306 = vmatprep.subr.bf16.mxu0 %v11074_v10  ;;  %3347 = vmatprep.subr.bf16.mxu1 %v11075_v29 }
 0xc60   : > { %3307 = vmatpush1.bf16.msra.mxu0 %v11076_v25  ;;  %3348 = vmatpush1.bf16.msra.mxu1 %v11077_v7 }
 0xc61   : > { %3308 = vmatprep.subr.bf16.mxu0 %v11078_v12  ;;  %3349 = vmatprep.subr.bf16.mxu1 %v11079_v39  ;;  %v11097_v12 = vld [vmem:[#allocation34_spill] sm:$0xff] }
 0xc64   : > { %3309 = vmatpush1.bf16.msra.mxu0 %v11080_v62  ;;  %3350 = vmatpush1.bf16.msra.mxu1 %v11081_v53 }
 0xc65   : > { %3310 = vmatprep.subr.bf16.mxu0 %v11082_v19  ;;  %3351 = vmatprep.subr.bf16.mxu1 %v11083_v8 }
 0xc68   : > { %3311 = vmatpush1.bf16.msra.mxu0 %v11084_v52  ;;  %3352 = vmatpush1.bf16.msra.mxu1 %v11085_v20  ;;  %v11098_v20 = vld [vmem:[#allocation35_spill] sm:$0xff] }
 0xc69   : > { %3312 = vmatprep.subr.bf16.mxu0 %v11086_v60  ;;  %3353 = vmatprep.subr.bf16.mxu1 %v11087_v58 }
 0xc6c   : > { %3313 = vmatpush1.bf16.msra.mxu0 %v11088_v38  ;;  %3354 = vmatpush1.bf16.msra.mxu1 %v11089_v35 }
 0xc6d   : > { %3314 = vmatprep.subr.bf16.mxu0 %v11090_v43  ;;  %3355 = vmatprep.subr.bf16.mxu1 %v11091_v13  ;;  %v3175_v43 = vld [vmem:[%s7077_s29 + $0x78] sm:$0xff] }
 0xc70   : > { %3315 = vmatpush1.bf16.msra.mxu0 %v11092_v32  ;;  %3356 = vmatpush1.bf16.msra.mxu1 %v11093_v31 }
 0xc71   : > { %3387 = vmatprep.subr.bf16.mxu0 %v11094_v44  ;;  %3428 = vmatprep.subr.bf16.mxu1 %v11095_v1  ;;  %v3176_v1 = vld [vmem:[%s7077_s29 + $0x80] sm:$0xff] }
 0xce5   : > { %v3091_v40 = vpop.f32.mrb[52].mxu0  ;;  %v3132_v63 = vpop.f32.mrb[60].mxu1 }
 0xce6   : > { %v3092_v49 = vadd.f32 %v3091_v40, %v11096_v16  ;;  %v3093_v22 = vpop.f32.mrb[53].mxu0  ;;  %v3134_v11 = vpop.f32.mrb[61].mxu1  ;;  %v3133_v38 = vadd.f32 %v3132_v63, %v7744_v51 }
 0xce7   : > { %v3095_v48 = vpop.f32.mrb[54].mxu0  ;;  %v3136_v10 = vpop.f32.mrb[62].mxu1  ;;  %v3094_v39 = vadd.f32 %v3093_v22, %v11097_v12  ;;  %v3135_v60 = vadd.f32 %v3134_v11, %v11098_v20 }
 0xce8   : > { %v4820_v29 = vmul.f32 -1.442695, %v3092_v49  ;;  %v3096_v25 = vpop.f32.mrb[55].mxu0  ;;  %v3137_v7 = vpop.f32.mrb[63].mxu1 }
 0xce9   : > { %v4821_v62 = vmul.f32 -1.442695, %v3094_v39 }
 0xcea   : > { %5660 = vpow2.f32 %v4820_v29 }
 0xceb   : > { %5662 = vpow2.f32 %v4821_v62 }
 0xcf4   : > { %v5661_v53 = vpop.eup %5660 }
 0xcf5   : > { %v3142_v19 = vadd.f32 1.0, %v5661_v53  ;;  %v5663_v8 = vpop.eup %5662 }
 0xcf6   : > { %v3148_v52 = vadd.f32 1.0, %v5663_v8 }
 0xcf7   : > { %5664 = vrcp.f32 %v3142_v19 }
 0xcf8   : > { %5666 = vrcp.f32 %v3148_v52 }
 0xd01   : > { %v5665_v58 = vpop.eup %5664 }
 0xd02   : > { %v3151_v35 = vmul.f32 %v5665_v58, %v3135_v60  ;;  %v5667_v63 = vpop.eup %5666 }
 0xd03   : > { %v3154_v39 = vsub.f32 1.0, %v5667_v63  ;;  %v3156_v53 = vmul.f32 %v5667_v63, %v8838_v45  ;;  %v11102_v63 = vld [vmem:[#allocation80_spill] sm:$0xff] }
 0xd04   : > { %v3152_v13 = vadd.f32 %v3151_v35, %v3133_v38 }
 0xd05   : > { %v3213_v32 = vpop.f32.mrb[56].mxu0  ;;  %v3254_v31 = vpop.f32.mrb[64].mxu1 }
 0xd06   : > { %5668 = vtanh.f32 %v3152_v13  ;;  %v3260_v44 = vadd.f32 %v3213_v32, %v3175_v43  ;;  %v3215_v40 = vpop.f32.mrb[57].mxu0  ;;  %v5060_v49 = vpop.f32.mrb[65].mxu1  ;;  %v3274_v35 = vadd.f32 %v8830_v34, %v3254_v31  ;;  %v3177_v13 = vld [vmem:[%s7077_s29 + $0x88] sm:$0xff] }
 0xd07   : > { %v3217_v22 = vpop.f32.mrb[58].mxu0  ;;  %v3257_v48 = vpop.f32.mrb[66].mxu1  ;;  %v3267_v11 = vadd.f32 %v3215_v40, %v3176_v1 }
 0xd08   : > { %v4822_v10 = vmul.f32 -1.442695, %v3260_v44  ;;  %v3218_v29 = vpop.f32.mrb[59].mxu0  ;;  %v5061_v25 = vpop.f32.mrb[67].mxu1  ;;  %v3172_v48 = vmul.f32 %v9097_v61, %v8838_v45  ;;  %v11101_v61 = vld [vmem:[#allocation79_spill] sm:$0xff] }
 0xd09   : > { %v4823_v7 = vmul.f32 -1.442695, %v3267_v11  ;;  %v9487_v45 = vld [vmem:[#allocation12 + $0x164] ss:$16 sps:$4 sm:$0xff]  }
 0xd0a   : > { %5670 = vpow2.f32 %v4822_v10  ;;  %11177 = vst [vmem:[#allocation56_spill] sm:$0xff] %v9487_v45 }
 0xd0b   : > { %5672 = vpow2.f32 %v4823_v7  ;;  %v11103_v7 = vld [vmem:[#allocation81_spill] sm:$0xff] }
 0xd10   : > { %v5669_v62 = vpop.eup %5668 }
 0xd11   : > { %v3155_v19 = vmul.f32 %v5669_v62, %v3154_v39  ;;  %v11104_v39 = vld [vmem:[#allocation82_spill] sm:$0xff]  ;;  %v11105_v62 = vld [vmem:[#allocation83_spill] sm:$0xff] }
 0xd13   : > { %v3157_v8 = vadd.f32 %v3156_v53, %v3155_v19  ;;  %v11106_v53 = vld [vmem:[#allocation84_spill] sm:$0xff]  ;;  %v11111_v19 = vld [vmem:[#allocation89_spill] sm:$0xff] }
 0xd14   : > { %v5671_v52 = vpop.eup %5670 }
 0xd15   : > { %v3264_v60 = vadd.f32 1.0, %v5671_v52  ;;  %v5673_v58 = vpop.eup %5672  ;;  %v3171_v40 = vmul.f32 %v9091_v27, %v3157_v8  ;;  %v11100_v27 = vld [vmem:[#allocation78_spill] sm:$0xff]  ;;  %v11113_v52 = vld [vmem:[#allocation91_spill] sm:$0xff] }
 0xd16   : > { %v3271_v38 = vadd.f32 1.0, %v5673_v58  ;;  %v11112_v8 = vld [vmem:[#allocation90_spill] sm:$0xff]  ;;  %v11115_v58 = vld [vmem:[#allocation93_spill] sm:$0xff] }
 0xd17   : > { %5674 = vrcp.f32 %v3264_v60  ;;  %v9217_v25 = vadd.f32 %v3172_v48, %v3171_v40  ;;  %v11114_v60 = vld [vmem:[#allocation92_spill] sm:$0xff]  ;;  %v11123_v40 = vld [vmem:[#allocation101_spill] sm:$0xff] }
 0xd18   : > { %5676 = vrcp.f32 %v3271_v38  ;;  %v11116_v38 = vld [vmem:[#allocation94_spill] sm:$0xff]  ;;  %v11126_v48 = vld [vmem:[#allocation104_spill] sm:$0xff] }
 0xd19   : > { %11099 = vst [vmem:[#allocation38_spill] sm:$0xff] %v9217_v25  ;;  %v3386_v11 = vpack.c.bf16 %v9217_v25, %v9217_v25 }
 0xd21   : > { %v5675_v43 = vpop.eup %5674 }
 0xd22   : > { %v3275_v32 = vmul.f32 %v5675_v43, %v3274_v35  ;;  %v5677_v1 = vpop.eup %5676  ;;  %v11117_v35 = vld [vmem:[#allocation95_spill] sm:$0xff]  ;;  %v11118_v43 = vld [vmem:[#allocation96_spill] sm:$0xff] }
 0xd23   : > { %v3278_v49 = vsub.f32 1.0, %v5677_v1  ;;  %v3280_v29 = vmul.f32 %v5677_v1, %v9118_v0  ;;  %v11122_v1 = vld [vmem:[#allocation100_spill] sm:$0xff] }
 0xd24   : > { %v3276_v44 = vadd.f32 %v3275_v32, %v3177_v13  ;;  %v11119_v13 = vld [vmem:[#allocation97_spill] sm:$0xff]  ;;  %v11120_v32 = vld [vmem:[#allocation98_spill] sm:$0xff] }
 0xd26   : > { %5678 = vtanh.f32 %v3276_v44  ;;  %v11121_v44 = vld [vmem:[#allocation99_spill] sm:$0xff] }
 0xd30   : > { %v5679_v22 = vpop.eup %5678 }
 0xd31   : > { %v3279_v10 = vmul.f32 %v5679_v22, %v3278_v49  ;;  %v11124_v49 = vld [vmem:[#allocation102_spill] sm:$0xff]  ;;  %v11125_v22 = vld [vmem:[#allocation103_spill] sm:$0xff] }
 0xd33   : > { %v9219_v34 = vadd.f32 %v3280_v29, %v3279_v10  ;;  %v11127_v10 = vld [vmem:[#allocation105_spill] sm:$0xff]  ;;  %v11128_v29 = vld [vmem:[#allocation106_spill] sm:$0xff] }
 0xd35   : > { %v3282_v31 = vpack.c.bf16 %v9219_v34, %v9219_v34 }
 0xd37   : > { %3317 = vmatmul.mubr.bf16.vlgmr.msra.gmra.mrb[60].mxu0 %v3282_v31  ;;  %3358 = vmatmul.mubr.bf16.vlgmr.msra.gmra.mrb[68].mxu1 %v3282_v31  ;;  %v11129_v31 = vld [vmem:[#allocation107_spill] sm:$0xff] }
 0xd38   : > { %3419 = vmatprep.mubr.bf16.mxu0 %v3386_v11  ;;  %3460 = vmatprep.mubr.bf16.mxu1 %v3386_v11  ;;  %v11130_v11 = vld [vmem:[#allocation108_spill] sm:$0xff] }
 0xd39   : > { %3388 = vmatpush1.bf16.msra.mxu0 %v8846_v55  ;;  %3429 = vmatpush1.bf16.msra.mxu1 %v8849_v3  ;;  %v11107_v55 = vld [vmem:[#allocation85_spill] sm:$0xff]  ;;  %v11108_v3 = vld [vmem:[#allocation86_spill] sm:$0xff] }
 0xd3a   : > { %3389 = vmatprep.subr.bf16.mxu0 %v8852_v14  ;;  %3430 = vmatprep.subr.bf16.mxu1 %v8855_v28  ;;  %v11109_v14 = vld [vmem:[#allocation87_spill] sm:$0xff]  ;;  %v11110_v28 = vld [vmem:[#allocation88_spill] sm:$0xff] }
 0xd3d   : > { %3390 = vmatpush1.bf16.msra.mxu0 %v11100_v27  ;;  %3431 = vmatpush1.bf16.msra.mxu1 %v11101_v61  ;;  %v11131_v27 = vld [vmem:[#allocation109_spill] sm:$0xff]  ;;  %v11132_v61 = vld [vmem:[#allocation110_spill] sm:$0xff] }
 0xd3e   : > { %3391 = vmatprep.subr.bf16.mxu0 %v11102_v63  ;;  %3432 = vmatprep.subr.bf16.mxu1 %v11103_v7  ;;  %v11133_v63 = vld [vmem:[#allocation111_spill] sm:$0xff]  ;;  %v11134_v7 = vld [vmem:[#allocation112_spill] sm:$0xff] }
 0xd41   : > { %3392 = vmatpush1.bf16.msra.mxu0 %v11104_v39  ;;  %3433 = vmatpush1.bf16.msra.mxu1 %v11105_v62  ;;  %v11135_v39 = vld [vmem:[#allocation113_spill] sm:$0xff]  ;;  %v11136_v62 = vld [vmem:[#allocation114_spill] sm:$0xff] }
 0xd42   : > { %3393 = vmatprep.subr.bf16.mxu0 %v11106_v53  ;;  %3434 = vmatprep.subr.bf16.mxu1 %v11107_v55  ;;  %v11137_v53 = vld [vmem:[#allocation115_spill] sm:$0xff]  ;;  %v11138_v55 = vld [vmem:[#allocation116_spill] sm:$0xff] }
 0xd45   : > { %3394 = vmatpush1.bf16.msra.mxu0 %v11108_v3  ;;  %3435 = vmatpush1.bf16.msra.mxu1 %v11109_v14  ;;  %v11139_v3 = vld [vmem:[#allocation117_spill] sm:$0xff]  ;;  %v11140_v14 = vld [vmem:[#allocation118_spill] sm:$0xff] }
 0xd46   : > { %3395 = vmatprep.subr.bf16.mxu0 %v11110_v28  ;;  %3436 = vmatprep.subr.bf16.mxu1 %v11111_v19  ;;  %v11141_v28 = vld [vmem:[#allocation120_spill] sm:$0xff]  ;;  %v11142_v19 = vld [vmem:[#allocation121_spill] sm:$0xff] }
 0xd49   : > { %3396 = vmatpush1.bf16.msra.mxu0 %v11112_v8  ;;  %3437 = vmatpush1.bf16.msra.mxu1 %v11113_v52  ;;  %v11143_v8 = vld [vmem:[#allocation122_spill] sm:$0xff]  ;;  %v11144_v52 = vld [vmem:[#allocation123_spill] sm:$0xff] }
 0xd4a   : > { %3397 = vmatprep.subr.bf16.mxu0 %v11114_v60  ;;  %3438 = vmatprep.subr.bf16.mxu1 %v11115_v58  ;;  %v11145_v60 = vld [vmem:[#allocation124_spill] sm:$0xff]  ;;  %v11146_v58 = vld [vmem:[#allocation125_spill] sm:$0xff] }
 0xd4d   : > { %3398 = vmatpush1.bf16.msra.mxu0 %v11116_v38  ;;  %3439 = vmatpush1.bf16.msra.mxu1 %v11117_v35  ;;  %v11147_v38 = vld [vmem:[#allocation126_spill] sm:$0xff]  ;;  %v11148_v35 = vld [vmem:[#allocation128_spill] sm:$0xff] }
 0xd4e   : > { %3399 = vmatprep.subr.bf16.mxu0 %v11118_v43  ;;  %3440 = vmatprep.subr.bf16.mxu1 %v11119_v13  ;;  %v11149_v43 = vld [vmem:[#allocation129_spill] sm:$0xff]  ;;  %v11150_v13 = vld [vmem:[#allocation130_spill] sm:$0xff] }
 0xd51   : > { %3400 = vmatpush1.bf16.msra.mxu0 %v11120_v32  ;;  %3441 = vmatpush1.bf16.msra.mxu1 %v11121_v44  ;;  %v11151_v32 = vld [vmem:[#allocation131_spill] sm:$0xff]  ;;  %v11152_v44 = vld [vmem:[#allocation132_spill] sm:$0xff] }
 0xd52   : > { %3401 = vmatprep.subr.bf16.mxu0 %v11122_v1  ;;  %3442 = vmatprep.subr.bf16.mxu1 %v11123_v40  ;;  %v11153_v1 = vld [vmem:[#allocation133_spill] sm:$0xff]  ;;  %v11154_v40 = vld [vmem:[#allocation134_spill] sm:$0xff] }
 0xd55   : > { %3402 = vmatpush1.bf16.msra.mxu0 %v11124_v49  ;;  %3443 = vmatpush1.bf16.msra.mxu1 %v11125_v22  ;;  %v11155_v49 = vld [vmem:[#allocation135_spill] sm:$0xff]  ;;  %v11156_v22 = vld [vmem:[#allocation136_spill] sm:$0xff] }
 0xd56   : > { %3403 = vmatprep.subr.bf16.mxu0 %v11126_v48  ;;  %3444 = vmatprep.subr.bf16.mxu1 %v11127_v10  ;;  %v11157_v48 = vld [vmem:[#allocation137_spill] sm:$0xff]  ;;  %v11158_v10 = vld [vmem:[#allocation138_spill] sm:$0xff] }
 0xd59   : > { %3404 = vmatpush1.bf16.msra.mxu0 %v11128_v29  ;;  %3445 = vmatpush1.bf16.msra.mxu1 %v11129_v31 }
 0xd5a   : > { %3405 = vmatprep.subr.bf16.mxu0 %v11130_v11  ;;  %3446 = vmatprep.subr.bf16.mxu1 %v11131_v27  ;;  %v11159_v11 = vld [vmem:[#allocation127_spill] sm:$0xff] }
 0xd5d   : > { %3406 = vmatpush1.bf16.msra.mxu0 %v11132_v61  ;;  %3447 = vmatpush1.bf16.msra.mxu1 %v11133_v63 }
 0xd5e   : > { %3407 = vmatprep.subr.bf16.mxu0 %v11134_v7  ;;  %3448 = vmatprep.subr.bf16.mxu1 %v11135_v39 }
 0xd61   : > { %3408 = vmatpush1.bf16.msra.mxu0 %v11136_v62  ;;  %3449 = vmatpush1.bf16.msra.mxu1 %v11137_v53 }
 0xd62   : > { %3409 = vmatprep.subr.bf16.mxu0 %v11138_v55  ;;  %3450 = vmatprep.subr.bf16.mxu1 %v11139_v3 }
 0xd65   : > { %3410 = vmatpush1.bf16.msra.mxu0 %v11140_v14  ;;  %3451 = vmatpush1.bf16.msra.mxu1 %v11141_v28 }
 0xd66   : > { %3411 = vmatprep.subr.bf16.mxu0 %v11142_v19  ;;  %3452 = vmatprep.subr.bf16.mxu1 %v11143_v8 }
 0xd69   : > { %3412 = vmatpush1.bf16.msra.mxu0 %v11144_v52  ;;  %3453 = vmatpush1.bf16.msra.mxu1 %v11145_v60 }
 0xd6a   : > { %3413 = vmatprep.subr.bf16.mxu0 %v11146_v58  ;;  %3454 = vmatprep.subr.bf16.mxu1 %v11147_v38 }
 0xd6d   : > { %3414 = vmatpush1.bf16.msra.mxu0 %v11148_v35  ;;  %3455 = vmatpush1.bf16.msra.mxu1 %v11149_v43 }
 0xd6e   : > { %3415 = vmatprep.subr.bf16.mxu0 %v11150_v13  ;;  %3456 = vmatprep.subr.bf16.mxu1 %v11151_v32 }
 0xd71   : > { %3416 = vmatpush1.bf16.msra.mxu0 %v11152_v44  ;;  %3457 = vmatpush1.bf16.msra.mxu1 %v11153_v1 }
 0xd72   : > { %3417 = vmatprep.subr.bf16.mxu0 %v11154_v40  ;;  %3458 = vmatprep.subr.bf16.mxu1 %v11155_v49 }
 0xd75   : > { %3418 = vmatpush1.bf16.msra.mxu0 %v11156_v22  ;;  %3459 = vmatpush1.bf16.msra.mxu1 %v11157_v48  ;;  %v9295_v48 = vld [vmem:[#allocation9 + $0x8] ss:$12 sps:$4 sm:$0xff]  }
 0xd76   : > { %3509 = vmatprep.subr.bf16.mxu0 %v11158_v10  ;;  %5062 = vmatprep.subr.bf16.mxu1 %v10644_v26  ;;  %v9305_v10 = vld [vmem:[#allocation9 + $0x20] ss:$12 sps:$4 sm:$0xff]  }
 0xe0a   : > { %v3318_v29 = vpop.f32.mrb[60].mxu0  ;;  %v3359_v31 = vpop.f32.mrb[68].mxu1 }
 0xe0b   : > { %v3319_v27 = vadd.f32 %v3318_v29, %v11159_v11  ;;  %v3320_v61 = vpop.f32.mrb[61].mxu0  ;;  %v3361_v63 = vpop.f32.mrb[69].mxu1  ;;  %v3360_v38 = vadd.f32 %v3359_v31, %v7564_v5  ;;  %v9376_v29 = vld [vmem:[#allocation12 + $0x28] ss:$16 sps:$4 sm:$0xff]   ;;  %v9379_v31 = vld [vmem:[#allocation12 + $0x44] ss:$16 sps:$4 sm:$0xff]  }
 0xe0c   : > { %v3322_v7 = vpop.f32.mrb[62].mxu0  ;;  %v3363_v39 = vpop.f32.mrb[70].mxu1  ;;  %v3321_v3 = vadd.f32 %v3320_v61, %v10752_v15  ;;  %v3362_v60 = vadd.f32 %v3361_v63, %v7560_v9  ;;  %v9394_v61 = vld [vmem:[#allocation12 + $0x6c] ss:$16 sps:$4 sm:$0xff]   ;;  %v9397_v63 = vld [vmem:[#allocation12 + $0x60] ss:$16 sps:$4 sm:$0xff]  }
 0xe0d   : > { %v4824_v62 = vmul.f32 -1.442695, %v3319_v27  ;;  %v3323_v53 = vpop.f32.mrb[63].mxu0  ;;  %v3364_v55 = vpop.f32.mrb[71].mxu1  ;;  %v9385_v27 = vld [vmem:[#allocation12 + $0x40] ss:$16 sps:$4 sm:$0xff]  }
 0xe0e   : > { %v4825_v14 = vmul.f32 -1.442695, %v3321_v3  ;;  %v9400_v7 = vld [vmem:[#allocation12 + $0x68] ss:$16 sps:$4 sm:$0xff]   ;;  %v9403_v39 = vld [vmem:[#allocation12 + $0x84] ss:$16 sps:$4 sm:$0xff]  }
 0xe0f   : > { %5680 = vpow2.f32 %v4824_v62  ;;  %v9406_v62 = vld [vmem:[#allocation12 + $0x8c] ss:$16 sps:$4 sm:$0xff]   ;;  %v9409_v53 = vld [vmem:[#allocation12 + $0x80] ss:$16 sps:$4 sm:$0xff]   ;;  %v9412_v55 = vld [vmem:[#allocation12 + $0x88] ss:$16 sps:$4 sm:$0xff]  }
 0xe10   : > { %5682 = vpow2.f32 %v4825_v14  ;;  %v9415_v3 = vld [vmem:[#allocation12 + $0xa4] ss:$16 sps:$4 sm:$0xff]   ;;  %v9418_v14 = vld [vmem:[#allocation12 + $0xac] ss:$16 sps:$4 sm:$0xff]  }
 0xe19   : > { %v5681_v28 = vpop.eup %5680 }
 0xe1a   : > { %v3369_v19 = vadd.f32 1.0, %v5681_v28  ;;  %v5683_v8 = vpop.eup %5682  ;;  %v9421_v28 = vld [vmem:[#allocation12 + $0xa0] ss:$16 sps:$4 sm:$0xff]  }
 0xe1b   : > { %v3375_v52 = vadd.f32 1.0, %v5683_v8  ;;  %v9427_v8 = vld [vmem:[#allocation12 + $0xc4] ss:$16 sps:$4 sm:$0xff]  }
 0xe1c   : > { %5684 = vrcp.f32 %v3369_v19  ;;  %v9424_v19 = vld [vmem:[#allocation12 + $0xa8] ss:$16 sps:$4 sm:$0xff]  }
 0xe1d   : > { %5686 = vrcp.f32 %v3375_v52  ;;  %v9430_v52 = vld [vmem:[#allocation12 + $0xcc] ss:$16 sps:$4 sm:$0xff]  }
 0xe26   : > { %v5685_v58 = vpop.eup %5684 }
 0xe27   : > { %v3378_v35 = vmul.f32 %v5685_v58, %v3362_v60  ;;  %v5687_v13 = vpop.eup %5686  ;;  %v9433_v60 = vld [vmem:[#allocation12 + $0xc0] ss:$16 sps:$4 sm:$0xff]   ;;  %v9436_v58 = vld [vmem:[#allocation12 + $0xc8] ss:$16 sps:$4 sm:$0xff]  }
 0xe28   : > { %v3381_v32 = vsub.f32 1.0, %v5687_v13  ;;  %v3383_v40 = vmul.f32 %v5687_v13, %v9120_v30  ;;  %11160 = vst [vmem:[#allocation39_spill] sm:$0xff] %v9436_v58  ;;  %v9448_v13 = vld [vmem:[#allocation12 + $0xe8] ss:$16 sps:$4 sm:$0xff]  }
 0xe29   : > { %v3379_v43 = vadd.f32 %v3378_v35, %v3360_v38  ;;  %v9439_v38 = vld [vmem:[#allocation12 + $0xe4] ss:$16 sps:$4 sm:$0xff]   ;;  %v9442_v35 = vld [vmem:[#allocation12 + $0xec] ss:$16 sps:$4 sm:$0xff]   ;;  %11164 = vst [vmem:[#allocation43_spill] sm:$0xff] %v9448_v13 }
 0xe2a   : > { %11161 = vst [vmem:[#allocation40_spill] sm:$0xff] %v9439_v38  ;;  %11162 = vst [vmem:[#allocation41_spill] sm:$0xff] %v9442_v35 }
 0xe2b   : > { %5688 = vtanh.f32 %v3379_v43  ;;  %v9445_v43 = vld [vmem:[#allocation12 + $0xe0] ss:$16 sps:$4 sm:$0xff]  }
 0xe2c   : > { %11163 = vst [vmem:[#allocation42_spill] sm:$0xff] %v9445_v43 }
 0xe35   : > { %v5689_v44 = vpop.eup %5688 }
 0xe36   : > { %v3382_v1 = vmul.f32 %v5689_v44, %v3381_v32  ;;  %v9451_v32 = vld [vmem:[#allocation12 + $0x104] ss:$16 sps:$4 sm:$0xff]   ;;  %v9454_v44 = vld [vmem:[#allocation12 + $0x10c] ss:$16 sps:$4 sm:$0xff]  }
 0xe37   : > { %11165 = vst [vmem:[#allocation44_spill] sm:$0xff] %v9451_v32  ;;  %11166 = vst [vmem:[#allocation45_spill] sm:$0xff] %v9454_v44 }
 0xe38   : > { %v3384_v49 = vadd.f32 %v3383_v40, %v3382_v1  ;;  %v9457_v1 = vld [vmem:[#allocation12 + $0x100] ss:$16 sps:$4 sm:$0xff]   ;;  %v9460_v40 = vld [vmem:[#allocation12 + $0x108] ss:$16 sps:$4 sm:$0xff]  }
 0xe39   : > { %11167 = vst [vmem:[#allocation46_spill] sm:$0xff] %v9457_v1  ;;  %11168 = vst [vmem:[#allocation47_spill] sm:$0xff] %v9460_v40 }
 0xe3a   : > { %v3385_v22 = vpack.c.bf16 %v3384_v49, %v3384_v49 }
 0xe3c   : > { %3420 = vmatmul.mubr.bf16.vlgmr.msra.gmra.mrb[64].mxu0 %v3385_v22  ;;  %3461 = vmatmul.mubr.bf16.vlgmr.msra.gmra.mrb[72].mxu1 %v3385_v22  ;;  %v9466_v22 = vld [vmem:[#allocation12 + $0x12c] ss:$16 sps:$4 sm:$0xff]  }
 0xe3d   : > { %3510 = vmatpush1.bf16.msra.mxu0 %v9041_v33  ;;  %5063 = vmatpush3.bf16.msra.mxu1 %v9295_v48  ;;  %v9311_v33 = vld [vmem:[#allocation9 + $0x38] ss:$12 sps:$4 sm:$0xff]   ;;  %11170 = vst [vmem:[#allocation49_spill] sm:$0xff] %v9466_v22 }
 0xe3e   : > { %3511 = vmatprep.subr.bf16.mxu0 %v9046_v41  ;;  %5064 = vmatprep.subr.bf16.mxu1 %v10644_v26  ;;  %v9317_v41 = vld [vmem:[#allocation9 + $0x50] ss:$12 sps:$4 sm:$0xff]  }
 0xe3f   : > { %3541 = vmatprep.mubr.bf16.mxu0 %v10647_v18  ;;  %5078 = vmatprep.mubr.msk.bf16.mxu1 %vm6694_vm0, %v10644_v26 }
 0xe41   : > { %3512 = vmatpush1.bf16.msra.mxu0 %v9057_v23  ;;  %5065 = vmatpush3.bf16.msra.mxu1 %v9305_v10  ;;  %v9323_v23 = vld [vmem:[#allocation9 + $0x68] ss:$12 sps:$4 sm:$0xff]  }
 0xe42   : > { %3513 = vmatprep.subr.bf16.mxu0 %v9061_v36  ;;  %5066 = vmatprep.subr.bf16.mxu1 %v10644_v26  ;;  %v9328_v36 = vstv %s3491_s1  ;;  %s4154_s1 = ssub.f32 1.0, %s4151_s28 }
 0xe45   : > { %3514 = vmatpush1.bf16.msra.mxu0 %v9067_v54  ;;  %5067 = vmatpush3.bf16.msra.mxu1 %v9311_v33  ;;  %v9331_v54 = vld [vmem:[#allocation9 + $0x80] ss:$12 sps:$4 sm:$0xff]  }
 0xe46   : > { %3515 = vmatprep.subr.bf16.mxu0 %v9071_v2  ;;  %5068 = vmatprep.subr.bf16.mxu1 %v10644_v26  ;;  %v9334_v2 = vstv %s3494_s2 }
 0xe49   : > { %3516 = vmatpush1.bf16.msra.mxu0 %v9075_v37  ;;  %5069 = vmatpush3.bf16.msra.mxu1 %v9317_v41  ;;  %v3493_v37 = vmul.f32 %v9328_v36, %v9219_v34 }
 0xe4a   : > { %3517 = vmatprep.subr.bf16.mxu0 %v9079_v56  ;;  %5070 = vmatprep.subr.bf16.mxu1 %v10644_v26  ;;  %v3498_v56 = vmul.f32 %v9328_v36, %v3384_v49  ;;  %v9463_v49 = vld [vmem:[#allocation12 + $0x124] ss:$16 sps:$4 sm:$0xff]  }
 0xe4b   : > { %11169 = vst [vmem:[#allocation48_spill] sm:$0xff] %v9463_v49 }
 0xe4d   : > { %3518 = vmatpush1.bf16.msra.mxu0 %v9083_v42  ;;  %5071 = vmatpush3.bf16.msra.mxu1 %v9323_v23  ;;  %v3496_v42 = vmul.f32 %v9334_v2, %v9118_v0  ;;  %v9356_v0 = vld [vmem:[#allocation9 + $0xb0] ss:$12 sps:$4 sm:$0xff]  }
 0xe4e   : > { %3519 = vmatprep.subr.bf16.mxu0 %v9087_v57  ;;  %5072 = vmatprep.subr.bf16.mxu1 %v10644_v26  ;;  %v9344_v57 = vld [vmem:[#allocation9 + $0x98] ss:$12 sps:$4 sm:$0xff]  }
 0xe51   : > { %3520 = vmatpush1.bf16.msra.mxu0 %v9093_v6  ;;  %5073 = vmatpush3.bf16.msra.mxu1 %v9331_v54  ;;  %v3499_v6 = vmul.f32 %v9334_v2, %v9120_v30  ;;  %v9362_v30 = vld [vmem:[#allocation12 + $0xc] ss:$16 sps:$4 sm:$0xff]  }
 0xe52   : > { %3521 = vmatprep.subr.bf16.mxu0 %v9101_v4  ;;  %5074 = vmatprep.subr.bf16.mxu1 %v10644_v26  ;;  %v9351_v4 = vadd.f32 %v3496_v42, %v3493_v37  ;;  %v9469_v37 = vld [vmem:[#allocation12 + $0x120] ss:$16 sps:$4 sm:$0xff]   ;;  %v9475_v42 = vld [vmem:[#allocation12 + $0x144] ss:$16 sps:$4 sm:$0xff]  }
 0xe53   : > { %v9353_v34 = vadd.f32 %v3499_v6, %v3498_v56  ;;  %11171 = vst [vmem:[#allocation50_spill] sm:$0xff] %v9469_v37  ;;  %v9472_v56 = vld [vmem:[#allocation12 + $0x128] ss:$16 sps:$4 sm:$0xff]   ;;  %11173 = vst [vmem:[#allocation52_spill] sm:$0xff] %v9475_v42  ;;  %v9478_v6 = vld [vmem:[#allocation12 + $0x14c] ss:$16 sps:$4 sm:$0xff]  }
 0xe54   : > { %11172 = vst [vmem:[#allocation51_spill] sm:$0xff] %v9472_v56  ;;  %11174 = vst [vmem:[#allocation53_spill] sm:$0xff] %v9478_v6 }
 0xe55   : > { %3522 = vmatpush1.bf16.msra.mxu0 %v9108_v24  ;;  %5075 = vmatpush3.bf16.msra.mxu1 %v9344_v57  ;;  %v3508_v24 = vpack.c.bf16 %v9351_v4, %v9351_v4 }
 0xe56   : > { %3523 = vmatprep.subr.bf16.mxu0 %v9114_v21  ;;  %5076 = vmatprep.subr.bf16.mxu1 %v10644_v26  ;;  %v3613_v21 = vpack.c.bf16 %v9353_v34, %v9353_v34 }
 0xe59   : > { %3524 = vmatpush1.bf16.msra.mxu0 %v9122_v17  ;;  %5077 = vmatpush3.bf16.msra.mxu1 %v9356_v0  ;;  %v9368_v17 = vld [vmem:[#allocation12 + $0x8] ss:$16 sps:$4 sm:$0xff]  }
 0xe5a   : > { %3614 = vmatprep.subr.bf16.mxu0 %v9128_v47  ;;  %3655 = vmatprep.subr.bf16.mxu1 %v9362_v30  ;;  %v9372_v47 = vld [vmem:[#allocation12 + $0x2c] ss:$16 sps:$4 sm:$0xff]  }
 0xe5c   : > { %3542 = vmatmul.mubr.bf16.vlgmr.msra.gmra.mrb[68].mxu0 %v3508_v24  ;;  %5079 = vmatmul.mubr.bf16.vlgmr.msra.gmra.mrb[76].mxu1 %v3508_v24  ;;  %v9481_v24 = vld [vmem:[#allocation12 + $0x140] ss:$16 sps:$4 sm:$0xff]  }
 0xe5d   : > { %3646 = vmatprep.mubr.bf16.mxu0 %v3613_v21  ;;  %3687 = vmatprep.mubr.bf16.mxu1 %v3613_v21  ;;  %11175 = vst [vmem:[#allocation54_spill] sm:$0xff] %v9481_v24  ;;  %v9484_v21 = vld [vmem:[#allocation12 + $0x148] ss:$16 sps:$4 sm:$0xff]  }
 0xe5e   : > { %3615 = vmatpush1.bf16.msra.mxu0 %v9134_v59  ;;  %3656 = vmatpush1.bf16.msra.mxu1 %v9368_v17  ;;  %v9382_v59 = vld [vmem:[#allocation12 + $0x4c] ss:$16 sps:$4 sm:$0xff]   ;;  %11176 = vst [vmem:[#allocation55_spill] sm:$0xff] %v9484_v21 }
 0xe5f   : > { %3616 = vmatprep.subr.bf16.mxu0 %v9138_v46  ;;  %3657 = vmatprep.subr.bf16.mxu1 %v9372_v47  ;;  %v9388_v46 = vld [vmem:[#allocation12 + $0x48] ss:$16 sps:$4 sm:$0xff]  }
 0xe62   : > { %3617 = vmatpush1.bf16.msra.mxu0 %v9142_v50  ;;  %3658 = vmatpush1.bf16.msra.mxu1 %v9376_v29  ;;  %v9391_v50 = vld [vmem:[#allocation12 + $0x64] ss:$16 sps:$4 sm:$0xff]  }
 0xe63   : > { %3618 = vmatprep.subr.bf16.mxu0 %v9379_v31  ;;  %3659 = vmatprep.subr.bf16.mxu1 %v9382_v59 }
 0xe66   : > { %3619 = vmatpush1.bf16.msra.mxu0 %v9385_v27  ;;  %3660 = vmatpush1.bf16.msra.mxu1 %v9388_v46 }
 0xe67   : > { %3620 = vmatprep.subr.bf16.mxu0 %v9391_v50  ;;  %3661 = vmatprep.subr.bf16.mxu1 %v9394_v61 }
 0xe6a   : > { %3621 = vmatpush1.bf16.msra.mxu0 %v9397_v63  ;;  %3662 = vmatpush1.bf16.msra.mxu1 %v9400_v7 }
 0xe6b   : > { %3622 = vmatprep.subr.bf16.mxu0 %v9403_v39  ;;  %3663 = vmatprep.subr.bf16.mxu1 %v9406_v62 }
 0xe6e   : > { %3623 = vmatpush1.bf16.msra.mxu0 %v9409_v53  ;;  %3664 = vmatpush1.bf16.msra.mxu1 %v9412_v55 }
 0xe6f   : > { %3624 = vmatprep.subr.bf16.mxu0 %v9415_v3  ;;  %3665 = vmatprep.subr.bf16.mxu1 %v9418_v14 }
 0xe72   : > { %3625 = vmatpush1.bf16.msra.mxu0 %v9421_v28  ;;  %3666 = vmatpush1.bf16.msra.mxu1 %v9424_v19 }
 0xe73   : > { %3626 = vmatprep.subr.bf16.mxu0 %v9427_v8  ;;  %3667 = vmatprep.subr.bf16.mxu1 %v9430_v52 }
 0xe76   : > { %3627 = vmatpush1.bf16.msra.mxu0 %v9433_v60  ;;  %3668 = vmatpush1.bf16.msra.mxu1 %v9436_v58 }
 0xe77   : > { %3628 = vmatprep.subr.bf16.mxu0 %v9439_v38  ;;  %3669 = vmatprep.subr.bf16.mxu1 %v9442_v35 }
 0xe7a   : > { %3629 = vmatpush1.bf16.msra.mxu0 %v9445_v43  ;;  %3670 = vmatpush1.bf16.msra.mxu1 %v9448_v13 }
 0xe7b   : > { %3630 = vmatprep.subr.bf16.mxu0 %v9451_v32  ;;  %3671 = vmatprep.subr.bf16.mxu1 %v9454_v44 }
 0xe7e   : > { %3631 = vmatpush1.bf16.msra.mxu0 %v9457_v1  ;;  %3672 = vmatpush1.bf16.msra.mxu1 %v9460_v40 }
 0xe7f   : > { %3632 = vmatprep.subr.bf16.mxu0 %v9463_v49  ;;  %3673 = vmatprep.subr.bf16.mxu1 %v9466_v22 }
 0xe82   : > { %3633 = vmatpush1.bf16.msra.mxu0 %v9469_v37  ;;  %3674 = vmatpush1.bf16.msra.mxu1 %v9472_v56  ;;  %v9490_v56 = vld [vmem:[#allocation12 + $0x16c] ss:$16 sps:$4 sm:$0xff]  }
 0xe83   : > { %3634 = vmatprep.subr.bf16.mxu0 %v9475_v42  ;;  %3675 = vmatprep.subr.bf16.mxu1 %v9478_v6  ;;  %11178 = vst [vmem:[#allocation57_spill] sm:$0xff] %v9490_v56  ;;  %v9493_v42 = vld [vmem:[#allocation12 + $0x160] ss:$16 sps:$4 sm:$0xff]   ;;  %v9496_v6 = vld [vmem:[#allocation12 + $0x168] ss:$16 sps:$4 sm:$0xff]  }
 0xe84   : > { %11179 = vst [vmem:[#allocation58_spill] sm:$0xff] %v9493_v42  ;;  %11180 = vst [vmem:[#allocation59_spill] sm:$0xff] %v9496_v6 }
 0xe86   : > { %3635 = vmatpush1.bf16.msra.mxu0 %v9481_v24  ;;  %3676 = vmatpush1.bf16.msra.mxu1 %v9484_v21  ;;  %v9499_v24 = vld [vmem:[#allocation12 + $0x184] ss:$16 sps:$4 sm:$0xff]   ;;  %v9502_v21 = vld [vmem:[#allocation12 + $0x18c] ss:$16 sps:$4 sm:$0xff]  }
 0xe87   : > { %3636 = vmatprep.subr.bf16.mxu0 %v9487_v45  ;;  %3677 = vmatprep.subr.bf16.mxu1 %v9490_v56  ;;  %11181 = vst [vmem:[#allocation60_spill] sm:$0xff] %v9499_v24  ;;  %11182 = vst [vmem:[#allocation61_spill] sm:$0xff] %v9502_v21  ;;  %v9505_v45 = vld [vmem:[#allocation12 + $0x180] ss:$16 sps:$4 sm:$0xff]   ;;  %v9508_v56 = vld [vmem:[#allocation12 + $0x188] ss:$16 sps:$4 sm:$0xff]  }
 0xe88   : > { %11183 = vst [vmem:[#allocation119_spill] sm:$0xff] %v9505_v45  ;;  %11184 = vst [vmem:[#allocation62_spill] sm:$0xff] %v9508_v56 }
 0xe8a   : > { %3637 = vmatpush1.bf16.msra.mxu0 %v9493_v42  ;;  %3678 = vmatpush1.bf16.msra.mxu1 %v9496_v6  ;;  %v9511_v42 = vld [vmem:[#allocation12 + $0x1a4] ss:$16 sps:$4 sm:$0xff]   ;;  %v9514_v6 = vld [vmem:[#allocation12 + $0x1ac] ss:$16 sps:$4 sm:$0xff]  }
 0xe8b   : > { %3638 = vmatprep.subr.bf16.mxu0 %v9499_v24  ;;  %3679 = vmatprep.subr.bf16.mxu1 %v9502_v21  ;;  %11185 = vst [vmem:[#allocation63_spill] sm:$0xff] %v9511_v42  ;;  %11186 = vst [vmem:[#allocation64_spill] sm:$0xff] %v9514_v6  ;;  %v9517_v24 = vld [vmem:[#allocation12 + $0x1a0] ss:$16 sps:$4 sm:$0xff]   ;;  %v9520_v21 = vld [vmem:[#allocation12 + $0x1a8] ss:$16 sps:$4 sm:$0xff]  }
 0xe8c   : > { %11187 = vst [vmem:[#allocation65_spill] sm:$0xff] %v9517_v24  ;;  %11188 = vst [vmem:[#allocation66_spill] sm:$0xff] %v9520_v21 }
 0xe8e   : > { %3639 = vmatpush1.bf16.msra.mxu0 %v9505_v45  ;;  %3680 = vmatpush1.bf16.msra.mxu1 %v9508_v56  ;;  %v9523_v45 = vld [vmem:[#allocation12 + $0x1c4] ss:$16 sps:$4 sm:$0xff]   ;;  %v9526_v56 = vld [vmem:[#allocation12 + $0x1cc] ss:$16 sps:$4 sm:$0xff]  }
 0xe8f   : > { %3640 = vmatprep.subr.bf16.mxu0 %v9511_v42  ;;  %3681 = vmatprep.subr.bf16.mxu1 %v9514_v6  ;;  %11189 = vst [vmem:[#allocation67_spill] sm:$0xff] %v9523_v45  ;;  %11190 = vst [vmem:[#allocation68_spill] sm:$0xff] %v9526_v56  ;;  %v9529_v42 = vld [vmem:[#allocation12 + $0x1c0] ss:$16 sps:$4 sm:$0xff]   ;;  %v9532_v6 = vld [vmem:[#allocation12 + $0x1c8] ss:$16 sps:$4 sm:$0xff]  }
 0xe90   : > { %11191 = vst [vmem:[#allocation69_spill] sm:$0xff] %v9529_v42  ;;  %11192 = vst [vmem:[#allocation70_spill] sm:$0xff] %v9532_v6 }
 0xe92   : > { %3641 = vmatpush1.bf16.msra.mxu0 %v9517_v24  ;;  %3682 = vmatpush1.bf16.msra.mxu1 %v9520_v21  ;;  %v9535_v24 = vld [vmem:[#allocation12 + $0x1e4] ss:$16 sps:$4 sm:$0xff]   ;;  %v9538_v21 = vld [vmem:[#allocation12 + $0x1ec] ss:$16 sps:$4 sm:$0xff]  }
 0xe93   : > { %3642 = vmatprep.subr.bf16.mxu0 %v9523_v45  ;;  %3683 = vmatprep.subr.bf16.mxu1 %v9526_v56  ;;  %11193 = vst [vmem:[#allocation71_spill] sm:$0xff] %v9535_v24  ;;  %11194 = vst [vmem:[#allocation72_spill] sm:$0xff] %v9538_v21  ;;  %v9541_v45 = vld [vmem:[#allocation12 + $0x1e0] ss:$16 sps:$4 sm:$0xff]   ;;  %v9544_v56 = vld [vmem:[#allocation12 + $0x1e8] ss:$16 sps:$4 sm:$0xff]  }
 0xe94   : > { %11195 = vst [vmem:[#allocation73_spill] sm:$0xff] %v9541_v45  ;;  %11196 = vst [vmem:[#allocation74_spill] sm:$0xff] %v9544_v56 }
 0xe96   : > { %3643 = vmatpush1.bf16.msra.mxu0 %v9529_v42  ;;  %3684 = vmatpush1.bf16.msra.mxu1 %v9532_v6  ;;  %v9547_v42 = vld [vmem:[#allocation15 + $0x4] ss:$16 sps:$4 sm:$0xff]   ;;  %v9550_v6 = vld [vmem:[#allocation15 + $0xc] ss:$16 sps:$4 sm:$0xff]  }
 0xe97   : > { %3644 = vmatprep.subr.bf16.mxu0 %v9535_v24  ;;  %3685 = vmatprep.subr.bf16.mxu1 %v9538_v21  ;;  %11197 = vst [vmem:[#allocation76_spill] sm:$0xff] %v9547_v42  ;;  %11198 = vst [vmem:[#allocation78_spill] sm:$0xff] %v9550_v6 }
 0xe9a   : > { %3645 = vmatpush1.bf16.msra.mxu0 %v9541_v45  ;;  %3686 = vmatpush1.bf16.msra.mxu1 %v9544_v56 }
 0xe9b   : > { %3717 = vmatprep.subr.bf16.mxu0 %v9547_v42  ;;  %3758 = vmatprep.subr.bf16.mxu1 %v9550_v6 }
 0xf0f   : > { %v3421_v24 = vpop.f32.mrb[64].mxu0  ;;  %v3462_v37 = vpop.f32.mrb[72].mxu1 }
 0xf10   : > { %v3422_v21 = vadd.f32 %v3421_v24, %v11096_v16  ;;  %v3423_v22 = vpop.f32.mrb[65].mxu0  ;;  %v3464_v49 = vpop.f32.mrb[73].mxu1 }
 0xf11   : > { %v3425_v40 = vpop.f32.mrb[66].mxu0  ;;  %v3466_v45 = vpop.f32.mrb[74].mxu1  ;;  %v3424_v32 = vadd.f32 %v3423_v22, %v11097_v12  ;;  %v3465_v24 = vadd.f32 %v3464_v49, %v11098_v20 }
 0xf12   : > { %v4826_v1 = vmul.f32 -1.442695, %v3422_v21  ;;  %v3426_v44 = vpop.f32.mrb[67].mxu0  ;;  %v3467_v56 = vpop.f32.mrb[75].mxu1  ;;  %v3463_v45 = vadd.f32 %v3462_v37, %v7744_v51  ;;  %v3505_v40 = vld [vmem:[%s7077_s29 + $0x90] sm:$0xff] }
 0xf13   : > { %v4827_v42 = vmul.f32 -1.442695, %v3424_v32 }
 0xf14   : > { %5690 = vpow2.f32 %v4826_v1  ;;  %v3506_v1 = vld [vmem:[%s7077_s29 + $0x98] sm:$0xff] }
 0xf15   : > { %5692 = vpow2.f32 %v4827_v42 }
 0xf1e   : > { %v5691_v13 = vpop.eup %5690 }
 0xf1f   : > { %v3472_v6 = vadd.f32 1.0, %v5691_v13  ;;  %v5693_v43 = vpop.eup %5692 }
 0xf20   : > { %v3478_v35 = vadd.f32 1.0, %v5693_v43 }
 0xf21   : > { %5694 = vrcp.f32 %v3472_v6 }
 0xf22   : > { %5696 = vrcp.f32 %v3478_v35 }
 0xf2b   : > { %v5695_v16 = vpop.eup %5694 }
 0xf2c   : > { %v3481_v44 = vmul.f32 %v5695_v16, %v3465_v24  ;;  %v5697_v20 = vpop.eup %5696 }
 0xf2d   : > { %v3484_v16 = vsub.f32 1.0, %v5697_v20  ;;  %v3486_v24 = vmul.f32 %v5697_v20, %v9217_v25 }
 0xf2e   : > { %v3482_v56 = vadd.f32 %v3481_v44, %v3463_v45 }
 0xf2f   : > { %v3543_v21 = vpop.f32.mrb[68].mxu0  ;;  %v3584_v22 = vpop.f32.mrb[76].mxu1 }
 0xf30   : > { %5698 = vtanh.f32 %v3482_v56  ;;  %v3590_v32 = vadd.f32 %v3543_v21, %v3505_v40  ;;  %v3545_v42 = vpop.f32.mrb[69].mxu0  ;;  %v5080_v12 = vpop.f32.mrb[77].mxu1 }
 0xf31   : > { %v3547_v13 = vpop.f32.mrb[70].mxu0  ;;  %v3587_v6 = vpop.f32.mrb[78].mxu1  ;;  %v3597_v49 = vadd.f32 %v3545_v42, %v3506_v1  ;;  %v3507_v1 = vld [vmem:[%s7077_s29 + $0xa0] sm:$0xff] }
 0xf32   : > { %v4828_v38 = vmul.f32 -1.442695, %v3590_v32  ;;  %v3548_v43 = vpop.f32.mrb[71].mxu0  ;;  %v5081_v58 = vpop.f32.mrb[79].mxu1  ;;  %v9560_v32 = vld [vmem:[#allocation10] ss:$0 sm:$0xff] }
 0xf33   : > { %v4829_v35 = vmul.f32 -1.442695, %v3597_v49  ;;  %v3604_v58 = vadd.f32 %v9560_v32, %v3584_v22 }
 0xf34   : > { %5700 = vpow2.f32 %v4828_v38 }
 0xf35   : > { %5702 = vpow2.f32 %v4829_v35  ;;  %v3502_v35 = vmul.f32 %v9334_v2, %v9217_v25  ;;  %v9579_v2 = vld [vmem:[#allocation15 + $0x8] ss:$16 sps:$4 sm:$0xff]   ;;  %v9636_v25 = vld [vmem:[#allocation15 + $0xa0] ss:$16 sps:$4 sm:$0xff]  }
 0xf36   : > { %11215 = vst [vmem:[#allocation95_spill] sm:$0xff] %v9636_v25 }
 0xf3a   : > { %v5699_v37 = vpop.eup %5698 }
 0xf3b   : > { %v3485_v45 = vmul.f32 %v5699_v37, %v3484_v16 }
 0xf3d   : > { %v3487_v44 = vadd.f32 %v3486_v24, %v3485_v45 }
 0xf3e   : > { %v5701_v40 = vpop.eup %5700 }
 0xf3f   : > { %v3594_v56 = vadd.f32 1.0, %v5701_v40  ;;  %v5703_v12 = vpop.eup %5702  ;;  %v3501_v20 = vmul.f32 %v9328_v36, %v3487_v44  ;;  %v9576_v36 = vld [vmem:[#allocation15] ss:$16 sps:$4 sm:$0xff]   ;;  %v9582_v44 = vld [vmem:[#allocation15 + $0x24] ss:$16 sps:$4 sm:$0xff]  }
 0xf40   : > { %v3601_v21 = vadd.f32 1.0, %v5703_v12  ;;  %v9588_v12 = vld [vmem:[#allocation15 + $0x20] ss:$16 sps:$4 sm:$0xff]  }
 0xf41   : > { %5704 = vrcp.f32 %v3594_v56  ;;  %v9568_v24 = vadd.f32 %v3502_v35, %v3501_v20  ;;  %v9585_v56 = vld [vmem:[#allocation15 + $0x2c] ss:$16 sps:$4 sm:$0xff]   ;;  %11199 = vst [vmem:[#allocation79_spill] sm:$0xff] %v9588_v12  ;;  %v9612_v20 = vld [vmem:[#allocation15 + $0x60] ss:$16 sps:$4 sm:$0xff]  }
 0xf42   : > { %5706 = vrcp.f32 %v3601_v21  ;;  %v9591_v21 = vld [vmem:[#allocation15 + $0x28] ss:$16 sps:$4 sm:$0xff]   ;;  %11207 = vst [vmem:[#allocation87_spill] sm:$0xff] %v9612_v20  ;;  %v9621_v35 = vld [vmem:[#allocation15 + $0x8c] ss:$16 sps:$4 sm:$0xff]  }
 0xf43   : > { %v3716_v40 = vpack.c.bf16 %v9568_v24, %v9568_v24  ;;  %11200 = vst [vmem:[#allocation80_spill] sm:$0xff] %v9591_v21  ;;  %11210 = vst [vmem:[#allocation90_spill] sm:$0xff] %v9621_v35 }
 0xf4b   : > { %v5705_v38 = vpop.eup %5704 }
 0xf4c   : > { %v3605_v42 = vmul.f32 %v5705_v38, %v3604_v58  ;;  %v5707_v6 = vpop.eup %5706  ;;  %v9594_v58 = vld [vmem:[#allocation15 + $0x44] ss:$16 sps:$4 sm:$0xff]   ;;  %v9597_v38 = vld [vmem:[#allocation15 + $0x4c] ss:$16 sps:$4 sm:$0xff]  }
 0xf4d   : > { %v3608_v43 = vsub.f32 1.0, %v5707_v6  ;;  %v3610_v37 = vmul.f32 %v5707_v6, %v9351_v4  ;;  %11201 = vst [vmem:[#allocation81_spill] sm:$0xff] %v9594_v58  ;;  %11202 = vst [vmem:[#allocation82_spill] sm:$0xff] %v9597_v38  ;;  %v9609_v6 = vld [vmem:[#allocation15 + $0x6c] ss:$16 sps:$4 sm:$0xff]  }
 0xf4e   : > { %v3606_v13 = vadd.f32 %v3605_v42, %v3507_v1  ;;  %v9600_v1 = vld [vmem:[#allocation15 + $0x40] ss:$16 sps:$4 sm:$0xff]   ;;  %v9603_v42 = vld [vmem:[#allocation15 + $0x48] ss:$16 sps:$4 sm:$0xff]   ;;  %11206 = vst [vmem:[#allocation86_spill] sm:$0xff] %v9609_v6 }
 0xf4f   : > { %11203 = vst [vmem:[#allocation83_spill] sm:$0xff] %v9600_v1  ;;  %11204 = vst [vmem:[#allocation84_spill] sm:$0xff] %v9603_v42 }
 0xf50   : > { %5708 = vtanh.f32 %v3606_v13  ;;  %v9606_v13 = vld [vmem:[#allocation15 + $0x64] ss:$16 sps:$4 sm:$0xff]  }
 0xf51   : > { %11205 = vst [vmem:[#allocation85_spill] sm:$0xff] %v9606_v13 }
 0xf5a   : > { %v5709_v49 = vpop.eup %5708 }
 0xf5b   : > { %v3609_v16 = vmul.f32 %v5709_v49, %v3608_v43  ;;  %v9615_v43 = vld [vmem:[#allocation15 + $0x68] ss:$16 sps:$4 sm:$0xff]   ;;  %v9618_v49 = vld [vmem:[#allocation15 + $0x84] ss:$16 sps:$4 sm:$0xff]  }
 0xf5c   : > { %11208 = vst [vmem:[#allocation88_spill] sm:$0xff] %v9615_v43  ;;  %11209 = vst [vmem:[#allocation89_spill] sm:$0xff] %v9618_v49 }
 0xf5d   : > { %v9570_v22 = vadd.f32 %v3610_v37, %v3609_v16  ;;  %v9624_v16 = vld [vmem:[#allocation15 + $0x80] ss:$16 sps:$4 sm:$0xff]   ;;  %v9627_v37 = vld [vmem:[#allocation15 + $0x88] ss:$16 sps:$4 sm:$0xff]  }
 0xf5e   : > { %11211 = vst [vmem:[#allocation91_spill] sm:$0xff] %v9624_v16  ;;  %11212 = vst [vmem:[#allocation92_spill] sm:$0xff] %v9627_v37 }
 0xf5f   : > { %v3612_v45 = vpack.c.bf16 %v9570_v22, %v9570_v22 }
 0xf61   : > { %3647 = vmatmul.mubr.bf16.vlgmr.msra.gmra.mrb[72].mxu0 %v3612_v45  ;;  %3688 = vmatmul.mubr.bf16.vlgmr.msra.gmra.mrb[80].mxu1 %v3612_v45  ;;  %v9630_v45 = vld [vmem:[#allocation15 + $0xa4] ss:$16 sps:$4 sm:$0xff]  }
 0xf62   : > { %3749 = vmatprep.mubr.bf16.mxu0 %v3716_v40  ;;  %3790 = vmatprep.mubr.bf16.mxu1 %v3716_v40  ;;  %11213 = vst [vmem:[#allocation93_spill] sm:$0xff] %v9630_v45  ;;  %v9633_v40 = vld [vmem:[#allocation15 + $0xac] ss:$16 sps:$4 sm:$0xff]  }
 0xf63   : > { %3718 = vmatpush1.bf16.msra.mxu0 %v9576_v36  ;;  %3759 = vmatpush1.bf16.msra.mxu1 %v9579_v2  ;;  %11214 = vst [vmem:[#allocation94_spill] sm:$0xff] %v9633_v40 }
 0xf64   : > { %3719 = vmatprep.subr.bf16.mxu0 %v9582_v44  ;;  %3760 = vmatprep.subr.bf16.mxu1 %v9585_v56 }
 0xf67   : > { %3720 = vmatpush1.bf16.msra.mxu0 %v9588_v12  ;;  %3761 = vmatpush1.bf16.msra.mxu1 %v9591_v21 }
 0xf68   : > { %3721 = vmatprep.subr.bf16.mxu0 %v9594_v58  ;;  %3762 = vmatprep.subr.bf16.mxu1 %v9597_v38 }
 0xf6b   : > { %3722 = vmatpush1.bf16.msra.mxu0 %v9600_v1  ;;  %3763 = vmatpush1.bf16.msra.mxu1 %v9603_v42 }
 0xf6c   : > { %3723 = vmatprep.subr.bf16.mxu0 %v9606_v13  ;;  %3764 = vmatprep.subr.bf16.mxu1 %v9609_v6 }
 0xf6f   : > { %3724 = vmatpush1.bf16.msra.mxu0 %v9612_v20  ;;  %3765 = vmatpush1.bf16.msra.mxu1 %v9615_v43 }
 0xf70   : > { %3725 = vmatprep.subr.bf16.mxu0 %v9618_v49  ;;  %3766 = vmatprep.subr.bf16.mxu1 %v9621_v35  ;;  %v9639_v35 = vld [vmem:[#allocation15 + $0xa8] ss:$16 sps:$4 sm:$0xff]  }
 0xf71   : > { %11216 = vst [vmem:[#allocation96_spill] sm:$0xff] %v9639_v35 }
 0xf73   : > { %3726 = vmatpush1.bf16.msra.mxu0 %v9624_v16  ;;  %3767 = vmatpush1.bf16.msra.mxu1 %v9627_v37  ;;  %v9642_v16 = vld [vmem:[#allocation15 + $0xc4] ss:$16 sps:$4 sm:$0xff]   ;;  %v9645_v37 = vld [vmem:[#allocation15 + $0xcc] ss:$16 sps:$4 sm:$0xff]  }
 0xf74   : > { %3727 = vmatprep.subr.bf16.mxu0 %v9630_v45  ;;  %3768 = vmatprep.subr.bf16.mxu1 %v9633_v40  ;;  %11217 = vst [vmem:[#allocation97_spill] sm:$0xff] %v9642_v16  ;;  %11218 = vst [vmem:[#allocation98_spill] sm:$0xff] %v9645_v37  ;;  %v9648_v45 = vld [vmem:[#allocation15 + $0xc0] ss:$16 sps:$4 sm:$0xff]   ;;  %v9651_v40 = vld [vmem:[#allocation15 + $0xc8] ss:$16 sps:$4 sm:$0xff]  }
 0xf75   : > { %11219 = vst [vmem:[#allocation99_spill] sm:$0xff] %v9648_v45  ;;  %11220 = vst [vmem:[#allocation100_spill] sm:$0xff] %v9651_v40 }
 0xf77   : > { %3728 = vmatpush1.bf16.msra.mxu0 %v9636_v25  ;;  %3769 = vmatpush1.bf16.msra.mxu1 %v9639_v35  ;;  %v9654_v25 = vld [vmem:[#allocation15 + $0xe4] ss:$16 sps:$4 sm:$0xff]   ;;  %v9657_v35 = vld [vmem:[#allocation15 + $0xec] ss:$16 sps:$4 sm:$0xff]  }
 0xf78   : > { %3729 = vmatprep.subr.bf16.mxu0 %v9642_v16  ;;  %3770 = vmatprep.subr.bf16.mxu1 %v9645_v37  ;;  %11221 = vst [vmem:[#allocation101_spill] sm:$0xff] %v9654_v25  ;;  %11222 = vst [vmem:[#allocation102_spill] sm:$0xff] %v9657_v35  ;;  %v9660_v16 = vld [vmem:[#allocation15 + $0xe0] ss:$16 sps:$4 sm:$0xff]   ;;  %v9663_v37 = vld [vmem:[#allocation15 + $0xe8] ss:$16 sps:$4 sm:$0xff]  }
 0xf79   : > { %11223 = vst [vmem:[#allocation103_spill] sm:$0xff] %v9660_v16  ;;  %11224 = vst [vmem:[#allocation104_spill] sm:$0xff] %v9663_v37 }
 0xf7b   : > { %3730 = vmatpush1.bf16.msra.mxu0 %v9648_v45  ;;  %3771 = vmatpush1.bf16.msra.mxu1 %v9651_v40  ;;  %v9666_v45 = vld [vmem:[#allocation15 + $0x104] ss:$16 sps:$4 sm:$0xff]   ;;  %v9669_v40 = vld [vmem:[#allocation15 + $0x10c] ss:$16 sps:$4 sm:$0xff]  }
 0xf7c   : > { %3731 = vmatprep.subr.bf16.mxu0 %v9654_v25  ;;  %3772 = vmatprep.subr.bf16.mxu1 %v9657_v35  ;;  %11225 = vst [vmem:[#allocation105_spill] sm:$0xff] %v9666_v45  ;;  %11226 = vst [vmem:[#allocation106_spill] sm:$0xff] %v9669_v40  ;;  %v9672_v25 = vld [vmem:[#allocation15 + $0x100] ss:$16 sps:$4 sm:$0xff]   ;;  %v9675_v35 = vld [vmem:[#allocation15 + $0x108] ss:$16 sps:$4 sm:$0xff]  }
 0xf7d   : > { %11227 = vst [vmem:[#allocation107_spill] sm:$0xff] %v9672_v25  ;;  %11228 = vst [vmem:[#allocation108_spill] sm:$0xff] %v9675_v35 }
 0xf7f   : > { %3732 = vmatpush1.bf16.msra.mxu0 %v9660_v16  ;;  %3773 = vmatpush1.bf16.msra.mxu1 %v9663_v37  ;;  %v9678_v16 = vld [vmem:[#allocation15 + $0x124] ss:$16 sps:$4 sm:$0xff]   ;;  %v9681_v37 = vld [vmem:[#allocation15 + $0x12c] ss:$16 sps:$4 sm:$0xff]  }
 0xf80   : > { %3733 = vmatprep.subr.bf16.mxu0 %v9666_v45  ;;  %3774 = vmatprep.subr.bf16.mxu1 %v9669_v40  ;;  %11229 = vst [vmem:[#allocation109_spill] sm:$0xff] %v9678_v16  ;;  %11230 = vst [vmem:[#allocation110_spill] sm:$0xff] %v9681_v37  ;;  %v9684_v45 = vld [vmem:[#allocation15 + $0x120] ss:$16 sps:$4 sm:$0xff]   ;;  %v9687_v40 = vld [vmem:[#allocation15 + $0x128] ss:$16 sps:$4 sm:$0xff]  }
 0xf81   : > { %11231 = vst [vmem:[#allocation111_spill] sm:$0xff] %v9684_v45  ;;  %11232 = vst [vmem:[#allocation112_spill] sm:$0xff] %v9687_v40 }
 0xf83   : > { %3734 = vmatpush1.bf16.msra.mxu0 %v9672_v25  ;;  %3775 = vmatpush1.bf16.msra.mxu1 %v9675_v35  ;;  %v9690_v25 = vld [vmem:[#allocation15 + $0x144] ss:$16 sps:$4 sm:$0xff]   ;;  %v9693_v35 = vld [vmem:[#allocation15 + $0x14c] ss:$16 sps:$4 sm:$0xff]  }
 0xf84   : > { %3735 = vmatprep.subr.bf16.mxu0 %v9678_v16  ;;  %3776 = vmatprep.subr.bf16.mxu1 %v9681_v37  ;;  %11233 = vst [vmem:[#allocation113_spill] sm:$0xff] %v9690_v25  ;;  %11234 = vst [vmem:[#allocation114_spill] sm:$0xff] %v9693_v35  ;;  %v9696_v16 = vld [vmem:[#allocation15 + $0x140] ss:$16 sps:$4 sm:$0xff]   ;;  %v9699_v37 = vld [vmem:[#allocation15 + $0x148] ss:$16 sps:$4 sm:$0xff]  }
 0xf85   : > { %11235 = vst [vmem:[#allocation115_spill] sm:$0xff] %v9696_v16  ;;  %11236 = vst [vmem:[#allocation116_spill] sm:$0xff] %v9699_v37 }
 0xf87   : > { %3736 = vmatpush1.bf16.msra.mxu0 %v9684_v45  ;;  %3777 = vmatpush1.bf16.msra.mxu1 %v9687_v40  ;;  %v9702_v45 = vld [vmem:[#allocation15 + $0x164] ss:$16 sps:$4 sm:$0xff]   ;;  %v9705_v40 = vld [vmem:[#allocation15 + $0x16c] ss:$16 sps:$4 sm:$0xff]  }
 0xf88   : > { %3737 = vmatprep.subr.bf16.mxu0 %v9690_v25  ;;  %3778 = vmatprep.subr.bf16.mxu1 %v9693_v35  ;;  %11237 = vst [vmem:[#allocation117_spill] sm:$0xff] %v9702_v45  ;;  %11238 = vst [vmem:[#allocation118_spill] sm:$0xff] %v9705_v40  ;;  %v9708_v25 = vld [vmem:[#allocation15 + $0x160] ss:$16 sps:$4 sm:$0xff]   ;;  %v9711_v35 = vld [vmem:[#allocation15 + $0x168] ss:$16 sps:$4 sm:$0xff]  }
 0xf89   : > { %11239 = vst [vmem:[#allocation120_spill] sm:$0xff] %v9708_v25  ;;  %11240 = vst [vmem:[#allocation121_spill] sm:$0xff] %v9711_v35 }
 0xf8b   : > { %3738 = vmatpush1.bf16.msra.mxu0 %v9696_v16  ;;  %3779 = vmatpush1.bf16.msra.mxu1 %v9699_v37  ;;  %v9714_v16 = vld [vmem:[#allocation15 + $0x184] ss:$16 sps:$4 sm:$0xff]   ;;  %v9717_v37 = vld [vmem:[#allocation15 + $0x18c] ss:$16 sps:$4 sm:$0xff]  }
 0xf8c   : > { %3739 = vmatprep.subr.bf16.mxu0 %v9702_v45  ;;  %3780 = vmatprep.subr.bf16.mxu1 %v9705_v40  ;;  %11241 = vst [vmem:[#allocation122_spill] sm:$0xff] %v9714_v16  ;;  %11242 = vst [vmem:[#allocation123_spill] sm:$0xff] %v9717_v37  ;;  %v9720_v45 = vld [vmem:[#allocation15 + $0x180] ss:$16 sps:$4 sm:$0xff]   ;;  %v9723_v40 = vld [vmem:[#allocation15 + $0x188] ss:$16 sps:$4 sm:$0xff]  }
 0xf8d   : > { %11243 = vst [vmem:[#allocation124_spill] sm:$0xff] %v9720_v45  ;;  %11244 = vst [vmem:[#allocation125_spill] sm:$0xff] %v9723_v40 }
 0xf8f   : > { %3740 = vmatpush1.bf16.msra.mxu0 %v9708_v25  ;;  %3781 = vmatpush1.bf16.msra.mxu1 %v9711_v35  ;;  %v9726_v25 = vld [vmem:[#allocation15 + $0x1a4] ss:$16 sps:$4 sm:$0xff]   ;;  %v9729_v35 = vld [vmem:[#allocation15 + $0x1ac] ss:$16 sps:$4 sm:$0xff]  }
 0xf90   : > { %3741 = vmatprep.subr.bf16.mxu0 %v9714_v16  ;;  %3782 = vmatprep.subr.bf16.mxu1 %v9717_v37  ;;  %11245 = vst [vmem:[#allocation126_spill] sm:$0xff] %v9726_v25  ;;  %11246 = vst [vmem:[#allocation128_spill] sm:$0xff] %v9729_v35  ;;  %v9732_v16 = vld [vmem:[#allocation15 + $0x1a0] ss:$16 sps:$4 sm:$0xff]   ;;  %v9735_v37 = vld [vmem:[#allocation15 + $0x1a8] ss:$16 sps:$4 sm:$0xff]  }
 0xf91   : > { %11247 = vst [vmem:[#allocation129_spill] sm:$0xff] %v9732_v16  ;;  %11248 = vst [vmem:[#allocation130_spill] sm:$0xff] %v9735_v37 }
 0xf93   : > { %3742 = vmatpush1.bf16.msra.mxu0 %v9720_v45  ;;  %3783 = vmatpush1.bf16.msra.mxu1 %v9723_v40  ;;  %v9738_v45 = vld [vmem:[#allocation15 + $0x1c4] ss:$16 sps:$4 sm:$0xff]   ;;  %v9741_v40 = vld [vmem:[#allocation15 + $0x1cc] ss:$16 sps:$4 sm:$0xff]  }
 0xf94   : > { %3743 = vmatprep.subr.bf16.mxu0 %v9726_v25  ;;  %3784 = vmatprep.subr.bf16.mxu1 %v9729_v35  ;;  %11249 = vst [vmem:[#allocation131_spill] sm:$0xff] %v9738_v45  ;;  %11250 = vst [vmem:[#allocation132_spill] sm:$0xff] %v9741_v40  ;;  %v9744_v25 = vld [vmem:[#allocation15 + $0x1c0] ss:$16 sps:$4 sm:$0xff]   ;;  %v9747_v35 = vld [vmem:[#allocation15 + $0x1c8] ss:$16 sps:$4 sm:$0xff]  }
 0xf95   : > { %11251 = vst [vmem:[#allocation133_spill] sm:$0xff] %v9744_v25  ;;  %11252 = vst [vmem:[#allocation134_spill] sm:$0xff] %v9747_v35 }
 0xf97   : > { %3744 = vmatpush1.bf16.msra.mxu0 %v9732_v16  ;;  %3785 = vmatpush1.bf16.msra.mxu1 %v9735_v37  ;;  %v9750_v16 = vld [vmem:[#allocation15 + $0x1e4] ss:$16 sps:$4 sm:$0xff]   ;;  %v9753_v37 = vld [vmem:[#allocation15 + $0x1ec] ss:$16 sps:$4 sm:$0xff]  }
 0xf98   : > { %3745 = vmatprep.subr.bf16.mxu0 %v9738_v45  ;;  %3786 = vmatprep.subr.bf16.mxu1 %v9741_v40  ;;  %11253 = vst [vmem:[#allocation135_spill] sm:$0xff] %v9750_v16  ;;  %11254 = vst [vmem:[#allocation136_spill] sm:$0xff] %v9753_v37  ;;  %v9756_v45 = vld [vmem:[#allocation15 + $0x1e0] ss:$16 sps:$4 sm:$0xff]   ;;  %v9759_v40 = vld [vmem:[#allocation15 + $0x1e8] ss:$16 sps:$4 sm:$0xff]  }
 0xf99   : > { %11255 = vst [vmem:[#allocation137_spill] sm:$0xff] %v9756_v45  ;;  %11256 = vst [vmem:[#allocation138_spill] sm:$0xff] %v9759_v40 }
 0xf9b   : > { %3746 = vmatpush1.bf16.msra.mxu0 %v9744_v25  ;;  %3787 = vmatpush1.bf16.msra.mxu1 %v9747_v35  ;;  %v6252_v25 = vld [vmem:[#allocation9 + $0x4] ss:$12 sps:$4 sm:$0xff]  }
 0xf9c   : > { %3747 = vmatprep.subr.bf16.mxu0 %v9750_v16  ;;  %3788 = vmatprep.subr.bf16.mxu1 %v9753_v37 }
 0xf9f   : > { %3748 = vmatpush1.bf16.msra.mxu0 %v9756_v45  ;;  %3789 = vmatpush1.bf16.msra.mxu1 %v9759_v40 }
 0xfa0   : > { %3839 = vmatprep.subr.bf16.mxu0 %v6252_v25  ;;  %5082 = vmatprep.subr.bf16.mxu1 %v10644_v26 }
0x1034   : > { %v3648_v35 = vpop.f32.mrb[72].mxu0  ;;  %v3689_v49 = vpop.f32.mrb[80].mxu1 }
0x1035   : > { %v3649_v16 = vadd.f32 %v3648_v35, %v11159_v11  ;;  %v3650_v43 = vpop.f32.mrb[73].mxu0  ;;  %v3691_v20 = vpop.f32.mrb[81].mxu1  ;;  %v3690_v11 = vadd.f32 %v3689_v49, %v7564_v5  ;;  %v6261_v49 = vld [vmem:[#allocation9 + $0x60] ss:$12 sps:$4 sm:$0xff]  }
0x1036   : > { %v3652_v6 = vpop.f32.mrb[74].mxu0  ;;  %v3693_v37 = vpop.f32.mrb[82].mxu1  ;;  %v3651_v45 = vadd.f32 %v3650_v43, %v10752_v15  ;;  %v3692_v12 = vadd.f32 %v3691_v20, %v7560_v9  ;;  %v6259_v20 = vld [vmem:[#allocation9 + $0x48] ss:$12 sps:$4 sm:$0xff]  }
0x1037   : > { %v4830_v13 = vmul.f32 -1.442695, %v3649_v16  ;;  %v3653_v42 = vpop.f32.mrb[75].mxu0  ;;  %v3694_v1 = vpop.f32.mrb[83].mxu1 }
0x1038   : > { %v4831_v38 = vmul.f32 -1.442695, %v3651_v45 }
0x1039   : > { %5710 = vpow2.f32 %v4830_v13 }
0x103a   : > { %5712 = vpow2.f32 %v4831_v38 }
0x1043   : > { %v5711_v40 = vpop.eup %5710 }
0x1044   : > { %v3699_v25 = vadd.f32 1.0, %v5711_v40  ;;  %v5713_v58 = vpop.eup %5712  ;;  %v6262_v40 = vld [vmem:[#allocation9 + $0x7c] ss:$12 sps:$4 sm:$0xff]  }
0x1045   : > { %v3705_v21 = vadd.f32 1.0, %v5713_v58  ;;  %v6253_v58 = vld [vmem:[#allocation9] ss:$12 sps:$4 sm:$0xff]  }
0x1046   : > { %5714 = vrcp.f32 %v3699_v25  ;;  %v6263_v25 = vld [vmem:[#allocation9 + $0x78] ss:$12 sps:$4 sm:$0xff]  }
0x1047   : > { %5716 = vrcp.f32 %v3705_v21  ;;  %v6254_v21 = vld [vmem:[#allocation9 + $0x1c] ss:$12 sps:$4 sm:$0xff]  }
0x1050   : > { %v5715_v35 = vpop.eup %5714 }
0x1051   : > { %v3708_v6 = vmul.f32 %v5715_v35, %v3692_v12  ;;  %v5717_v1 = vpop.eup %5716  ;;  %v6257_v12 = vld [vmem:[#allocation9 + $0x30] ss:$12 sps:$4 sm:$0xff]  }
0x1052   : > { %v3711_v43 = vsub.f32 1.0, %v5717_v1  ;;  %v3713_v38 = vmul.f32 %v5717_v1, %v9353_v34  ;;  %v6265_v1 = vld [vmem:[#allocation9 + $0x90] ss:$12 sps:$4 sm:$0xff]  }
0x1053   : > { %v3709_v42 = vadd.f32 %v3708_v6, %v3690_v11  ;;  %v6255_v11 = vld [vmem:[#allocation9 + $0x18] ss:$12 sps:$4 sm:$0xff]   ;;  %v6264_v6 = vld [vmem:[#allocation9 + $0x94] ss:$12 sps:$4 sm:$0xff]  }
0x1055   : > { %5718 = vtanh.f32 %v3709_v42 }
0x105f   : > { %v5719_v13 = vpop.eup %5718 }
0x1060   : > { %v3712_v16 = vmul.f32 %v5719_v13, %v3711_v43  ;;  %v6266_v43 = vld [vmem:[#allocation9 + $0xac] ss:$12 sps:$4 sm:$0xff]  }
0x1062   : > { %v3714_v37 = vadd.f32 %v3713_v38, %v3712_v16  ;;  %v6267_v16 = vld [vmem:[#allocation9 + $0xa8] ss:$12 sps:$4 sm:$0xff]  }
0x1063   : > { %v6268_v38 = vld [vmem:[#allocation12 + $0x4] ss:$16 sps:$4 sm:$0xff]  }
0x1064   : > { %v3715_v45 = vpack.c.bf16 %v3714_v37, %v3714_v37 }
0x1066   : > { %3750 = vmatmul.mubr.bf16.vlgmr.msra.gmra.mrb[76].mxu0 %v3715_v45  ;;  %3791 = vmatmul.mubr.bf16.vlgmr.msra.gmra.mrb[84].mxu1 %v3715_v45  ;;  %v11282_v45 = vld [vmem:[#allocation62_spill] sm:$0xff] }
0x1067   : > { %3840 = vmatpush1.bf16.msra.mxu0 %v6253_v58  ;;  %5083 = vmatpush3.bf16.msra.mxu1 %v9295_v48  ;;  %v6256_v48 = vld [vmem:[#allocation9 + $0x34] ss:$12 sps:$4 sm:$0xff]  }
0x1068   : > { %3841 = vmatprep.subr.bf16.mxu0 %v6254_v21  ;;  %5084 = vmatprep.subr.bf16.mxu1 %v10644_v26  ;;  %v11283_v58 = vld [vmem:[#allocation63_spill] sm:$0xff]  ;;  %v11284_v21 = vld [vmem:[#allocation64_spill] sm:$0xff] }
0x1069   : > { %3871 = vmatprep.mubr.bf16.mxu0 %v10647_v18  ;;  %5098 = vmatprep.mubr.msk.bf16.mxu1 %vm6694_vm0, %v10644_v26  ;;  %v6258_v18 = vld [vmem:[#allocation9 + $0x4c] ss:$12 sps:$4 sm:$0xff]  }
0x106b   : > { %3842 = vmatpush1.bf16.msra.mxu0 %v6255_v11  ;;  %5085 = vmatpush3.bf16.msra.mxu1 %v9305_v10  ;;  %v6260_v10 = vld [vmem:[#allocation9 + $0x64] ss:$12 sps:$4 sm:$0xff]  }
0x106c   : > { %3843 = vmatprep.subr.bf16.mxu0 %v6256_v48  ;;  %5086 = vmatprep.subr.bf16.mxu1 %v10644_v26  ;;  %v11285_v11 = vld [vmem:[#allocation65_spill] sm:$0xff]  ;;  %v11286_v48 = vld [vmem:[#allocation66_spill] sm:$0xff] }
0x106f   : > { %3844 = vmatpush1.bf16.msra.mxu0 %v6257_v12  ;;  %5087 = vmatpush3.bf16.msra.mxu1 %v9311_v33  ;;  %v9788_v33 = vstv %s3821_s25  ;;  %v11287_v12 = vld [vmem:[#allocation67_spill] sm:$0xff] }
0x1070   : > { %3845 = vmatprep.subr.bf16.mxu0 %v6258_v18  ;;  %5088 = vmatprep.subr.bf16.mxu1 %v10644_v26  ;;  %v3823_v35 = vmul.f32 %v9788_v33, %v9570_v22  ;;  %v11288_v18 = vld [vmem:[#allocation68_spill] sm:$0xff] }
0x1073   : > { %3846 = vmatpush1.bf16.msra.mxu0 %v6259_v20  ;;  %5089 = vmatpush3.bf16.msra.mxu1 %v9317_v41  ;;  %v9791_v41 = vstv %s3824_s21  ;;  %v11289_v20 = vld [vmem:[#allocation69_spill] sm:$0xff] }
0x1074   : > { %3847 = vmatprep.subr.bf16.mxu0 %v6260_v10  ;;  %5090 = vmatprep.subr.bf16.mxu1 %v10644_v26  ;;  %v3826_v42 = vmul.f32 %v9791_v41, %v9351_v4  ;;  %v11290_v10 = vld [vmem:[#allocation70_spill] sm:$0xff] }
0x1076   : > { %v9803_v22 = vadd.f32 %v3826_v42, %v3823_v35  ;;  %v11294_v35 = vld [vmem:[#allocation74_spill] sm:$0xff] }
0x1077   : > { %3848 = vmatpush1.bf16.msra.mxu0 %v6261_v49  ;;  %5091 = vmatpush3.bf16.msra.mxu1 %v9323_v23  ;;  %v3828_v23 = vmul.f32 %v9788_v33, %v3714_v37  ;;  %v11281_v37 = vld [vmem:[#allocation119_spill] sm:$0xff] }
0x1078   : > { %3849 = vmatprep.subr.bf16.mxu0 %v6262_v40  ;;  %5092 = vmatprep.subr.bf16.mxu1 %v10644_v26  ;;  %v3838_v4 = vpack.c.bf16 %v9803_v22, %v9803_v22  ;;  %v11291_v49 = vld [vmem:[#allocation71_spill] sm:$0xff]  ;;  %v11292_v40 = vld [vmem:[#allocation72_spill] sm:$0xff] }
0x107b   : > { %3850 = vmatpush1.bf16.msra.mxu0 %v6263_v25  ;;  %5093 = vmatpush3.bf16.msra.mxu1 %v9331_v54  ;;  %v3829_v54 = vmul.f32 %v9791_v41, %v9353_v34  ;;  %v6270_v34 = vld [vmem:[#allocation12 + $0x24] ss:$16 sps:$4 sm:$0xff]  }
0x107c   : > { %3851 = vmatprep.subr.bf16.mxu0 %v6264_v6  ;;  %5094 = vmatprep.subr.bf16.mxu1 %v10644_v26  ;;  %v11293_v25 = vld [vmem:[#allocation73_spill] sm:$0xff]  ;;  %v11295_v6 = vld [vmem:[#allocation76_spill] sm:$0xff] }
0x107d   : > { %v9805_v13 = vadd.f32 %v3829_v54, %v3828_v23  ;;  %v11296_v23 = vld [vmem:[#allocation78_spill] sm:$0xff]  ;;  %v11297_v54 = vld [vmem:[#allocation33_spill] sm:$0xff] }
0x107f   : > { %3852 = vmatpush1.bf16.msra.mxu0 %v6265_v1  ;;  %5095 = vmatpush3.bf16.msra.mxu1 %v9344_v57  ;;  %v3943_v57 = vpack.c.bf16 %v9805_v13, %v9805_v13 }
0x1080   : > { %3853 = vmatprep.subr.bf16.mxu0 %v6266_v43  ;;  %5096 = vmatprep.subr.bf16.mxu1 %v10644_v26  ;;  %v6269_v26 = vld [vmem:[#allocation12] ss:$16 sps:$4 sm:$0xff]  }
0x1083   : > { %3854 = vmatpush1.bf16.msra.mxu0 %v6267_v16  ;;  %5097 = vmatpush3.bf16.msra.mxu1 %v9356_v0  ;;  %v6271_v0 = vld [vmem:[#allocation12 + $0x20] ss:$16 sps:$4 sm:$0xff]  }
0x1084   : > { %3944 = vmatprep.subr.bf16.mxu0 %v6268_v38  ;;  %3985 = vmatprep.subr.bf16.mxu1 %v9362_v30  ;;  %v11258_v30 = vld [vmem:[#allocation39_spill] sm:$0xff] }
0x1086   : > { %3872 = vmatmul.mubr.bf16.vlgmr.msra.gmra.mrb[80].mxu0 %v3838_v4  ;;  %5099 = vmatmul.mubr.bf16.vlgmr.msra.gmra.mrb[88].mxu1 %v3838_v4 }
0x1087   : > { %3976 = vmatprep.mubr.bf16.mxu0 %v3943_v57  ;;  %4017 = vmatprep.mubr.bf16.mxu1 %v3943_v57 }
0x1088   : > { %3945 = vmatpush1.bf16.msra.mxu0 %v6269_v26  ;;  %3986 = vmatpush1.bf16.msra.mxu1 %v9368_v17  ;;  %v11259_v17 = vld [vmem:[#allocation40_spill] sm:$0xff] }
0x1089   : > { %3946 = vmatprep.subr.bf16.mxu0 %v6270_v34  ;;  %3987 = vmatprep.subr.bf16.mxu1 %v9372_v47  ;;  %v11260_v47 = vld [vmem:[#allocation41_spill] sm:$0xff] }
0x108c   : > { %3947 = vmatpush1.bf16.msra.mxu0 %v6271_v0  ;;  %3988 = vmatpush1.bf16.msra.mxu1 %v9376_v29  ;;  %v11261_v29 = vld [vmem:[#allocation42_spill] sm:$0xff] }
0x108d   : > { %3948 = vmatprep.subr.bf16.mxu0 %v9379_v31  ;;  %3989 = vmatprep.subr.bf16.mxu1 %v9382_v59  ;;  %v11262_v31 = vld [vmem:[#allocation43_spill] sm:$0xff]  ;;  %v11263_v59 = vld [vmem:[#allocation44_spill] sm:$0xff] }
0x1090   : > { %3949 = vmatpush1.bf16.msra.mxu0 %v9385_v27  ;;  %3990 = vmatpush1.bf16.msra.mxu1 %v9388_v46  ;;  %v11264_v27 = vld [vmem:[#allocation45_spill] sm:$0xff]  ;;  %v11265_v46 = vld [vmem:[#allocation46_spill] sm:$0xff] }
0x1091   : > { %3950 = vmatprep.subr.bf16.mxu0 %v9391_v50  ;;  %3991 = vmatprep.subr.bf16.mxu1 %v9394_v61  ;;  %v11266_v50 = vld [vmem:[#allocation47_spill] sm:$0xff]  ;;  %v11267_v61 = vld [vmem:[#allocation48_spill] sm:$0xff] }
0x1094   : > { %3951 = vmatpush1.bf16.msra.mxu0 %v9397_v63  ;;  %3992 = vmatpush1.bf16.msra.mxu1 %v9400_v7  ;;  %v11268_v63 = vld [vmem:[#allocation49_spill] sm:$0xff]  ;;  %v11269_v7 = vld [vmem:[#allocation50_spill] sm:$0xff] }
0x1095   : > { %3952 = vmatprep.subr.bf16.mxu0 %v9403_v39  ;;  %3993 = vmatprep.subr.bf16.mxu1 %v9406_v62  ;;  %v11270_v39 = vld [vmem:[#allocation51_spill] sm:$0xff]  ;;  %v11271_v62 = vld [vmem:[#allocation52_spill] sm:$0xff] }
0x1098   : > { %3953 = vmatpush1.bf16.msra.mxu0 %v9409_v53  ;;  %3994 = vmatpush1.bf16.msra.mxu1 %v9412_v55  ;;  %v11272_v53 = vld [vmem:[#allocation53_spill] sm:$0xff]  ;;  %v11273_v55 = vld [vmem:[#allocation54_spill] sm:$0xff] }
0x1099   : > { %3954 = vmatprep.subr.bf16.mxu0 %v9415_v3  ;;  %3995 = vmatprep.subr.bf16.mxu1 %v9418_v14  ;;  %v11274_v3 = vld [vmem:[#allocation55_spill] sm:$0xff]  ;;  %v11275_v14 = vld [vmem:[#allocation56_spill] sm:$0xff] }
0x109c   : > { %3955 = vmatpush1.bf16.msra.mxu0 %v9421_v28  ;;  %3996 = vmatpush1.bf16.msra.mxu1 %v9424_v19  ;;  %v11276_v28 = vld [vmem:[#allocation57_spill] sm:$0xff]  ;;  %v11277_v19 = vld [vmem:[#allocation58_spill] sm:$0xff] }
0x109d   : > { %3956 = vmatprep.subr.bf16.mxu0 %v9427_v8  ;;  %3997 = vmatprep.subr.bf16.mxu1 %v9430_v52  ;;  %v11278_v8 = vld [vmem:[#allocation59_spill] sm:$0xff]  ;;  %v11279_v52 = vld [vmem:[#allocation60_spill] sm:$0xff] }
0x10a0   : > { %3957 = vmatpush1.bf16.msra.mxu0 %v9433_v60  ;;  %3998 = vmatpush1.bf16.msra.mxu1 %v11258_v30  ;;  %v11280_v60 = vld [vmem:[#allocation61_spill] sm:$0xff]  ;;  %v11298_v30 = vld [vmem:[#allocation34_spill] sm:$0xff] }
0x10a1   : > { %3958 = vmatprep.subr.bf16.mxu0 %v11259_v17  ;;  %3999 = vmatprep.subr.bf16.mxu1 %v11260_v47 }
0x10a4   : > { %3959 = vmatpush1.bf16.msra.mxu0 %v11261_v29  ;;  %4000 = vmatpush1.bf16.msra.mxu1 %v11262_v31 }
0x10a5   : > { %3960 = vmatprep.subr.bf16.mxu0 %v11263_v59  ;;  %4001 = vmatprep.subr.bf16.mxu1 %v11264_v27 }
0x10a8   : > { %3961 = vmatpush1.bf16.msra.mxu0 %v11265_v46  ;;  %4002 = vmatpush1.bf16.msra.mxu1 %v11266_v50  ;;  %v11299_v46 = vld [vmem:[#allocation35_spill] sm:$0xff] }
0x10a9   : > { %3962 = vmatprep.subr.bf16.mxu0 %v11267_v61  ;;  %4003 = vmatprep.subr.bf16.mxu1 %v11268_v63 }
0x10ac   : > { %3963 = vmatpush1.bf16.msra.mxu0 %v11269_v7  ;;  %4004 = vmatpush1.bf16.msra.mxu1 %v11270_v39  ;;  %v3835_v39 = vld [vmem:[%s7077_s29 + $0xa8] sm:$0xff] }
0x10ad   : > { %3964 = vmatprep.subr.bf16.mxu0 %v11271_v62  ;;  %4005 = vmatprep.subr.bf16.mxu1 %v11272_v53 }
0x10b0   : > { %3965 = vmatpush1.bf16.msra.mxu0 %v11273_v55  ;;  %4006 = vmatpush1.bf16.msra.mxu1 %v11274_v3 }
0x10b1   : > { %3966 = vmatprep.subr.bf16.mxu0 %v11275_v14  ;;  %4007 = vmatprep.subr.bf16.mxu1 %v11276_v28  ;;  %v3836_v14 = vld [vmem:[%s7077_s29 + $0xb0] sm:$0xff] }
0x10b4   : > { %3967 = vmatpush1.bf16.msra.mxu0 %v11277_v19  ;;  %4008 = vmatpush1.bf16.msra.mxu1 %v11278_v8 }
0x10b5   : > { %3968 = vmatprep.subr.bf16.mxu0 %v11279_v52  ;;  %4009 = vmatprep.subr.bf16.mxu1 %v11280_v60 }
0x10b8   : > { %3969 = vmatpush1.bf16.msra.mxu0 %v11281_v37  ;;  %4010 = vmatpush1.bf16.msra.mxu1 %v11282_v45 }
0x10b9   : > { %3970 = vmatprep.subr.bf16.mxu0 %v11283_v58  ;;  %4011 = vmatprep.subr.bf16.mxu1 %v11284_v21 }
0x10bc   : > { %3971 = vmatpush1.bf16.msra.mxu0 %v11285_v11  ;;  %4012 = vmatpush1.bf16.msra.mxu1 %v11286_v48 }
0x10bd   : > { %3972 = vmatprep.subr.bf16.mxu0 %v11287_v12  ;;  %4013 = vmatprep.subr.bf16.mxu1 %v11288_v18 }
0x10c0   : > { %3973 = vmatpush1.bf16.msra.mxu0 %v11289_v20  ;;  %4014 = vmatpush1.bf16.msra.mxu1 %v11290_v10 }
0x10c1   : > { %3974 = vmatprep.subr.bf16.mxu0 %v11291_v49  ;;  %4015 = vmatprep.subr.bf16.mxu1 %v11292_v40 }
0x10c4   : > { %3975 = vmatpush1.bf16.msra.mxu0 %v11293_v25  ;;  %4016 = vmatpush1.bf16.msra.mxu1 %v11294_v35 }
0x10c5   : > { %4047 = vmatprep.subr.bf16.mxu0 %v11295_v6  ;;  %4088 = vmatprep.subr.bf16.mxu1 %v11296_v23 }
0x1139   : > { %v3751_v42 = vpop.f32.mrb[76].mxu0  ;;  %v3792_v1 = vpop.f32.mrb[84].mxu1 }
0x113a   : > { %v3752_v43 = vadd.f32 %v3751_v42, %v11297_v54  ;;  %v3753_v16 = vpop.f32.mrb[77].mxu0  ;;  %v3794_v4 = vpop.f32.mrb[85].mxu1  ;;  %v3793_v63 = vadd.f32 %v3792_v1, %v7744_v51  ;;  %v3837_v42 = vld [vmem:[%s7077_s29 + $0xb8] sm:$0xff] }
0x113b   : > { %v3755_v38 = vpop.f32.mrb[78].mxu0  ;;  %v3796_v57 = vpop.f32.mrb[86].mxu1  ;;  %v3754_v17 = vadd.f32 %v3753_v16, %v11298_v30  ;;  %v3795_v50 = vadd.f32 %v3794_v4, %v11299_v46 }
0x113c   : > { %v4832_v26 = vmul.f32 -1.442695, %v3752_v43  ;;  %v3756_v34 = vpop.f32.mrb[79].mxu0  ;;  %v3797_v0 = vpop.f32.mrb[87].mxu1 }
0x113d   : > { %v4833_v47 = vmul.f32 -1.442695, %v3754_v17  ;;  %v9890_v17 = vstv %s4151_s28 }
0x113e   : > { %5720 = vpow2.f32 %v4832_v26  ;;  %v3832_v26 = vmul.f32 %v9791_v41, %v9568_v24 }
0x113f   : > { %5722 = vpow2.f32 %v4833_v47  ;;  %v9892_v47 = vstv %s4154_s1 }
0x1148   : > { %v5721_v29 = vpop.eup %5720 }
0x1149   : > { %v3802_v31 = vadd.f32 1.0, %v5721_v29  ;;  %v5723_v59 = vpop.eup %5722 }
0x114a   : > { %v3808_v27 = vadd.f32 1.0, %v5723_v59 }
0x114b   : > { %5724 = vrcp.f32 %v3802_v31 }
0x114c   : > { %5726 = vrcp.f32 %v3808_v27 }
0x1155   : > { %v5725_v61 = vpop.eup %5724 }
0x1156   : > { %v3811_v7 = vmul.f32 %v5725_v61, %v3795_v50  ;;  %v5727_v21 = vpop.eup %5726  ;;  %v11300_v50 = vld [vmem:[#allocation79_spill] sm:$0xff]  ;;  %v11302_v61 = vld [vmem:[#allocation81_spill] sm:$0xff] }
0x1157   : > { %v3814_v48 = vsub.f32 1.0, %v5727_v21  ;;  %v3816_v18 = vmul.f32 %v5727_v21, %v9568_v24  ;;  %v11323_v21 = vld [vmem:[#allocation102_spill] sm:$0xff] }
0x1158   : > { %v3812_v62 = vadd.f32 %v3811_v7, %v3793_v63  ;;  %v11303_v63 = vld [vmem:[#allocation82_spill] sm:$0xff]  ;;  %v11304_v7 = vld [vmem:[#allocation83_spill] sm:$0xff] }
0x1159   : > { %v3873_v53 = vpop.f32.mrb[80].mxu0  ;;  %v3914_v55 = vpop.f32.mrb[88].mxu1 }
0x115a   : > { %5728 = vtanh.f32 %v3812_v62  ;;  %v3920_v3 = vadd.f32 %v3873_v53, %v3835_v39  ;;  %v3875_v28 = vpop.f32.mrb[81].mxu0  ;;  %v5100_v19 = vpop.f32.mrb[89].mxu1  ;;  %v3934_v6 = vadd.f32 %v9560_v32, %v3914_v55  ;;  %v11305_v39 = vld [vmem:[#allocation84_spill] sm:$0xff]  ;;  %v11308_v62 = vld [vmem:[#allocation87_spill] sm:$0xff]  ;;  %v11311_v53 = vld [vmem:[#allocation90_spill] sm:$0xff] }
0x115b   : > { %v3877_v8 = vpop.f32.mrb[82].mxu0  ;;  %v3917_v52 = vpop.f32.mrb[90].mxu1  ;;  %v3927_v58 = vadd.f32 %v3875_v28, %v3836_v14  ;;  %v11312_v55 = vld [vmem:[#allocation91_spill] sm:$0xff]  ;;  %v11314_v14 = vld [vmem:[#allocation93_spill] sm:$0xff]  ;;  %v11315_v28 = vld [vmem:[#allocation94_spill] sm:$0xff] }
0x115c   : > { %v4834_v60 = vmul.f32 -1.442695, %v3920_v3  ;;  %v3878_v37 = vpop.f32.mrb[83].mxu0  ;;  %v5101_v45 = vpop.f32.mrb[91].mxu1  ;;  %v11313_v3 = vld [vmem:[#allocation92_spill] sm:$0xff]  ;;  %v11316_v19 = vld [vmem:[#allocation95_spill] sm:$0xff] }
0x115d   : > { %v4835_v11 = vmul.f32 -1.442695, %v3927_v58  ;;  %v11317_v8 = vld [vmem:[#allocation96_spill] sm:$0xff]  ;;  %v11318_v52 = vld [vmem:[#allocation97_spill] sm:$0xff]  ;;  %v11320_v37 = vld [vmem:[#allocation99_spill] sm:$0xff] }
0x115e   : > { %5730 = vpow2.f32 %v4834_v60  ;;  %v11319_v60 = vld [vmem:[#allocation98_spill] sm:$0xff]  ;;  %v11321_v45 = vld [vmem:[#allocation100_spill] sm:$0xff]  ;;  %v11322_v58 = vld [vmem:[#allocation101_spill] sm:$0xff] }
0x115f   : > { %5732 = vpow2.f32 %v4835_v11  ;;  %v11324_v11 = vld [vmem:[#allocation103_spill] sm:$0xff] }
0x1164   : > { %v5729_v12 = vpop.eup %5728 }
0x1165   : > { %v3815_v20 = vmul.f32 %v5729_v12, %v3814_v48  ;;  %v11325_v48 = vld [vmem:[#allocation104_spill] sm:$0xff]  ;;  %v11326_v12 = vld [vmem:[#allocation105_spill] sm:$0xff] }
0x1167   : > { %v3817_v10 = vadd.f32 %v3816_v18, %v3815_v20  ;;  %v11327_v18 = vld [vmem:[#allocation106_spill] sm:$0xff]  ;;  %v11328_v20 = vld [vmem:[#allocation107_spill] sm:$0xff] }
0x1168   : > { %v5731_v49 = vpop.eup %5730 }
0x1169   : > { %v3924_v40 = vadd.f32 1.0, %v5731_v49  ;;  %v5733_v25 = vpop.eup %5732  ;;  %v3831_v4 = vmul.f32 %v9788_v33, %v3817_v10  ;;  %v4156_v33 = vmul.f32 %v9892_v47, %v9803_v22  ;;  %v11329_v10 = vld [vmem:[#allocation108_spill] sm:$0xff]  ;;  %v11330_v49 = vld [vmem:[#allocation109_spill] sm:$0xff] }
0x116a   : > { %v3931_v35 = vadd.f32 1.0, %v5733_v25  ;;  %v11332_v25 = vld [vmem:[#allocation111_spill] sm:$0xff] }
0x116b   : > { %5734 = vrcp.f32 %v3924_v40  ;;  %v9888_v0 = vadd.f32 %v3832_v26, %v3831_v4  ;;  %v11331_v40 = vld [vmem:[#allocation110_spill] sm:$0xff]  ;;  %v11340_v4 = vld [vmem:[#allocation120_spill] sm:$0xff]  ;;  %v11343_v26 = vld [vmem:[#allocation123_spill] sm:$0xff] }
0x116c   : > { %5736 = vrcp.f32 %v3931_v35  ;;  %v11333_v35 = vld [vmem:[#allocation112_spill] sm:$0xff] }
0x116d   : > { %v4046_v27 = vpack.c.bf16 %v9888_v0, %v9888_v0 }
0x1175   : > { %v5735_v23 = vpop.eup %5734 }
0x1176   : > { %v3935_v1 = vmul.f32 %v5735_v23, %v3934_v6  ;;  %v5737_v16 = vpop.eup %5736  ;;  %v11334_v6 = vld [vmem:[#allocation113_spill] sm:$0xff]  ;;  %v11335_v23 = vld [vmem:[#allocation114_spill] sm:$0xff] }
0x1177   : > { %v3938_v38 = vsub.f32 1.0, %v5737_v16  ;;  %v3940_v32 = vmul.f32 %v5737_v16, %v9803_v22  ;;  %v11301_v22 = vld [vmem:[#allocation80_spill] sm:$0xff]  ;;  %v11339_v16 = vld [vmem:[#allocation118_spill] sm:$0xff] }
0x1178   : > { %v3936_v43 = vadd.f32 %v3935_v1, %v3837_v42  ;;  %v11336_v42 = vld [vmem:[#allocation115_spill] sm:$0xff]  ;;  %v11337_v1 = vld [vmem:[#allocation116_spill] sm:$0xff] }
0x117a   : > { %5738 = vtanh.f32 %v3936_v43  ;;  %v11338_v43 = vld [vmem:[#allocation117_spill] sm:$0xff] }
0x1184   : > { %v5739_v57 = vpop.eup %5738 }
0x1185   : > { %v3939_v34 = vmul.f32 %v5739_v57, %v3938_v38  ;;  %v11341_v38 = vld [vmem:[#allocation121_spill] sm:$0xff]  ;;  %v11342_v57 = vld [vmem:[#allocation122_spill] sm:$0xff] }
0x1187   : > { %v3941_v29 = vadd.f32 %v3940_v32, %v3939_v34  ;;  %v11344_v34 = vld [vmem:[#allocation124_spill] sm:$0xff]  ;;  %v11345_v32 = vld [vmem:[#allocation125_spill] sm:$0xff] }
0x1189   : > { %v3942_v31 = vpack.c.bf16 %v3941_v29, %v3941_v29  ;;  %v4153_v59 = vmul.f32 %v9890_v17, %v3941_v29  ;;  %v11346_v29 = vld [vmem:[#allocation126_spill] sm:$0xff] }
0x118b   : > { %3977 = vmatmul.mubr.bf16.vlgmr.msra.gmra.mrb[84].mxu0 %v3942_v31  ;;  %4018 = vmatmul.mubr.bf16.vlgmr.msra.gmra.mrb[92].mxu1 %v3942_v31  ;;  %v4157_v41 = vadd.f32 %v4156_v33, %v4153_v59  ;;  %v11347_v31 = vld [vmem:[#allocation128_spill] sm:$0xff]  ;;  %v11348_v59 = vld [vmem:[#allocation129_spill] sm:$0xff]  ;;  %v11349_v33 = vld [vmem:[#allocation130_spill] sm:$0xff] }
0x118c   : > { %4079 = vmatprep.mubr.bf16.mxu0 %v4046_v27  ;;  %4120 = vmatprep.mubr.bf16.mxu1 %v4046_v27  ;;  %v11350_v27 = vld [vmem:[#allocation131_spill] sm:$0xff] }
0x118d   : > { %4048 = vmatpush1.bf16.msra.mxu0 %v9576_v36  ;;  %4089 = vmatpush1.bf16.msra.mxu1 %v9579_v2  ;;  %4165 = vst [vmem:[#allocation2] sm:$0xff] %v4157_v41  ;;  %v11306_v36 = vld [vmem:[#allocation85_spill] sm:$0xff]  ;;  %v11307_v2 = vld [vmem:[#allocation86_spill] sm:$0xff]  ;;  %v11351_v41 = vld [vmem:[#allocation132_spill] sm:$0xff] }
0x118e   : > { %4049 = vmatprep.subr.bf16.mxu0 %v9582_v44  ;;  %4090 = vmatprep.subr.bf16.mxu1 %v9585_v56  ;;  %v11309_v44 = vld [vmem:[#allocation88_spill] sm:$0xff]  ;;  %v11310_v56 = vld [vmem:[#allocation89_spill] sm:$0xff] }
0x1191   : > { %4050 = vmatpush1.bf16.msra.mxu0 %v11300_v50  ;;  %4091 = vmatpush1.bf16.msra.mxu1 %v11301_v22  ;;  %v11352_v50 = vld [vmem:[#allocation133_spill] sm:$0xff]  ;;  %v11353_v22 = vld [vmem:[#allocation134_spill] sm:$0xff] }
0x1192   : > { %4051 = vmatprep.subr.bf16.mxu0 %v11302_v61  ;;  %4092 = vmatprep.subr.bf16.mxu1 %v11303_v63  ;;  %v11354_v61 = vld [vmem:[#allocation135_spill] sm:$0xff]  ;;  %v11355_v63 = vld [vmem:[#allocation136_spill] sm:$0xff] }
0x1195   : > { %4052 = vmatpush1.bf16.msra.mxu0 %v11304_v7  ;;  %4093 = vmatpush1.bf16.msra.mxu1 %v11305_v39  ;;  %v11356_v7 = vld [vmem:[#allocation137_spill] sm:$0xff]  ;;  %v11357_v39 = vld [vmem:[#allocation138_spill] sm:$0xff] }
0x1196   : > { %4053 = vmatprep.subr.bf16.mxu0 %v11306_v36  ;;  %4094 = vmatprep.subr.bf16.mxu1 %v11307_v2  ;;  %v5512_v36 = vld [vmem:[#allocation18] sm:$0xff]  }
0x1199   : > { %4054 = vmatpush1.bf16.msra.mxu0 %v11308_v62  ;;  %4095 = vmatpush1.bf16.msra.mxu1 %v11309_v44  ;;  %v11358_v44 = vld [vmem:[#allocation127_spill] sm:$0xff] }
0x119a   : > { %4055 = vmatprep.subr.bf16.mxu0 %v11310_v56  ;;  %4096 = vmatprep.subr.bf16.mxu1 %v11311_v53 }
0x119d   : > { %4056 = vmatpush1.bf16.msra.mxu0 %v11312_v55  ;;  %4097 = vmatpush1.bf16.msra.mxu1 %v11313_v3 }
0x119e   : > { %4057 = vmatprep.subr.bf16.mxu0 %v11314_v14  ;;  %4098 = vmatprep.subr.bf16.mxu1 %v11315_v28 }
0x11a1   : > { %4058 = vmatpush1.bf16.msra.mxu0 %v11316_v19  ;;  %4099 = vmatpush1.bf16.msra.mxu1 %v11317_v8 }
0x11a2   : > { %4059 = vmatprep.subr.bf16.mxu0 %v11318_v52  ;;  %4100 = vmatprep.subr.bf16.mxu1 %v11319_v60 }
0x11a5   : > { %4060 = vmatpush1.bf16.msra.mxu0 %v11320_v37  ;;  %4101 = vmatpush1.bf16.msra.mxu1 %v11321_v45 }
0x11a6   : > { %4061 = vmatprep.subr.bf16.mxu0 %v11322_v58  ;;  %4102 = vmatprep.subr.bf16.mxu1 %v11323_v21 }
0x11a9   : > { %4062 = vmatpush1.bf16.msra.mxu0 %v11324_v11  ;;  %4103 = vmatpush1.bf16.msra.mxu1 %v11325_v48 }
0x11aa   : > { %4063 = vmatprep.subr.bf16.mxu0 %v11326_v12  ;;  %4104 = vmatprep.subr.bf16.mxu1 %v11327_v18 }
0x11ad   : > { %4064 = vmatpush1.bf16.msra.mxu0 %v11328_v20  ;;  %4105 = vmatpush1.bf16.msra.mxu1 %v11329_v10 }
0x11ae   : > { %4065 = vmatprep.subr.bf16.mxu0 %v11330_v49  ;;  %4106 = vmatprep.subr.bf16.mxu1 %v11331_v40 }
0x11b1   : > { %4066 = vmatpush1.bf16.msra.mxu0 %v11332_v25  ;;  %4107 = vmatpush1.bf16.msra.mxu1 %v11333_v35 }
0x11b2   : > { %4067 = vmatprep.subr.bf16.mxu0 %v11334_v6  ;;  %4108 = vmatprep.subr.bf16.mxu1 %v11335_v23  ;;  %v5513_v23 = vld [vmem:[#allocation18 + $0x8] sm:$0xff]  }
0x11b5   : > { %4068 = vmatpush1.bf16.msra.mxu0 %v11336_v42  ;;  %4109 = vmatpush1.bf16.msra.mxu1 %v11337_v1  ;;  %v11359_v1 = vld [vmem:[#allocation36_spill] sm:$0xff] }
0x11b6   : > { %4069 = vmatprep.subr.bf16.mxu0 %v11338_v43  ;;  %4110 = vmatprep.subr.bf16.mxu1 %v11339_v16 }
0x11b9   : > { %4070 = vmatpush1.bf16.msra.mxu0 %v11340_v4  ;;  %4111 = vmatpush1.bf16.msra.mxu1 %v11341_v38  ;;  %v5514_v4 = vld [vmem:[#allocation18 + $0x10] sm:$0xff]   ;;  %v5515_v38 = vld [vmem:[#allocation18 + $0x18] sm:$0xff]  }
0x11ba   : > { %4071 = vmatprep.subr.bf16.mxu0 %v11342_v57  ;;  %4112 = vmatprep.subr.bf16.mxu1 %v11343_v26  ;;  %v5516_v57 = vld [vmem:[#allocation18 + $0x20] sm:$0xff]   ;;  %v5518_v26 = vld [vmem:[#allocation18 + $0x30] sm:$0xff]  }
0x11bd   : > { %4072 = vmatpush1.bf16.msra.mxu0 %v11344_v34  ;;  %4113 = vmatpush1.bf16.msra.mxu1 %v11345_v32  ;;  %v5519_v34 = vld [vmem:[#allocation18 + $0x38] sm:$0xff]  }
0x11be   : > { %4073 = vmatprep.subr.bf16.mxu0 %v11346_v29  ;;  %4114 = vmatprep.subr.bf16.mxu1 %v11347_v31  ;;  %v11361_v32 = vld [vmem:[#allocation37_spill] sm:$0xff] }
0x11bf   : > { %v11362_v29 = vld [vmem:[#allocation77_spill] sm:$0xff] }
0x11c0   : > { %v4177_v31 = vpack.c.bf16 %v11362_v29, %v11361_v32 }
0x11c1   : > { %4074 = vmatpush1.bf16.msra.mxu0 %v11348_v59  ;;  %4115 = vmatpush1.bf16.msra.mxu1 %v11349_v33  ;;  %v11363_v59 = vld [vmem:[#allocation38_spill] sm:$0xff] }
0x11c2   : > { %4075 = vmatprep.subr.bf16.mxu0 %v11350_v27  ;;  %4116 = vmatprep.subr.bf16.mxu1 %v11351_v41  ;;  %v4178_v33 = vpack.c.bf16 %v9568_v24, %v11363_v59 }
0x11c5   : > { %4076 = vmatpush1.bf16.msra.mxu0 %v11352_v50  ;;  %4117 = vmatpush1.bf16.msra.mxu1 %v11353_v22 }
0x11c6   : > { %4077 = vmatprep.subr.bf16.mxu0 %v11354_v61  ;;  %4118 = vmatprep.subr.bf16.mxu1 %v11355_v63 }
0x11c9   : > { %4078 = vmatpush1.bf16.msra.mxu0 %v11356_v7  ;;  %4119 = vmatpush1.bf16.msra.mxu1 %v11357_v39 }
0x11ca   : > { %5102 = vmatprep.subr.bf16.mxu0 %v5512_v36 }
0x125e   : > { %v3978_v2 = vpop.f32.mrb[84].mxu0  ;;  %v4019_v62 = vpop.f32.mrb[92].mxu1 }
0x125f   : > { %v3979_v56 = vadd.f32 %v3978_v2, %v11358_v44  ;;  %v3980_v53 = vpop.f32.mrb[85].mxu0  ;;  %v4021_v55 = vpop.f32.mrb[93].mxu1  ;;  %v4020_v12 = vadd.f32 %v4019_v62, %v7564_v5  ;;  %v11360_v5 = vld [vmem:[#allocation75_spill] sm:$0xff] }
0x1260   : > { %v3982_v3 = vpop.f32.mrb[86].mxu0  ;;  %v4023_v14 = vpop.f32.mrb[94].mxu1  ;;  %v3981_v52 = vadd.f32 %v3980_v53, %v10752_v15  ;;  %v4022_v11 = vadd.f32 %v4021_v55, %v7560_v9  ;;  %v4159_v9 = vmul.f32 %v9892_v47, %v9805_v13  ;;  %v4176_v43 = vpack.c.bf16 %v11360_v5, %v11359_v1 }
0x1261   : > { %v4836_v28 = vmul.f32 -1.442695, %v3979_v56  ;;  %v3983_v19 = vpop.f32.mrb[87].mxu0  ;;  %v4024_v8 = vpop.f32.mrb[95].mxu1 }
0x1262   : > { %v4837_v60 = vmul.f32 -1.442695, %v3981_v52  ;;  %v4840_v19 = vld [vmem:[#allocation19] ss:$0 sm:$0xff] }
0x1263   : > { %5740 = vpow2.f32 %v4836_v28 }
0x1264   : > { %5742 = vpow2.f32 %v4837_v60 }
0x126d   : > { %v5741_v37 = vpop.eup %5740 }
0x126e   : > { %v4029_v45 = vadd.f32 1.0, %v5741_v37  ;;  %v5743_v58 = vpop.eup %5742 }
0x126f   : > { %v4035_v21 = vadd.f32 1.0, %v5743_v58 }
0x1270   : > { %5744 = vrcp.f32 %v4029_v45 }
0x1271   : > { %5746 = vrcp.f32 %v4035_v21 }
0x127a   : > { %v5745_v48 = vpop.eup %5744 }
0x127b   : > { %v4038_v18 = vmul.f32 %v5745_v48, %v4022_v11  ;;  %v5747_v10 = vpop.eup %5746 }
0x127c   : > { %v4041_v49 = vsub.f32 1.0, %v5747_v10  ;;  %v4043_v25 = vmul.f32 %v5747_v10, %v9805_v13  ;;  %v5517_v13 = vld [vmem:[#allocation18 + $0x28] sm:$0xff]  }
0x127d   : > { %v4039_v20 = vadd.f32 %v4038_v18, %v4020_v12 }
0x127f   : > { %5748 = vtanh.f32 %v4039_v20 }
0x1289   : > { %v5749_v15 = vpop.eup %5748 }
0x128a   : > { %v4042_v40 = vmul.f32 %v5749_v15, %v4041_v49  ;;  %v4162_v49 = vmul.f32 %v9892_v47, %v9888_v0 }
0x128c   : > { %v4044_v35 = vadd.f32 %v4043_v25, %v4042_v40 }
0x128e   : > { %v4045_v6 = vpack.c.bf16 %v4044_v35, %v4044_v35  ;;  %v4158_v42 = vmul.f32 %v9890_v17, %v4044_v35 }
0x1290   : > { %4080 = vmatmul.mubr.bf16.vlgmr.msra.gmra.mrb[88].mxu0 %v4045_v6  ;;  %4121 = vmatmul.mubr.bf16.vlgmr.msra.gmra.mrb[96].mxu1 %v4045_v6  ;;  %v4160_v16 = vadd.f32 %v4159_v9, %v4158_v42 }
0x1291   : > { %5103 = vmatpush3.bf16.msra.mxu0 %v5512_v36  ;;  %5118 = vmatprep.mubr.bf16.mxu0 %v4176_v43 }
0x1292   : > { %5104 = vmatprep.subr.bf16.mxu0 %v5513_v23  ;;  %4166 = vst [vmem:[#allocation2 + $0x8] sm:$0xff] %v4160_v16 }
0x1295   : > { %5105 = vmatpush3.bf16.msra.mxu0 %v5513_v23 }
0x1296   : > { %5106 = vmatprep.subr.bf16.mxu0 %v5514_v4 }
0x1299   : > { %5107 = vmatpush3.bf16.msra.mxu0 %v5514_v4 }
0x129a   : > { %5108 = vmatprep.subr.bf16.mxu0 %v5515_v38 }
0x129d   : > { %5109 = vmatpush3.bf16.msra.mxu0 %v5515_v38 }
0x129e   : > { %5110 = vmatprep.subr.bf16.mxu0 %v5516_v57 }
0x12a1   : > { %5111 = vmatpush3.bf16.msra.mxu0 %v5516_v57 }
0x12a2   : > { %5112 = vmatprep.subr.bf16.mxu0 %v5517_v13 }
0x12a5   : > { %5113 = vmatpush3.bf16.msra.mxu0 %v5517_v13 }
0x12a6   : > { %5114 = vmatprep.subr.bf16.mxu0 %v5518_v26 }
0x12a9   : > { %5115 = vmatpush3.bf16.msra.mxu0 %v5518_v26 }
0x12aa   : > { %5116 = vmatprep.subr.bf16.mxu0 %v5519_v34 }
0x12ad   : > { %5117 = vmatpush3.bf16.msra.mxu0 %v5519_v34 }
0x12b0   : > { %5119 = vmatmul.mubr.bf16.vlgmr.msra.gmra.mrb[92].mxu0 %v4177_v31 }
0x12b1   : > { %5122 = vmatprep.mubr.bf16.mxu0 %v4178_v33 }
0x1363   : > { %v4081_v27 = vpop.f32.mrb[88].mxu0  ;;  %v4122_v41 = vpop.f32.mrb[96].mxu1 }
0x1364   : > { %v4082_v50 = vadd.f32 %v4081_v27, %v11297_v54  ;;  %v4083_v22 = vpop.f32.mrb[89].mxu0  ;;  %v4124_v61 = vpop.f32.mrb[97].mxu1  ;;  %v4123_v14 = vadd.f32 %v4122_v41, %v7744_v51 }
0x1365   : > { %v4085_v63 = vpop.f32.mrb[90].mxu0  ;;  %v4126_v7 = vpop.f32.mrb[98].mxu1  ;;  %v4084_v62 = vadd.f32 %v4083_v22, %v11298_v30  ;;  %v4125_v3 = vadd.f32 %v4124_v61, %v11299_v46 }
0x1366   : > { %v4838_v39 = vmul.f32 -1.442695, %v4082_v50  ;;  %v4086_v36 = vpop.f32.mrb[91].mxu0  ;;  %v4127_v2 = vpop.f32.mrb[99].mxu1 }
0x1367   : > { %v4839_v44 = vmul.f32 -1.442695, %v4084_v62 }
0x1368   : > { %5750 = vpow2.f32 %v4838_v39 }
0x1369   : > { %5752 = vpow2.f32 %v4839_v44 }
0x1372   : > { %v5751_v56 = vpop.eup %5750 }
0x1373   : > { %v4132_v24 = vadd.f32 1.0, %v5751_v56  ;;  %v5753_v53 = vpop.eup %5752 }
0x1374   : > { %v4138_v55 = vadd.f32 1.0, %v5753_v53 }
0x1375   : > { %5754 = vrcp.f32 %v4132_v24 }
0x1376   : > { %5756 = vrcp.f32 %v4138_v55 }
0x137f   : > { %v5755_v54 = vpop.eup %5754 }
0x1380   : > { %v4141_v28 = vmul.f32 %v5755_v54, %v4125_v3  ;;  %v5757_v48 = vpop.eup %5756 }
0x1381   : > { %v4144_v46 = vsub.f32 1.0, %v5757_v48  ;;  %v4146_v18 = vmul.f32 %v5757_v48, %v9888_v0 }
0x1382   : > { %v4142_v8 = vadd.f32 %v4141_v28, %v4123_v14 }
0x1383   : > { %v5120_v52 = vpop.f32.mrb[92].mxu0 }
0x1384   : > { %5758 = vtanh.f32 %v4142_v8  ;;  %v4294_v30 = vadd.f32 %v5120_v52, %v4840_v19  ;;  %v4285_v60 = vpop.f32.mrb[93].mxu0 }
0x1385   : > { %v4286_v37 = vadd.f32 %v4840_v19, %v4285_v60  ;;  %v5121_v45 = vpop.f32.mrb[94].mxu0 }
0x1386   : > { %4320 = vmax.xlane.f32.xlu1 %v4294_v30  ;;  %v4288_v58 = vpop.f32.mrb[95].mxu0  ;;  %v4297_v21 = vadd.f32 %v5121_v45, %v4840_v19 }
0x1387   : > { %4316 = vmax.xlane.f32.xlu0 %v4286_v37  ;;  %v4289_v11 = vadd.f32 %v4840_v19, %v4288_v58 }
0x138a   : > { %4322 = vmax.xlane.f32.xlu1 %v4297_v21 }
0x138b   : > { %4318 = vmax.xlane.f32.xlu0 %v4289_v11 }
0x138e   : > { %v5759_v51 = vpop.eup %5758 }
0x138f   : > { %v4145_v12 = vmul.f32 %v5759_v51, %v4144_v46 }
0x1391   : > { %v4147_v20 = vadd.f32 %v4146_v18, %v4145_v12 }
0x1393   : > { %v4161_v10 = vmul.f32 %v9890_v17, %v4147_v20 }
0x1395   : > { %v4163_v15 = vadd.f32 %v4162_v49, %v4161_v10 }
0x1397   : > { %4167 = vst [vmem:[#allocation2 + $0x10] sm:$0xff] %v4163_v15  ;;  %v4179_v40 = vpack.c.bf16 %v4163_v15, %v9888_v0 }
0x1399   : > { %5123 = vmatmul.mubr.bf16.gmra.mrb[96].mxu0 %v4179_v40 }
0x1413   : > { %v4321_v35 = vpop.xlane.xlu1 %4320 }
0x1414   : > { %v4317_v25 = vpop.xlane.xlu0 %4316  ;;  %v9988_v1 = vsub.f32 %v4294_v30, %v4321_v35 }
0x1415   : > { %v9984_v23 = vsub.f32 %v4286_v37, %v4317_v25 }
0x1416   : > { %v4344_v0 = vmul.f32 1.442695, %v9988_v1 }
0x1417   : > { %v4323_v9 = vpop.xlane.xlu1 %4322  ;;  %v4340_v17 = vmul.f32 1.442695, %v9984_v23 }
0x1418   : > { %v4319_v6 = vpop.xlane.xlu0 %4318  ;;  %v9991_v5 = vsub.f32 %v4297_v21, %v4323_v9 }
0x1419   : > { %v9986_v42 = vsub.f32 %v4289_v11, %v4319_v6  ;;  %5760 = vpow2.f32 %v4340_v17 }
0x141a   : > { %v4346_v57 = vmul.f32 1.442695, %v9991_v5 }
0x141b   : > { %v4342_v47 = vmul.f32 1.442695, %v9986_v42 }
0x141d   : > { %5762 = vpow2.f32 %v4342_v47  ;;  %v4409_v47 = vld [vmem:[#allocation2 + $0x8] sm:$0xff] (!%p4849_p10) }
0x141e   : > { %5764 = vpow2.f32 %v4344_v0  ;;  %4412 = vst [vmem:[#allocation22 + $0x8] sm:$0xff] (!%p4849_p10), %v4409_v47 }
0x141f   : > { %5766 = vpow2.f32 %v4346_v57 }
0x1423   : > { %v5761_v29 = vpop.eup %5760 }
0x1427   : > { %v5763_v31 = vpop.eup %5762 }
0x1428   : > { %v5765_v59 = vpop.eup %5764 }
0x1429   : > { %v5767_v33 = vpop.eup %5766 }
0x146c   : > { %v5124_v43 = vpop.f32.mrb[96].mxu0 }
0x146d   : > { %v4301_v16 = vpop.f32.mrb[97].mxu0  ;;  %v4310_v34 = vadd.f32 %v5124_v43, %v4840_v19  ;;  %v4410_v43 = vld [vmem:[#allocation2 + $0x10] sm:$0xff] (!%p4849_p10) }
0x146e   : > { %v4302_v4 = vadd.f32 %v4840_v19, %v4301_v16  ;;  %v5125_v38 = vpop.f32.mrb[98].mxu0  ;;  %4413 = vst [vmem:[#allocation22 + $0x10] sm:$0xff] (!%p4849_p10), %v4410_v43 }
0x146f   : > { %v4304_v13 = vpop.f32.mrb[99].mxu0  ;;  %v4313_v32 = vadd.f32 %v5125_v38, %v4840_v19 }
0x1470   : > { %v4305_v26 = vadd.f32 %v4840_v19, %v4304_v13  ;;  %4324 = vmax.xlane.f32.xlu0 %v4302_v4 }
0x1472   : > { %4326 = vmax.xlane.f32.xlu1 %v4305_v26 }
0x1474   : > { %4328 = vmax.xlane.f32.xlu0 %v4310_v34 }
0x1476   : > { %4330 = vmax.xlane.f32.xlu1 %v4313_v32 }
0x1478   : > { %4356 = vadd.xlane.f32.xlu0 %v5761_v29 }
0x147a   : > { %4358 = vadd.xlane.f32.xlu1 %v5763_v31 }
0x147c   : > { %4360 = vadd.xlane.f32.xlu0 %v5765_v59 }
0x147e   : > { %4362 = vadd.xlane.f32.xlu1 %v5767_v33 }
0x14fd   : > { %v4325_v27 = vpop.xlane.xlu0 %4324 }
0x14fe   : > { %v4336_v41 = vsub.f32 %v4302_v4, %v4325_v27 }
0x14ff   : > { %v4327_v50 = vpop.xlane.xlu1 %4326 }
0x1500   : > { %v4348_v22 = vmul.f32 1.442695, %v4336_v41  ;;  %v4337_v61 = vsub.f32 %v4305_v26, %v4327_v50 }
0x1501   : > { %v4329_v63 = vpop.xlane.xlu0 %4328 }
0x1502   : > { %5768 = vpow2.f32 %v4348_v22  ;;  %v4350_v7 = vmul.f32 1.442695, %v4337_v61  ;;  %v4338_v39 = vsub.f32 %v4310_v34, %v4329_v63 }
0x1503   : > { %v4331_v36 = vpop.xlane.xlu1 %4330 }
0x1504   : > { %5770 = vpow2.f32 %v4350_v7  ;;  %v4352_v2 = vmul.f32 1.442695, %v4338_v39  ;;  %v4339_v62 = vsub.f32 %v4313_v32, %v4331_v36 }
0x1505   : > { %v4357_v44 = vpop.xlane.xlu0 %4356 }
0x1506   : > { %5772 = vpow2.f32 %v4352_v2  ;;  %v4354_v56 = vmul.f32 1.442695, %v4339_v62 }
0x1507   : > { %5774 = vlog2.f32 %v4357_v44  ;;  %v4359_v24 = vpop.xlane.xlu1 %4358 }
0x1508   : > { %5776 = vpow2.f32 %v4354_v56 }
0x1509   : > { %5778 = vlog2.f32 %v4359_v24  ;;  %v4361_v53 = vpop.xlane.xlu0 %4360 }
0x150a   : > { %5780 = vlog2.f32 %v4361_v53 }
0x150b   : > { %v4363_v55 = vpop.xlane.xlu1 %4362 }
0x150c   : > { %v5769_v3 = vpop.eup %5768  ;;  %5782 = vlog2.f32 %v4363_v55 }
0x150d   : > { %4364 = vadd.xlane.f32.xlu0 %v5769_v3 }
0x150e   : > { %v5771_v54 = vpop.eup %5770 }
0x150f   : > { %4366 = vadd.xlane.f32.xlu1 %v5771_v54 }
0x1510   : > { %v5773_v14 = vpop.eup %5772 }
0x1511   : > { %v5775_v28 = vpop.eup %5774  ;;  %4368 = vadd.xlane.f32.xlu0 %v5773_v14 }
0x1512   : > { %v5777_v19 = vpop.eup %5776  ;;  %v4373_v8 = vmul.f32 0.6931472, %v5775_v28 }
0x1513   : > { %v5779_v52 = vpop.eup %5778  ;;  %4370 = vadd.xlane.f32.xlu1 %v5777_v19 }
0x1514   : > { %v5781_v30 = vpop.eup %5780  ;;  %v4388_v60 = vsub.f32 %v9984_v23, %v4373_v8  ;;  %v4375_v37 = vmul.f32 0.6931472, %v5779_v52 }
0x1515   : > { %v4377_v45 = vmul.f32 0.6931472, %v5781_v30 }
0x1516   : > { %v5783_v58 = vpop.eup %5782  ;;  %4396 = vst [vmem:[%s7104_s10] sm:$0xff] %v4388_v60  ;;  %v4389_v21 = vsub.f32 %v9986_v42, %v4375_v37 }
0x1517   : > { %v4390_v11 = vsub.f32 %v9988_v1, %v4377_v45  ;;  %v4379_v48 = vmul.f32 0.6931472, %v5783_v58 }
0x1518   : > { %4397 = vst [vmem:[%s7104_s10 + $0x8] sm:$0xff] %v4389_v21 }
0x1519   : > { %4398 = vst [vmem:[%s7104_s10 + $0x10] sm:$0xff] %v4390_v11  ;;  %v4391_v46 = vsub.f32 %v9991_v5, %v4379_v48  ;;  %v4408_v5 = vld [vmem:[#allocation2] sm:$0xff] (!%p4849_p10) }
0x151a   : > { %4411 = vst [vmem:[#allocation22] sm:$0xff] (!%p4849_p10), %v4408_v5 }
0x151b   : > { %4399 = vst [vmem:[%s7104_s10 + $0x18] sm:$0xff] %v4391_v46 }
0x159a   : > { %v4365_v51 = vpop.xlane.xlu0 %4364 }
0x159b   : > { %5784 = vlog2.f32 %v4365_v51 }
0x159c   : > { %v4367_v12 = vpop.xlane.xlu1 %4366 }
0x159d   : > { %5786 = vlog2.f32 %v4367_v12 }
0x159e   : > { %v4369_v18 = vpop.xlane.xlu0 %4368 }
0x159f   : > { %5788 = vlog2.f32 %v4369_v18 }
0x15a0   : > { %v4371_v20 = vpop.xlane.xlu1 %4370 }
0x15a1   : > { %5790 = vlog2.f32 %v4371_v20 }
0x15a5   : > { %v5785_v10 = vpop.eup %5784 }
0x15a6   : > { %v4381_v49 = vmul.f32 0.6931472, %v5785_v10 }
0x15a7   : > { %v5787_v15 = vpop.eup %5786 }
0x15a8   : > { %v4392_v40 = vsub.f32 %v4336_v41, %v4381_v49  ;;  %v4383_v25 = vmul.f32 0.6931472, %v5787_v15 }
0x15a9   : > { %v5789_v35 = vpop.eup %5788 }
0x15aa   : > { %4400 = vst [vmem:[%s7104_s10 + $0x20] sm:$0xff] %v4392_v40  ;;  %v4393_v6 = vsub.f32 %v4337_v61, %v4383_v25  ;;  %v4385_v23 = vmul.f32 0.6931472, %v5789_v35  ;;  %4407 = sbr.rel (%p4849_p10) target bundleno = 5553 (0x15b1), region = 108 }
0x15ab   : > { %v5791_v42 = vpop.eup %5790 }
0x15ac   : > { %4401 = vst [vmem:[%s7104_s10 + $0x28] sm:$0xff] %v4393_v6  ;;  %v4394_v9 = vsub.f32 %v4338_v39, %v4385_v23  ;;  %v4387_v1 = vmul.f32 0.6931472, %v5791_v42 }
0x15ae   : > { %4402 = vst [vmem:[%s7104_s10 + $0x30] sm:$0xff] %v4394_v9  ;;  %v4395_v17 = vsub.f32 %v4339_v62, %v4387_v1 }
0x15b0   : > { %4403 = vst [vmem:[%s7104_s10 + $0x38] sm:$0xff] %v4395_v17 }
0x15b1 PF: > { %s4857_s29 = sshll.u32 %s6780_s23, 10  ;;  %s11364_s12 = sld [smem:[#allocation141_spill]] }
0x15b2   : > { %s4428_s26 = sshll.u32 %s7104_s10, 4  ;;  %s4415_s25 = scalar_lea.sflag [#allocation6], %s7073_s13  ;;  %s10016_s26 = int_to_ptr.vmem [resolvable:$true] %s4428_s26 }
0x15b3   : > { %s6554_s21 = scalar_lea.vmem %s10016_s26, 1024  ;;  %p11365_p3 = scmp.ne.s32.totalorder %s10534_s14, 0 }
0x15b4   : > { %p6555_p8 = scmp.ne.s32.totalorder %s10016_s26, %s6554_s21  ;;  %s6695_s27 = smov [#allocation21]  }
0x15b5   : > { %s6558_s22 = sshll.u32 %s6695_s27, 4  ;;  %s6559_s22 = int_to_ptr.vmem [resolvable:$false] %s6558_s22 }
0x15b6   : > { %p6556_p12 = pnand %p6555_p8, %p11365_p3  ;;  %s6560_s28 = scalar_lea.vmem %s6559_s22, 2048 }
0x15b7   : > { %s10013_s11 = scalar_lea.hbm %s11364_s12, %s4857_s29  ;;  %p6561_p1 = scmp.lt.s32.totalorder %s10016_s26, %s6559_s22 }
0x15b8   : > { %p6557_p13 = pneg %p6556_p12  ;;  %p6562_p2 = scmp.lt.s32.totalorder %s6560_s28, %s6554_s21 }
0x15ba   : > { %p6563_p6 = por %p6562_p2, %p6561_p1 }
0x15bc   : > { %p6564_p4 = pnand %p6563_p6, %p6557_p13 }
0x15be   : > { %6567 = shalt.err (!%p6564_p4)
}
0x15bf   : > { %s6568_s10 = scalar_lea.hbm %s10013_s11, 1024  ;;  %s6572_s24 = scalar_lea.hbm %s11364_s12, 2048 }
0x15c0   : > { %p6569_p7 = scmp.ne.s32.totalorder %s10013_s11, %s6568_s10  ;;  %p6573_p9 = scmp.lt.u32.totalorder %s10013_s11, %s11364_s12 }
0x15c1   : > { %p6574_p0 = scmp.lt.u32.totalorder %s6572_s24, %s6568_s10  ;;  %p6576_p8 = scmp.lt.u32.totalorder %s6568_s10, %s10013_s11 }
0x15c2   : > { %p6570_p5 = pnand %p6569_p7, %p11365_p3 }
0x15c3   : > { %p6575_p10 = por %p6574_p0, %p6573_p9 }
0x15c4   : > { %p6571_p11 = pneg %p6570_p5 }
0x15c5   : > { %p6577_p12 = por %p6576_p8, %p6575_p10 }
0x15c7   : > { %p6578_p13 = pnand %p6577_p12, %p6571_p11 }
0x15c9   : > { %6581 = shalt.err (!%p6578_p13)
}
0x15ca   : > { %s6696_s21 = smov 128   ;;  %s6697_s22 = smov 8  }
0x15cb   : > { %5167 = dma.vmem_to_hbm [thread:$0]  (%p11365_p3), %s10016_s26, 1024, %s10013_s11, %s4415_s25, %s6696_s21, %s6696_s21, %s6697_s22  }
0x15cc   : > { %s6698_s28 = smov [#allocation22]   ;;  %p11366_p2 = scmp.eq.s32.totalorder %s6780_s23, 1 }
0x15cd   : > { %s4441_s1 = sshll.u32 %s6698_s28, 4  ;;  %s4442_s1 = int_to_ptr.vmem [resolvable:$true] %s4441_s1 }
0x15ce   : > { %s6582_s29 = scalar_lea.vmem %s4442_s1, 384  ;;  %p6589_p7 = scmp.lt.s32.totalorder %s4442_s1, %s4442_s1 }
0x15cf   : > { %p6583_p1 = scmp.ne.s32.totalorder %s4442_s1, %s6582_s29  ;;  %p6590_p5 = scmp.lt.s32.totalorder %s6582_s29, %s6582_s29 }
0x15d1   : > { %p6584_p6 = pnand %p6583_p1, %p11366_p2  ;;  %p6591_p11 = por %p6590_p5, %p6589_p7 }
0x15d3   : > { %p6585_p4 = pneg %p6584_p6 }
0x15d5   : > { %p6592_p9 = pnand %p6591_p11, %p6585_p4 }
0x15d7   : > { %6595 = shalt.err (!%p6592_p9)
}
0x15d8   : > { %s11367_s2 = sld [smem:[#allocation142_spill]]  ;;  %p11368_p0 = pmov %p11366_p2 }
0x15de   : > { %s6596_s14 = scalar_lea.hbm %s11367_s2, 384 }
0x15df   : > { %p6597_p3 = scmp.ne.s32.totalorder %s11367_s2, %s6596_s14  ;;  %p6602_p12 = scmp.lt.u32.totalorder %s6596_s14, %s11367_s2 }
0x15e1   : > { %p6598_p10 = pnand %p6597_p3, %p11368_p0 }
0x15e3   : > { %p6599_p8 = pneg %p6598_p10 }
0x15e5   : > { %p6604_p13 = pnand %p6602_p12, %p6599_p8 }
0x15e7   : > { %6607 = shalt.err (!%p6604_p13)
}
0x15e8   : > { %p11369_p1 = pmov %p11368_p0  ;;  %p11370_p2 = pmov %p11368_p0 }
0x15ea   : > { %5169 = dma.vmem_to_hbm [thread:$0]  (%p11369_p1), %s4442_s1, 384, %s11367_s2, [#allocation23], %s6696_s21, %s6696_s21, %s6697_s22  }
0x15eb   : > { %6649 = dma.done.wait (%p11370_p2), [#allocation23], 384   ;;  %p11371_p6 = pmov %p11368_p0 }
0x15ed   : > { %6651 = vsyncadd (%p11371_p6), [#allocation23], 4294966912 }
0x15ee PF: > { %s4460_s29 = sand.u32 1, %s6658_s17   ;;  %p11372_p4 = scmp.ne.s32.totalorder %s10535_s30, 0 }
0x15ef   : > { %p11373_p7 = scmp.ge.s32.totalorder %s6670_s20, 2  ;;  %s4461_s10 = scalar_lea.sflag [#allocation6], %s4460_s29 }
0x15f1   : > { %p5206_p5 = pnand %p11373_p7, %p11372_p4 }
0x15f3   : > { %6653 = dma.done.wait (!%p5206_p5), %s4461_s10, 1024  }
0x15f4   : > { %6655 = vsyncadd (!%p5206_p5), %s4461_s10, 4294966272  ;;  %p31_p11 = scmp.ge.s32.totalorder %s6998_s16, 4   ;;  %s11374_s17 = smov %s6662_s18 }
0x15f5   : > { %s11375_s18 = smov %s6666_s19  ;;  %s11376_s19 = smov %s7010_s15 }
0x15f6   : > { %s11377_s20 = smov %s6998_s16  ;;  %33 = sbr.rel (!%p31_p11) target bundleno = 16 (0x10), region = 159 }
0x15fd   :  { %4466 = vsyncpa [#allocation5], 1 }
0x15fe   :  { %4468 = vsyncpa [#allocation5 + $0x1], 1 }
0x15ff   :  { %4469 = vsyncpa [#allocation8], 1 }
0x1600   :  { %4470 = vsyncpa [#allocation11], 1 }
0x1601   :  { %4471 = vsyncpa [#allocation14], 1 }
0x1602   :  { %4472 = vsyncpa [#allocation17], 1 }
0x1603   :  { %4473 = vsyncpa [#allocation20], 1 }
0x1604   :  { %4474 = vsyncpa [#allocation6], 1 }
0x1605   :  { %4476 = vsyncpa [#allocation6 + $0x1], 1 }
0x1606   :  { %4477 = vsyncpa [#allocation23], 1 }

</bundles_post_ra>
